<compile_context>
chip_gen: v5e
topology: v5e:2x2
jax: 0.10.0
libtpu: 0.0.40
codegen_flags: <defaults>
</compile_context>

<pallas_src>
import jax
import jax.numpy as jnp
from jax.experimental import pallas as pl
from jax.experimental.pallas import tpu as pltpu


_K = 5        # Conv1d kernel size (all three stages)
_POOL = 3     # MaxPool1d kernel == stride
_H = 128      # LSTM hidden size
_OPAD = 128   # lane-dense padded logits width


def _sigmoid(z):
    # tanh-based sigmoid: single EUP op, no divide, no exp overflow.
    return 0.5 * (jnp.tanh(0.5 * z) + 1.0)


def _conv_relu_pool(hs, w_ref, b_ref, pool_ref):
    """Conv1d(valid, K=5) + ReLU + MaxPool1d(3, 3) for a batch tile.

    hs:       list of Bt values, each (L, Cin) f32 (one per batch element)
    w_ref:    (K*Cin, Cout) bf16  (pre-flattened in pack_params)
    b_ref:    (1, Cout) f32
    pool_ref: VMEM scratch with >= Bt*Lc rows and Cout lanes, f32
    returns:  list of Bt values, each (Lp, Cout) f32
    """
    Bt = len(hs)
    L, Cin = hs[0].shape
    Cout = w_ref.shape[1]
    Lc = L - _K + 1
    Lp = Lc // _POOL

    # im2col per batch element (unit-stride slices + lane concat), then ONE row-stacked
    # matmul so the MXU sees M = Bt*Lc instead of Lc.
    # (Shifted-accumulate form for Cin=128 stages was considered; im2col keeps a single
    #  deep-contraction matmul per stage and reuses the structure that already compiles.)
    hbs = [h.astype(jnp.bfloat16) for h in hs]
    cols = jnp.concatenate(
        [jnp.concatenate([hb[k:k + Lc, :] for k in range(_K)], axis=-1) for hb in hbs],
        axis=0)                                                        # (Bt*Lc, K*Cin)
    acc = jnp.dot(cols, w_ref[...], preferred_element_type=jnp.float32)
    acc = jnp.maximum(acc + b_ref[...], 0.0)                           # bias + ReLU (f32)

    # MaxPool1d(3, stride 3): spill conv rows to VMEM scratch, read back with stride-3
    # sublane loads and take the elementwise max.  No selection matmuls, no iota work.
    n_acc = Bt * Lc
    pool_ref[pl.ds(0, n_acc), :] = acc
    if Lc == _POOL * Lp:
        n_p = Bt * Lp                       # pooling groups never straddle batch rows
        pooled = jnp.maximum(
            jnp.maximum(pool_ref[pl.ds(0, n_p, stride=_POOL), :],
                        pool_ref[pl.ds(1, n_p, stride=_POOL), :]),
            pool_ref[pl.ds(2, n_p, stride=_POOL), :])                  # (Bt*Lp, Cout)
    else:
        # floor-mode remainder: pool per batch element so groups stay inside one element.
        pooled = jnp.concatenate(
            [jnp.maximum(
                jnp.maximum(pool_ref[pl.ds(b * Lc + 0, Lp, stride=_POOL), :],
                            pool_ref[pl.ds(b * Lc + 1, Lp, stride=_POOL), :]),
                pool_ref[pl.ds(b * Lc + 2, Lp, stride=_POOL), :])
             for b in range(Bt)], axis=0)

    return [pooled[b * Lp:(b + 1) * Lp, :] for b in range(Bt)]


def _fused_kernel(x_ref,
                  c1w_ref, c1b_ref, c2w_ref, c2b_ref, c3w_ref, c3b_ref,
                  wih_ref, whh_ref, bf_ref, bb_ref,
                  aW_ref, ab_ref, au_ref,
                  w1_ref, b1_ref, w2_ref, b2_ref,
                  o_ref, pool_ref):
    """Whole forward pass for one batch tile of Bt elements.

    x_ref: (Bt, L, E) embedded tokens.  o_ref: (1, Bt, 128) lane-padded logits.
    """
    Bt = x_ref.shape[0]
    H = _H
    H3, H4 = 3 * H, 4 * H

    # ---- three Conv1d(5) + ReLU + MaxPool1d(3) stages -------------------------------
    hs = [x_ref[b] for b in range(Bt)]                         # per-element (L, E) f32
    hs = _conv_relu_pool(hs, c1w_ref, c1b_ref, pool_ref)
    hs = _conv_relu_pool(hs, c2w_ref, c2b_ref, pool_ref)
    hs = _conv_relu_pool(hs, c3w_ref, c3b_ref, pool_ref)       # Bt x (T, 128)
    T = hs[0].shape[0]

    # time-major stacking (rows ordered (t, b)) so every LSTM step reads a contiguous
    # (Bt, .) row block -- no strided/indexed access inside the recurrence.
    h_t = jnp.concatenate(
        [hs[b][t:t + 1, :] for t in range(T) for b in range(Bt)], axis=0)  # (T*Bt, 128)

    # ---- BiLSTM (batch_first, h0=c0=0), gates pre-packed as [i, f, o, g] -------------
    # Input projection for BOTH directions hoisted out of the recurrence.
    gx = jnp.dot(h_t.astype(jnp.bfloat16), wih_ref[...],
                 preferred_element_type=jnp.float32)           # (T*Bt, 8H)
    gx_f = gx[:, :H4] + bf_ref[...]                            # (T*Bt, 4H)
    gx_b = gx[:, H4:] + bb_ref[...]
    whh = whh_ref[...]                                         # (H, 8H) bf16

    h_st = jnp.zeros((2 * Bt, H), jnp.float32)                 # rows: [fwd batch; bwd batch]
    c_st = jnp.zeros((2 * Bt, H), jnp.float32)
    outs_f = [None] * T
    outs_b = [None] * T
    for s in range(T):
        tf = s
        tb = T - 1 - s
        # single fused recurrent matmul per step for both directions
        r = jnp.dot(h_st.astype(jnp.bfloat16), whh,
                    preferred_element_type=jnp.float32)        # (2Bt, 8H)
        g = jnp.concatenate(
            [gx_f[tf * Bt:(tf + 1) * Bt, :] + r[:Bt, :H4],
             gx_b[tb * Bt:(tb + 1) * Bt, :] + r[Bt:, H4:]], axis=0)   # (2Bt, 4H)
        sg = _sigmoid(g[:, :H3])                               # i | f | o in one wide op
        gg = jnp.tanh(g[:, H3:])                               # g
        c_st = sg[:, H:2 * H] * c_st + sg[:, :H] * gg
        h_st = sg[:, 2 * H:H3] * jnp.tanh(c_st)
        outs_f[tf] = h_st[:Bt, :]
        outs_b[tb] = h_st[Bt:, :]

    lstm_t = [jnp.concatenate([outs_f[t], outs_b[t]], axis=-1)
              for t in range(T)]                               # T x (Bt, 2H)

    # ---- AttentionWithContext (time-vectorized matmul, per-batch softmax over T) -----
    flat = jnp.concatenate(lstm_t, axis=0)                     # (T*Bt, 2H), time-major
    uit = jnp.tanh(jnp.dot(flat.astype(jnp.bfloat16), aW_ref[...],
                           preferred_element_type=jnp.float32) + ab_ref[...])
    ait = jnp.sum(uit * au_ref[...], axis=-1, keepdims=True)   # (T*Bt, 1)
    sc = [ait[t * Bt:(t + 1) * Bt, :] for t in range(T)]       # T x (Bt, 1)
    m = sc[0]
    for t in range(1, T):
        m = jnp.maximum(m, sc[t])
    es = [jnp.exp(sc[t] - m) for t in range(T)]
    den = es[0]
    for t in range(1, T):
        den = den + es[t]
    ctx = es[0] * lstm_t[0]
    for t in range(1, T):
        ctx = ctx + es[t] * lstm_t[t]
    ctx = ctx * (1.0 / den)                                    # exact softmax weighting

    # ---- fc1(ReLU) + fc2 (lane-padded to 128 for a dense store) ----------------------
    h1 = jnp.maximum(
        jnp.dot(ctx.astype(jnp.bfloat16), w1_ref[...],
                preferred_element_type=jnp.float32) + b1_ref[...], 0.0)
    out = jnp.dot(h1.astype(jnp.bfloat16), w2_ref[...],
                  preferred_element_type=jnp.float32) + b2_ref[...]     # (Bt, 128)
    o_ref[0] = out


# ------------------------------ params + wrappers ------------------------------------

def init_params(key, vocab_size, embedding_dim, output_dim):
    """Random params in (transposed) PyTorch layout.

    conv*_w[k, ci, co] == torch conv.weight[co, ci, k]
    wih_* / whh_*      == torch weight_ih/hh.T   (PyTorch gate order i, f, g, o)
    b_*                == torch (bias_ih + bias_hh)
    fc*_w              == torch fc*.weight.T
    """
    ks = jax.random.split(key, 20)

    def u(k, shape, scale=0.08):
        return jax.random.uniform(k, shape, jnp.float32, -scale, scale)

    H = _H
    D = 2 * H
    p = {}
    p["emb"] = u(ks[0], (vocab_size, embedding_dim), 0.5)
    p["conv1_w"] = u(ks[1], (_K, embedding_dim, 128))
    p["conv1_b"] = u(ks[2], (1, 128))
    p["conv2_w"] = u(ks[3], (_K, 128, 128))
    p["conv2_b"] = u(ks[4], (1, 128))
    p["conv3_w"] = u(ks[5], (_K, 128, 128))
    p["conv3_b"] = u(ks[6], (1, 128))
    p["wih_f"] = u(ks[7], (128, 4 * H))
    p["whh_f"] = u(ks[8], (H, 4 * H))
    p["b_f"] = u(ks[9], (1, 4 * H))
    p["wih_b"] = u(ks[10], (128, 4 * H))
    p["whh_b"] = u(ks[11], (H, 4 * H))
    p["b_b"] = u(ks[12], (1, 4 * H))
    p["att_W"] = u(ks[13], (D, D))
    p["att_b"] = jnp.zeros((1, D), jnp.float32)
    p["att_u"] = u(ks[14], (1, D), 0.1527)
    p["fc1_w"] = u(ks[15], (D, 96))
    p["fc1_b"] = u(ks[16], (1, 96))
    p["fc2_w"] = u(ks[17], (96, output_dim))
    p["fc2_b"] = u(ks[18], (1, output_dim))
    return p


def pack_params(p):
    """One-time kernel-ready weight prep (hoisted out of the per-call path):
    bf16 casts, conv-weight flatten, gate reorder [i,f,g,o] -> [i,f,o,g],
    fwd/bwd direction concat, fc2 padding to 128 output lanes."""
    H = _H
    to_bf16 = lambda a: a.astype(jnp.bfloat16)

    def reorder(w):  # gate columns [i, f, g, o] -> [i, f, o, g]
        return jnp.concatenate(
            [w[:, :2 * H], w[:, 3 * H:4 * H], w[:, 2 * H:3 * H]], axis=-1)

    O = p["fc2_w"].shape[1]
    w2p = jnp.zeros((p["fc2_w"].shape[0], _OPAD), jnp.float32).at[:, :O].set(p["fc2_w"])
    b2p = jnp.zeros((1, _OPAD), jnp.float32).at[:, :O].set(p["fc2_b"])

    return {
        "emb": p["emb"],
        "c1w": to_bf16(p["conv1_w"].reshape(-1, p["conv1_w"].shape[-1])), "c1b": p["conv1_b"],
        "c2w": to_bf16(p["conv2_w"].reshape(-1, p["conv2_w"].shape[-1])), "c2b": p["conv2_b"],
        "c3w": to_bf16(p["conv3_w"].reshape(-1, p["conv3_w"].shape[-1])), "c3b": p["conv3_b"],
        "wih": to_bf16(jnp.concatenate([reorder(p["wih_f"]), reorder(p["wih_b"])], axis=1)),
        "whh": to_bf16(jnp.concatenate([reorder(p["whh_f"]), reorder(p["whh_b"])], axis=1)),
        "bf": reorder(p["b_f"]), "bb": reorder(p["b_b"]),
        "aW": to_bf16(p["att_W"]), "ab": p["att_b"], "au": p["att_u"],
        "w1": to_bf16(p["fc1_w"]), "b1": p["fc1_b"],
        "w2": to_bf16(w2p), "b2": b2p,
    }


@jax.jit
def _forward_padded(tokens, packed):
    # Embedding lookup = data-dependent gather -> plain-JAX glue, channels-last (B, L, E).
    # spatial_dropout (Dropout2d) is identity at inference time.
    emb = packed["emb"][tokens]
    B, L, E = emb.shape

    # Batch tile: split the batch in two grid steps when possible so v7x megacore puts one
    # tile on each TensorCore; on v5e/v6e this is just a 2-step serial loop.
    Bt = B // 2 if (B % 2 == 0 and B >= 2) else B
    G = B // Bt

    # static sanity check on the conv/pool length chain
    l = L
    for _ in range(3):
        lc = l - _K + 1
        if lc < _POOL:
            raise ValueError(f"sequence length {L} is too short for the conv/pool stack")
        l = lc // _POOL

    weights = (packed["c1w"], packed["c1b"], packed["c2w"], packed["c2b"],
               packed["c3w"], packed["c3b"],
               packed["wih"], packed["whh"], packed["bf"], packed["bb"],
               packed["aW"], packed["ab"], packed["au"],
               packed["w1"], packed["b1"], packed["w2"], packed["b2"])

    # Weight blocks have constant index maps, so their DMAs are not re-issued per step.
    # TODO(synk): mark these pl.Buffered(1) if VMEM headroom ever matters (footprint ~3 MB).
    w_specs = [pl.BlockSpec(w.shape, lambda i: (0, 0)) for w in weights]

    out = pl.pallas_call(
        _fused_kernel,
        out_shape=jax.ShapeDtypeStruct((G, Bt, _OPAD), jnp.float32),
        grid=(G,),
        in_specs=[pl.BlockSpec((Bt, L, E), lambda i: (i, 0, 0))] + w_specs,
        out_specs=pl.BlockSpec((1, Bt, _OPAD), lambda i: (i, 0, 0)),
        scratch_shapes=[pltpu.VMEM((Bt * (L - _K + 1), 128), jnp.float32)],  # pooling spill
        compiler_params=pltpu.CompilerParams(
            dimension_semantics=("parallel",),          # one batch tile per TensorCore (v7x)
            vmem_limit_bytes=32 * 1024 * 1024),
    )(emb, *weights)
    return out.reshape(B, _OPAD)


def cnn_bilstm_attention_forward(tokens, packed, output_dim):
    return _forward_padded(tokens, packed)[:, :output_dim]


if __name__ == "__main__":
    vocab_size, embedding_dim, output_dim = 50, 32, 4
    B, L = 8, 160   # 160 -> conv/pool -> 52 -> 16 -> 4 timesteps into the BiLSTM

    key = jax.random.PRNGKey(0)
    k_tok, k_par = jax.random.split(key)
    tokens = jax.random.randint(k_tok, (B, L), 0, vocab_size, dtype=jnp.int32)
    params = init_params(k_par, vocab_size, embedding_dim, output_dim)
    packed = pack_params(params)

    out = cnn_bilstm_attention_forward(tokens, packed, output_dim)
    jax.block_until_ready(out)
    assert out.shape == (B, output_dim) and bool(jnp.all(jnp.isfinite(out)))
    print("KERNEL_OK")
</pallas_src>

<mosaic_0001>
module attributes {stable_mosaic.version = 11 : i64} {
  func.func @_fused_kernel(%arg0: i32, %arg1: memref<4x160x32xf32, #tpu.memory_space<vmem>>, %arg2: memref<160x128xbf16, #tpu.memory_space<vmem>>, %arg3: memref<1x128xf32, #tpu.memory_space<vmem>>, %arg4: memref<640x128xbf16, #tpu.memory_space<vmem>>, %arg5: memref<1x128xf32, #tpu.memory_space<vmem>>, %arg6: memref<640x128xbf16, #tpu.memory_space<vmem>>, %arg7: memref<1x128xf32, #tpu.memory_space<vmem>>, %arg8: memref<128x1024xbf16, #tpu.memory_space<vmem>>, %arg9: memref<128x1024xbf16, #tpu.memory_space<vmem>>, %arg10: memref<1x512xf32, #tpu.memory_space<vmem>>, %arg11: memref<1x512xf32, #tpu.memory_space<vmem>>, %arg12: memref<256x256xbf16, #tpu.memory_space<vmem>>, %arg13: memref<1x256xf32, #tpu.memory_space<vmem>>, %arg14: memref<1x256xf32, #tpu.memory_space<vmem>>, %arg15: memref<256x96xbf16, #tpu.memory_space<vmem>>, %arg16: memref<1x96xf32, #tpu.memory_space<vmem>>, %arg17: memref<96x128xbf16, #tpu.memory_space<vmem>>, %arg18: memref<1x128xf32, #tpu.memory_space<vmem>>, %arg19: memref<1x4x128xf32, #tpu.memory_space<vmem>>, %arg20: memref<624x128xf32, #tpu.memory_space<vmem>>) attributes {dimension_semantics = [#tpu.dimension_semantics<parallel>], iteration_bounds = array<i64: 2>, scalar_prefetch = 0 : i64, scratch_operands = 1 : i64, tpu.core_type = #tpu.core_type<tc>, window_params = [{transform_indices = @transform_0, window_bounds = array<i64: 4, 160, 32>}, {pipeline_mode = #tpu.pipeline_mode<synchronous>, transform_indices = @transform_1, window_bounds = array<i64: 160, 128>}, {pipeline_mode = #tpu.pipeline_mode<synchronous>, transform_indices = @transform_2, window_bounds = array<i64: 1, 128>}, {pipeline_mode = #tpu.pipeline_mode<synchronous>, transform_indices = @transform_3, window_bounds = array<i64: 640, 128>}, {pipeline_mode = #tpu.pipeline_mode<synchronous>, transform_indices = @transform_4, window_bounds = array<i64: 1, 128>}, {pipeline_mode = #tpu.pipeline_mode<synchronous>, transform_indices = @transform_5, window_bounds = array<i64: 640, 128>}, {pipeline_mode = #tpu.pipeline_mode<synchronous>, transform_indices = @transform_6, window_bounds = array<i64: 1, 128>}, {pipeline_mode = #tpu.pipeline_mode<synchronous>, transform_indices = @transform_7, window_bounds = array<i64: 128, 1024>}, {pipeline_mode = #tpu.pipeline_mode<synchronous>, transform_indices = @transform_8, window_bounds = array<i64: 128, 1024>}, {pipeline_mode = #tpu.pipeline_mode<synchronous>, transform_indices = @transform_9, window_bounds = array<i64: 1, 512>}, {pipeline_mode = #tpu.pipeline_mode<synchronous>, transform_indices = @transform_10, window_bounds = array<i64: 1, 512>}, {pipeline_mode = #tpu.pipeline_mode<synchronous>, transform_indices = @transform_11, window_bounds = array<i64: 256, 256>}, {pipeline_mode = #tpu.pipeline_mode<synchronous>, transform_indices = @transform_12, window_bounds = array<i64: 1, 256>}, {pipeline_mode = #tpu.pipeline_mode<synchronous>, transform_indices = @transform_13, window_bounds = array<i64: 1, 256>}, {pipeline_mode = #tpu.pipeline_mode<synchronous>, transform_indices = @transform_14, window_bounds = array<i64: 256, 96>}, {pipeline_mode = #tpu.pipeline_mode<synchronous>, transform_indices = @transform_15, window_bounds = array<i64: 1, 96>}, {pipeline_mode = #tpu.pipeline_mode<synchronous>, transform_indices = @transform_16, window_bounds = array<i64: 96, 128>}, {pipeline_mode = #tpu.pipeline_mode<synchronous>, transform_indices = @transform_17, window_bounds = array<i64: 1, 128>}, {transform_indices = @transform_18, window_bounds = array<i64: 1, 4, 128>}]} {
    %c0 = arith.constant 0 : index
    %c0_0 = arith.constant 0 : index
    %c0_1 = arith.constant 0 : index
    %0 = vector.load %arg1[%c0, %c0_0, %c0_1] : memref<4x160x32xf32, #tpu.memory_space<vmem>>, vector<1x160x32xf32>
    %1 = vector.shape_cast %0 : vector<1x160x32xf32> to vector<160x32xf32>
    %c1 = arith.constant 1 : index
    %c0_2 = arith.constant 0 : index
    %c0_3 = arith.constant 0 : index
    %2 = vector.load %arg1[%c1, %c0_2, %c0_3] : memref<4x160x32xf32, #tpu.memory_space<vmem>>, vector<1x160x32xf32>
    %3 = vector.shape_cast %2 : vector<1x160x32xf32> to vector<160x32xf32>
    %c2 = arith.constant 2 : index
    %c0_4 = arith.constant 0 : index
    %c0_5 = arith.constant 0 : index
    %4 = vector.load %arg1[%c2, %c0_4, %c0_5] : memref<4x160x32xf32, #tpu.memory_space<vmem>>, vector<1x160x32xf32>
    %5 = vector.shape_cast %4 : vector<1x160x32xf32> to vector<160x32xf32>
    %c3 = arith.constant 3 : index
    %c0_6 = arith.constant 0 : index
    %c0_7 = arith.constant 0 : index
    %6 = vector.load %arg1[%c3, %c0_6, %c0_7] : memref<4x160x32xf32, #tpu.memory_space<vmem>>, vector<1x160x32xf32>
    %7 = vector.shape_cast %6 : vector<1x160x32xf32> to vector<160x32xf32>
    %8 = arith.truncf %1 : vector<160x32xf32> to vector<160x32xbf16>
    %9 = arith.truncf %3 : vector<160x32xf32> to vector<160x32xbf16>
    %10 = arith.truncf %5 : vector<160x32xf32> to vector<160x32xbf16>
    %11 = arith.truncf %7 : vector<160x32xf32> to vector<160x32xbf16>
    %12 = vector.extract_strided_slice %8 {offsets = [0, 0], sizes = [156, 32], strides = [1, 1]} : vector<160x32xbf16> to vector<156x32xbf16>
    %13 = vector.extract_strided_slice %8 {offsets = [1, 0], sizes = [156, 32], strides = [1, 1]} : vector<160x32xbf16> to vector<156x32xbf16>
    %14 = vector.extract_strided_slice %8 {offsets = [2, 0], sizes = [156, 32], strides = [1, 1]} : vector<160x32xbf16> to vector<156x32xbf16>
    %15 = vector.extract_strided_slice %8 {offsets = [3, 0], sizes = [156, 32], strides = [1, 1]} : vector<160x32xbf16> to vector<156x32xbf16>
    %16 = vector.extract_strided_slice %8 {offsets = [4, 0], sizes = [156, 32], strides = [1, 1]} : vector<160x32xbf16> to vector<156x32xbf16>
    %17 = tpu.concatenate %12, %13, %14, %15, %16 in 1 : vector<156x32xbf16>, vector<156x32xbf16>, vector<156x32xbf16>, vector<156x32xbf16>, vector<156x32xbf16> -> vector<156x160xbf16>
    %18 = vector.extract_strided_slice %9 {offsets = [0, 0], sizes = [156, 32], strides = [1, 1]} : vector<160x32xbf16> to vector<156x32xbf16>
    %19 = vector.extract_strided_slice %9 {offsets = [1, 0], sizes = [156, 32], strides = [1, 1]} : vector<160x32xbf16> to vector<156x32xbf16>
    %20 = vector.extract_strided_slice %9 {offsets = [2, 0], sizes = [156, 32], strides = [1, 1]} : vector<160x32xbf16> to vector<156x32xbf16>
    %21 = vector.extract_strided_slice %9 {offsets = [3, 0], sizes = [156, 32], strides = [1, 1]} : vector<160x32xbf16> to vector<156x32xbf16>
    %22 = vector.extract_strided_slice %9 {offsets = [4, 0], sizes = [156, 32], strides = [1, 1]} : vector<160x32xbf16> to vector<156x32xbf16>
    %23 = tpu.concatenate %18, %19, %20, %21, %22 in 1 : vector<156x32xbf16>, vector<156x32xbf16>, vector<156x32xbf16>, vector<156x32xbf16>, vector<156x32xbf16> -> vector<156x160xbf16>
    %24 = vector.extract_strided_slice %10 {offsets = [0, 0], sizes = [156, 32], strides = [1, 1]} : vector<160x32xbf16> to vector<156x32xbf16>
    %25 = vector.extract_strided_slice %10 {offsets = [1, 0], sizes = [156, 32], strides = [1, 1]} : vector<160x32xbf16> to vector<156x32xbf16>
    %26 = vector.extract_strided_slice %10 {offsets = [2, 0], sizes = [156, 32], strides = [1, 1]} : vector<160x32xbf16> to vector<156x32xbf16>
    %27 = vector.extract_strided_slice %10 {offsets = [3, 0], sizes = [156, 32], strides = [1, 1]} : vector<160x32xbf16> to vector<156x32xbf16>
    %28 = vector.extract_strided_slice %10 {offsets = [4, 0], sizes = [156, 32], strides = [1, 1]} : vector<160x32xbf16> to vector<156x32xbf16>
    %29 = tpu.concatenate %24, %25, %26, %27, %28 in 1 : vector<156x32xbf16>, vector<156x32xbf16>, vector<156x32xbf16>, vector<156x32xbf16>, vector<156x32xbf16> -> vector<156x160xbf16>
    %30 = vector.extract_strided_slice %11 {offsets = [0, 0], sizes = [156, 32], strides = [1, 1]} : vector<160x32xbf16> to vector<156x32xbf16>
    %31 = vector.extract_strided_slice %11 {offsets = [1, 0], sizes = [156, 32], strides = [1, 1]} : vector<160x32xbf16> to vector<156x32xbf16>
    %32 = vector.extract_strided_slice %11 {offsets = [2, 0], sizes = [156, 32], strides = [1, 1]} : vector<160x32xbf16> to vector<156x32xbf16>
    %33 = vector.extract_strided_slice %11 {offsets = [3, 0], sizes = [156, 32], strides = [1, 1]} : vector<160x32xbf16> to vector<156x32xbf16>
    %34 = vector.extract_strided_slice %11 {offsets = [4, 0], sizes = [156, 32], strides = [1, 1]} : vector<160x32xbf16> to vector<156x32xbf16>
    %35 = tpu.concatenate %30, %31, %32, %33, %34 in 1 : vector<156x32xbf16>, vector<156x32xbf16>, vector<156x32xbf16>, vector<156x32xbf16>, vector<156x32xbf16> -> vector<156x160xbf16>
    %36 = tpu.concatenate %17, %23, %29, %35 in 0 : vector<156x160xbf16>, vector<156x160xbf16>, vector<156x160xbf16>, vector<156x160xbf16> -> vector<624x160xbf16>
    %c0_8 = arith.constant 0 : index
    %c0_9 = arith.constant 0 : index
    %37 = vector.load %arg2[%c0_8, %c0_9] : memref<160x128xbf16, #tpu.memory_space<vmem>>, vector<160x128xbf16>
    %cst = arith.constant dense<0.000000e+00> : vector<624x128xf32>
    %38 = tpu.matmul %36, %37, %cst {dimension_numbers = #tpu.dot_dimension_numbers<[1], [0], [0], [1], [0, 0, 1, 1], [], []>} : vector<624x160xbf16>, vector<160x128xbf16>, vector<624x128xf32> -> vector<624x128xf32>
    %c0_10 = arith.constant 0 : index
    %c0_11 = arith.constant 0 : index
    %39 = vector.load %arg3[%c0_10, %c0_11] : memref<1x128xf32, #tpu.memory_space<vmem>>, vector<1x128xf32>
    %40 = vector.broadcast %39 : vector<1x128xf32> to vector<624x128xf32>
    %41 = arith.addf %38, %40 : vector<624x128xf32>
    %cst_12 = arith.constant 0.000000e+00 : f32
    %42 = vector.broadcast %cst_12 : f32 to vector<624x128xf32>
    %43 = arith.maximumf %41, %42 : vector<624x128xf32>
    %c0_13 = arith.constant 0 : index
    %c0_14 = arith.constant 0 : index
    %44 = vector.load %arg20[%c0_13, %c0_14] : memref<624x128xf32, #tpu.memory_space<vmem>>, vector<624x128xf32>
    tpu.vector_store %arg20[%c0_13, %c0_14], %43 {strides = array<i32>} : memref<624x128xf32, #tpu.memory_space<vmem>>, vector<624x128xf32>,
    %c0_15 = arith.constant 0 : index
    %c0_16 = arith.constant 0 : index
    %45 = tpu.strided_load %arg20[%c0_15, %c0_16] {strides = array<i32: 3, 1>} : memref<624x128xf32, #tpu.memory_space<vmem>>, vector<208x128xf32>
    %c1_17 = arith.constant 1 : index
    %c0_18 = arith.constant 0 : index
    %46 = tpu.strided_load %arg20[%c1_17, %c0_18] {strides = array<i32: 3, 1>} : memref<624x128xf32, #tpu.memory_space<vmem>>, vector<208x128xf32>
    %47 = arith.maximumf %45, %46 : vector<208x128xf32>
    %c2_19 = arith.constant 2 : index
    %c0_20 = arith.constant 0 : index
    %48 = tpu.strided_load %arg20[%c2_19, %c0_20] {strides = array<i32: 3, 1>} : memref<624x128xf32, #tpu.memory_space<vmem>>, vector<208x128xf32>
    %49 = arith.maximumf %47, %48 : vector<208x128xf32>
    %50 = vector.extract_strided_slice %49 {offsets = [0, 0], sizes = [52, 128], strides = [1, 1]} : vector<208x128xf32> to vector<52x128xf32>
    %51 = vector.extract_strided_slice %49 {offsets = [52, 0], sizes = [52, 128], strides = [1, 1]} : vector<208x128xf32> to vector<52x128xf32>
    %52 = vector.extract_strided_slice %49 {offsets = [104, 0], sizes = [52, 128], strides = [1, 1]} : vector<208x128xf32> to vector<52x128xf32>
    %53 = vector.extract_strided_slice %49 {offsets = [156, 0], sizes = [52, 128], strides = [1, 1]} : vector<208x128xf32> to vector<52x128xf32>
    %54 = arith.truncf %50 : vector<52x128xf32> to vector<52x128xbf16>
    %55 = arith.truncf %51 : vector<52x128xf32> to vector<52x128xbf16>
    %56 = arith.truncf %52 : vector<52x128xf32> to vector<52x128xbf16>
    %57 = arith.truncf %53 : vector<52x128xf32> to vector<52x128xbf16>
    %58 = vector.extract_strided_slice %54 {offsets = [0, 0], sizes = [48, 128], strides = [1, 1]} : vector<52x128xbf16> to vector<48x128xbf16>
    %59 = vector.extract_strided_slice %54 {offsets = [1, 0], sizes = [48, 128], strides = [1, 1]} : vector<52x128xbf16> to vector<48x128xbf16>
    %60 = vector.extract_strided_slice %54 {offsets = [2, 0], sizes = [48, 128], strides = [1, 1]} : vector<52x128xbf16> to vector<48x128xbf16>
    %61 = vector.extract_strided_slice %54 {offsets = [3, 0], sizes = [48, 128], strides = [1, 1]} : vector<52x128xbf16> to vector<48x128xbf16>
    %62 = vector.extract_strided_slice %54 {offsets = [4, 0], sizes = [48, 128], strides = [1, 1]} : vector<52x128xbf16> to vector<48x128xbf16>
    %63 = tpu.concatenate %58, %59, %60, %61, %62 in 1 : vector<48x128xbf16>, vector<48x128xbf16>, vector<48x128xbf16>, vector<48x128xbf16>, vector<48x128xbf16> -> vector<48x640xbf16>
    %64 = vector.extract_strided_slice %55 {offsets = [0, 0], sizes = [48, 128], strides = [1, 1]} : vector<52x128xbf16> to vector<48x128xbf16>
    %65 = vector.extract_strided_slice %55 {offsets = [1, 0], sizes = [48, 128], strides = [1, 1]} : vector<52x128xbf16> to vector<48x128xbf16>
    %66 = vector.extract_strided_slice %55 {offsets = [2, 0], sizes = [48, 128], strides = [1, 1]} : vector<52x128xbf16> to vector<48x128xbf16>
    %67 = vector.extract_strided_slice %55 {offsets = [3, 0], sizes = [48, 128], strides = [1, 1]} : vector<52x128xbf16> to vector<48x128xbf16>
    %68 = vector.extract_strided_slice %55 {offsets = [4, 0], sizes = [48, 128], strides = [1, 1]} : vector<52x128xbf16> to vector<48x128xbf16>
    %69 = tpu.concatenate %64, %65, %66, %67, %68 in 1 : vector<48x128xbf16>, vector<48x128xbf16>, vector<48x128xbf16>, vector<48x128xbf16>, vector<48x128xbf16> -> vector<48x640xbf16>
    %70 = vector.extract_strided_slice %56 {offsets = [0, 0], sizes = [48, 128], strides = [1, 1]} : vector<52x128xbf16> to vector<48x128xbf16>
    %71 = vector.extract_strided_slice %56 {offsets = [1, 0], sizes = [48, 128], strides = [1, 1]} : vector<52x128xbf16> to vector<48x128xbf16>
    %72 = vector.extract_strided_slice %56 {offsets = [2, 0], sizes = [48, 128], strides = [1, 1]} : vector<52x128xbf16> to vector<48x128xbf16>
    %73 = vector.extract_strided_slice %56 {offsets = [3, 0], sizes = [48, 128], strides = [1, 1]} : vector<52x128xbf16> to vector<48x128xbf16>
    %74 = vector.extract_strided_slice %56 {offsets = [4, 0], sizes = [48, 128], strides = [1, 1]} : vector<52x128xbf16> to vector<48x128xbf16>
    %75 = tpu.concatenate %70, %71, %72, %73, %74 in 1 : vector<48x128xbf16>, vector<48x128xbf16>, vector<48x128xbf16>, vector<48x128xbf16>, vector<48x128xbf16> -> vector<48x640xbf16>
    %76 = vector.extract_strided_slice %57 {offsets = [0, 0], sizes = [48, 128], strides = [1, 1]} : vector<52x128xbf16> to vector<48x128xbf16>
    %77 = vector.extract_strided_slice %57 {offsets = [1, 0], sizes = [48, 128], strides = [1, 1]} : vector<52x128xbf16> to vector<48x128xbf16>
    %78 = vector.extract_strided_slice %57 {offsets = [2, 0], sizes = [48, 128], strides = [1, 1]} : vector<52x128xbf16> to vector<48x128xbf16>
    %79 = vector.extract_strided_slice %57 {offsets = [3, 0], sizes = [48, 128], strides = [1, 1]} : vector<52x128xbf16> to vector<48x128xbf16>
    %80 = vector.extract_strided_slice %57 {offsets = [4, 0], sizes = [48, 128], strides = [1, 1]} : vector<52x128xbf16> to vector<48x128xbf16>
    %81 = tpu.concatenate %76, %77, %78, %79, %80 in 1 : vector<48x128xbf16>, vector<48x128xbf16>, vector<48x128xbf16>, vector<48x128xbf16>, vector<48x128xbf16> -> vector<48x640xbf16>
    %82 = tpu.concatenate %63, %69, %75, %81 in 0 : vector<48x640xbf16>, vector<48x640xbf16>, vector<48x640xbf16>, vector<48x640xbf16> -> vector<192x640xbf16>
    %c0_21 = arith.constant 0 : index
    %c0_22 = arith.constant 0 : index
    %83 = vector.load %arg4[%c0_21, %c0_22] : memref<640x128xbf16, #tpu.memory_space<vmem>>, vector<640x128xbf16>
    %cst_23 = arith.constant dense<0.000000e+00> : vector<192x128xf32>
    %84 = tpu.matmul %82, %83, %cst_23 {dimension_numbers = #tpu.dot_dimension_numbers<[1], [0], [0], [1], [0, 0, 1, 1], [], []>} : vector<192x640xbf16>, vector<640x128xbf16>, vector<192x128xf32> -> vector<192x128xf32>
    %c0_24 = arith.constant 0 : index
    %c0_25 = arith.constant 0 : index
    %85 = vector.load %arg5[%c0_24, %c0_25] : memref<1x128xf32, #tpu.memory_space<vmem>>, vector<1x128xf32>
    %86 = vector.broadcast %85 : vector<1x128xf32> to vector<192x128xf32>
    %87 = arith.addf %84, %86 : vector<192x128xf32>
    %cst_26 = arith.constant 0.000000e+00 : f32
    %88 = vector.broadcast %cst_26 : f32 to vector<192x128xf32>
    %89 = arith.maximumf %87, %88 : vector<192x128xf32>
    %c0_27 = arith.constant 0 : index
    %c0_28 = arith.constant 0 : index
    %90 = vector.load %arg20[%c0_27, %c0_28] : memref<624x128xf32, #tpu.memory_space<vmem>>, vector<192x128xf32>
    tpu.vector_store %arg20[%c0_27, %c0_28], %89 {strides = array<i32>} : memref<624x128xf32, #tpu.memory_space<vmem>>, vector<192x128xf32>,
    %c0_29 = arith.constant 0 : index
    %c0_30 = arith.constant 0 : index
    %91 = tpu.strided_load %arg20[%c0_29, %c0_30] {strides = array<i32: 3, 1>} : memref<624x128xf32, #tpu.memory_space<vmem>>, vector<64x128xf32>
    %c1_31 = arith.constant 1 : index
    %c0_32 = arith.constant 0 : index
    %92 = tpu.strided_load %arg20[%c1_31, %c0_32] {strides = array<i32: 3, 1>} : memref<624x128xf32, #tpu.memory_space<vmem>>, vector<64x128xf32>
    %93 = arith.maximumf %91, %92 : vector<64x128xf32>
    %c2_33 = arith.constant 2 : index
    %c0_34 = arith.constant 0 : index
    %94 = tpu.strided_load %arg20[%c2_33, %c0_34] {strides = array<i32: 3, 1>} : memref<624x128xf32, #tpu.memory_space<vmem>>, vector<64x128xf32>
    %95 = arith.maximumf %93, %94 : vector<64x128xf32>
    %96 = vector.extract_strided_slice %95 {offsets = [0, 0], sizes = [16, 128], strides = [1, 1]} : vector<64x128xf32> to vector<16x128xf32>
    %97 = vector.extract_strided_slice %95 {offsets = [16, 0], sizes = [16, 128], strides = [1, 1]} : vector<64x128xf32> to vector<16x128xf32>
    %98 = vector.extract_strided_slice %95 {offsets = [32, 0], sizes = [16, 128], strides = [1, 1]} : vector<64x128xf32> to vector<16x128xf32>
    %99 = vector.extract_strided_slice %95 {offsets = [48, 0], sizes = [16, 128], strides = [1, 1]} : vector<64x128xf32> to vector<16x128xf32>
    %100 = arith.truncf %96 : vector<16x128xf32> to vector<16x128xbf16>
    %101 = arith.truncf %97 : vector<16x128xf32> to vector<16x128xbf16>
    %102 = arith.truncf %98 : vector<16x128xf32> to vector<16x128xbf16>
    %103 = arith.truncf %99 : vector<16x128xf32> to vector<16x128xbf16>
    %104 = vector.extract_strided_slice %100 {offsets = [0, 0], sizes = [12, 128], strides = [1, 1]} : vector<16x128xbf16> to vector<12x128xbf16>
    %105 = vector.extract_strided_slice %100 {offsets = [1, 0], sizes = [12, 128], strides = [1, 1]} : vector<16x128xbf16> to vector<12x128xbf16>
    %106 = vector.extract_strided_slice %100 {offsets = [2, 0], sizes = [12, 128], strides = [1, 1]} : vector<16x128xbf16> to vector<12x128xbf16>
    %107 = vector.extract_strided_slice %100 {offsets = [3, 0], sizes = [12, 128], strides = [1, 1]} : vector<16x128xbf16> to vector<12x128xbf16>
    %108 = vector.extract_strided_slice %100 {offsets = [4, 0], sizes = [12, 128], strides = [1, 1]} : vector<16x128xbf16> to vector<12x128xbf16>
    %109 = tpu.concatenate %104, %105, %106, %107, %108 in 1 : vector<12x128xbf16>, vector<12x128xbf16>, vector<12x128xbf16>, vector<12x128xbf16>, vector<12x128xbf16> -> vector<12x640xbf16>
    %110 = vector.extract_strided_slice %101 {offsets = [0, 0], sizes = [12, 128], strides = [1, 1]} : vector<16x128xbf16> to vector<12x128xbf16>
    %111 = vector.extract_strided_slice %101 {offsets = [1, 0], sizes = [12, 128], strides = [1, 1]} : vector<16x128xbf16> to vector<12x128xbf16>
    %112 = vector.extract_strided_slice %101 {offsets = [2, 0], sizes = [12, 128], strides = [1, 1]} : vector<16x128xbf16> to vector<12x128xbf16>
    %113 = vector.extract_strided_slice %101 {offsets = [3, 0], sizes = [12, 128], strides = [1, 1]} : vector<16x128xbf16> to vector<12x128xbf16>
    %114 = vector.extract_strided_slice %101 {offsets = [4, 0], sizes = [12, 128], strides = [1, 1]} : vector<16x128xbf16> to vector<12x128xbf16>
    %115 = tpu.concatenate %110, %111, %112, %113, %114 in 1 : vector<12x128xbf16>, vector<12x128xbf16>, vector<12x128xbf16>, vector<12x128xbf16>, vector<12x128xbf16> -> vector<12x640xbf16>
    %116 = vector.extract_strided_slice %102 {offsets = [0, 0], sizes = [12, 128], strides = [1, 1]} : vector<16x128xbf16> to vector<12x128xbf16>
    %117 = vector.extract_strided_slice %102 {offsets = [1, 0], sizes = [12, 128], strides = [1, 1]} : vector<16x128xbf16> to vector<12x128xbf16>
    %118 = vector.extract_strided_slice %102 {offsets = [2, 0], sizes = [12, 128], strides = [1, 1]} : vector<16x128xbf16> to vector<12x128xbf16>
    %119 = vector.extract_strided_slice %102 {offsets = [3, 0], sizes = [12, 128], strides = [1, 1]} : vector<16x128xbf16> to vector<12x128xbf16>
    %120 = vector.extract_strided_slice %102 {offsets = [4, 0], sizes = [12, 128], strides = [1, 1]} : vector<16x128xbf16> to vector<12x128xbf16>
    %121 = tpu.concatenate %116, %117, %118, %119, %120 in 1 : vector<12x128xbf16>, vector<12x128xbf16>, vector<12x128xbf16>, vector<12x128xbf16>, vector<12x128xbf16> -> vector<12x640xbf16>
    %122 = vector.extract_strided_slice %103 {offsets = [0, 0], sizes = [12, 128], strides = [1, 1]} : vector<16x128xbf16> to vector<12x128xbf16>
    %123 = vector.extract_strided_slice %103 {offsets = [1, 0], sizes = [12, 128], strides = [1, 1]} : vector<16x128xbf16> to vector<12x128xbf16>
    %124 = vector.extract_strided_slice %103 {offsets = [2, 0], sizes = [12, 128], strides = [1, 1]} : vector<16x128xbf16> to vector<12x128xbf16>
    %125 = vector.extract_strided_slice %103 {offsets = [3, 0], sizes = [12, 128], strides = [1, 1]} : vector<16x128xbf16> to vector<12x128xbf16>
    %126 = vector.extract_strided_slice %103 {offsets = [4, 0], sizes = [12, 128], strides = [1, 1]} : vector<16x128xbf16> to vector<12x128xbf16>
    %127 = tpu.concatenate %122, %123, %124, %125, %126 in 1 : vector<12x128xbf16>, vector<12x128xbf16>, vector<12x128xbf16>, vector<12x128xbf16>, vector<12x128xbf16> -> vector<12x640xbf16>
    %128 = tpu.concatenate %109, %115, %121, %127 in 0 : vector<12x640xbf16>, vector<12x640xbf16>, vector<12x640xbf16>, vector<12x640xbf16> -> vector<48x640xbf16>
    %c0_35 = arith.constant 0 : index
    %c0_36 = arith.constant 0 : index
    %129 = vector.load %arg6[%c0_35, %c0_36] : memref<640x128xbf16, #tpu.memory_space<vmem>>, vector<640x128xbf16>
    %cst_37 = arith.constant dense<0.000000e+00> : vector<48x128xf32>
    %130 = tpu.matmul %128, %129, %cst_37 {dimension_numbers = #tpu.dot_dimension_numbers<[1], [0], [0], [1], [0, 0, 1, 1], [], []>} : vector<48x640xbf16>, vector<640x128xbf16>, vector<48x128xf32> -> vector<48x128xf32>
    %c0_38 = arith.constant 0 : index
    %c0_39 = arith.constant 0 : index
    %131 = vector.load %arg7[%c0_38, %c0_39] : memref<1x128xf32, #tpu.memory_space<vmem>>, vector<1x128xf32>
    %132 = vector.broadcast %131 : vector<1x128xf32> to vector<48x128xf32>
    %133 = arith.addf %130, %132 : vector<48x128xf32>
    %cst_40 = arith.constant 0.000000e+00 : f32
    %134 = vector.broadcast %cst_40 : f32 to vector<48x128xf32>
    %135 = arith.maximumf %133, %134 : vector<48x128xf32>
    %c0_41 = arith.constant 0 : index
    %c0_42 = arith.constant 0 : index
    %136 = vector.load %arg20[%c0_41, %c0_42] : memref<624x128xf32, #tpu.memory_space<vmem>>, vector<48x128xf32>
    tpu.vector_store %arg20[%c0_41, %c0_42], %135 {strides = array<i32>} : memref<624x128xf32, #tpu.memory_space<vmem>>, vector<48x128xf32>,
    %c0_43 = arith.constant 0 : index
    %c0_44 = arith.constant 0 : index
    %137 = tpu.strided_load %arg20[%c0_43, %c0_44] {strides = array<i32: 3, 1>} : memref<624x128xf32, #tpu.memory_space<vmem>>, vector<16x128xf32>
    %c1_45 = arith.constant 1 : index
    %c0_46 = arith.constant 0 : index
    %138 = tpu.strided_load %arg20[%c1_45, %c0_46] {strides = array<i32: 3, 1>} : memref<624x128xf32, #tpu.memory_space<vmem>>, vector<16x128xf32>
    %139 = arith.maximumf %137, %138 : vector<16x128xf32>
    %c2_47 = arith.constant 2 : index
    %c0_48 = arith.constant 0 : index
    %140 = tpu.strided_load %arg20[%c2_47, %c0_48] {strides = array<i32: 3, 1>} : memref<624x128xf32, #tpu.memory_space<vmem>>, vector<16x128xf32>
    %141 = arith.maximumf %139, %140 : vector<16x128xf32>
    %142 = vector.extract_strided_slice %141 {offsets = [0, 0], sizes = [4, 128], strides = [1, 1]} : vector<16x128xf32> to vector<4x128xf32>
    %143 = vector.extract_strided_slice %141 {offsets = [4, 0], sizes = [4, 128], strides = [1, 1]} : vector<16x128xf32> to vector<4x128xf32>
    %144 = vector.extract_strided_slice %141 {offsets = [8, 0], sizes = [4, 128], strides = [1, 1]} : vector<16x128xf32> to vector<4x128xf32>
    %145 = vector.extract_strided_slice %141 {offsets = [12, 0], sizes = [4, 128], strides = [1, 1]} : vector<16x128xf32> to vector<4x128xf32>
    %146 = vector.extract_strided_slice %142 {offsets = [0, 0], sizes = [1, 128], strides = [1, 1]} : vector<4x128xf32> to vector<1x128xf32>
    %147 = vector.extract_strided_slice %143 {offsets = [0, 0], sizes = [1, 128], strides = [1, 1]} : vector<4x128xf32> to vector<1x128xf32>
    %148 = vector.extract_strided_slice %144 {offsets = [0, 0], sizes = [1, 128], strides = [1, 1]} : vector<4x128xf32> to vector<1x128xf32>
    %149 = vector.extract_strided_slice %145 {offsets = [0, 0], sizes = [1, 128], strides = [1, 1]} : vector<4x128xf32> to vector<1x128xf32>
    %150 = vector.extract_strided_slice %142 {offsets = [1, 0], sizes = [1, 128], strides = [1, 1]} : vector<4x128xf32> to vector<1x128xf32>
    %151 = vector.extract_strided_slice %143 {offsets = [1, 0], sizes = [1, 128], strides = [1, 1]} : vector<4x128xf32> to vector<1x128xf32>
    %152 = vector.extract_strided_slice %144 {offsets = [1, 0], sizes = [1, 128], strides = [1, 1]} : vector<4x128xf32> to vector<1x128xf32>
    %153 = vector.extract_strided_slice %145 {offsets = [1, 0], sizes = [1, 128], strides = [1, 1]} : vector<4x128xf32> to vector<1x128xf32>
    %154 = vector.extract_strided_slice %142 {offsets = [2, 0], sizes = [1, 128], strides = [1, 1]} : vector<4x128xf32> to vector<1x128xf32>
    %155 = vector.extract_strided_slice %143 {offsets = [2, 0], sizes = [1, 128], strides = [1, 1]} : vector<4x128xf32> to vector<1x128xf32>
    %156 = vector.extract_strided_slice %144 {offsets = [2, 0], sizes = [1, 128], strides = [1, 1]} : vector<4x128xf32> to vector<1x128xf32>
    %157 = vector.extract_strided_slice %145 {offsets = [2, 0], sizes = [1, 128], strides = [1, 1]} : vector<4x128xf32> to vector<1x128xf32>
    %158 = vector.extract_strided_slice %142 {offsets = [3, 0], sizes = [1, 128], strides = [1, 1]} : vector<4x128xf32> to vector<1x128xf32>
    %159 = vector.extract_strided_slice %143 {offsets = [3, 0], sizes = [1, 128], strides = [1, 1]} : vector<4x128xf32> to vector<1x128xf32>
    %160 = vector.extract_strided_slice %144 {offsets = [3, 0], sizes = [1, 128], strides = [1, 1]} : vector<4x128xf32> to vector<1x128xf32>
    %161 = vector.extract_strided_slice %145 {offsets = [3, 0], sizes = [1, 128], strides = [1, 1]} : vector<4x128xf32> to vector<1x128xf32>
    %162 = tpu.concatenate %146, %147, %148, %149, %150, %151, %152, %153, %154, %155, %156, %157, %158, %159, %160, %161 in 0 : vector<1x128xf32>, vector<1x128xf32>, vector<1x128xf32>, vector<1x128xf32>, vector<1x128xf32>, vector<1x128xf32>, vector<1x128xf32>, vector<1x128xf32>, vector<1x128xf32>, vector<1x128xf32>, vector<1x128xf32>, vector<1x128xf32>, vector<1x128xf32>, vector<1x128xf32>, vector<1x128xf32>, vector<1x128xf32> -> vector<16x128xf32>
    %163 = arith.truncf %162 : vector<16x128xf32> to vector<16x128xbf16>
    %c0_49 = arith.constant 0 : index
    %c0_50 = arith.constant 0 : index
    %164 = vector.load %arg8[%c0_49, %c0_50] : memref<128x1024xbf16, #tpu.memory_space<vmem>>, vector<128x1024xbf16>
    %cst_51 = arith.constant dense<0.000000e+00> : vector<16x1024xf32>
    %165 = tpu.matmul %163, %164, %cst_51 {dimension_numbers = #tpu.dot_dimension_numbers<[1], [0], [0], [1], [0, 0, 1, 1], [], []>} : vector<16x128xbf16>, vector<128x1024xbf16>, vector<16x1024xf32> -> vector<16x1024xf32>
    %166 = vector.extract_strided_slice %165 {offsets = [0, 0], sizes = [16, 512], strides = [1, 1]} : vector<16x1024xf32> to vector<16x512xf32>
    %c0_52 = arith.constant 0 : index
    %c0_53 = arith.constant 0 : index
    %167 = vector.load %arg10[%c0_52, %c0_53] : memref<1x512xf32, #tpu.memory_space<vmem>>, vector<1x512xf32>
    %168 = vector.broadcast %167 : vector<1x512xf32> to vector<16x512xf32>
    %169 = arith.addf %166, %168 : vector<16x512xf32>
    %170 = vector.extract_strided_slice %165 {offsets = [0, 512], sizes = [16, 512], strides = [1, 1]} : vector<16x1024xf32> to vector<16x512xf32>
    %c0_54 = arith.constant 0 : index
    %c0_55 = arith.constant 0 : index
    %171 = vector.load %arg11[%c0_54, %c0_55] : memref<1x512xf32, #tpu.memory_space<vmem>>, vector<1x512xf32>
    %172 = vector.broadcast %171 : vector<1x512xf32> to vector<16x512xf32>
    %173 = arith.addf %170, %172 : vector<16x512xf32>
    %c0_56 = arith.constant 0 : index
    %c0_57 = arith.constant 0 : index
    %174 = vector.load %arg9[%c0_56, %c0_57] : memref<128x1024xbf16, #tpu.memory_space<vmem>>, vector<128x1024xbf16>
    %cst_58 = arith.constant 0.000000e+00 : f32
    %175 = vector.broadcast %cst_58 : f32 to vector<8x128xf32>
    %cst_59 = arith.constant 0.000000e+00 : f32
    %176 = vector.broadcast %cst_59 : f32 to vector<8x128xf32>
    %177 = arith.truncf %175 : vector<8x128xf32> to vector<8x128xbf16>
    %cst_60 = arith.constant dense<0.000000e+00> : vector<8x1024xf32>
    %178 = tpu.matmul %177, %174, %cst_60 {dimension_numbers = #tpu.dot_dimension_numbers<[1], [0], [0], [1], [0, 0, 1, 1], [], []>} : vector<8x128xbf16>, vector<128x1024xbf16>, vector<8x1024xf32> -> vector<8x1024xf32>
    %179 = vector.extract_strided_slice %169 {offsets = [0, 0], sizes = [4, 512], strides = [1, 1]} : vector<16x512xf32> to vector<4x512xf32>
    %180 = vector.extract_strided_slice %178 {offsets = [0, 0], sizes = [4, 512], strides = [1, 1]} : vector<8x1024xf32> to vector<4x512xf32>
    %181 = arith.addf %179, %180 : vector<4x512xf32>
    %182 = vector.extract_strided_slice %173 {offsets = [12, 0], sizes = [4, 512], strides = [1, 1]} : vector<16x512xf32> to vector<4x512xf32>
    %183 = vector.extract_strided_slice %178 {offsets = [4, 512], sizes = [4, 512], strides = [1, 1]} : vector<8x1024xf32> to vector<4x512xf32>
    %184 = arith.addf %182, %183 : vector<4x512xf32>
    %185 = tpu.concatenate %181, %184 in 0 : vector<4x512xf32>, vector<4x512xf32> -> vector<8x512xf32>
    %186 = vector.extract_strided_slice %185 {offsets = [0, 0], sizes = [8, 384], strides = [1, 1]} : vector<8x512xf32> to vector<8x384xf32>
    %cst_61 = arith.constant 5.000000e-01 : f32
    %187 = vector.broadcast %cst_61 : f32 to vector<8x384xf32>
    %188 = arith.mulf %187, %186 : vector<8x384xf32>
    %189 = math.tanh %188 : vector<8x384xf32>
    %cst_62 = arith.constant 1.000000e+00 : f32
    %190 = vector.broadcast %cst_62 : f32 to vector<8x384xf32>
    %191 = arith.addf %189, %190 : vector<8x384xf32>
    %cst_63 = arith.constant 5.000000e-01 : f32
    %192 = vector.broadcast %cst_63 : f32 to vector<8x384xf32>
    %193 = arith.mulf %192, %191 : vector<8x384xf32>
    %194 = vector.extract_strided_slice %185 {offsets = [0, 384], sizes = [8, 128], strides = [1, 1]} : vector<8x512xf32> to vector<8x128xf32>
    %195 = math.tanh %194 : vector<8x128xf32>
    %196 = vector.extract_strided_slice %193 {offsets = [0, 128], sizes = [8, 128], strides = [1, 1]} : vector<8x384xf32> to vector<8x128xf32>
    %197 = arith.mulf %196, %176 : vector<8x128xf32>
    %198 = vector.extract_strided_slice %193 {offsets = [0, 0], sizes = [8, 128], strides = [1, 1]} : vector<8x384xf32> to vector<8x128xf32>
    %199 = arith.mulf %198, %195 : vector<8x128xf32>
    %200 = arith.addf %197, %199 : vector<8x128xf32>
    %201 = vector.extract_strided_slice %193 {offsets = [0, 256], sizes = [8, 128], strides = [1, 1]} : vector<8x384xf32> to vector<8x128xf32>
    %202 = math.tanh %200 : vector<8x128xf32>
    %203 = arith.mulf %201, %202 : vector<8x128xf32>
    %204 = vector.extract_strided_slice %203 {offsets = [0, 0], sizes = [4, 128], strides = [1, 1]} : vector<8x128xf32> to vector<4x128xf32>
    %205 = vector.extract_strided_slice %203 {offsets = [4, 0], sizes = [4, 128], strides = [1, 1]} : vector<8x128xf32> to vector<4x128xf32>
    %206 = arith.truncf %203 : vector<8x128xf32> to vector<8x128xbf16>
    %cst_64 = arith.constant dense<0.000000e+00> : vector<8x1024xf32>
    %207 = tpu.matmul %206, %174, %cst_64 {dimension_numbers = #tpu.dot_dimension_numbers<[1], [0], [0], [1], [0, 0, 1, 1], [], []>} : vector<8x128xbf16>, vector<128x1024xbf16>, vector<8x1024xf32> -> vector<8x1024xf32>
    %208 = vector.extract_strided_slice %169 {offsets = [4, 0], sizes = [4, 512], strides = [1, 1]} : vector<16x512xf32> to vector<4x512xf32>
    %209 = vector.extract_strided_slice %207 {offsets = [0, 0], sizes = [4, 512], strides = [1, 1]} : vector<8x1024xf32> to vector<4x512xf32>
    %210 = arith.addf %208, %209 : vector<4x512xf32>
    %211 = vector.extract_strided_slice %173 {offsets = [8, 0], sizes = [4, 512], strides = [1, 1]} : vector<16x512xf32> to vector<4x512xf32>
    %212 = vector.extract_strided_slice %207 {offsets = [4, 512], sizes = [4, 512], strides = [1, 1]} : vector<8x1024xf32> to vector<4x512xf32>
    %213 = arith.addf %211, %212 : vector<4x512xf32>
    %214 = tpu.concatenate %210, %213 in 0 : vector<4x512xf32>, vector<4x512xf32> -> vector<8x512xf32>
    %215 = vector.extract_strided_slice %214 {offsets = [0, 0], sizes = [8, 384], strides = [1, 1]} : vector<8x512xf32> to vector<8x384xf32>
    %cst_65 = arith.constant 5.000000e-01 : f32
    %216 = vector.broadcast %cst_65 : f32 to vector<8x384xf32>
    %217 = arith.mulf %216, %215 : vector<8x384xf32>
    %218 = math.tanh %217 : vector<8x384xf32>
    %cst_66 = arith.constant 1.000000e+00 : f32
    %219 = vector.broadcast %cst_66 : f32 to vector<8x384xf32>
    %220 = arith.addf %218, %219 : vector<8x384xf32>
    %cst_67 = arith.constant 5.000000e-01 : f32
    %221 = vector.broadcast %cst_67 : f32 to vector<8x384xf32>
    %222 = arith.mulf %221, %220 : vector<8x384xf32>
    %223 = vector.extract_strided_slice %214 {offsets = [0, 384], sizes = [8, 128], strides = [1, 1]} : vector<8x512xf32> to vector<8x128xf32>
    %224 = math.tanh %223 : vector<8x128xf32>
    %225 = vector.extract_strided_slice %222 {offsets = [0, 128], sizes = [8, 128], strides = [1, 1]} : vector<8x384xf32> to vector<8x128xf32>
    %226 = arith.mulf %225, %200 : vector<8x128xf32>
    %227 = vector.extract_strided_slice %222 {offsets = [0, 0], sizes = [8, 128], strides = [1, 1]} : vector<8x384xf32> to vector<8x128xf32>
    %228 = arith.mulf %227, %224 : vector<8x128xf32>
    %229 = arith.addf %226, %228 : vector<8x128xf32>
    %230 = vector.extract_strided_slice %222 {offsets = [0, 256], sizes = [8, 128], strides = [1, 1]} : vector<8x384xf32> to vector<8x128xf32>
    %231 = math.tanh %229 : vector<8x128xf32>
    %232 = arith.mulf %230, %231 : vector<8x128xf32>
    %233 = vector.extract_strided_slice %232 {offsets = [0, 0], sizes = [4, 128], strides = [1, 1]} : vector<8x128xf32> to vector<4x128xf32>
    %234 = vector.extract_strided_slice %232 {offsets = [4, 0], sizes = [4, 128], strides = [1, 1]} : vector<8x128xf32> to vector<4x128xf32>
    %235 = arith.truncf %232 : vector<8x128xf32> to vector<8x128xbf16>
    %cst_68 = arith.constant dense<0.000000e+00> : vector<8x1024xf32>
    %236 = tpu.matmul %235, %174, %cst_68 {dimension_numbers = #tpu.dot_dimension_numbers<[1], [0], [0], [1], [0, 0, 1, 1], [], []>} : vector<8x128xbf16>, vector<128x1024xbf16>, vector<8x1024xf32> -> vector<8x1024xf32>
    %237 = vector.extract_strided_slice %169 {offsets = [8, 0], sizes = [4, 512], strides = [1, 1]} : vector<16x512xf32> to vector<4x512xf32>
    %238 = vector.extract_strided_slice %236 {offsets = [0, 0], sizes = [4, 512], strides = [1, 1]} : vector<8x1024xf32> to vector<4x512xf32>
    %239 = arith.addf %237, %238 : vector<4x512xf32>
    %240 = vector.extract_strided_slice %173 {offsets = [4, 0], sizes = [4, 512], strides = [1, 1]} : vector<16x512xf32> to vector<4x512xf32>
    %241 = vector.extract_strided_slice %236 {offsets = [4, 512], sizes = [4, 512], strides = [1, 1]} : vector<8x1024xf32> to vector<4x512xf32>
    %242 = arith.addf %240, %241 : vector<4x512xf32>
    %243 = tpu.concatenate %239, %242 in 0 : vector<4x512xf32>, vector<4x512xf32> -> vector<8x512xf32>
    %244 = vector.extract_strided_slice %243 {offsets = [0, 0], sizes = [8, 384], strides = [1, 1]} : vector<8x512xf32> to vector<8x384xf32>
    %cst_69 = arith.constant 5.000000e-01 : f32
    %245 = vector.broadcast %cst_69 : f32 to vector<8x384xf32>
    %246 = arith.mulf %245, %244 : vector<8x384xf32>
    %247 = math.tanh %246 : vector<8x384xf32>
    %cst_70 = arith.constant 1.000000e+00 : f32
    %248 = vector.broadcast %cst_70 : f32 to vector<8x384xf32>
    %249 = arith.addf %247, %248 : vector<8x384xf32>
    %cst_71 = arith.constant 5.000000e-01 : f32
    %250 = vector.broadcast %cst_71 : f32 to vector<8x384xf32>
    %251 = arith.mulf %250, %249 : vector<8x384xf32>
    %252 = vector.extract_strided_slice %243 {offsets = [0, 384], sizes = [8, 128], strides = [1, 1]} : vector<8x512xf32> to vector<8x128xf32>
    %253 = math.tanh %252 : vector<8x128xf32>
    %254 = vector.extract_strided_slice %251 {offsets = [0, 128], sizes = [8, 128], strides = [1, 1]} : vector<8x384xf32> to vector<8x128xf32>
    %255 = arith.mulf %254, %229 : vector<8x128xf32>
    %256 = vector.extract_strided_slice %251 {offsets = [0, 0], sizes = [8, 128], strides = [1, 1]} : vector<8x384xf32> to vector<8x128xf32>
    %257 = arith.mulf %256, %253 : vector<8x128xf32>
    %258 = arith.addf %255, %257 : vector<8x128xf32>
    %259 = vector.extract_strided_slice %251 {offsets = [0, 256], sizes = [8, 128], strides = [1, 1]} : vector<8x384xf32> to vector<8x128xf32>
    %260 = math.tanh %258 : vector<8x128xf32>
    %261 = arith.mulf %259, %260 : vector<8x128xf32>
    %262 = vector.extract_strided_slice %261 {offsets = [0, 0], sizes = [4, 128], strides = [1, 1]} : vector<8x128xf32> to vector<4x128xf32>
    %263 = vector.extract_strided_slice %261 {offsets = [4, 0], sizes = [4, 128], strides = [1, 1]} : vector<8x128xf32> to vector<4x128xf32>
    %264 = arith.truncf %261 : vector<8x128xf32> to vector<8x128xbf16>
    %cst_72 = arith.constant dense<0.000000e+00> : vector<8x1024xf32>
    %265 = tpu.matmul %264, %174, %cst_72 {dimension_numbers = #tpu.dot_dimension_numbers<[1], [0], [0], [1], [0, 0, 1, 1], [], []>} : vector<8x128xbf16>, vector<128x1024xbf16>, vector<8x1024xf32> -> vector<8x1024xf32>
    %266 = vector.extract_strided_slice %169 {offsets = [12, 0], sizes = [4, 512], strides = [1, 1]} : vector<16x512xf32> to vector<4x512xf32>
    %267 = vector.extract_strided_slice %265 {offsets = [0, 0], sizes = [4, 512], strides = [1, 1]} : vector<8x1024xf32> to vector<4x512xf32>
    %268 = arith.addf %266, %267 : vector<4x512xf32>
    %269 = vector.extract_strided_slice %173 {offsets = [0, 0], sizes = [4, 512], strides = [1, 1]} : vector<16x512xf32> to vector<4x512xf32>
    %270 = vector.extract_strided_slice %265 {offsets = [4, 512], sizes = [4, 512], strides = [1, 1]} : vector<8x1024xf32> to vector<4x512xf32>
    %271 = arith.addf %269, %270 : vector<4x512xf32>
    %272 = tpu.concatenate %268, %271 in 0 : vector<4x512xf32>, vector<4x512xf32> -> vector<8x512xf32>
    %273 = vector.extract_strided_slice %272 {offsets = [0, 0], sizes = [8, 384], strides = [1, 1]} : vector<8x512xf32> to vector<8x384xf32>
    %cst_73 = arith.constant 5.000000e-01 : f32
    %274 = vector.broadcast %cst_73 : f32 to vector<8x384xf32>
    %275 = arith.mulf %274, %273 : vector<8x384xf32>
    %276 = math.tanh %275 : vector<8x384xf32>
    %cst_74 = arith.constant 1.000000e+00 : f32
    %277 = vector.broadcast %cst_74 : f32 to vector<8x384xf32>
    %278 = arith.addf %276, %277 : vector<8x384xf32>
    %cst_75 = arith.constant 5.000000e-01 : f32
    %279 = vector.broadcast %cst_75 : f32 to vector<8x384xf32>
    %280 = arith.mulf %279, %278 : vector<8x384xf32>
    %281 = vector.extract_strided_slice %272 {offsets = [0, 384], sizes = [8, 128], strides = [1, 1]} : vector<8x512xf32> to vector<8x128xf32>
    %282 = math.tanh %281 : vector<8x128xf32>
    %283 = vector.extract_strided_slice %280 {offsets = [0, 128], sizes = [8, 128], strides = [1, 1]} : vector<8x384xf32> to vector<8x128xf32>
    %284 = arith.mulf %283, %258 : vector<8x128xf32>
    %285 = vector.extract_strided_slice %280 {offsets = [0, 0], sizes = [8, 128], strides = [1, 1]} : vector<8x384xf32> to vector<8x128xf32>
    %286 = arith.mulf %285, %282 : vector<8x128xf32>
    %287 = arith.addf %284, %286 : vector<8x128xf32>
    %288 = vector.extract_strided_slice %280 {offsets = [0, 256], sizes = [8, 128], strides = [1, 1]} : vector<8x384xf32> to vector<8x128xf32>
    %289 = math.tanh %287 : vector<8x128xf32>
    %290 = arith.mulf %288, %289 : vector<8x128xf32>
    %291 = vector.extract_strided_slice %290 {offsets = [0, 0], sizes = [4, 128], strides = [1, 1]} : vector<8x128xf32> to vector<4x128xf32>
    %292 = vector.extract_strided_slice %290 {offsets = [4, 0], sizes = [4, 128], strides = [1, 1]} : vector<8x128xf32> to vector<4x128xf32>
    %293 = tpu.concatenate %204, %292 in 1 : vector<4x128xf32>, vector<4x128xf32> -> vector<4x256xf32>
    %294 = tpu.concatenate %233, %263 in 1 : vector<4x128xf32>, vector<4x128xf32> -> vector<4x256xf32>
    %295 = tpu.concatenate %262, %234 in 1 : vector<4x128xf32>, vector<4x128xf32> -> vector<4x256xf32>
    %296 = tpu.concatenate %291, %205 in 1 : vector<4x128xf32>, vector<4x128xf32> -> vector<4x256xf32>
    %297 = tpu.concatenate %293, %294, %295, %296 in 0 : vector<4x256xf32>, vector<4x256xf32>, vector<4x256xf32>, vector<4x256xf32> -> vector<16x256xf32>
    %298 = arith.truncf %297 : vector<16x256xf32> to vector<16x256xbf16>
    %c0_76 = arith.constant 0 : index
    %c0_77 = arith.constant 0 : index
    %299 = vector.load %arg12[%c0_76, %c0_77] : memref<256x256xbf16, #tpu.memory_space<vmem>>, vector<256x256xbf16>
    %cst_78 = arith.constant dense<0.000000e+00> : vector<16x256xf32>
    %300 = tpu.matmul %298, %299, %cst_78 {dimension_numbers = #tpu.dot_dimension_numbers<[1], [0], [0], [1], [0, 0, 1, 1], [], []>} : vector<16x256xbf16>, vector<256x256xbf16>, vector<16x256xf32> -> vector<16x256xf32>
    %c0_79 = arith.constant 0 : index
    %c0_80 = arith.constant 0 : index
    %301 = vector.load %arg13[%c0_79, %c0_80] : memref<1x256xf32, #tpu.memory_space<vmem>>, vector<1x256xf32>
    %302 = vector.broadcast %301 : vector<1x256xf32> to vector<16x256xf32>
    %303 = arith.addf %300, %302 : vector<16x256xf32>
    %304 = math.tanh %303 : vector<16x256xf32>
    %c0_81 = arith.constant 0 : index
    %c0_82 = arith.constant 0 : index
    %305 = vector.load %arg14[%c0_81, %c0_82] : memref<1x256xf32, #tpu.memory_space<vmem>>, vector<1x256xf32>
    %306 = vector.broadcast %305 : vector<1x256xf32> to vector<16x256xf32>
    %307 = arith.mulf %304, %306 : vector<16x256xf32>
    %cst_83 = arith.constant dense<0.000000e+00> : vector<16xf32>
    %308 = vector.multi_reduction <add>, %307, %cst_83 [1] : vector<16x256xf32> to vector<16xf32>
    %309 = vector.shape_cast %308 : vector<16xf32> to vector<16x1xf32>
    %310 = vector.extract_strided_slice %309 {offsets = [0, 0], sizes = [4, 1], strides = [1, 1]} : vector<16x1xf32> to vector<4x1xf32>
    %311 = vector.extract_strided_slice %309 {offsets = [4, 0], sizes = [4, 1], strides = [1, 1]} : vector<16x1xf32> to vector<4x1xf32>
    %312 = vector.extract_strided_slice %309 {offsets = [8, 0], sizes = [4, 1], strides = [1, 1]} : vector<16x1xf32> to vector<4x1xf32>
    %313 = vector.extract_strided_slice %309 {offsets = [12, 0], sizes = [4, 1], strides = [1, 1]} : vector<16x1xf32> to vector<4x1xf32>
    %314 = arith.maximumf %310, %311 : vector<4x1xf32>
    %315 = arith.maximumf %314, %312 : vector<4x1xf32>
    %316 = arith.maximumf %315, %313 : vector<4x1xf32>
    %317 = arith.subf %310, %316 : vector<4x1xf32>
    %318 = math.exp %317 : vector<4x1xf32>
    %319 = arith.subf %311, %316 : vector<4x1xf32>
    %320 = math.exp %319 : vector<4x1xf32>
    %321 = arith.subf %312, %316 : vector<4x1xf32>
    %322 = math.exp %321 : vector<4x1xf32>
    %323 = arith.subf %313, %316 : vector<4x1xf32>
    %324 = math.exp %323 : vector<4x1xf32>
    %325 = arith.addf %318, %320 : vector<4x1xf32>
    %326 = arith.addf %325, %322 : vector<4x1xf32>
    %327 = arith.addf %326, %324 : vector<4x1xf32>
    %328 = vector.broadcast %318 : vector<4x1xf32> to vector<4x256xf32>
    %329 = arith.mulf %328, %293 : vector<4x256xf32>
    %330 = vector.broadcast %320 : vector<4x1xf32> to vector<4x256xf32>
    %331 = arith.mulf %330, %294 : vector<4x256xf32>
    %332 = arith.addf %329, %331 : vector<4x256xf32>
    %333 = vector.broadcast %322 : vector<4x1xf32> to vector<4x256xf32>
    %334 = arith.mulf %333, %295 : vector<4x256xf32>
    %335 = arith.addf %332, %334 : vector<4x256xf32>
    %336 = vector.broadcast %324 : vector<4x1xf32> to vector<4x256xf32>
    %337 = arith.mulf %336, %296 : vector<4x256xf32>
    %338 = arith.addf %335, %337 : vector<4x256xf32>
    %cst_84 = arith.constant 1.000000e+00 : f32
    %339 = vector.broadcast %cst_84 : f32 to vector<4x1xf32>
    %340 = arith.divf %339, %327 : vector<4x1xf32>
    %341 = vector.broadcast %340 : vector<4x1xf32> to vector<4x256xf32>
    %342 = arith.mulf %338, %341 : vector<4x256xf32>
    %343 = arith.truncf %342 : vector<4x256xf32> to vector<4x256xbf16>
    %c0_85 = arith.constant 0 : index
    %c0_86 = arith.constant 0 : index
    %344 = vector.load %arg15[%c0_85, %c0_86] : memref<256x96xbf16, #tpu.memory_space<vmem>>, vector<256x96xbf16>
    %cst_87 = arith.constant dense<0.000000e+00> : vector<4x96xf32>
    %345 = tpu.matmul %343, %344, %cst_87 {dimension_numbers = #tpu.dot_dimension_numbers<[1], [0], [0], [1], [0, 0, 1, 1], [], []>} : vector<4x256xbf16>, vector<256x96xbf16>, vector<4x96xf32> -> vector<4x96xf32>
    %c0_88 = arith.constant 0 : index
    %c0_89 = arith.constant 0 : index
    %346 = vector.load %arg16[%c0_88, %c0_89] : memref<1x96xf32, #tpu.memory_space<vmem>>, vector<1x96xf32>
    %347 = vector.broadcast %346 : vector<1x96xf32> to vector<4x96xf32>
    %348 = arith.addf %345, %347 : vector<4x96xf32>
    %cst_90 = arith.constant 0.000000e+00 : f32
    %349 = vector.broadcast %cst_90 : f32 to vector<4x96xf32>
    %350 = arith.maximumf %348, %349 : vector<4x96xf32>
    %351 = arith.truncf %350 : vector<4x96xf32> to vector<4x96xbf16>
    %c0_91 = arith.constant 0 : index
    %c0_92 = arith.constant 0 : index
    %352 = vector.load %arg17[%c0_91, %c0_92] : memref<96x128xbf16, #tpu.memory_space<vmem>>, vector<96x128xbf16>
    %cst_93 = arith.constant dense<0.000000e+00> : vector<4x128xf32>
    %353 = tpu.matmul %351, %352, %cst_93 {dimension_numbers = #tpu.dot_dimension_numbers<[1], [0], [0], [1], [0, 0, 1, 1], [], []>} : vector<4x96xbf16>, vector<96x128xbf16>, vector<4x128xf32> -> vector<4x128xf32>
    %c0_94 = arith.constant 0 : index
    %c0_95 = arith.constant 0 : index
    %354 = vector.load %arg18[%c0_94, %c0_95] : memref<1x128xf32, #tpu.memory_space<vmem>>, vector<1x128xf32>
    %355 = vector.broadcast %354 : vector<1x128xf32> to vector<4x128xf32>
    %356 = arith.addf %353, %355 : vector<4x128xf32>
    %c0_96 = arith.constant 0 : index
    %c0_97 = arith.constant 0 : index
    %c0_98 = arith.constant 0 : index
    %357 = vector.load %arg19[%c0_96, %c0_97, %c0_98] : memref<1x4x128xf32, #tpu.memory_space<vmem>>, vector<1x4x128xf32>
    %358 = vector.shape_cast %357 : vector<1x4x128xf32> to vector<4x128xf32>
    %359 = vector.shape_cast %356 : vector<4x128xf32> to vector<1x4x128xf32>
    tpu.vector_store %arg19[%c0_96, %c0_97, %c0_98], %359 {strides = array<i32>} : memref<1x4x128xf32, #tpu.memory_space<vmem>>, vector<1x4x128xf32>,
    return
  }
  func.func @transform_0(%arg0: i32) -> (i32, i32, i32) {
    %c0_i32 = arith.constant 0 : i32
    %c0_i32_0 = arith.constant 0 : i32
    %c0_i32_1 = arith.constant 0 : i32
    return %arg0, %c0_i32, %c0_i32_0 : i32, i32, i32
  }
  func.func @transform_1(%arg0: i32) -> (i32, i32) {
    %c0_i32 = arith.constant 0 : i32
    %c0_i32_0 = arith.constant 0 : i32
    %c0_i32_1 = arith.constant 0 : i32
    return %c0_i32, %c0_i32_0 : i32, i32
  }
  func.func @transform_2(%arg0: i32) -> (i32, i32) {
    %c0_i32 = arith.constant 0 : i32
    %c0_i32_0 = arith.constant 0 : i32
    %c0_i32_1 = arith.constant 0 : i32
    return %c0_i32, %c0_i32_0 : i32, i32
  }
  func.func @transform_3(%arg0: i32) -> (i32, i32) {
    %c0_i32 = arith.constant 0 : i32
    %c0_i32_0 = arith.constant 0 : i32
    %c0_i32_1 = arith.constant 0 : i32
    return %c0_i32, %c0_i32_0 : i32, i32
  }
  func.func @transform_4(%arg0: i32) -> (i32, i32) {
    %c0_i32 = arith.constant 0 : i32
    %c0_i32_0 = arith.constant 0 : i32
    %c0_i32_1 = arith.constant 0 : i32
    return %c0_i32, %c0_i32_0 : i32, i32
  }
  func.func @transform_5(%arg0: i32) -> (i32, i32) {
    %c0_i32 = arith.constant 0 : i32
    %c0_i32_0 = arith.constant 0 : i32
    %c0_i32_1 = arith.constant 0 : i32
    return %c0_i32, %c0_i32_0 : i32, i32
  }
  func.func @transform_6(%arg0: i32) -> (i32, i32) {
    %c0_i32 = arith.constant 0 : i32
    %c0_i32_0 = arith.constant 0 : i32
    %c0_i32_1 = arith.constant 0 : i32
    return %c0_i32, %c0_i32_0 : i32, i32
  }
  func.func @transform_7(%arg0: i32) -> (i32, i32) {
    %c0_i32 = arith.constant 0 : i32
    %c0_i32_0 = arith.constant 0 : i32
    %c0_i32_1 = arith.constant 0 : i32
    return %c0_i32, %c0_i32_0 : i32, i32
  }
  func.func @transform_8(%arg0: i32) -> (i32, i32) {
    %c0_i32 = arith.constant 0 : i32
    %c0_i32_0 = arith.constant 0 : i32
    %c0_i32_1 = arith.constant 0 : i32
    return %c0_i32, %c0_i32_0 : i32, i32
  }
  func.func @transform_9(%arg0: i32) -> (i32, i32) {
    %c0_i32 = arith.constant 0 : i32
    %c0_i32_0 = arith.constant 0 : i32
    %c0_i32_1 = arith.constant 0 : i32
    return %c0_i32, %c0_i32_0 : i32, i32
  }
  func.func @transform_10(%arg0: i32) -> (i32, i32) {
    %c0_i32 = arith.constant 0 : i32
    %c0_i32_0 = arith.constant 0 : i32
    %c0_i32_1 = arith.constant 0 : i32
    return %c0_i32, %c0_i32_0 : i32, i32
  }
  func.func @transform_11(%arg0: i32) -> (i32, i32) {
    %c0_i32 = arith.constant 0 : i32
    %c0_i32_0 = arith.constant 0 : i32
    %c0_i32_1 = arith.constant 0 : i32
    return %c0_i32, %c0_i32_0 : i32, i32
  }
  func.func @transform_12(%arg0: i32) -> (i32, i32) {
    %c0_i32 = arith.constant 0 : i32
    %c0_i32_0 = arith.constant 0 : i32
    %c0_i32_1 = arith.constant 0 : i32
    return %c0_i32, %c0_i32_0 : i32, i32
  }
  func.func @transform_13(%arg0: i32) -> (i32, i32) {
    %c0_i32 = arith.constant 0 : i32
    %c0_i32_0 = arith.constant 0 : i32
    %c0_i32_1 = arith.constant 0 : i32
    return %c0_i32, %c0_i32_0 : i32, i32
  }
  func.func @transform_14(%arg0: i32) -> (i32, i32) {
    %c0_i32 = arith.constant 0 : i32
    %c0_i32_0 = arith.constant 0 : i32
    %c0_i32_1 = arith.constant 0 : i32
    return %c0_i32, %c0_i32_0 : i32, i32
  }
  func.func @transform_15(%arg0: i32) -> (i32, i32) {
    %c0_i32 = arith.constant 0 : i32
    %c0_i32_0 = arith.constant 0 : i32
    %c0_i32_1 = arith.constant 0 : i32
    return %c0_i32, %c0_i32_0 : i32, i32
  }
  func.func @transform_16(%arg0: i32) -> (i32, i32) {
    %c0_i32 = arith.constant 0 : i32
    %c0_i32_0 = arith.constant 0 : i32
    %c0_i32_1 = arith.constant 0 : i32
    return %c0_i32, %c0_i32_0 : i32, i32
  }
  func.func @transform_17(%arg0: i32) -> (i32, i32) {
    %c0_i32 = arith.constant 0 : i32
    %c0_i32_0 = arith.constant 0 : i32
    %c0_i32_1 = arith.constant 0 : i32
    return %c0_i32, %c0_i32_0 : i32, i32
  }
  func.func @transform_18(%arg0: i32) -> (i32, i32, i32) {
    %c0_i32 = arith.constant 0 : i32
    %c0_i32_0 = arith.constant 0 : i32
    %c0_i32_1 = arith.constant 0 : i32
    return %arg0, %c0_i32, %c0_i32_0 : i32, i32, i32
  }
}

</mosaic_0001>

<bundles_post_ra>
// kernel: _forward_padded.1
= control target key start
LH: loop header
LB: loop body
LE: loop exit
PB: predicated region body
PF: predicated region fallthrough
CT: control target
= control target key end

     0   :  { %s13702_s0 = inlined_call_operand.vmem [shape: f32[8,160,32], index: 0, kind: input, shape index: {}]   ;;  %s13703_s1 = inlined_call_operand.vmem [shape: bf16[160,128], index: 1, kind: input, shape index: {}]   ;;  %s13704_s2 = inlined_call_operand.vmem [shape: f32[1,128], index: 2, kind: input, shape index: {}]   ;;  %s13705_s3 = inlined_call_operand.vmem [shape: bf16[640,128], index: 3, kind: input, shape index: {}]   ;;  %s13706_s4 = inlined_call_operand.vmem [shape: f32[1,128], index: 4, kind: input, shape index: {}]   ;;  %s13707_s5 = inlined_call_operand.vmem [shape: bf16[640,128], index: 5, kind: input, shape index: {}]   ;;  %s13708_s6 = inlined_call_operand.vmem [shape: f32[1,128], index: 6, kind: input, shape index: {}]   ;;  %s13709_s7 = inlined_call_operand.vmem [shape: bf16[128,1024], index: 7, kind: input, shape index: {}]   ;;  %s13710_s8 = inlined_call_operand.vmem [shape: bf16[128,1024], index: 8, kind: input, shape index: {}]   ;;  %s13711_s9 = inlined_call_operand.vmem [shape: f32[1,512], index: 9, kind: input, shape index: {}]   ;;  %s13712_s10 = inlined_call_operand.vmem [shape: f32[1,512], index: 10, kind: input, shape index: {}]   ;;  %s13713_s11 = inlined_call_operand.vmem [shape: bf16[256,256], index: 11, kind: input, shape index: {}]   ;;  %s13714_s12 = inlined_call_operand.vmem [shape: f32[1,256], index: 12, kind: input, shape index: {}]   ;;  %s13715_s13 = inlined_call_operand.vmem [shape: f32[1,256], index: 13, kind: input, shape index: {}]   ;;  %s13716_s14 = inlined_call_operand.vmem [shape: bf16[256,96], index: 14, kind: input, shape index: {}]   ;;  %s13717_s15 = inlined_call_operand.vmem [shape: f32[1,96], index: 15, kind: input, shape index: {}]   ;;  %s13718_s16 = inlined_call_operand.vmem [shape: bf16[96,128], index: 16, kind: input, shape index: {}]   ;;  %s13719_s17 = inlined_call_operand.vmem [shape: f32[1,128], index: 17, kind: input, shape index: {}]   ;;  %s13720_s18 = inlined_call_operand.hbm [shape: f32[2,4,128], index: 18, kind: output, shape index: {}]  }
   0x1   :  { %13843 = sst [smem:[#allocation53_spill]] %s13702_s0 }
   0x2   :  { %13844 = sst [smem:[#allocation54_spill]] %s13703_s1 }
   0x3   :  { %13845 = sst [smem:[#allocation55_spill]] %s13704_s2 }
   0x4   :  { %13846 = sst [smem:[#allocation56_spill]] %s13705_s3 }
   0x5   :  { %13847 = sst [smem:[#allocation57_spill]] %s13706_s4 }
   0x6   :  { %13848 = sst [smem:[#allocation58_spill]] %s13707_s5 }
   0x7   :  { %13849 = sst [smem:[#allocation59_spill]] %s13708_s6 }
   0x8   :  { %13850 = sst [smem:[#allocation60_spill]] %s13709_s7 }
   0x9   :  { %23 = vsyncpa [#allocation4], 0 }
   0xa   :  { %25 = vsyncpa [#allocation4 + $0x1], 0  ;;  %s9098_s27 = smov 0   ;;  %s9100_s28 = smov 0  }
   0xb   :  { %s9102_s29 = smov 0   ;;  %s9104_s30 = smov 0  }
   0xc LB: > { %13851 = sst [smem:[#allocation6_spill]] %s8993_s29  ;;  %s7347_s0 = sadd.s32 4294967295, %s8997_s30   ;;  %s8997_s30 = sphi %s9104_s30, %s14062_s30   ;;  %s8993_s29 = sphi %s9102_s29, %s14064_s29   ;;  %s8989_s28 = sphi %s9100_s28, %s14066_s28   ;;  %s8985_s27 = sphi %s9098_s27, %s14065_s27  }
   0xd   : > { %s7348_s19 = sadd.s32 4294967294, %s8997_s30   ;;  %s9121_s1 = sadd.s32 1, %s8997_s30  }
   0xe   : > { %13852 = sst [smem:[#allocation7_spill]] %s9121_s1  ;;  %s421_s20 = sadd.s32 1, %s8993_s29 }
   0xf   : > { %s418_s21 = ssub.s32 %s8997_s30, %s9121_s1  ;;  %p431_p0 = scmp.ne.s32.totalorder %s8993_s29, %s8989_s28 }
  0x10   : > { %p419_p1 = scmp.eq.s32.totalorder %s418_s21, 0  ;;  %p432_p2 = scmp.eq.s32.totalorder %s7347_s0, 1 }
  0x11   : > { %p437_p3 = scmp.ne.s32.totalorder %s8989_s28, %s8985_s27  ;;  %p438_p4 = scmp.eq.s32.totalorder %s7348_s19, 1 }
  0x12   : > { %s9131_s22 = scalar_select %p419_p1, %s8993_s29, %s421_s20  }
  0x13   : > { %p9133_p5 = por %p432_p2, %p431_p0  ;;  %p9137_p6 = por %p438_p4, %p437_p3 }
  0x14   : > { %13853 = sst [smem:[#allocation8_spill]] %s9131_s22  ;;  %p7351_p7 = scmp.ge.s32.totalorder %s8997_s30, 1 }
  0x15   : > { %p517_p8 = scmp.lt.s32.totalorder %s8997_s30, 3 }
  0x17   : > { %p518_p9 = pnand %p7351_p7, %p517_p8 }
  0x19   : > { %521 = sbr.rel (%p518_p9) target bundleno = 3298 (0xce2), region = 92 }
  0x1e   : > { %s9143_s24 = sshll.u32 %s7347_s0, 2  ;;  %s13856_s21 = sld [smem:[#allocation53_spill]]  ;;  %vm793_vm0 = vsmask.f32 7424  ;;  %vm933_vm1 = vsmask.f32 6400 }
  0x1f   : > { %p573_p10 = scmp.lt.s32.totalorder %s9143_s24, 7  ;;  %vm893_vm2 = vcmask 1046528   ;;  %s13723_s0 = smov 64   ;;  %vm993_vm3 = vcmask 1045504   ;;  %vm1013_vm4 = vcmask 261120   ;;  %vm1034_vm5 = vcmask 523264  }
  0x20   : > { %vm1055_vm6 = vcmask 785408   ;;  %s13860_s19 = sld [smem:[#allocation55_spill]]  ;;  %vm2130_vm7 = vcmask 1043456   ;;  %vm2188_vm8 = vcmask 1041408   ;;  %vm5079_vm9 = vcmask 1040384   ;;  %s569_s20 = sand.u32 1, %s8989_s28  }
  0x21   : > { %s574_s25 = scalar_select %p573_p10, %s9143_s24, 7  ;;  %vm5082_vm10 = vcmask 1042432   ;;  %vm5085_vm11 = vcmask 1044480  }
  0x22   : > { %s13861_s3 = sld [smem:[#allocation56_spill]] }
  0x23   : > { %s8821_s26 = smul.u32 160, %s574_s25  ;;  %s13725_s25 = smov 32  }
  0x24   : > { %s13863_s4 = sld [smem:[#allocation57_spill]] }
  0x25   : > { %s9150_s22 = scalar_lea.vmem %s13856_s21, %s8821_s26  ;;  %s13730_s26 = smov 96  }
  0x26   : > { %v580_v0 = vld [vmem:[%s9150_s22] sm:$0xff]  ;;  %v581_v1 = vld [vmem:[%s9150_s22 + $0x8] sm:$0xff]  ;;  %v582_v2 = vld [vmem:[%s9150_s22 + $0x10] sm:$0xff]  ;;  %s13857_s21 = sld [smem:[#allocation54_spill]] }
  0x27   : > { %v583_v3 = vld [vmem:[%s9150_s22 + $0x18] sm:$0xff]  ;;  %v663_v4 = vpack.c.bf16 %v580_v0, %v580_v0  ;;  %v664_v5 = vpack.c.bf16 %v581_v1, %v581_v1  ;;  %v665_v6 = vpack.c.bf16 %v582_v2, %v582_v2  ;;  %v584_v7 = vld [vmem:[%s9150_s22 + $0x20] sm:$0xff]  ;;  %v585_v8 = vld [vmem:[%s9150_s22 + $0x28] sm:$0xff]  ;;  %s13918_s7 = sld [smem:[#allocation60_spill]] }
  0x28   : > { %v666_v9 = vpack.c.bf16 %v583_v3, %v583_v3  ;;  %v667_v10 = vpack.c.bf16 %v584_v7, %v584_v7  ;;  %v668_v11 = vpack.c.bf16 %v585_v8, %v585_v8  ;;  %v586_v12 = vld [vmem:[%s9150_s22 + $0x30] sm:$0xff]  ;;  %v587_v13 = vld [vmem:[%s9150_s22 + $0x38] sm:$0xff]  ;;  %v588_v22 = vld [vmem:[%s9150_s22 + $0x40] sm:$0xff]  ;;  %s13921_s5 = sld [smem:[#allocation58_spill]] }
  0x29   : > { %v763_v14 = vunpack.c.l.b16 %v663_v4  ;;  %v764_v15 = vunpack.c.l.b16 %v664_v5  ;;  %v765_v16 = vunpack.c.l.b16 %v665_v6  ;;  %v669_v17 = vpack.c.bf16 %v586_v12, %v586_v12  ;;  %v589_v29 = vld [vmem:[%s9150_s22 + $0x48] sm:$0xff]  ;;  %v590_v61 = vld [vmem:[%s9150_s22 + $0x50] sm:$0xff]  ;;  %v591_v62 = vld [vmem:[%s9150_s22 + $0x58] sm:$0xff]  ;;  %s13940_s6 = sld [smem:[#allocation59_spill]] }
  0x2a   : > { %v766_v18 = vunpack.c.l.b16 %v666_v9  ;;  %v767_v19 = vunpack.c.l.b16 %v667_v10  ;;  %v768_v20 = vunpack.c.l.b16 %v668_v11  ;;  %v670_v21 = vpack.c.bf16 %v587_v13, %v587_v13 }
  0x2b   : > { %v9161_v23 = vpack.c.b16 %v764_v15, %v763_v14  ;;  %v769_v25 = vunpack.c.l.b16 %v669_v17  ;;  %v671_v30 = vpack.c.bf16 %v588_v22, %v588_v22  ;;  %v672_v42 = vpack.c.bf16 %v589_v29, %v589_v29  ;;  %v592_v17 = vld [vmem:[%s9150_s22 + $0x60] sm:$0xff] }
  0x2c   : > { %v9163_v24 = vpack.c.b16 %v766_v18, %v765_v16  ;;  %v9167_v28 = vpack.c.b16 %v768_v20, %v767_v19  ;;  %v770_v34 = vunpack.c.l.b16 %v670_v21  ;;  %v673_v5 = vpack.c.bf16 %v590_v61, %v590_v61  ;;  %v8556_v15 = vld [vmem:[%s13857_s21 + $0x38] sm:$0xff]  ;;  %v593_v18 = vld [vmem:[%s9150_s22 + $0x68] sm:$0xff]  ;;  %v8555_v22 = vld [vmem:[%s13857_s21 + $0x30] sm:$0xff] }
  0x2d   : > { %v795_v26 = vshrl.u32 %v9161_v23, 16  ;;  %v797_v27 = vshll.u32 %v9161_v23, 16  ;;  %v894_v53 = vrot.slane %v9161_v23, 1  ;;  %v771_v56 = vunpack.c.l.b16 %v671_v30  ;;  %2457 = vmatpush.bf16.msra.mxu0 %v8556_v15 }
  0x2e   : > { %v802_v31 = vshll.u32 %v9163_v24, 16  ;;  %v806_v32 = vshrl.u32 %v9163_v24, 16  ;;  %v895_v33 = vrot.slane %v9163_v24, 1  ;;  %v897_v38 = vrot.slane %v9167_v28, 1 }
  0x2f   : > { %v799_v35 = vrot.slane %v797_v27, 1  ;;  %v934_v36 = vrot.slane %v795_v26, 1  ;;  %v935_v37 = vrot.slane %v797_v27, 2  ;;  %v810_v45 = vshll.u32 %v9167_v28, 16 }
  0x30   : > { %v804_v39 = vrot.slane %v802_v31, 1  ;;  %v937_v40 = vrot.slane %v806_v32, 1  ;;  %v938_v41 = vrot.slane %v802_v31, 2  ;;  %v898_v46 = vsel %vm893_vm2, %v895_v33, %v897_v38 }
  0x31   : > { %v800_v43 = vor.u32 %v799_v35, %v795_v26  ;;  %v936_v44 = vor.u32 %v935_v37, %v934_v36  ;;  %915 = vrot.lane.b32.xlu2 %v898_v46, %s13723_s0  ;;  %v9179_v48 = vpack.c.b16 %v770_v34, %v769_v25  ;;  %v814_v49 = vshrl.u32 %v9167_v28, 16  ;;  %2458 = vmatpush.bf16.msra.mxu0 %v8555_v22 }
  0x32   : > { %v939_v47 = vor.u32 %v938_v41, %v937_v40  ;;  %v942_v51 = vrot.slane %v810_v45, 2  ;;  %v772_v57 = vunpack.c.l.b16 %v672_v42  ;;  %v808_v58 = vor.u32 %v806_v32, %v804_v39  ;;  %v8554_v32 = vld [vmem:[%s13857_s21 + $0x28] sm:$0xff] }
  0x33   : > { %v805_v50 = vsel %vm793_vm0, %v800_v43, %v804_v39  ;;  %v818_v54 = vshll.u32 %v9179_v48, 16  ;;  %v941_v55 = vrot.slane %v814_v49, 1  ;;  %v812_v59 = vrot.slane %v810_v45, 1  ;;  %v8553_v43 = vld [vmem:[%s13857_s21 + $0x20] sm:$0xff] }
  0x34   : > { %873 = vrot.lane.b32.xlu0 %v805_v50, %s13725_s25  ;;  %v940_v52 = vsel %vm933_vm1, %v936_v44, %v939_v47  ;;  %v822_v60 = vshrl.u32 %v9179_v48, 16  ;;  %v896_v1 = vsel %vm893_vm2, %v894_v53, %v895_v33  ;;  %v9193_v4 = vpack.c.b16 %v772_v57, %v771_v56 }
  0x35   : > { %973 = vrot.lane.b32.xlu1 %v940_v52, %s13730_s26  ;;  %v943_v63 = vor.u32 %v942_v51, %v941_v55  ;;  %v946_v0 = vrot.slane %v818_v54, 2  ;;  %v674_v6 = vpack.c.bf16 %v591_v62, %v591_v62  ;;  %v813_v7 = vsel %vm793_vm0, %v808_v58, %v812_v59  ;;  %2459 = vmatpush.bf16.msra.mxu0 %v8554_v32  ;;  %v8552_v51 = vld [vmem:[%s13857_s21 + $0x18] sm:$0xff]  ;;  %v8558_v58 = vld [vmem:[%s13857_s21 + $0x48] sm:$0xff] }
  0x36   : > { %v945_v2 = vrot.slane %v822_v60, 1  ;;  %v816_v9 = vor.u32 %v814_v49, %v812_v59  ;;  %v820_v10 = vrot.slane %v818_v54, 1  ;;  %v826_v11 = vshll.u32 %v9193_v4, 16  ;;  %v595_v49 = vld [vmem:[%s9150_s22 + $0x78] sm:$0xff]  ;;  %2667 = vmatpush.bf16.msra.mxu1 %v8558_v58 }
  0x37   : > { %v944_v3 = vsel %vm933_vm1, %v939_v47, %v943_v63  ;;  %v773_v12 = vunpack.c.l.b16 %v673_v5  ;;  %v774_v13 = vunpack.c.l.b16 %v674_v6  ;;  %v830_v14 = vshrl.u32 %v9193_v4, 16  ;;  %v594_v47 = vld [vmem:[%s9150_s22 + $0x70] sm:$0xff]  ;;  %v596_v5 = vld [vmem:[%s9150_s22 + $0x80] sm:$0xff]  ;;  %v597_v6 = vld [vmem:[%s9150_s22 + $0x88] sm:$0xff] }
  0x38   : > { %v947_v8 = vor.u32 %v946_v0, %v945_v2  ;;  %v899_v16 = vrot.slane %v9179_v48, 1  ;;  %v950_v21 = vrot.slane %v826_v11, 2  ;;  %v821_v25 = vsel %vm793_vm0, %v816_v9, %v820_v10 }
  0x39   : > { %975 = vrot.lane.b32.xlu2 %v944_v3, %s13730_s26  ;;  %v949_v20 = vrot.slane %v830_v14, 1  ;;  %v9212_v26 = vpack.c.b16 %v774_v13, %v773_v12  ;;  %v675_v27 = vpack.c.bf16 %v592_v17, %v592_v17  ;;  %v676_v29 = vpack.c.bf16 %v593_v18, %v593_v18  ;;  %2460 = vmatpush.bf16.msra.mxu0 %v8553_v43 }
  0x3a   : > { %v948_v19 = vsel %vm933_vm1, %v943_v63, %v947_v8  ;;  %v900_v30 = vsel %vm893_vm2, %v897_v38, %v899_v16  ;;  %v824_v33 = vor.u32 %v822_v60, %v820_v10  ;;  %v828_v34 = vrot.slane %v826_v11, 1  ;;  %v8551_v63 = vld [vmem:[%s13857_s21 + $0x10] sm:$0xff] }
  0x3b   : > { %v951_v31 = vor.u32 %v950_v21, %v949_v20  ;;  %v834_v35 = vshll.u32 %v9212_v26, 16  ;;  %v775_v36 = vunpack.c.l.b16 %v675_v27  ;;  %v776_v37 = vunpack.c.l.b16 %v676_v29 }
  0x3c   : > { %913 = vrot.lane.b32.xlu0 %v896_v1, %s13723_s0  ;;  %s13858_s0 = smov 32   ;;  %v838_v38 = vshrl.u32 %v9212_v26, 16  ;;  %v901_v39 = vrot.slane %v9193_v4, 1  ;;  %v829_v44 = vsel %vm793_vm0, %v824_v33, %v828_v34  ;;  %v832_v52 = vor.u32 %v830_v14, %v828_v34 }
  0x3d   : > { %875 = vrot.lane.b32.xlu1 %v813_v7, %s13725_s25  ;;  %s13859_s25 = smov 64   ;;  %v952_v40 = vsel %vm933_vm1, %v947_v8, %v951_v31  ;;  %v954_v42 = vrot.slane %v834_v35, 2  ;;  %v9231_v45 = vpack.c.b16 %v776_v37, %v775_v36  ;;  %v836_v53 = vrot.slane %v834_v35, 1  ;;  %2461 = vmatpush.bf16.msra.mxu0 %v8552_v51  ;;  %v598_v37 = vld [vmem:[%s9150_s22 + $0x90] sm:$0xff] }
  0x3e   : > { %v953_v41 = vrot.slane %v838_v38, 1  ;;  %v902_v46 = vsel %vm893_vm2, %v899_v16, %v901_v39  ;;  %v677_v55 = vpack.c.bf16 %v594_v47, %v594_v47  ;;  %v678_v56 = vpack.c.bf16 %v595_v49, %v595_v49 }
  0x3f   : > { %v842_v54 = vshll.u32 %v9231_v45, 16  ;;  %v846_v57 = vshrl.u32 %v9231_v45, 16  ;;  %v903_v59 = vrot.slane %v9212_v26, 1  ;;  %v837_v0 = vsel %vm793_vm0, %v832_v52, %v836_v53  ;;  %v8557_v52 = vld [vmem:[%s13857_s21 + $0x40] sm:$0xff] }
  0x40   : > { %v955_v50 = vor.u32 %v954_v42, %v953_v41  ;;  %v777_v1 = vunpack.c.l.b16 %v677_v55  ;;  %v778_v2 = vunpack.c.l.b16 %v678_v56  ;;  %v840_v8 = vor.u32 %v838_v38, %v836_v53  ;;  %v599_v38 = vld [vmem:[%s9150_s22 + $0x98] sm:$0xff]  ;;  %v7357_v53 = vld [vmem:[%s9150_s22 + $0xb0] sm:$0xff]  ;;  %v8550_v55 = vld [vmem:[%s13857_s21 + $0x8] sm:$0xff]  ;;  %2668 = vmatpush.bf16.msra.mxu1 %v8557_v52 }
  0x41   : > { %977 = vrot.lane.b32.xlu2 %v948_v19, %s13730_s26  ;;  %v957_v61 = vrot.slane %v846_v57, 1  ;;  %v958_v62 = vrot.slane %v842_v54, 2  ;;  %v904_v3 = vsel %vm893_vm2, %v901_v39, %v903_v59  ;;  %2462 = vmatpush.bf16.msra.mxu0 %v8551_v63  ;;  %v844_v9 = vrot.slane %v842_v54, 1  ;;  %v7358_v54 = vld [vmem:[%s9150_s22 + $0xb8] sm:$0xff]  ;;  %v8549_v63 = vld [vmem:[%s13857_s21] sm:$0xff] }
  0x42   : > { %v956_v60 = vsel %vm933_vm1, %v951_v31, %v955_v50  ;;  %v9261_v10 = vpack.c.b16 %v778_v2, %v777_v1  ;;  %v679_v11 = vpack.c.bf16 %v596_v5, %v596_v5  ;;  %v680_v12 = vpack.c.bf16 %v597_v6, %v597_v6 }
  0x43   : > { %v9257_v7 = vor.u32 %v958_v62, %v957_v61  ;;  %v905_v13 = vrot.slane %v9231_v45, 1  ;;  %v845_v15 = vsel %vm793_vm0, %v840_v8, %v844_v9  ;;  %v848_v20 = vor.u32 %v846_v57, %v844_v9 }
  0x44   : > { %877 = vrot.lane.b32.xlu0 %v821_v25, %s13858_s0  ;;  %v850_v16 = vshll.u32 %v9261_v10, 16  ;;  %v779_v17 = vunpack.c.l.b16 %v679_v11  ;;  %v780_v18 = vunpack.c.l.b16 %v680_v12  ;;  %v907_v25 = vrot.slane %v9261_v10, 1 }
  0x45   : > { %917 = vrot.lane.b32.xlu1 %v900_v30, %s13859_s25  ;;  %v960_v14 = vsel %vm933_vm1, %v955_v50, %v9257_v7  ;;  %v906_v19 = vsel %vm893_vm2, %v903_v59, %v905_v13  ;;  %v854_v29 = vshrl.u32 %v9261_v10, 16  ;;  %v681_v39 = vpack.c.bf16 %v598_v37, %v598_v37  ;;  %2463 = vmatpush.bf16.msra.mxu0 %v8550_v55 }
  0x46   : > { %v852_v21 = vrot.slane %v850_v16, 1  ;;  %v9274_v22 = vpack.c.b16 %v780_v18, %v779_v17  ;;  %v908_v31 = vsel %vm893_vm2, %v905_v13, %v907_v25  ;;  %v994_v58 = vrot.slane %v9161_v23, 2 }
  0x47   : > { %v781_v41 = vunpack.c.l.b16 %v681_v39  ;;  %v995_v59 = vrot.slane %v9163_v24, 2  ;;  %v685_v61 = vpack.c.bf16 %v7357_v53, %v7357_v53  ;;  %v961_v17 = vrot.slane %v854_v29, 1 }
  0x48   : > { %v853_v27 = vsel %vm793_vm0, %v848_v20, %v852_v21  ;;  %v858_v30 = vshll.u32 %v9274_v22, 16  ;;  %v856_v32 = vor.u32 %v854_v29, %v852_v21  ;;  %v909_v34 = vrot.slane %v9274_v22, 1 }
  0x49   : > { %979 = vrot.lane.b32.xlu2 %v952_v40, %s13730_s26  ;;  %v682_v40 = vpack.c.bf16 %v599_v38, %v599_v38  ;;  %v862_v47 = vshrl.u32 %v9274_v22, 16  ;;  %v1107_v6 = vunpack.c.l.b16 %v685_v61  ;;  %2464 = vmatpush.bf16.msra.mxu0 %v8549_v63  ;;  %v962_v20 = vrot.slane %v850_v16, 2 }
  0x4a   : > { %v860_v33 = vrot.slane %v858_v30, 1  ;;  %v910_v36 = vsel %vm893_vm2, %v907_v25, %v909_v34  ;;  %v997_v38 = vrot.slane %v9167_v28, 2  ;;  %v966_v39 = vrot.slane %v858_v30, 2 }
  0x4b   : > { %v782_v42 = vunpack.c.l.b16 %v682_v40  ;;  %v965_v37 = vrot.slane %v862_v47, 1 }
  0x4c   : > { %879 = vrot.lane.b32.xlu0 %v829_v44, %s13858_s0  ;;  %v861_v35 = vsel %vm793_vm0, %v856_v32, %v860_v33  ;;  %v7355_v44 = vld [vmem:[%s9150_s22 + $0xa0] sm:$0xff]  ;;  %v864_v56 = vor.u32 %v862_v47, %v860_v33  ;;  %v963_v33 = vor.u32 %v962_v20, %v961_v17 }
  0x4d   : > { %919 = vrot.lane.b32.xlu1 %v902_v46, %s13859_s25  ;;  %v9292_v43 = vpack.c.b16 %v782_v42, %v781_v41  ;;  %v7356_v46 = vld [vmem:[%s9150_s22 + $0xa8] sm:$0xff]  ;;  %v683_v50 = vpack.c.bf16 %v7355_v44, %v7355_v44  ;;  %v967_v42 = vor.u32 %v966_v39, %v965_v37  ;;  %v7359_v44 = vld [vmem:[%s9150_s22 + $0xc0] sm:$0xff] }
  0x4e   : > { %v684_v51 = vpack.c.bf16 %v7356_v46, %v7356_v46  ;;  %v964_v16 = vsel %vm933_vm1, %v9257_v7, %v963_v33  ;;  %v7360_v46 = vld [vmem:[%s9150_s22 + $0xc8] sm:$0xff] }
  0x4f   : > { %v866_v49 = vshll.u32 %v9292_v43, 16  ;;  %v1105_v1 = vunpack.c.l.b16 %v683_v50  ;;  %v687_v50 = vpack.c.bf16 %v7359_v44, %v7359_v44  ;;  %v688_v47 = vpack.c.bf16 %v7360_v46, %v7360_v46  ;;  %v7363_v46 = vld [vmem:[%s9150_s22 + $0xe0] sm:$0xff] }
  0x50   : > { %v1106_v2 = vunpack.c.l.b16 %v684_v51  ;;  %v998_v51 = vsel %vm993_vm3, %v995_v59, %v997_v38 }
  0x51   : > { %981 = vrot.lane.b32.xlu2 %v956_v60, %s13730_s26  ;;  %v9308_v57 = vrot.slane %v866_v49, 1  ;;  %v911_v60 = vrot.slane %v9292_v43, 1  ;;  %v1109_v52 = vunpack.c.l.b16 %v687_v50  ;;  %v1110_v53 = vunpack.c.l.b16 %v688_v47  ;;  %v7364_v50 = vld [vmem:[%s9150_s22 + $0xe8] sm:$0xff] }
  0x52   : > { %v9323_v9 = vpack.c.b16 %v1106_v2, %v1105_v1 }
  0x53   : > { %v869_v62 = vsel %vm793_vm0, %v864_v56, %v9308_v57  ;;  %v912_v5 = vsel %vm893_vm2, %v909_v34, %v911_v60  ;;  %v9355_v30 = vpack.c.b16 %v1110_v53, %v1109_v52  ;;  %v870_v56 = vshrl.u32 %v9292_v43, 16 }
  0x54   : > { %881 = vrot.lane.b32.xlu0 %v837_v0, %s13858_s0  ;;  %v686_v0 = vpack.c.bf16 %v7358_v54, %v7358_v54  ;;  %v1136_v12 = vshrl.u32 %v9323_v9, 16  ;;  %v1138_v13 = vshll.u32 %v9323_v9, 16  ;;  %v1234_v18 = vrot.slane %v9323_v9, 1 }
  0x55   : > { %921 = vrot.lane.b32.xlu1 %v904_v3, %s13859_s25  ;;  %v996_v3 = vsel %vm993_vm3, %v994_v58, %v995_v59  ;;  %v968_v54 = vsel %vm933_vm1, %v963_v33, %v967_v42  ;;  %v1151_v55 = vshll.u32 %v9355_v30, 16  ;;  %v969_v61 = vrot.slane %v870_v56, 1 }
  0x56   : > { %7455 = vmatmul.msk.bf16.vlgmr.msra.gmra.mxu1 %vm1013_vm4, %v996_v3  ;;  %v1108_v8 = vunpack.c.l.b16 %v686_v0  ;;  %v1274_v34 = vrot.slane %v1138_v13, 2  ;;  %v999_v3 = vrot.slane %v9179_v48, 2  ;;  %v692_v52 = vpack.c.bf16 %v7364_v50, %v7364_v50 }
  0x57   : > { %v1153_v59 = vrot.slane %v1151_v55, 1 }
  0x58   : > { %v9325_v11 = vpack.c.b16 %v1108_v8, %v1107_v6  ;;  %v872_v6 = vor.u32 %v870_v56, %v9308_v57  ;;  %v7361_v8 = vld [vmem:[%s9150_s22 + $0xd0] sm:$0xff] }
  0x59   : > { %983 = vrot.lane.b32.xlu2 %v960_v14, %s13730_s26  ;;  %v1140_v14 = vrot.slane %v1138_v13, 1 }
  0x5b   : > { %v1141_v21 = vor.u32 %v1140_v14, %v1136_v12  ;;  %v689_v14 = vpack.c.bf16 %v7361_v8, %v7361_v8  ;;  %v7366_v8 = vld [vmem:[%s9150_s22 + $0xf8] sm:$0xff] }
  0x5c   : > { %883 = vrot.lane.b32.xlu0 %v845_v15, %s13858_s0  ;;  %v1143_v15 = vshll.u32 %v9325_v11, 16 }
  0x5d   : > { %923 = vrot.lane.b32.xlu1 %v906_v19, %s13859_s25  ;;  %v1235_v19 = vrot.slane %v9325_v11, 1  ;;  %v1111_v20 = vunpack.c.l.b16 %v689_v14 }
  0x5e   : > { %v1145_v25 = vrot.slane %v1143_v15, 1 }
  0x5f   : > { %v1236_v32 = vsel %vm893_vm2, %v1234_v18, %v1235_v19 }
  0x60   : > { %v1146_v29 = vsel %vm793_vm0, %v1141_v21, %v1145_v25 }
  0x61   : > { %985 = vrot.lane.b32.xlu2 %v964_v16, %s13730_s26 }
  0x64   : > { %885 = vrot.lane.b32.xlu0 %v853_v27, %s13858_s0  ;;  %v1147_v27 = vshrl.u32 %v9325_v11, 16 }
  0x65   : > { %925 = vrot.lane.b32.xlu1 %v908_v31, %s13859_s25  ;;  %v1273_v31 = vrot.slane %v1136_v12, 1  ;;  %v7362_v12 = vld [vmem:[%s9150_s22 + $0xd8] sm:$0xff] }
  0x66   : > { %7456 = vmatmul.msk.bf16.gmra.mxu1 %vm1013_vm4, %v998_v51  ;;  %v1149_v58 = vor.u32 %v1147_v27, %v1145_v25 }
  0x67   : > { %v1275_v40 = vor.u32 %v1274_v34, %v1273_v31  ;;  %v1281_v31 = vrot.slane %v1151_v55, 2 }
  0x68   : > { %v1154_v63 = vsel %vm793_vm0, %v1149_v58, %v1153_v59 }
  0x69   : > { %987 = vrot.lane.b32.xlu2 %v968_v54, %s13730_s26  ;;  %v1114_v54 = vunpack.c.l.b16 %v692_v52 }
  0x6c   : > { %887 = vrot.lane.b32.xlu0 %v861_v35, %s13858_s0  ;;  %v1277_v35 = vrot.slane %v1143_v15, 2  ;;  %v690_v15 = vpack.c.bf16 %v7362_v12, %v7362_v12 }
  0x6d   : > { %927 = vrot.lane.b32.xlu1 %v910_v36, %s13859_s25  ;;  %v1276_v36 = vrot.slane %v1147_v27, 1  ;;  %v1155_v27 = vshrl.u32 %v9355_v30, 16 }
  0x6e   : > { %v1112_v21 = vunpack.c.l.b16 %v690_v15  ;;  %v694_v15 = vpack.c.bf16 %v7366_v8, %v7366_v8 }
  0x6f   : > { %v9345_v41 = vor.u32 %v1277_v35, %v1276_v36  ;;  %v1157_v33 = vor.u32 %v1155_v27, %v1153_v59  ;;  %v1001_v35 = vrot.slane %v9193_v4, 2 }
  0x70   : > { %v9381_v25 = vpack.c.b16 %v1112_v21, %v1111_v20 }
  0x71   : > { %v1279_v7 = vsel %vm933_vm1, %v1275_v40, %v9345_v41  ;;  %v1002_v40 = vsel %vm993_vm3, %v999_v3, %v1001_v35 }
  0x72   : > { %v1159_v34 = vshll.u32 %v9381_v25, 16 }
  0x74   : > { %889 = vrot.lane.b32.xlu0 %v869_v62, %s13858_s0  ;;  %v970_v62 = vrot.slane %v866_v49, 2  ;;  %v1000_v49 = vsel %vm993_vm3, %v997_v38, %v999_v3  ;;  %v1161_v36 = vrot.slane %v1159_v34, 1 }
  0x75   : > { %929 = vrot.lane.b32.xlu1 %v912_v5, %s13859_s25 }
  0x76   : > { %v971_v0 = vor.u32 %v970_v62, %v969_v61  ;;  %7457 = vmatmul.msk.bf16.gmra.mxu1 %vm1013_vm4, %v1000_v49  ;;  %v1162_v39 = vsel %vm793_vm0, %v1157_v33, %v1161_v36  ;;  %v1003_v61 = vrot.slane %v9212_v26, 2  ;;  %v1005_v33 = vrot.slane %v9231_v45, 2 }
  0x78   : > { %v972_v2 = vsel %vm933_vm1, %v967_v42, %v971_v0  ;;  %v1004_v3 = vsel %vm993_vm3, %v1001_v35, %v1003_v61 }
  0x79   : > { %989 = vrot.lane.b32.xlu2 %v972_v2, %s13730_s26 }
  0x7c   : > { %1214 = vrot.lane.b32.xlu0 %v1146_v29, %s13858_s0  ;;  %v1280_v29 = vrot.slane %v1155_v27, 1 }
  0x7d   : > { %1253 = vrot.lane.b32.xlu1 %v1236_v32, %s13859_s25 }
  0x7e   : > { %v1282_v16 = vor.u32 %v1281_v31, %v1280_v29 }
  0x80   : > { %v1283_v44 = vsel %vm933_vm1, %v9345_v41, %v1282_v16  ;;  %v1163_v41 = vshrl.u32 %v9381_v25, 16 }
  0x81   : > { %891 = vrot.lane.b32.xlu2 %v872_v6, %s13858_s0  ;;  %v7365_v6 = vld [vmem:[%s9150_s22 + $0xf0] sm:$0xff] }
  0x82   : > { %v1165_v56 = vor.u32 %v1163_v41, %v1161_v36  ;;  %v1284_v12 = vrot.slane %v1163_v41, 1  ;;  %v693_v14 = vpack.c.bf16 %v7365_v6, %v7365_v6  ;;  %v7370_v6 = vld [vmem:[%s9150_s22 + $0x118] sm:$0xff] }
  0x84   : > { %1312 = vrot.lane.b32.xlu0 %v1279_v7, %s13730_s26  ;;  %v691_v7 = vpack.c.bf16 %v7363_v46, %v7363_v46 }
  0x85   : > { %931 = vrot.lane.b32.xlu1 %v911_v60, %s13859_s25  ;;  %v1237_v60 = vrot.slane %v9355_v30, 1 }
  0x86   : > { %7458 = vmatmul.msk.bf16.gmra.mxu1 %vm1013_vm4, %v1002_v40  ;;  %v1113_v53 = vunpack.c.l.b16 %v691_v7  ;;  %v7367_v40 = vld [vmem:[%s9150_s22 + $0x100] sm:$0xff] }
  0x87   : > { %v1238_v1 = vsel %vm893_vm2, %v1235_v19, %v1237_v60  ;;  %v695_v50 = vpack.c.bf16 %v7367_v40, %v7367_v40  ;;  %v7372_v40 = vld [vmem:[%s9150_s22 + $0x128] sm:$0xff] }
  0x89   : > { %991 = vrot.lane.b32.xlu2 %v971_v0, %s13730_s26 }
  0x8b   : > { %v916_v32 = vpop.permute.xlu2 %915 }
  0x8c   : > { %1216 = vrot.lane.b32.xlu0 %v1154_v63, %s13858_s0 }
  0x8d   : > { %1255 = vrot.lane.b32.xlu1 %v1238_v1, %s13859_s25 }
  0x91   : > { %1314 = vrot.lane.b32.xlu2 %v1283_v44, %s13730_s26 }
  0x93   : > { %v976_v47 = vpop.permute.xlu2 %975 }
  0x94   : > { %1218 = vrot.lane.b32.xlu0 %v1162_v39, %s13858_s0 }
  0x96   : > { %7459 = vmatmul.msk.bf16.gmra.mxu1 %vm1013_vm4, %v1004_v3 }
  0x9b   : > { %v978_v49 = vpop.permute.xlu2 %977 }
  0xa3   : > { %v980_v39 = vpop.permute.xlu2 %979 }
  0xa6   : > { %v874_v5 = vpop.permute.xlu0 %873 }
  0xa7   : > { %v974_v13 = vpop.permute.xlu1 %973  ;;  %v1015_v17 = vsel %vm1013_vm4, %v9161_v23, %v874_v5  ;;  %v1239_v23 = vrot.slane %v9381_v25, 1 }
  0xa9   : > { %v1240_v37 = vsel %vm893_vm2, %v1237_v60, %v1239_v23 }
  0xaa   : > { %1257 = vrot.lane.b32.xlu1 %v1240_v37, %s13859_s25 }
  0xae   : > { %v914_v18 = vpop.permute.xlu0 %913 }
  0xaf   : > { %v1036_v19 = vsel %vm1034_vm5, %v1015_v17, %v914_v18  ;;  %v876_v38 = vpop.permute.xlu1 %875 }
  0xb0   : > { %v1057_v57 = vsel %vm1055_vm6, %v1036_v19, %v974_v13  ;;  %v1017_v42 = vsel %vm1013_vm4, %v9163_v24, %v876_v38  ;;  %v9403_v24 = vpack.c.b16 %v1114_v54, %v1113_v53  ;;  %v1285_v13 = vrot.slane %v1159_v34, 2 }
  0xb1   : > { %2465 = vmatmul.bf16.vlgmr.msra.gmra.mxu0 %v1057_v57  ;;  %v1038_v51 = vsel %vm1034_vm5, %v1017_v42, %v916_v32  ;;  %v1116_v19 = vunpack.c.l.b16 %v694_v15  ;;  %v7368_v42 = vld [vmem:[%s9150_s22 + $0x108] sm:$0xff] }
  0xb2   : > { %v1060_v55 = vsel %vm1055_vm6, %v1038_v51, %v976_v47  ;;  %v1167_v58 = vshll.u32 %v9403_v24, 16  ;;  %v1241_v59 = vrot.slane %v9403_v24, 1  ;;  %v1286_v18 = vor.u32 %v1285_v13, %v1284_v12 }
  0xb3   : > { %v1171_v57 = vshrl.u32 %v9403_v24, 16  ;;  %v696_v47 = vpack.c.bf16 %v7368_v42, %v7368_v42 }
  0xb4   : > { %v1169_v60 = vrot.slane %v1167_v58, 1  ;;  %v1242_v63 = vsel %vm893_vm2, %v1239_v23, %v1241_v59  ;;  %v1287_v20 = vsel %vm933_vm1, %v1282_v16, %v1286_v18  ;;  %v1006_v16 = vsel %vm993_vm3, %v1003_v61, %v1005_v33 }
  0xb5   : > { %1259 = vrot.lane.b32.xlu1 %v1242_v63, %s13859_s25  ;;  %1316 = vrot.lane.b32.xlu2 %v1287_v20, %s13730_s26  ;;  %v1288_v44 = vrot.slane %v1171_v57, 1  ;;  %v1289_v46 = vrot.slane %v1167_v58, 2  ;;  %v1118_v52 = vunpack.c.l.b16 %v696_v47  ;;  %v700_v47 = vpack.c.bf16 %v7372_v40, %v7372_v40 }
  0xb6   : > { %v878_v62 = vpop.permute.xlu0 %877  ;;  %v1170_v0 = vsel %vm793_vm0, %v1165_v56, %v1169_v60  ;;  %v1173_v27 = vor.u32 %v1171_v57, %v1169_v60  ;;  %7460 = vmatmul.msk.bf16.gmra.mxu1 %vm1013_vm4, %v1006_v16 }
  0xb7   : > { %v1019_v1 = vsel %vm1013_vm4, %v9167_v28, %v878_v62  ;;  %v918_v2 = vpop.permute.xlu1 %917  ;;  %1220 = vrot.lane.b32.xlu0 %v1170_v0, %s13858_s0  ;;  %v1115_v28 = vunpack.c.l.b16 %v693_v14  ;;  %v1290_v7 = vor.u32 %v1289_v46, %v1288_v44  ;;  %v698_v14 = vpack.c.bf16 %v7370_v6, %v7370_v6  ;;  %v7374_v6 = vld [vmem:[%s9150_s22 + $0x138] sm:$0xff] }
  0xb8   : > { %v1040_v5 = vsel %vm1034_vm5, %v1019_v1, %v918_v2 }
  0xb9   : > { %v1063_v17 = vsel %vm1055_vm6, %v1040_v5, %v978_v49  ;;  %v9422_v21 = vpack.c.b16 %v1116_v19, %v1115_v28  ;;  %v1291_v53 = vsel %vm933_vm1, %v1286_v18, %v1290_v7  ;;  %v982_v5 = vpop.permute.xlu2 %981  ;;  %v7369_v49 = vld [vmem:[%s9150_s22 + $0x110] sm:$0xff]  ;;  %v1120_v18 = vunpack.c.l.b16 %v698_v14 }
  0xba   : > { %v697_v13 = vpack.c.bf16 %v7369_v49, %v7369_v49  ;;  %v7373_v49 = vld [vmem:[%s9150_s22 + $0x130] sm:$0xff] }
  0xbb   : > { %v1175_v31 = vshll.u32 %v9422_v21, 16  ;;  %v1243_v32 = vrot.slane %v9422_v21, 1 }
  0xbd   : > { %v1177_v23 = vrot.slane %v1175_v31, 1  ;;  %v1244_v35 = vsel %vm893_vm2, %v1241_v59, %v1243_v32  ;;  %1318 = vrot.lane.b32.xlu2 %v1291_v53, %s13730_s26  ;;  %v1007_v59 = vrot.slane %v9261_v10, 2  ;;  %v1293_v12 = vrot.slane %v1175_v31, 2 }
  0xbe   : > { %v880_v34 = vpop.permute.xlu0 %879  ;;  %1261 = vrot.lane.b32.xlu1 %v1244_v35, %s13859_s25 }
  0xbf   : > { %v1178_v29 = vsel %vm793_vm0, %v1173_v27, %v1177_v23  ;;  %v1021_v36 = vsel %vm1013_vm4, %v9179_v48, %v880_v34  ;;  %v920_v37 = vpop.permute.xlu1 %919  ;;  %v1117_v48 = vunpack.c.l.b16 %v695_v50  ;;  %v1008_v2 = vsel %vm993_vm3, %v1005_v33, %v1007_v59 }
  0xc0   : > { %1222 = vrot.lane.b32.xlu0 %v1178_v29, %s13858_s0  ;;  %v1042_v38 = vsel %vm1034_vm5, %v1021_v36, %v920_v37 }
  0xc1   : > { %2470 = vmatmul.bf16.gmra.mxu0 %v1060_v55  ;;  %v1066_v51 = vsel %vm1055_vm6, %v1042_v38, %v980_v39  ;;  %v9442_v54 = vpack.c.b16 %v1118_v52, %v1117_v48  ;;  %v1179_v55 = vshrl.u32 %v9422_v21, 16  ;;  %v984_v38 = vpop.permute.xlu2 %983  ;;  %v7371_v39 = vld [vmem:[%s9150_s22 + $0x120] sm:$0xff] }
  0xc2   : > { %v699_v46 = vpack.c.bf16 %v7371_v39, %v7371_v39 }
  0xc3   : > { %v1181_v41 = vor.u32 %v1179_v55, %v1177_v23  ;;  %v1183_v56 = vshll.u32 %v9442_v54, 16  ;;  %v1245_v58 = vrot.slane %v9442_v54, 1  ;;  %v1292_v8 = vrot.slane %v1179_v55, 1 }
  0xc4   : > { %v1187_v20 = vshrl.u32 %v9442_v54, 16 }
  0xc5   : > { %v1185_v62 = vrot.slane %v1183_v56, 1  ;;  %v1246_v60 = vsel %vm893_vm2, %v1243_v32, %v1245_v58  ;;  %v1009_v32 = vrot.slane %v9274_v22, 2  ;;  %v1297_v44 = vrot.slane %v1183_v56, 2 }
  0xc6   : > { %v882_v61 = vpop.permute.xlu0 %881  ;;  %1263 = vrot.lane.b32.xlu1 %v1246_v60, %s13859_s25  ;;  %7461 = vmatmul.msk.bf16.gmra.mxu1 %vm1013_vm4, %v1008_v2  ;;  %v1296_v42 = vrot.slane %v1187_v20, 1 }
  0xc7   : > { %v1186_v63 = vsel %vm793_vm0, %v1181_v41, %v1185_v62  ;;  %v1023_v0 = vsel %vm1013_vm4, %v9193_v4, %v882_v61  ;;  %v922_v1 = vpop.permute.xlu1 %921  ;;  %v1119_v4 = vunpack.c.l.b16 %v697_v13  ;;  %v1189_v57 = vor.u32 %v1187_v20, %v1185_v62 }
  0xc8   : > { %1224 = vrot.lane.b32.xlu0 %v1186_v63, %s13858_s0  ;;  %v1044_v3 = vsel %vm1034_vm5, %v1023_v0, %v922_v1  ;;  %v1010_v37 = vsel %vm993_vm3, %v1007_v59, %v1009_v32  ;;  %v701_v13 = vpack.c.bf16 %v7373_v49, %v7373_v49 }
  0xc9   : > { %v1069_v15 = vsel %vm1055_vm6, %v1044_v3, %v982_v5  ;;  %v9462_v19 = vpack.c.b16 %v1120_v18, %v1119_v4  ;;  %v986_v5 = vpop.permute.xlu2 %985 }
  0xcb   : > { %v1191_v27 = vshll.u32 %v9462_v19, 16  ;;  %v1247_v31 = vrot.slane %v9462_v19, 1  ;;  %v1195_v52 = vshrl.u32 %v9462_v19, 16 }
  0xcd   : > { %v1193_v34 = vrot.slane %v1191_v27, 1  ;;  %v1248_v23 = vsel %vm893_vm2, %v1245_v58, %v1247_v31  ;;  %v1011_v58 = vrot.slane %v9292_v43, 2 }
  0xce   : > { %v884_v33 = vpop.permute.xlu0 %883  ;;  %1265 = vrot.lane.b32.xlu1 %v1248_v23, %s13859_s25 }
  0xcf   : > { %v1194_v35 = vsel %vm793_vm0, %v1189_v57, %v1193_v34  ;;  %v1025_v29 = vsel %vm1013_vm4, %v9212_v26, %v884_v33  ;;  %v924_v36 = vpop.permute.xlu1 %923  ;;  %v1121_v26 = vunpack.c.l.b16 %v699_v46  ;;  %v1197_v55 = vor.u32 %v1195_v52, %v1193_v34 }
  0xd0   : > { %1226 = vrot.lane.b32.xlu0 %v1194_v35, %s13858_s0  ;;  %v1046_v16 = vsel %vm1034_vm5, %v1025_v29, %v924_v36  ;;  %v1012_v2 = vsel %vm993_vm3, %v1009_v32, %v1011_v58  ;;  %v1332_v32 = vrot.slane %v9323_v9, 2  ;;  %v1333_v33 = vrot.slane %v9325_v11, 2 }
  0xd1   : > { %2475 = vmatmul.bf16.gmra.mxu0 %v1063_v17  ;;  %v1294_v17 = vor.u32 %v1293_v12, %v1292_v8  ;;  %v1072_v50 = vsel %vm1055_vm6, %v1046_v16, %v984_v38  ;;  %v1300_v8 = vrot.slane %v1195_v52, 1  ;;  %v1301_v12 = vrot.slane %v1191_v27, 2  ;;  %v988_v46 = vpop.permute.xlu2 %987 }
  0xd2   : > { %v1334_v29 = vsel %vm993_vm3, %v1332_v32, %v1333_v33 }
  0xd3   : > { %v1295_v28 = vsel %vm933_vm1, %v1290_v7, %v1294_v17  ;;  %v1122_v7 = vunpack.c.l.b16 %v700_v47  ;;  %v9493_v0 = vpop.f32.mrf.mxu1  ;;  %v2074_v39 = vrot.slane %v1334_v29, 2 }
  0xd4   : > { %1320 = vrot.lane.b32.xlu2 %v1295_v28, %s13730_s26 }
  0xd5   : > { %v9484_v53 = vpack.c.b16 %v1122_v7, %v1121_v26 }
  0xd6   : > { %7462 = vmatmul.msk.bf16.gmra.mxu1 %vm1013_vm4, %v1010_v37  ;;  %v886_v59 = vpop.permute.xlu0 %885 }
  0xd7   : > { %v1199_v41 = vshll.u32 %v9484_v53, 16  ;;  %v1249_v56 = vrot.slane %v9484_v53, 1  ;;  %v1027_v60 = vsel %vm1013_vm4, %v9231_v45, %v886_v59  ;;  %v926_v63 = vpop.permute.xlu1 %925  ;;  %v702_v45 = vpack.c.bf16 %v7374_v6, %v7374_v6 }
  0xd8   : > { %v1048_v3 = vsel %vm1034_vm5, %v1027_v60, %v926_v63  ;;  %v1203_v57 = vshrl.u32 %v9484_v53, 16 }
  0xd9   : > { %v1201_v61 = vrot.slane %v1199_v41, 1  ;;  %v1250_v62 = vsel %vm893_vm2, %v1247_v31, %v1249_v56  ;;  %v1075_v14 = vsel %vm1055_vm6, %v1048_v3, %v986_v5  ;;  %v1124_v18 = vunpack.c.l.b16 %v702_v45  ;;  %v9554_v5 = vld [vmem:[%s13860_s19] ss:$0 sm:$0xff] }
  0xda   : > { %1267 = vrot.lane.b32.xlu1 %v1250_v62, %s13859_s25 }
  0xdb   : > { %v1202_v1 = vsel %vm793_vm0, %v1197_v55, %v1201_v61  ;;  %v9503_v4 = vpop.f32.mrf.mxu1  ;;  %v1205_v31 = vor.u32 %v1203_v57, %v1201_v61  ;;  %v990_v61 = vpop.permute.xlu2 %989 }
  0xdc   : > { %1228 = vrot.lane.b32.xlu0 %v1202_v1, %s13858_s0  ;;  %v7375_v1 = vld [vmem:[%s9150_s22 + $0x140] sm:$0xff] }
  0xde   : > { %v888_v35 = vpop.permute.xlu0 %887 }
  0xdf   : > { %v1029_v36 = vsel %vm1013_vm4, %v9261_v10, %v888_v35  ;;  %v928_v40 = vpop.permute.xlu1 %927  ;;  %v1304_v10 = vrot.slane %v1203_v57, 1 }
  0xe1   : > { %2480 = vmatmul.bf16.gmra.mxu0 %v1066_v51  ;;  %v1298_v51 = vor.u32 %v1297_v44, %v1296_v42  ;;  %v2242_v42 = vsel %vm993_vm3, %v1011_v58, %v2074_v39  ;;  %v1050_v44 = vsel %vm1034_vm5, %v1029_v36, %v928_v40  ;;  %v8565_v40 = vld [vmem:[%s13861_s3 + $0x30] sm:$0xff] }
  0xe2   : > { %v1078_v47 = vsel %vm1055_vm6, %v1050_v44, %v988_v46 }
  0xe3   : > { %v1299_v48 = vsel %vm933_vm1, %v1294_v17, %v1298_v51  ;;  %v1123_v17 = vunpack.c.l.b16 %v701_v13  ;;  %v9517_v37 = vpop.f32.mrf.mxu1 }
  0xe4   : > { %1322 = vrot.lane.b32.xlu2 %v1299_v48, %s13730_s26 }
  0xe5   : > { %v9507_v20 = vpack.c.b16 %v1124_v18, %v1123_v17  ;;  %v8566_v18 = vld [vmem:[%s13861_s3 + $0x38] sm:$0xff] }
  0xe6   : > { %7463 = vmatmul.msk.bf16.gmra.mxu1 %vm1013_vm4, %v1012_v2  ;;  %v890_v48 = vpop.permute.xlu0 %889  ;;  %v7376_v2 = vld [vmem:[%s9150_s22 + $0x148] sm:$0xff]  ;;  %4016 = vmatpush.bf16.msra.mxu2 %v8566_v18 }
  0xe7   : > { %v1207_v27 = vshll.u32 %v9507_v20, 16  ;;  %v1251_v23 = vrot.slane %v9507_v20, 1  ;;  %v1211_v52 = vshrl.u32 %v9507_v20, 16  ;;  %v930_v55 = vpop.permute.xlu1 %929  ;;  %v1031_v59 = vsel %vm1013_vm4, %v9274_v22, %v890_v48  ;;  %v8564_v48 = vld [vmem:[%s13861_s3 + $0x28] sm:$0xff] }
  0xe8   : > { %v1052_v3 = vsel %vm1034_vm5, %v1031_v59, %v930_v55  ;;  %v703_v22 = vpack.c.bf16 %v7375_v1, %v7375_v1  ;;  %v704_v49 = vpack.c.bf16 %v7376_v2, %v7376_v2 }
  0xe9   : > { %v1209_v34 = vrot.slane %v1207_v27, 1  ;;  %v1252_v38 = vsel %vm893_vm2, %v1249_v56, %v1251_v23  ;;  %v1308_v13 = vrot.slane %v1211_v52, 1  ;;  %v1309_v45 = vrot.slane %v1207_v27, 2 }
  0xea   : > { %1269 = vrot.lane.b32.xlu1 %v1252_v38, %s13859_s25  ;;  %v1081_v17 = vsel %vm1055_vm6, %v1052_v3, %v990_v61  ;;  %v1431_v57 = vunpack.c.l.b16 %v703_v22  ;;  %4017 = vmatpush.bf16.msra.mxu2 %v8565_v40 }
  0xeb   : > { %v1210_v16 = vsel %vm793_vm0, %v1205_v31, %v1209_v34  ;;  %v9527_v26 = vpop.f32.mrf.mxu1  ;;  %v1213_v56 = vor.u32 %v1211_v52, %v1209_v34  ;;  %v1432_v31 = vunpack.c.l.b16 %v704_v49  ;;  %v1310_v34 = vor.u32 %v1309_v45, %v1308_v13  ;;  %v8563_v13 = vld [vmem:[%s13861_s3 + $0x20] sm:$0xff] }
  0xec   : > { %1230 = vrot.lane.b32.xlu0 %v1210_v16, %s13858_s0 }
  0xed   : > { %v9566_v29 = vpack.c.b16 %v1432_v31, %v1431_v57  ;;  %v8562_v57 = vld [vmem:[%s13861_s3 + $0x18] sm:$0xff] }
  0xee   : > { %v1215_v6 = vpop.permute.xlu0 %1214  ;;  %4018 = vmatpush.bf16.msra.mxu2 %v8564_v48 }
  0xef   : > { %v1254_v32 = vpop.permute.xlu1 %1253  ;;  %v1352_v38 = vsel %vm1013_vm4, %v9323_v9, %v1215_v6  ;;  %v1464_v44 = vshll.u32 %v9566_v29, 16 }
  0xf1   : > { %2485 = vmatmul.bf16.gmra.mxu0 %v1069_v15  ;;  %v1302_v15 = vor.u32 %v1301_v12, %v1300_v8  ;;  %v7377_v8 = vld [vmem:[%s9150_s22 + $0x150] sm:$0xff]  ;;  %v7378_v12 = vld [vmem:[%s9150_s22 + $0x158] sm:$0xff] }
  0xf2   : > { %1271 = vrot.lane.b32.xlu1 %v1251_v23, %s13859_s25  ;;  %4019 = vmatpush.bf16.msra.mxu2 %v8563_v13 }
  0xf3   : > { %v1303_v28 = vsel %vm933_vm1, %v1298_v51, %v1302_v15  ;;  %v9541_v62 = vpop.f32.mrf.mxu1 }
  0xf4   : > { %1324 = vrot.lane.b32.xlu2 %v1303_v28, %s13730_s26  ;;  %1232 = vrot.lane.b32.xlu0 %v1213_v56, %s13858_s0  ;;  %v706_v28 = vpack.c.bf16 %v7378_v12, %v7378_v12  ;;  %v1560_v56 = vrot.slane %v9566_v29, 1 }
  0xf6   : > { %7464 = vmatmul.msk.bf16.gmra.mxu1 %vm1013_vm4, %v2242_v42  ;;  %v1434_v27 = vunpack.c.l.b16 %v706_v28  ;;  %4020 = vmatpush.bf16.msra.mxu2 %v8562_v57 }
  0xf7   : > { %v932_v6 = vpop.permute.xlu1 %931 }
  0xfb   : > { %v9564_v35 = vpop.f32.mrf.mxu1 }
  0xff   : > { %v1256_v40 = vpop.permute.xlu1 %1255 }
 0x101   : > { %2490 = vmatmul.bf16.gmra.mxu0 %v1072_v50  ;;  %v1305_v50 = vrot.slane %v1199_v41, 2  ;;  %v1335_v41 = vrot.slane %v9355_v30, 2 }
 0x103   : > { %v1306_v51 = vor.u32 %v1305_v50, %v1304_v10  ;;  %v9537_v58 = vsel %vm993_vm3, %v1333_v33, %v1335_v41  ;;  %v1466_v10 = vrot.slane %v1464_v44, 1  ;;  %v1372_v50 = vsel %vm1034_vm5, %v1352_v38, %v1254_v32  ;;  %v9604_v2 = vpop.f32.mrf.mxu1  ;;  %v8561_v38 = vld [vmem:[%s13861_s3 + $0x10] sm:$0xff] }
 0x104   : > { %v2077_v60 = vrot.slane %v9537_v58, 2  ;;  %4021 = vmatpush.bf16.msra.mxu2 %v8561_v38 }
 0x105   : > { %v1307_v7 = vsel %vm933_vm1, %v1302_v15, %v1306_v51  ;;  %v1311_v16 = vsel %vm933_vm1, %v1306_v51, %v1310_v34  ;;  %v1313_v51 = vpop.permute.xlu0 %1312 }
 0x106   : > { %1326 = vrot.lane.b32.xlu2 %v1307_v7, %s13730_s26  ;;  %v2078_v63 = vsel %vm993_vm3, %v2074_v39, %v2077_v60  ;;  %v892_v39 = vpop.permute.xlu2 %891  ;;  %s13862_s26 = smov 96   ;;  %v9612_v49 = vsel %vm1055_vm6, %v1372_v50, %v1313_v51 }
 0x107   : > { %7465 = vmatmul.msk.bf16.gmra.mxu1 %vm1013_vm4, %v2078_v63  ;;  %v1033_v61 = vsel %vm1013_vm4, %v9292_v43, %v892_v39 }
 0x10e   : > { %1328 = vrot.lane.b32.xlu2 %v1311_v16, %s13862_s26 }
 0x111   : > { %2495 = vmatmul.bf16.gmra.mxu0 %v1075_v14  ;;  %v705_v14 = vpack.c.bf16 %v7377_v8, %v7377_v8  ;;  %v1054_v8 = vsel %vm1034_vm5, %v1033_v61, %v932_v6 }
 0x113   : > { %v1433_v23 = vunpack.c.l.b16 %v705_v14  ;;  %v992_v14 = vpop.permute.xlu2 %991 }
 0x114   : > { %v1084_v18 = vsel %vm1055_vm6, %v1054_v8, %v992_v14  ;;  %v7381_v14 = vld [vmem:[%s9150_s22 + $0x170] sm:$0xff] }
 0x115   : > { %v9576_v42 = vpack.c.b16 %v1434_v27, %v1433_v23  ;;  %v9637_v27 = vpop.f32.mrf.mxu1 }
 0x116   : > { %1330 = vrot.lane.b32.xlu2 %v1310_v34, %s13862_s26  ;;  %v1217_v34 = vpop.permute.xlu0 %1216 }
 0x117   : > { %v1469_v9 = vshll.u32 %v9576_v42, 16  ;;  %v1561_v59 = vrot.slane %v9576_v42, 1  ;;  %v1354_v39 = vsel %vm1013_vm4, %v9325_v11, %v1217_v34  ;;  %v8560_v11 = vld [vmem:[%s13861_s3 + $0x8] sm:$0xff] }
 0x118   : > { %v1374_v48 = vsel %vm1034_vm5, %v1354_v39, %v1256_v40  ;;  %4022 = vmatpush.bf16.msra.mxu2 %v8560_v11 }
 0x119   : > { %v1471_v55 = vrot.slane %v1469_v9, 1  ;;  %v1562_v22 = vsel %vm893_vm2, %v1560_v56, %v1561_v59 }
 0x11a   : > { %1579 = vrot.lane.b32.xlu1 %v1562_v22, %s13859_s25 }
 0x11c   : > { %v1258_v38 = vpop.permute.xlu1 %1257 }
 0x121   : > { %2500 = vmatmul.bf16.gmra.mxu0 %v1078_v47  ;;  %v1337_v47 = vrot.slane %v9381_v25, 2 }
 0x123   : > { %v9602_v1 = vsel %vm993_vm3, %v1335_v41, %v1337_v47 }
 0x124   : > { %v2081_v43 = vrot.slane %v9602_v1, 2 }
 0x126   : > { %v2082_v12 = vsel %vm993_vm3, %v2077_v60, %v2081_v43 }
 0x127   : > { %7466 = vmatmul.msk.bf16.gmra.mxu1 %vm1013_vm4, %v2082_v12  ;;  %v8559_v12 = vld [vmem:[%s13861_s3] sm:$0xff] }
 0x128   : > { %4023 = vmatpush.bf16.msra.mxu2 %v8559_v12 }
 0x12e   : > { %v2466_v15 = vpop.f32.mrf.mxu0 }
 0x12f   : > { %v2467_v33 = vadd.f32 %v9554_v5, %v2466_v15  ;;  %v7379_v15 = vld [vmem:[%s9150_s22 + $0x160] sm:$0xff] }
 0x130   : > { %v707_v58 = vpack.c.bf16 %v7379_v15, %v7379_v15  ;;  %v7382_v15 = vld [vmem:[%s9150_s22 + $0x178] sm:$0xff] }
 0x131   : > { %v2671_v36 = vadd.f32 %v9493_v0, %v2467_v33  ;;  %2505 = vmatmul.bf16.gmra.mxu0 %v1081_v17  ;;  %v1462_v0 = vshrl.u32 %v9566_v29, 16  ;;  %v7380_v17 = vld [vmem:[%s9150_s22 + $0x168] sm:$0xff]  ;;  %v710_v57 = vpack.c.bf16 %v7382_v15, %v7382_v15 }
 0x132   : > { %v708_v60 = vpack.c.bf16 %v7380_v17, %v7380_v17  ;;  %v1435_v32 = vunpack.c.l.b16 %v707_v58  ;;  %v709_v58 = vpack.c.bf16 %v7381_v14, %v7381_v14 }
 0x133   : > { %v2865_v46 = vmax.f32 %v2671_v36, 0.0  ;;  %v1467_v52 = vor.u32 %v1466_v10, %v1462_v0  ;;  %v1473_v10 = vshrl.u32 %v9576_v42, 16 }
 0x134   : > { %v1436_v33 = vunpack.c.l.b16 %v708_v60 }
 0x135   : > { %2943 = vst [vmem:[#allocation2] sm:$0xff] %v2865_v46  ;;  %v1472_v3 = vsel %vm793_vm0, %v1467_v52, %v1471_v55  ;;  %v1475_v51 = vor.u32 %v1473_v10, %v1471_v55  ;;  %v1315_v52 = vpop.permute.xlu2 %1314  ;;  %v1602_v17 = vrot.slane %v1473_v10, 1 }
 0x136   : > { %v2468_v7 = vpop.f32.mrf.mxu0  ;;  %1540 = vrot.lane.b32.xlu0 %v1472_v3, %s13858_s0  ;;  %v9640_v16 = vpack.c.b16 %v1436_v33, %v1435_v32  ;;  %v9664_v3 = vpop.f32.mrf.mxu1  ;;  %v1437_v33 = vunpack.c.l.b16 %v709_v58 }
 0x137   : > { %v2469_v63 = vadd.f32 %v9554_v5, %v2468_v7  ;;  %v1339_v7 = vrot.slane %v9403_v24, 2 }
 0x138   : > { %v1477_v50 = vshll.u32 %v9640_v16, 16  ;;  %v1563_v61 = vrot.slane %v9640_v16, 1 }
 0x139   : > { %v2673_v41 = vadd.f32 %v9503_v4, %v2469_v63  ;;  %v2073_v4 = vrot.slane %v9612_v49, 2  ;;  %v9662_v55 = vsel %vm993_vm3, %v1337_v47, %v1339_v7 }
 0x13a   : > { %v1564_v22 = vsel %vm893_vm2, %v1561_v59, %v1563_v61  ;;  %v2085_v6 = vrot.slane %v9662_v55, 2  ;;  %v1607_v14 = vrot.slane %v1477_v50, 2 }
 0x13b   : > { %v2866_v45 = vmax.f32 %v2673_v41, 0.0  ;;  %v2238_v23 = vsel %vm993_vm3, %v1084_v18, %v2073_v4  ;;  %v9672_v41 = vsel %vm1055_vm6, %v1374_v48, %v1315_v52  ;;  %1581 = vrot.lane.b32.xlu1 %v1564_v22, %s13859_s25  ;;  %v1603_v18 = vrot.slane %v1469_v9, 2 }
 0x13c   : > { %v2086_v47 = vsel %vm993_vm3, %v2081_v43, %v2085_v6  ;;  %v2075_v59 = vrot.slane %v9672_v41, 2  ;;  %v1438_v9 = vunpack.c.l.b16 %v710_v57 }
 0x13d   : > { %2944 = vst [vmem:[#allocation2 + $0x8] sm:$0xff] %v2866_v45  ;;  %7467 = vmatmul.msk.bf16.gmra.mxu1 %vm1013_vm4, %v2086_v47  ;;  %v1599_v45 = vrot.slane %v1462_v0, 1  ;;  %v1604_v32 = vor.u32 %v1603_v18, %v1602_v17 }
 0x13e   : > { %v2471_v28 = vpop.f32.mrf.mxu0  ;;  %v2076_v0 = vsel %vm993_vm3, %v2073_v4, %v2075_v59  ;;  %v9703_v49 = vpack.c.b16 %v1438_v9, %v1437_v33  ;;  %v1481_v4 = vshrl.u32 %v9640_v16, 16  ;;  %v1260_v33 = vpop.permute.xlu1 %1259 }
 0x13f   : > { %v2472_v31 = vadd.f32 %v9554_v5, %v2471_v28 }
 0x141   : > { %v2676_v36 = vadd.f32 %v9517_v37, %v2472_v31  ;;  %2510 = vmatmul.bf16.gmra.mxu0 %v2238_v23  ;;  %v1479_v37 = vrot.slane %v1477_v50, 1  ;;  %v1219_v31 = vpop.permute.xlu0 %1218 }
 0x143   : > { %v2867_v46 = vmax.f32 %v2676_v36, 0.0  ;;  %v1480_v1 = vsel %vm793_vm0, %v1475_v51, %v1479_v37  ;;  %v1356_v36 = vsel %vm1013_vm4, %v9355_v30, %v1219_v31  ;;  %v1483_v40 = vor.u32 %v1481_v4, %v1479_v37  ;;  %v1317_v51 = vpop.permute.xlu2 %1316 }
 0x144   : > { %1542 = vrot.lane.b32.xlu0 %v1480_v1, %s13858_s0  ;;  %v1376_v10 = vsel %vm1034_vm5, %v1356_v36, %v1258_v38  ;;  %v1565_v30 = vrot.slane %v9703_v49, 1  ;;  %v8574_v38 = vld [vmem:[%s13861_s3 + $0x78] sm:$0xff] }
 0x145   : > { %2945 = vst [vmem:[#allocation2 + $0x10] sm:$0xff] %v2867_v46  ;;  %v1485_v46 = vshll.u32 %v9703_v49, 16  ;;  %v9725_v55 = vsel %vm1055_vm6, %v1376_v10, %v1317_v51  ;;  %4085 = vmatpush.bf16.msra.mxu3 %v8574_v38 }
 0x146   : > { %v2473_v56 = vpop.f32.mrf.mxu0 }
 0x147   : > { %v2474_v63 = vadd.f32 %v9554_v5, %v2473_v56  ;;  %v1487_v56 = vrot.slane %v1485_v46, 1 }
 0x149   : > { %v2678_v8 = vadd.f32 %v9527_v26, %v2474_v63  ;;  %v1600_v26 = vrot.slane %v1464_v44, 2  ;;  %v9696_v44 = vpop.f32.mrf.mxu1  ;;  %v1566_v63 = vsel %vm893_vm2, %v1563_v61, %v1565_v30 }
 0x14a   : > { %1583 = vrot.lane.b32.xlu1 %v1566_v63, %s13859_s25 }
 0x14b   : > { %v2868_v13 = vmax.f32 %v2678_v8, 0.0  ;;  %v1601_v28 = vor.u32 %v1600_v26, %v1599_v45  ;;  %v1488_v8 = vsel %vm793_vm0, %v1483_v40, %v1487_v56  ;;  %v7383_v45 = vld [vmem:[%s9150_s22 + $0x180] sm:$0xff]  ;;  %v7384_v26 = vld [vmem:[%s9150_s22 + $0x188] sm:$0xff]  ;;  %v1319_v40 = vpop.permute.xlu2 %1318 }
 0x14c   : > { %1544 = vrot.lane.b32.xlu0 %v1488_v8, %s13858_s0  ;;  %v3021_v12 = vld [vmem:[#allocation2] ss:$3 sm:$0xff]  ;;  %v3073_v61 = vld [vmem:[#allocation2 + $0x1] ss:$3 sm:$0xff]  ;;  %v711_v15 = vpack.c.bf16 %v7383_v45, %v7383_v45  ;;  %v712_v58 = vpack.c.bf16 %v7384_v26, %v7384_v26  ;;  %v3151_v9 = vld [vmem:[#allocation2 + $0x2] ss:$3 sm:$0xff] }
 0x14d   : > { %2946 = vst [vmem:[#allocation2 + $0x18] sm:$0xff] %v2868_v13  ;;  %v1605_v23 = vsel %vm933_vm1, %v1601_v28, %v1604_v32  ;;  %v2079_v13 = vrot.slane %v9725_v55, 2  ;;  %v3124_v18 = vmax.f32 %v3021_v12, %v3073_v61  ;;  %v8573_v61 = vld [vmem:[%s13861_s3 + $0x70] sm:$0xff] }
 0x14e   : > { %v2476_v43 = vpop.f32.mrf.mxu0  ;;  %1638 = vrot.lane.b32.xlu2 %v1605_v23, %s13862_s26  ;;  %v1439_v28 = vunpack.c.l.b16 %v711_v15  ;;  %4086 = vmatpush.bf16.msra.mxu3 %v8573_v61 }
 0x14f   : > { %v2477_v60 = vadd.f32 %v9554_v5, %v2476_v43  ;;  %v1221_v43 = vpop.permute.xlu0 %1220  ;;  %v2080_v57 = vsel %vm993_vm3, %v2075_v59, %v2079_v13  ;;  %v3202_v36 = vmax.f32 %v3124_v18, %v3151_v9 }
 0x150   : > { %v1358_v50 = vsel %vm1013_vm4, %v9381_v25, %v1221_v43  ;;  %v1489_v25 = vshrl.u32 %v9703_v49, 16 }
 0x151   : > { %v2681_v34 = vadd.f32 %v9541_v62, %v2477_v60  ;;  %2515 = vmatmul.bf16.gmra.mxu0 %v2076_v0  ;;  %v1341_v62 = vrot.slane %v9422_v21, 2  ;;  %v9718_v11 = vpop.f32.mrf.mxu1  ;;  %v1440_v0 = vunpack.c.l.b16 %v712_v58 }
 0x153   : > { %v2869_v39 = vmax.f32 %v2681_v34, 0.0  ;;  %v9716_v37 = vsel %vm993_vm3, %v1339_v7, %v1341_v62  ;;  %v9756_v41 = vpack.c.b16 %v1440_v0, %v1439_v28  ;;  %v7385_v28 = vld [vmem:[%s9150_s22 + $0x190] sm:$0xff] }
 0x154   : > { %v2089_v1 = vrot.slane %v9716_v37, 2  ;;  %v1610_v37 = vrot.slane %v1489_v25, 1 }
 0x155   : > { %2947 = vst [vmem:[#allocation2 + $0x20] sm:$0xff] %v2869_v39  ;;  %v1378_v39 = vsel %vm1034_vm5, %v1358_v50, %v1260_v33  ;;  %v1493_v51 = vshll.u32 %v9756_v41, 16  ;;  %v1567_v8 = vrot.slane %v9756_v41, 1  ;;  %v713_v33 = vpack.c.bf16 %v7385_v28, %v7385_v28 }
 0x156   : > { %v2478_v48 = vpop.f32.mrf.mxu0  ;;  %v2090_v7 = vsel %vm993_vm3, %v2085_v6, %v2089_v1  ;;  %v9780_v45 = vsel %vm1055_vm6, %v1378_v39, %v1319_v40 }
 0x157   : > { %v2479_v52 = vadd.f32 %v9554_v5, %v2478_v48  ;;  %7468 = vmatmul.msk.bf16.gmra.mxu1 %vm1013_vm4, %v2090_v7  ;;  %v1343_v48 = vrot.slane %v9442_v54, 2  ;;  %v1495_v12 = vrot.slane %v1493_v51, 1 }
 0x159   : > { %v2683_v22 = vadd.f32 %v9564_v35, %v2479_v52  ;;  %v1606_v35 = vrot.slane %v1481_v4, 1  ;;  %v9748_v31 = vpop.f32.mrf.mxu1 }
 0x15b   : > { %v2870_v47 = vmax.f32 %v2683_v22, 0.0  ;;  %v9741_v60 = vor.u32 %v1607_v14, %v1606_v35  ;;  %v3228_v22 = vpack.c.bf16 %v3202_v36, %v3202_v36  ;;  %v1568_v35 = vsel %vm893_vm2, %v1565_v30, %v1567_v8 }
 0x15c   : > { %1585 = vrot.lane.b32.xlu1 %v1568_v35, %s13859_s25  ;;  %v1345_v35 = vrot.slane %v9462_v19, 2 }
 0x15d   : > { %2948 = vst [vmem:[#allocation2 + $0x28] sm:$0xff] %v2870_v47  ;;  %v1609_v23 = vsel %vm933_vm1, %v1604_v32, %v9741_v60  ;;  %v1491_v32 = vor.u32 %v1489_v25, %v1487_v56  ;;  %v9777_v56 = vsel %vm993_vm3, %v1341_v62, %v1343_v48  ;;  %v3260_v18 = vunpack.c.l.b16 %v3228_v22  ;;  %v1223_v25 = vpop.permute.xlu0 %1222 }
 0x15e   : > { %v2481_v17 = vpop.f32.mrf.mxu0  ;;  %1640 = vrot.lane.b32.xlu2 %v1609_v23, %s13862_s26  ;;  %v2093_v14 = vrot.slane %v9777_v56, 2  ;;  %v8571_v23 = vld [vmem:[%s13861_s3 + $0x60] sm:$0xff]  ;;  %v1497_v22 = vshrl.u32 %v9756_v41, 16 }
 0x15f   : > { %v2482_v6 = vadd.f32 %v9554_v5, %v2481_v17  ;;  %v1496_v62 = vsel %vm793_vm0, %v1491_v32, %v1495_v12 }
 0x160   : > { %1546 = vrot.lane.b32.xlu0 %v1496_v62, %s13858_s0  ;;  %v2094_v17 = vsel %vm993_vm3, %v2089_v1, %v2093_v14  ;;  %v1611_v1 = vrot.slane %v1485_v46, 2  ;;  %v1499_v61 = vor.u32 %v1497_v22, %v1495_v12  ;;  %v9862_v12 = vsel %vm993_vm3, %v1343_v48, %v1345_v35 }
 0x161   : > { %v2686_v34 = vadd.f32 %v9604_v2, %v2482_v6  ;;  %2520 = vmatmul.bf16.gmra.mxu0 %v2080_v57  ;;  %v9782_v26 = vpop.f32.mrf.mxu1  ;;  %v2083_v6 = vrot.slane %v9780_v45, 2  ;;  %v7386_v57 = vld [vmem:[%s9150_s22 + $0x198] sm:$0xff] }
 0x162   : > { %v9815_v36 = vor.u32 %v1611_v1, %v1610_v37 }
 0x163   : > { %v2871_v59 = vmax.f32 %v2686_v34, 0.0  ;;  %v714_v34 = vpack.c.bf16 %v7386_v57, %v7386_v57  ;;  %v2084_v46 = vsel %vm993_vm3, %v2079_v13, %v2083_v6  ;;  %v2097_v57 = vrot.slane %v9862_v12, 2 }
 0x164   : > { %v3023_v2 = vld [vmem:[#allocation2 + $0x18] ss:$3 sm:$0xff]  ;;  %v3075_v4 = vld [vmem:[#allocation2 + $0x19] ss:$3 sm:$0xff]  ;;  %v3153_v63 = vld [vmem:[#allocation2 + $0x1a] ss:$3 sm:$0xff] }
 0x165   : > { %2949 = vst [vmem:[#allocation2 + $0x30] sm:$0xff] %v2871_v59  ;;  %v3125_v10 = vmax.f32 %v3023_v2, %v3075_v4  ;;  %v1441_v2 = vunpack.c.l.b16 %v713_v33  ;;  %v1442_v4 = vunpack.c.l.b16 %v714_v34  ;;  %v2098_v48 = vsel %vm993_vm3, %v2093_v14, %v2097_v57 }
 0x166   : > { %v2483_v52 = vpop.f32.mrf.mxu0  ;;  %v1615_v34 = vrot.slane %v1493_v51, 2 }
 0x167   : > { %v2484_v7 = vadd.f32 %v9554_v5, %v2483_v52  ;;  %v3203_v47 = vmax.f32 %v3125_v10, %v3153_v63  ;;  %7469 = vmatmul.msk.bf16.gmra.mxu1 %vm1013_vm4, %v2094_v17  ;;  %v1613_v10 = vsel %vm933_vm1, %v9741_v60, %v9815_v36  ;;  %v9835_v55 = vpack.c.b16 %v1442_v4, %v1441_v2  ;;  %v1262_v52 = vpop.permute.xlu1 %1261  ;;  %v8570_v60 = vld [vmem:[%s13861_s3 + $0x58] sm:$0xff]  ;;  %v8567_v2 = vld [vmem:[%s13861_s3 + $0x40] sm:$0xff] }
 0x168   : > { %1642 = vrot.lane.b32.xlu2 %v1613_v10, %s13862_s26 }
 0x169   : > { %v2688_v15 = vadd.f32 %v9637_v27, %v2484_v7  ;;  %v3229_v43 = vpack.c.bf16 %v3203_v47, %v3203_v47  ;;  %v8572_v27 = vld [vmem:[%s13861_s3 + $0x68] sm:$0xff]  ;;  %v9824_v39 = vpop.f32.mrf.mxu1  ;;  %v1501_v7 = vshll.u32 %v9835_v55, 16  ;;  %v1569_v17 = vrot.slane %v9835_v55, 1 }
 0x16a   : > { %4087 = vmatpush.bf16.msra.mxu3 %v8572_v27 }
 0x16b   : > { %v2872_v30 = vmax.f32 %v2688_v15, 0.0  ;;  %v3261_v58 = vunpack.c.l.b16 %v3229_v43  ;;  %v1321_v15 = vpop.permute.xlu2 %1320  ;;  %v1503_v62 = vrot.slane %v1501_v7, 1  ;;  %v1570_v28 = vsel %vm893_vm2, %v1567_v8, %v1569_v17  ;;  %v8568_v8 = vld [vmem:[%s13861_s3 + $0x48] sm:$0xff] }
 0x16c   : > { %1587 = vrot.lane.b32.xlu1 %v1570_v28, %s13859_s25 }
 0x16d   : > { %2950 = vst [vmem:[#allocation2 + $0x38] sm:$0xff] %v2872_v30  ;;  %v9806_v0 = vpack.c.b16 %v3261_v58, %v3260_v18  ;;  %v8569_v18 = vld [vmem:[%s13861_s3 + $0x50] sm:$0xff]  ;;  %v1504_v27 = vsel %vm793_vm0, %v1499_v61, %v1503_v62 }
 0x16e   : > { %v2486_v50 = vpop.f32.mrf.mxu0  ;;  %4088 = vmatpush.bf16.msra.mxu3 %v8571_v23  ;;  %1548 = vrot.lane.b32.xlu0 %v1504_v27, %s13858_s0  ;;  %v7388_v23 = vld [vmem:[%s9150_s22 + $0x1a8] sm:$0xff] }
 0x16f   : > { %v2487_v9 = vadd.f32 %v9554_v5, %v2486_v50  ;;  %4024 = vmatmul.bf16.vlgmr.msra.gmra.mxu2 %v9806_v0  ;;  %v3276_v59 = vshrl.u32 %v9806_v0, 16  ;;  %v3278_v38 = vshll.u32 %v9806_v0, 16  ;;  %v716_v14 = vpack.c.bf16 %v7388_v23, %v7388_v23 }
 0x171   : > { %v2691_v40 = vadd.f32 %v9664_v3, %v2487_v9  ;;  %2525 = vmatmul.bf16.gmra.mxu0 %v2084_v46  ;;  %v9832_v32 = vrot.slane %v3276_v59, 1  ;;  %v9839_v13 = vrot.slane %v3278_v38, 2  ;;  %v1360_v3 = vsel %vm1013_vm4, %v9403_v24, %v1223_v25  ;;  %v9864_v58 = vpop.f32.mrf.mxu1  ;;  %v7387_v9 = vld [vmem:[%s9150_s22 + $0x1a0] sm:$0xff] }
 0x172   : > { %4089 = vmatpush.bf16.msra.mxu3 %v8570_v60  ;;  %v1380_v24 = vsel %vm1034_vm5, %v1360_v3, %v1262_v52  ;;  %v715_v25 = vpack.c.bf16 %v7387_v9, %v7387_v9  ;;  %v1444_v52 = vunpack.c.l.b16 %v716_v14 }
 0x173   : > { %v2873_v63 = vmax.f32 %v2691_v40, 0.0  ;;  %v3318_v47 = vor.u32 %v9839_v13, %v9832_v32  ;;  %v9872_v37 = vsel %vm1055_vm6, %v1380_v24, %v1321_v15  ;;  %v1225_v40 = vpop.permute.xlu0 %1224  ;;  %v1505_v24 = vshrl.u32 %v9835_v55, 16 }
 0x174   : > { %v2087_v33 = vrot.slane %v9872_v37, 2  ;;  %v1443_v3 = vunpack.c.l.b16 %v715_v25  ;;  %v1362_v45 = vsel %vm1013_vm4, %v9422_v21, %v1225_v40  ;;  %v7390_v25 = vld [vmem:[%s9150_s22 + $0x1b8] sm:$0xff] }
 0x175   : > { %2951 = vst [vmem:[#allocation2 + $0x40] sm:$0xff] %v2873_v63 }
 0x176   : > { %v2488_v43 = vpop.f32.mrf.mxu0  ;;  %4090 = vmatpush.bf16.msra.mxu3 %v8569_v18  ;;  %v2088_v51 = vsel %vm993_vm3, %v2083_v6, %v2087_v33  ;;  %v1264_v6 = vpop.permute.xlu1 %1263 }
 0x177   : > { %v2489_v30 = vadd.f32 %v9554_v5, %v2488_v43  ;;  %7470 = vmatmul.msk.bf16.gmra.mxu1 %vm1013_vm4, %v2098_v48  ;;  %v1347_v43 = vrot.slane %v9484_v53, 2 }
 0x179   : > { %v2693_v1 = vadd.f32 %v9696_v44, %v2489_v30  ;;  %v1614_v44 = vrot.slane %v1497_v22, 1  ;;  %v9900_v10 = vpop.f32.mrf.mxu1  ;;  %v9907_v22 = vpack.c.b16 %v1444_v52, %v1443_v3  ;;  %v1382_v30 = vsel %vm1034_vm5, %v1362_v45, %v1264_v6 }
 0x17a   : > { %4091 = vmatpush.bf16.msra.mxu3 %v8568_v8  ;;  %v9922_v28 = vsel %vm993_vm3, %v1345_v35, %v1347_v43  ;;  %v718_v3 = vpack.c.bf16 %v7390_v25, %v7390_v25 }
 0x17b   : > { %v2874_v50 = vmax.f32 %v2693_v1, 0.0  ;;  %v9893_v4 = vor.u32 %v1615_v34, %v1614_v44  ;;  %v1509_v15 = vshll.u32 %v9907_v22, 16  ;;  %v1571_v27 = vrot.slane %v9907_v22, 1  ;;  %v1227_v14 = vpop.permute.xlu0 %1226 }
 0x17c   : > { %v3025_v9 = vld [vmem:[#allocation2 + $0x30] ss:$3 sm:$0xff]  ;;  %v3077_v23 = vld [vmem:[#allocation2 + $0x31] ss:$3 sm:$0xff] }
 0x17d   : > { %2952 = vst [vmem:[#allocation2 + $0x48] sm:$0xff] %v2874_v50  ;;  %v1617_v60 = vsel %vm933_vm1, %v9815_v36, %v9893_v4  ;;  %v1323_v36 = vpop.permute.xlu2 %1322  ;;  %v1511_v12 = vrot.slane %v1509_v15, 1  ;;  %v1572_v48 = vsel %vm893_vm2, %v1569_v17, %v1571_v27  ;;  %v2101_v50 = vrot.slane %v9922_v28, 2 }
 0x17e   : > { %v2491_v56 = vpop.f32.mrf.mxu0  ;;  %4092 = vmatpush.bf16.msra.mxu3 %v8567_v2  ;;  %1644 = vrot.lane.b32.xlu2 %v1617_v60, %s13862_s26  ;;  %v9932_v8 = vsel %vm1055_vm6, %v1382_v30, %v1323_v36  ;;  %v1364_v60 = vsel %vm1013_vm4, %v9442_v54, %v1227_v14  ;;  %v1266_v45 = vpop.permute.xlu1 %1265 }
 0x17f   : > { %v2492_v46 = vadd.f32 %v9554_v5, %v2491_v56  ;;  %1589 = vrot.lane.b32.xlu1 %v1572_v48, %s13859_s25  ;;  %v2102_v35 = vsel %vm993_vm3, %v2097_v57, %v2101_v50  ;;  %v2091_v17 = vrot.slane %v9932_v8, 2  ;;  %v7389_v56 = vld [vmem:[%s9150_s22 + $0x1b0] sm:$0xff]  ;;  %v1384_v37 = vsel %vm1034_vm5, %v1364_v60, %v1266_v45 }
 0x180   : > { %v717_v2 = vpack.c.bf16 %v7389_v56, %v7389_v56 }
 0x181   : > { %v2696_v63 = vadd.f32 %v9718_v11, %v2492_v46  ;;  %2530 = vmatmul.bf16.gmra.mxu0 %v2088_v51  ;;  %v1507_v11 = vor.u32 %v1505_v24, %v1503_v62  ;;  %v9924_v62 = vpop.f32.mrf.mxu1  ;;  %v1619_v46 = vrot.slane %v1501_v7, 2  ;;  %v3126_v51 = vmax.f32 %v3025_v9, %v3077_v23 }
 0x182   : > { %v2092_v6 = vsel %vm993_vm3, %v2087_v33, %v2091_v17 }
 0x183   : > { %v2875_v61 = vmax.f32 %v2696_v63, 0.0  ;;  %v1512_v1 = vsel %vm793_vm0, %v1507_v11, %v1511_v12  ;;  %v1445_v63 = vunpack.c.l.b16 %v717_v2  ;;  %v3155_v11 = vld [vmem:[#allocation2 + $0x32] ss:$3 sm:$0xff] }
 0x184   : > { %1550 = vrot.lane.b32.xlu0 %v1512_v1, %s13858_s0  ;;  %v3204_v36 = vmax.f32 %v3126_v51, %v3155_v11 }
 0x185   : > { %2953 = vst [vmem:[#allocation2 + $0x50] sm:$0xff] %v2875_v61  ;;  %v1446_v61 = vunpack.c.l.b16 %v718_v3 }
 0x186   : > { %v2493_v18 = vpop.f32.mrf.mxu0  ;;  %v3230_v56 = vpack.c.bf16 %v3204_v36, %v3204_v36 }
 0x187   : > { %v2494_v21 = vadd.f32 %v9554_v5, %v2493_v18  ;;  %7471 = vmatmul.msk.bf16.gmra.mxu1 %vm1013_vm4, %v2102_v35  ;;  %v9963_v54 = vpack.c.b16 %v1446_v61, %v1445_v63  ;;  %v1325_v18 = vpop.permute.xlu2 %1324  ;;  %v7391_v61 = vld [vmem:[%s9150_s22 + $0x1c0] sm:$0xff] }
 0x188   : > { %v3262_v45 = vunpack.c.l.b16 %v3230_v56 }
 0x189   : > { %v2698_v44 = vadd.f32 %v9748_v31, %v2494_v21  ;;  %v1618_v31 = vrot.slane %v1505_v24, 1  ;;  %v9956_v7 = vpop.f32.mrf.mxu1  ;;  %v1513_v21 = vshrl.u32 %v9907_v22, 16  ;;  %v1517_v35 = vshll.u32 %v9963_v54, 16 }
 0x18a   : > { %v1573_v25 = vrot.slane %v9963_v54, 1 }
 0x18b   : > { %v2876_v34 = vmax.f32 %v2698_v44, 0.0  ;;  %v9947_v52 = vor.u32 %v1619_v46, %v1618_v31  ;;  %v1515_v44 = vor.u32 %v1513_v21, %v1511_v12  ;;  %v1519_v46 = vrot.slane %v1517_v35, 1 }
 0x18d   : > { %2954 = vst [vmem:[#allocation2 + $0x58] sm:$0xff] %v2876_v34  ;;  %v1621_v30 = vsel %vm933_vm1, %v9893_v4, %v9947_v52  ;;  %v1349_v4 = vrot.slane %v9507_v20, 2  ;;  %v9970_v34 = vsel %vm1055_vm6, %v1384_v37, %v1325_v18  ;;  %v719_v37 = vpack.c.bf16 %v7391_v61, %v7391_v61 }
 0x18e   : > { %v2496_v40 = vpop.f32.mrf.mxu0  ;;  %1646 = vrot.lane.b32.xlu2 %v1621_v30, %s13862_s26  ;;  %v2095_v3 = vrot.slane %v9970_v34, 2  ;;  %v1623_v30 = vrot.slane %v1509_v15, 2 }
 0x18f   : > { %v2497_v57 = vadd.f32 %v9554_v5, %v2496_v40  ;;  %v9981_v12 = vsel %vm993_vm3, %v1347_v43, %v1349_v4  ;;  %v1574_v40 = vsel %vm893_vm2, %v1571_v27, %v1573_v25  ;;  %v1520_v43 = vsel %vm793_vm0, %v1515_v44, %v1519_v46 }
 0x190   : > { %v2105_v51 = vrot.slane %v9981_v12, 2  ;;  %1591 = vrot.lane.b32.xlu1 %v1574_v40, %s13859_s25  ;;  %1552 = vrot.lane.b32.xlu0 %v1520_v43, %s13858_s0  ;;  %v2096_v28 = vsel %vm993_vm3, %v2091_v17, %v2095_v3  ;;  %v1447_v44 = vunpack.c.l.b16 %v719_v37  ;;  %v1268_v43 = vpop.permute.xlu1 %1267 }
 0x191   : > { %v2701_v24 = vadd.f32 %v9782_v26, %v2497_v57  ;;  %2535 = vmatmul.bf16.gmra.mxu0 %v2092_v6  ;;  %v9983_v2 = vpop.f32.mrf.mxu1 }
 0x192   : > { %v2106_v60 = vsel %vm993_vm3, %v2101_v50, %v2105_v51  ;;  %v1622_v50 = vrot.slane %v1513_v21, 1  ;;  %v1229_v21 = vpop.permute.xlu0 %1228 }
 0x193   : > { %v2877_v33 = vmax.f32 %v2701_v24, 0.0  ;;  %v7392_v24 = vld [vmem:[%s9150_s22 + $0x1c8] sm:$0xff] }
 0x194   : > { %v3027_v1 = vld [vmem:[#allocation2 + $0x48] ss:$3 sm:$0xff]  ;;  %v3079_v48 = vld [vmem:[#allocation2 + $0x49] ss:$3 sm:$0xff]  ;;  %v3157_v23 = vld [vmem:[#allocation2 + $0x4a] ss:$3 sm:$0xff]  ;;  %v720_v18 = vpack.c.bf16 %v7392_v24, %v7392_v24  ;;  %v10020_v8 = vor.u32 %v1623_v30, %v1622_v50  ;;  %v1327_v24 = vpop.permute.xlu2 %1326 }
 0x195   : > { %2955 = vst [vmem:[#allocation2 + $0x60] sm:$0xff] %v2877_v33  ;;  %v3127_v26 = vmax.f32 %v3027_v1, %v3079_v48  ;;  %v3336_v33 = vrot.slane %v9806_v0, 2 }
 0x196   : > { %v2498_v9 = vpop.f32.mrf.mxu0  ;;  %v1625_v40 = vsel %vm933_vm1, %v9947_v52, %v10020_v8 }
 0x197   : > { %v2499_v14 = vadd.f32 %v9554_v5, %v2498_v9  ;;  %v3205_v31 = vmax.f32 %v3127_v26, %v3157_v23  ;;  %7472 = vmatmul.msk.bf16.gmra.mxu1 %vm1013_vm4, %v2106_v60  ;;  %v1448_v9 = vunpack.c.l.b16 %v720_v18  ;;  %1648 = vrot.lane.b32.xlu2 %v1625_v40, %s13862_s26 }
 0x199   : > { %v2703_v57 = vadd.f32 %v9824_v39, %v2499_v14  ;;  %v3231_v63 = vpack.c.bf16 %v3205_v31, %v3205_v31  ;;  %v3280_v39 = vrot.slane %v3278_v38, 1  ;;  %v3306_v38 = vrot.slane %v9806_v0, 1  ;;  %v10025_v26 = vpop.f32.mrf.mxu1 }
 0x19a   : > { %v10035_v0 = vpack.c.b16 %v1448_v9, %v1447_v44 }
 0x19b   : > { %v2878_v27 = vmax.f32 %v2703_v57, 0.0  ;;  %v3263_v6 = vunpack.c.l.b16 %v3231_v63  ;;  %v3281_v15 = vor.u32 %v3280_v39, %v3276_v59  ;;  %v1366_v63 = vsel %vm1013_vm4, %v9462_v19, %v1229_v21  ;;  %v7393_v21 = vld [vmem:[%s9150_s22 + $0x1d0] sm:$0xff] }
 0x19c   : > { %v1386_v19 = vsel %vm1034_vm5, %v1366_v63, %v1268_v43  ;;  %v1575_v30 = vrot.slane %v10035_v0, 1  ;;  %v721_v44 = vpack.c.bf16 %v7393_v21, %v7393_v21 }
 0x19d   : > { %2956 = vst [vmem:[#allocation2 + $0x68] sm:$0xff] %v2878_v27  ;;  %v10006_v11 = vpack.c.b16 %v3263_v6, %v3262_v45  ;;  %v1521_v27 = vshrl.u32 %v9963_v54, 16  ;;  %v1525_v45 = vshll.u32 %v10035_v0, 16  ;;  %v10079_v32 = vsel %vm1055_vm6, %v1386_v19, %v1327_v24 }
 0x19e   : > { %v2501_v36 = vpop.f32.mrf.mxu0 }
 0x19f   : > { %v2502_v1 = vadd.f32 %v9554_v5, %v2501_v36  ;;  %4029 = vmatmul.bf16.gmra.mxu2 %v10006_v11  ;;  %v3283_v48 = vshll.u32 %v10006_v11, 16  ;;  %v3287_v17 = vshrl.u32 %v10006_v11, 16  ;;  %v3307_v23 = vrot.slane %v10006_v11, 1 }
 0x1a0   : > { %v1523_v61 = vor.u32 %v1521_v27, %v1519_v46  ;;  %v1527_v50 = vrot.slane %v1525_v45, 1 }
 0x1a1   : > { %v2706_v56 = vadd.f32 %v9864_v58, %v2502_v1  ;;  %2540 = vmatmul.bf16.gmra.mxu0 %v2096_v28  ;;  %v10029_v14 = vrot.slane %v3283_v48, 1  ;;  %v3320_v31 = vrot.slane %v3283_v48, 2  ;;  %v3319_v59 = vrot.slane %v3287_v17, 1  ;;  %v10070_v46 = vpop.f32.mrf.mxu1 }
 0x1a2   : > { %v10042_v57 = vsel %vm893_vm2, %v3306_v38, %v3307_v23  ;;  %v3337_v58 = vrot.slane %v10006_v11, 2  ;;  %v1528_v18 = vsel %vm793_vm0, %v1523_v61, %v1527_v50  ;;  %v1576_v38 = vsel %vm893_vm2, %v1573_v25, %v1575_v30 }
 0x1a3   : > { %v2879_v60 = vmax.f32 %v2706_v56, 0.0  ;;  %v3286_v52 = vsel %vm793_vm0, %v3281_v15, %v10029_v14  ;;  %v10051_v6 = vor.u32 %v3320_v31, %v3319_v59  ;;  %1554 = vrot.lane.b32.xlu0 %v1528_v18, %s13858_s0  ;;  %1593 = vrot.lane.b32.xlu1 %v1576_v38, %s13859_s25  ;;  %v2099_v25 = vrot.slane %v10079_v32, 2  ;;  %v1231_v56 = vpop.permute.xlu0 %1230 }
 0x1a4   : > { %4093 = vmatmul.bf16.vlgmr.msra.gmra.mxu3 %v3286_v52  ;;  %v10056_v39 = vsel %vm993_vm3, %v3336_v33, %v3337_v58  ;;  %v2109_v33 = vrot.slane %v1349_v4, 2  ;;  %v1626_v4 = vrot.slane %v1521_v27, 1  ;;  %v1627_v48 = vrot.slane %v1517_v35, 2  ;;  %v1270_v52 = vpop.permute.xlu1 %1269 }
 0x1a5   : > { %2957 = vst [vmem:[#allocation2 + $0x70] sm:$0xff] %v2879_v60  ;;  %v10067_v36 = vsel %vm933_vm1, %v3318_v47, %v10051_v6  ;;  %v1449_v59 = vunpack.c.l.b16 %v721_v44  ;;  %v1368_v60 = vsel %vm1013_vm4, %v9484_v53, %v1231_v56  ;;  %v1658_v53 = vrot.slane %v9566_v29, 2 }
 0x1a6   : > { %v2503_v28 = vpop.f32.mrf.mxu0  ;;  %v2110_v47 = vsel %vm993_vm3, %v2105_v51, %v2109_v33  ;;  %v1628_v31 = vor.u32 %v1627_v48, %v1626_v4  ;;  %v2100_v51 = vsel %vm993_vm3, %v2095_v3, %v2099_v25  ;;  %v1529_v3 = vshrl.u32 %v10035_v0, 16 }
 0x1a7   : > { %v2504_v37 = vadd.f32 %v9554_v5, %v2503_v28  ;;  %7473 = vmatmul.msk.bf16.gmra.mxu1 %vm1013_vm4, %v2110_v47  ;;  %v1388_v19 = vsel %vm1034_vm5, %v1368_v60, %v1270_v52 }
 0x1a8   : > { %v1629_v43 = vsel %vm933_vm1, %v10020_v8, %v1628_v31  ;;  %v1531_v28 = vor.u32 %v1529_v3, %v1527_v50 }
 0x1a9   : > { %v2708_v13 = vadd.f32 %v9900_v10, %v2504_v37  ;;  %v7394_v10 = vld [vmem:[%s9150_s22 + $0x1d8] sm:$0xff]  ;;  %v10099_v40 = vpop.f32.mrf.mxu1  ;;  %1650 = vrot.lane.b32.xlu2 %v1629_v43, %s13862_s26  ;;  %v1659_v37 = vrot.slane %v9576_v42, 2 }
 0x1aa   : > { %v722_v9 = vpack.c.bf16 %v7394_v10, %v7394_v10 }
 0x1ab   : > { %v2880_v1 = vmax.f32 %v2708_v13, 0.0  ;;  %v10120_v47 = vsel %vm993_vm3, %v1658_v53, %v1659_v37 }
 0x1ac   : > { %v1450_v63 = vunpack.c.l.b16 %v722_v9  ;;  %v3029_v44 = vld [vmem:[#allocation2 + $0x60] ss:$3 sm:$0xff]  ;;  %v3081_v9 = vld [vmem:[#allocation2 + $0x61] ss:$3 sm:$0xff] }
 0x1ad   : > { %2958 = vst [vmem:[#allocation2 + $0x78] sm:$0xff] %v2880_v1 }
 0x1ae   : > { %v2506_v15 = vpop.f32.mrf.mxu0  ;;  %v10107_v27 = vpack.c.b16 %v1450_v63, %v1449_v59  ;;  %v3128_v59 = vmax.f32 %v3029_v44, %v3081_v9 }
 0x1af   : > { %v2507_v12 = vadd.f32 %v9554_v5, %v2506_v15 }
 0x1b0   : > { %v1533_v61 = vshll.u32 %v10107_v27, 16  ;;  %v1577_v38 = vrot.slane %v10107_v27, 1 }
 0x1b1   : > { %v2711_v35 = vadd.f32 %v9924_v62, %v2507_v12  ;;  %2545 = vmatmul.bf16.gmra.mxu0 %v2100_v51  ;;  %v1329_v62 = vpop.permute.xlu2 %1328  ;;  %v10126_v4 = vpop.f32.mrf.mxu1  ;;  %v1630_v12 = vrot.slane %v1529_v3, 1  ;;  %v10140_v51 = vld [vmem:[%s13860_s19] ss:$0 sm:$0xff] }
 0x1b2   : > { %v1535_v8 = vrot.slane %v1533_v61, 1  ;;  %v10123_v1 = vsel %vm1055_vm6, %v1388_v19, %v1329_v62  ;;  %v1578_v48 = vsel %vm893_vm2, %v1575_v30, %v1577_v38  ;;  %v1631_v30 = vrot.slane %v1525_v45, 2 }
 0x1b3   : > { %v2881_v34 = vmax.f32 %v2711_v35, 0.0  ;;  %1595 = vrot.lane.b32.xlu1 %v1578_v48, %s13859_s25  ;;  %v2103_v15 = vrot.slane %v10123_v1, 2  ;;  %v1272_v35 = vpop.permute.xlu1 %1271 }
 0x1b4   : > { %v1536_v13 = vsel %vm793_vm0, %v1531_v28, %v1535_v8  ;;  %v10150_v60 = vor.u32 %v1631_v30, %v1630_v12  ;;  %v1537_v28 = vshrl.u32 %v10107_v27, 16 }
 0x1b5   : > { %2959 = vst [vmem:[#allocation2 + $0x80] sm:$0xff] %v2881_v34  ;;  %1556 = vrot.lane.b32.xlu0 %v1536_v13, %s13858_s0  ;;  %v2104_v43 = vsel %vm993_vm3, %v2099_v25, %v2103_v15  ;;  %v3159_v34 = vld [vmem:[#allocation2 + $0x62] ss:$3 sm:$0xff] }
 0x1b6   : > { %v2508_v24 = vpop.f32.mrf.mxu0  ;;  %v1633_v3 = vsel %vm933_vm1, %v1628_v31, %v10150_v60  ;;  %v3206_v32 = vmax.f32 %v3128_v59, %v3159_v34  ;;  %v1539_v48 = vor.u32 %v1537_v28, %v1535_v8  ;;  %v7398_v34 = vld [vmem:[%s9150_s22 + $0x1f8] sm:$0xff] }
 0x1b7   : > { %v2509_v18 = vadd.f32 %v9554_v5, %v2508_v24  ;;  %v2132_v5 = vrot.slane %v10120_v47, 4  ;;  %1652 = vrot.lane.b32.xlu2 %v1633_v3, %s13862_s26 }
 0x1b9   : > { %v2713_v50 = vadd.f32 %v9956_v7, %v2509_v18  ;;  %v2250_v10 = vsel %vm2130_vm7, %v2109_v33, %v2132_v5  ;;  %v1233_v7 = vpop.permute.xlu0 %1232  ;;  %v10153_v52 = vpop.f32.mrf.mxu1 }
 0x1ba   : > { %7474 = vmatmul.msk.bf16.gmra.mxu1 %vm1013_vm4, %v2250_v10  ;;  %v1370_v63 = vsel %vm1013_vm4, %v9507_v20, %v1233_v7  ;;  %v1331_v19 = vpop.permute.xlu2 %1330 }
 0x1bb   : > { %v2882_v21 = vmax.f32 %v2713_v50, 0.0  ;;  %1597 = vrot.lane.b32.xlu1 %v1577_v38, %s13859_s25  ;;  %v1390_v20 = vsel %vm1034_vm5, %v1370_v63, %v1272_v35  ;;  %v1661_v38 = vrot.slane %v9640_v16, 2  ;;  %v3232_v50 = vpack.c.bf16 %v3206_v32, %v3206_v32 }
 0x1bc   : > { %v10162_v53 = vsel %vm1055_vm6, %v1390_v20, %v1331_v19  ;;  %v1635_v20 = vrot.slane %v1533_v61, 2 }
 0x1bd   : > { %2960 = vst [vmem:[#allocation2 + $0x88] sm:$0xff] %v2882_v21  ;;  %v10169_v21 = vsel %vm993_vm3, %v1659_v37, %v1661_v38  ;;  %1558 = vrot.lane.b32.xlu0 %v1539_v48, %s13858_s0  ;;  %v3264_v8 = vunpack.c.l.b16 %v3232_v50 }
 0x1be   : > { %v2511_v56 = vpop.f32.mrf.mxu0  ;;  %v2135_v7 = vrot.slane %v10169_v21, 4 }
 0x1bf   : > { %v2512_v33 = vadd.f32 %v10140_v51, %v2511_v56  ;;  %v2107_v56 = vrot.slane %v10162_v53, 2 }
 0x1c0   : > { %v2136_v37 = vsel %vm2130_vm7, %v2132_v5, %v2135_v7 }
 0x1c1   : > { %v2716_v45 = vadd.f32 %v9983_v2, %v2512_v33  ;;  %2550 = vmatmul.bf16.gmra.mxu0 %v2104_v43  ;;  %v10172_v9 = vpop.f32.mrf.mxu1  ;;  %v7395_v33 = vld [vmem:[%s9150_s22 + $0x1e0] sm:$0xff]  ;;  %v1634_v43 = vrot.slane %v1537_v28, 1  ;;  %v2108_v32 = vsel %vm993_vm3, %v2103_v15, %v2107_v56 }
 0x1c2   : > { %v723_v59 = vpack.c.bf16 %v7395_v33, %v7395_v33 }
 0x1c3   : > { %v2883_v62 = vmax.f32 %v2716_v45, 0.0  ;;  %v7397_v45 = vld [vmem:[%s9150_s22 + $0x1f0] sm:$0xff]  ;;  %v1636_v28 = vor.u32 %v1635_v20, %v1634_v43  ;;  %v1639_v43 = vpop.permute.xlu2 %1638 }
 0x1c4   : > { %v3031_v25 = vld [vmem:[#allocation2 + $0x78] ss:$3 sm:$0xff]  ;;  %v3083_v24 = vld [vmem:[#allocation2 + $0x79] ss:$3 sm:$0xff]  ;;  %v3161_v31 = vld [vmem:[#allocation2 + $0x7a] ss:$3 sm:$0xff]  ;;  %v725_v19 = vpack.c.bf16 %v7397_v45, %v7397_v45 }
 0x1c5   : > { %2961 = vst [vmem:[#allocation2 + $0x90] sm:$0xff] %v2883_v62  ;;  %v3129_v2 = vmax.f32 %v3031_v25, %v3083_v24  ;;  %v726_v62 = vpack.c.bf16 %v7398_v34, %v7398_v34  ;;  %v3289_v25 = vor.u32 %v3287_v17, %v10029_v14  ;;  %v1637_v17 = vsel %vm933_vm1, %v10150_v60, %v1636_v28 }
 0x1c6   : > { %v2513_v18 = vpop.f32.mrf.mxu0  ;;  %v1759_v15 = vunpack.c.l.b16 %v725_v19  ;;  %1654 = vrot.lane.b32.xlu2 %v1637_v17, %s13862_s26 }
 0x1c7   : > { %v2514_v13 = vadd.f32 %v10140_v51, %v2513_v18  ;;  %v3207_v47 = vmax.f32 %v3129_v2, %v3161_v31  ;;  %v1541_v2 = vpop.permute.xlu0 %1540  ;;  %v1757_v18 = vunpack.c.l.b16 %v723_v59  ;;  %v1760_v50 = vunpack.c.l.b16 %v726_v62 }
 0x1c9   : > { %v2718_v10 = vadd.f32 %v10025_v26, %v2514_v13  ;;  %v3233_v44 = vpack.c.bf16 %v3207_v47, %v3207_v47  ;;  %v7396_v26 = vld [vmem:[%s9150_s22 + $0x1e8] sm:$0xff]  ;;  %v10204_v1 = vpop.f32.mrf.mxu1 }
 0x1ca   : > { %7475 = vmatmul.msk.bf16.gmra.mxu1 %vm1013_vm4, %v2136_v37  ;;  %v724_v63 = vpack.c.bf16 %v7396_v26, %v7396_v26 }
 0x1cb   : > { %v2884_v12 = vmax.f32 %v2718_v10, 0.0  ;;  %v3265_v30 = vunpack.c.l.b16 %v3233_v44  ;;  %v1678_v10 = vsel %vm1013_vm4, %v9566_v29, %v1541_v2  ;;  %v1580_v44 = vpop.permute.xlu1 %1579 }
 0x1cc   : > { %v1758_v31 = vunpack.c.l.b16 %v724_v63  ;;  %v1698_v63 = vsel %vm1034_vm5, %v1678_v10, %v1580_v44 }
 0x1cd   : > { %2962 = vst [vmem:[#allocation2 + $0x98] sm:$0xff] %v2884_v12  ;;  %v10183_v35 = vpack.c.b16 %v3265_v30, %v3264_v8  ;;  %v10216_v8 = vpack.c.b16 %v1760_v50, %v1759_v15  ;;  %v10259_v2 = vsel %vm1055_vm6, %v1698_v63, %v1639_v43 }
 0x1ce   : > { %v2516_v3 = vpop.f32.mrf.mxu0  ;;  %v10208_v14 = vpack.c.b16 %v1758_v31, %v1757_v18  ;;  %1656 = vrot.lane.b32.xlu2 %v1636_v28, %s13862_s26  ;;  %v2131_v50 = vrot.slane %v10259_v2, 4 }
 0x1cf   : > { %v2517_v5 = vadd.f32 %v10140_v51, %v2516_v3  ;;  %4034 = vmatmul.bf16.gmra.mxu2 %v10183_v35  ;;  %v3291_v24 = vshll.u32 %v10183_v35, 16  ;;  %v3295_v61 = vshrl.u32 %v10183_v35, 16  ;;  %v3309_v48 = vrot.slane %v10183_v35, 1  ;;  %v1543_v17 = vpop.permute.xlu0 %1542 }
 0x1d0   : > { %v1788_v30 = vshrl.u32 %v10208_v14, 16  ;;  %v1790_v60 = vshll.u32 %v10208_v14, 16  ;;  %v1795_v33 = vshll.u32 %v10216_v8, 16  ;;  %v3339_v59 = vrot.slane %v10183_v35, 2  ;;  %v7401_v35 = vld [vmem:[%s9150_s22 + $0x210] sm:$0xff] }
 0x1d1   : > { %v2721_v13 = vadd.f32 %v10070_v46, %v2517_v5  ;;  %2555 = vmatmul.bf16.gmra.mxu0 %v2108_v32  ;;  %v10202_v47 = vrot.slane %v3291_v24, 1  ;;  %v10225_v29 = vsel %vm893_vm2, %v3307_v23, %v3309_v48  ;;  %v3323_v37 = vrot.slane %v3295_v61, 1 }
 0x1d2   : > { %v3324_v26 = vrot.slane %v3291_v24, 2  ;;  %v1792_v34 = vrot.slane %v1790_v60, 1  ;;  %v1663_v3 = vrot.slane %v9703_v49, 2  ;;  %v1797_v20 = vrot.slane %v1795_v33, 1 }
 0x1d3   : > { %v2885_v12 = vmax.f32 %v2721_v13, 0.0  ;;  %v3294_v46 = vsel %vm793_vm0, %v3289_v25, %v10202_v47  ;;  %v1886_v19 = vrot.slane %v10208_v14, 1  ;;  %v1887_v62 = vrot.slane %v10216_v8, 1 }
 0x1d4   : > { %4098 = vmatmul.bf16.gmra.mxu3 %v3294_v46  ;;  %v1793_v5 = vor.u32 %v1792_v34, %v1788_v30  ;;  %v10247_v32 = vsel %vm993_vm3, %v1661_v38, %v1663_v3  ;;  %v10249_v25 = vor.u32 %v3324_v26, %v3323_v37  ;;  %v10256_v24 = vsel %vm993_vm3, %v3337_v58, %v3339_v59  ;;  %v10262_v31 = vpop.f32.mrf.mxu1  ;;  %v7400_v46 = vld [vmem:[%s9150_s22 + $0x208] sm:$0xff] }
 0x1d5   : > { %2963 = vst [vmem:[#allocation2 + $0xa0] sm:$0xff] %v2885_v12  ;;  %v1888_v38 = vsel %vm893_vm2, %v1886_v19, %v1887_v62  ;;  %v2139_v13 = vrot.slane %v10247_v32, 4  ;;  %v7399_v12 = vld [vmem:[%s9150_s22 + $0x200] sm:$0xff]  ;;  %v728_v43 = vpack.c.bf16 %v7400_v46, %v7400_v46  ;;  %v1680_v21 = vsel %vm1013_vm4, %v9576_v42, %v1543_v17 }
 0x1d6   : > { %v2518_v45 = vpop.f32.mrf.mxu0  ;;  %v1798_v11 = vsel %vm793_vm0, %v1793_v5, %v1797_v20  ;;  %1905 = vrot.lane.b32.xlu1 %v1888_v38, %s13859_s25  ;;  %v10273_v58 = vsel %vm933_vm1, %v10051_v6, %v10249_v25  ;;  %v727_v63 = vpack.c.bf16 %v7399_v12, %v7399_v12  ;;  %v2246_v34 = vsel %vm2130_vm7, %v2107_v56, %v2131_v50 }
 0x1d7   : > { %v2519_v23 = vadd.f32 %v10140_v51, %v2518_v45  ;;  %1866 = vrot.lane.b32.xlu0 %v1798_v11, %s13858_s0  ;;  %v2140_v15 = vsel %vm2130_vm7, %v2135_v7, %v2139_v13  ;;  %v1582_v7 = vpop.permute.xlu1 %1581  ;;  %v1762_v19 = vunpack.c.l.b16 %v728_v43  ;;  %v1641_v11 = vpop.permute.xlu2 %1640  ;;  %v1799_v53 = vshrl.u32 %v10216_v8, 16 }
 0x1d8   : > { %v1700_v42 = vsel %vm1034_vm5, %v1680_v21, %v1582_v7  ;;  %v1545_v32 = vpop.permute.xlu0 %1544 }
 0x1d9   : > { %v2723_v18 = vadd.f32 %v10099_v40, %v2519_v23  ;;  %v1761_v23 = vunpack.c.l.b16 %v727_v63  ;;  %v1801_v12 = vor.u32 %v1799_v53, %v1797_v20 }
 0x1da   : > { %7476 = vmatmul.msk.bf16.gmra.mxu1 %vm1013_vm4, %v2140_v15 }
 0x1db   : > { %v2886_v40 = vmax.f32 %v2723_v18, 0.0 }
 0x1dc   : > { %v3033_v10 = vld [vmem:[#allocation2 + $0x90] ss:$3 sm:$0xff]  ;;  %v3085_v44 = vld [vmem:[#allocation2 + $0x91] ss:$3 sm:$0xff]  ;;  %v3163_v26 = vld [vmem:[#allocation2 + $0x92] ss:$3 sm:$0xff]  ;;  %v10295_v38 = vpop.f32.mrf.mxu1 }
 0x1dd   : > { %2964 = vst [vmem:[#allocation2 + $0xa8] sm:$0xff] %v2886_v40  ;;  %v3130_v6 = vmax.f32 %v3033_v10, %v3085_v44  ;;  %v10298_v40 = vpack.c.b16 %v1762_v19, %v1761_v23  ;;  %v10305_v10 = vsel %vm1055_vm6, %v1700_v42, %v1641_v11 }
 0x1de   : > { %v2521_v37 = vpop.f32.mrf.mxu0 }
 0x1df   : > { %v2522_v28 = vadd.f32 %v10140_v51, %v2521_v37  ;;  %v3208_v45 = vmax.f32 %v3130_v6, %v3163_v26  ;;  %v1803_v56 = vshll.u32 %v10298_v40, 16  ;;  %v3297_v6 = vor.u32 %v3295_v61, %v10202_v47  ;;  %v1584_v2 = vpop.permute.xlu1 %1583 }
 0x1e0   : > { %v1665_v37 = vrot.slane %v9756_v41, 2  ;;  %v1889_v43 = vrot.slane %v10298_v40, 1 }
 0x1e1   : > { %v2726_v5 = vadd.f32 %v10126_v4, %v2522_v28  ;;  %2560 = vmatmul.bf16.gmra.mxu0 %v2246_v34  ;;  %v3234_v18 = vpack.c.bf16 %v3208_v45, %v3208_v45  ;;  %v10314_v46 = vrot.slane %v1803_v56, 1 }
 0x1e2   : > { %v10326_v61 = vsel %vm993_vm3, %v1663_v3, %v1665_v37  ;;  %v1890_v23 = vsel %vm893_vm2, %v1887_v62, %v1889_v43 }
 0x1e3   : > { %v2887_v15 = vmax.f32 %v2726_v5, 0.0  ;;  %v10300_v17 = vunpack.c.l.b16 %v3234_v18  ;;  %v1806_v7 = vsel %vm793_vm0, %v1801_v12, %v10314_v46  ;;  %v2143_v3 = vrot.slane %v10326_v61, 4  ;;  %1907 = vrot.lane.b32.xlu1 %v1890_v23, %s13859_s25  ;;  %v1547_v61 = vpop.permute.xlu0 %1546 }
 0x1e4   : > { %v10329_v34 = vpop.f32.mrf.mxu1  ;;  %1868 = vrot.lane.b32.xlu0 %v1806_v7, %s13858_s0  ;;  %v1928_v12 = vrot.slane %v1799_v53, 1 }
 0x1e5   : > { %2965 = vst [vmem:[#allocation2 + $0xb0] sm:$0xff] %v2887_v15  ;;  %v3274_v4 = vpack.c.b16 %v10300_v17, %v10300_v17  ;;  %v2144_v11 = vsel %vm2130_vm7, %v2139_v13, %v2143_v3  ;;  %v2133_v15 = vrot.slane %v10305_v10, 4 }
 0x1e6   : > { %v2523_v44 = vpop.f32.mrf.mxu0 }
 0x1e7   : > { %v2524_v26 = vadd.f32 %v10140_v51, %v2523_v44  ;;  %v3299_v63 = vshll.u32 %v3274_v4, 16  ;;  %v3311_v21 = vrot.slane %v3274_v4, 1  ;;  %v3327_v47 = vshrl.u32 %v3274_v4, 16  ;;  %v1586_v10 = vpop.permute.xlu1 %1585 }
 0x1e8   : > { %v3341_v20 = vrot.slane %v3274_v4, 2  ;;  %v7402_v4 = vld [vmem:[%s9150_s22 + $0x218] sm:$0xff]  ;;  %v1925_v44 = vrot.slane %v1788_v30, 1 }
 0x1e9   : > { %v2728_v28 = vadd.f32 %v10153_v52, %v2524_v26  ;;  %v3301_v45 = vrot.slane %v3299_v63, 1  ;;  %v10342_v52 = vsel %vm893_vm2, %v3309_v48, %v3311_v21  ;;  %v3329_v19 = vrot.slane %v3327_v47, 1 }
 0x1ea   : > { %v3330_v5 = vrot.slane %v3299_v63, 2  ;;  %v10347_v18 = vsel %vm993_vm3, %v3339_v59, %v3341_v20  ;;  %7477 = vmatmul.msk.bf16.gmra.mxu1 %vm1013_vm4, %v2144_v11  ;;  %v1929_v26 = vrot.slane %v1795_v33, 2  ;;  %v729_v63 = vpack.c.bf16 %v7401_v35, %v7401_v35 }
 0x1eb   : > { %v2888_v42 = vmax.f32 %v2728_v28, 0.0  ;;  %v3302_v62 = vsel %vm793_vm0, %v3297_v6, %v3301_v45  ;;  %v1926_v6 = vrot.slane %v1790_v60, 2  ;;  %v2134_v21 = vsel %vm2130_vm7, %v2131_v50, %v2133_v15 }
 0x1ec   : > { %4103 = vmatmul.bf16.gmra.mxu3 %v3302_v62  ;;  %v3331_v48 = vor.u32 %v3330_v5, %v3329_v19  ;;  %v730_v47 = vpack.c.bf16 %v7402_v4, %v7402_v4  ;;  %v10376_v53 = vpop.f32.mrf.mxu1  ;;  %v10378_v20 = vor.u32 %v1929_v26, %v1928_v12  ;;  %v1763_v33 = vunpack.c.l.b16 %v729_v63  ;;  %v1643_v62 = vpop.permute.xlu2 %1642 }
 0x1ed   : > { %2966 = vst [vmem:[#allocation2 + $0xb8] sm:$0xff] %v2888_v42  ;;  %v1927_v7 = vor.u32 %v1926_v6, %v1925_v44  ;;  %v1682_v28 = vsel %vm1013_vm4, %v9640_v16, %v1545_v32  ;;  %v1667_v4 = vrot.slane %v9835_v55, 2 }
 0x1ee   : > { %v2526_v59 = vpop.f32.mrf.mxu0  ;;  %v10373_v30 = vsel %vm933_vm1, %v10249_v25, %v3331_v48  ;;  %v1764_v45 = vunpack.c.l.b16 %v730_v47  ;;  %v1702_v42 = vsel %vm1034_vm5, %v1682_v28, %v1584_v2  ;;  %v7404_v2 = vld [vmem:[%s9150_s22 + $0x228] sm:$0xff] }
 0x1ef   : > { %v2527_v13 = vadd.f32 %v10140_v51, %v2526_v59  ;;  %v1931_v23 = vsel %vm933_vm1, %v1927_v7, %v10378_v20  ;;  %v10395_v32 = vsel %vm1055_vm6, %v1702_v42, %v1643_v62  ;;  %v732_v62 = vpack.c.bf16 %v7404_v2, %v7404_v2 }
 0x1f0   : > { %1964 = vrot.lane.b32.xlu2 %v1931_v23, %s13862_s26  ;;  %v10385_v25 = vpack.c.b16 %v1764_v45, %v1763_v33 }
 0x1f1   : > { %v2731_v60 = vadd.f32 %v10172_v9, %v2527_v13  ;;  %2565 = vmatmul.bf16.gmra.mxu0 %v2134_v21  ;;  %v1807_v9 = vshrl.u32 %v10298_v40, 16 }
 0x1f2   : > { %v1811_v35 = vshll.u32 %v10385_v25, 16  ;;  %v1891_v6 = vrot.slane %v10385_v25, 1 }
 0x1f3   : > { %v2889_v50 = vmax.f32 %v2731_v60, 0.0  ;;  %v1809_v48 = vor.u32 %v1807_v9, %v10314_v46  ;;  %v10404_v46 = vsel %vm993_vm3, %v1665_v37, %v1667_v4  ;;  %v2137_v37 = vrot.slane %v10395_v32, 4 }
 0x1f4   : > { %v3035_v19 = vld [vmem:[#allocation2 + $0xa8] ss:$3 sm:$0xff]  ;;  %v3087_v5 = vld [vmem:[#allocation2 + $0xa9] ss:$3 sm:$0xff]  ;;  %v3165_v59 = vld [vmem:[#allocation2 + $0xaa] ss:$3 sm:$0xff]  ;;  %v10407_v63 = vpop.f32.mrf.mxu1  ;;  %v1892_v21 = vsel %vm893_vm2, %v1889_v43, %v1891_v6 }
 0x1f5   : > { %2967 = vst [vmem:[#allocation2 + $0xc0] sm:$0xff] %v2889_v50  ;;  %v3131_v11 = vmax.f32 %v3035_v19, %v3087_v5  ;;  %v1813_v13 = vrot.slane %v1811_v35, 1  ;;  %v2147_v7 = vrot.slane %v10404_v46, 4  ;;  %1909 = vrot.lane.b32.xlu1 %v1892_v21, %s13859_s25  ;;  %v7403_v43 = vld [vmem:[%s9150_s22 + $0x220] sm:$0xff]  ;;  %v1932_v23 = vrot.slane %v1807_v9, 1 }
 0x1f6   : > { %v2528_v16 = vpop.f32.mrf.mxu0  ;;  %v1933_v19 = vrot.slane %v1803_v56, 2  ;;  %v731_v5 = vpack.c.bf16 %v7403_v43, %v7403_v43  ;;  %v2138_v42 = vsel %vm2130_vm7, %v2133_v15, %v2137_v37  ;;  %v1669_v43 = vrot.slane %v9907_v22, 2 }
 0x1f7   : > { %v2529_v44 = vadd.f32 %v10140_v51, %v2528_v16  ;;  %v3209_v12 = vmax.f32 %v3131_v11, %v3165_v59  ;;  %v1814_v60 = vsel %vm793_vm0, %v1809_v48, %v1813_v13  ;;  %v1766_v59 = vunpack.c.l.b16 %v732_v62 }
 0x1f8   : > { %1870 = vrot.lane.b32.xlu0 %v1814_v60, %s13858_s0  ;;  %v10439_v11 = vor.u32 %v1933_v19, %v1932_v23 }
 0x1f9   : > { %v2733_v26 = vadd.f32 %v10204_v1, %v2529_v44  ;;  %v3235_v47 = vpack.c.bf16 %v3209_v12, %v3209_v12  ;;  %v2148_v1 = vsel %vm2130_vm7, %v2143_v3, %v2147_v7  ;;  %v1684_v44 = vsel %vm1013_vm4, %v9703_v49, %v1547_v61 }
 0x1fa   : > { %7478 = vmatmul.msk.bf16.gmra.mxu1 %vm1013_vm4, %v2148_v1  ;;  %v1935_v15 = vsel %vm933_vm1, %v10378_v20, %v10439_v11  ;;  %v1815_v49 = vshrl.u32 %v10385_v25, 16  ;;  %v1704_v20 = vsel %vm1034_vm5, %v1684_v44, %v1586_v10  ;;  %v7405_v10 = vld [vmem:[%s9150_s22 + $0x230] sm:$0xff] }
 0x1fb   : > { %v2890_v33 = vmax.f32 %v2733_v26, 0.0  ;;  %v10422_v28 = vunpack.c.l.b16 %v3235_v47  ;;  %1966 = vrot.lane.b32.xlu2 %v1935_v15, %s13862_s26  ;;  %v1645_v47 = vpop.permute.xlu2 %1644  ;;  %v7406_v15 = vld [vmem:[%s9150_s22 + $0x238] sm:$0xff] }
 0x1fc   : > { %v10444_v48 = vpop.f32.mrf.mxu1  ;;  %v1817_v1 = vor.u32 %v1815_v49, %v1813_v13  ;;  %v10473_v19 = vsel %vm1055_vm6, %v1704_v20, %v1645_v47  ;;  %v1937_v20 = vrot.slane %v1811_v35, 2 }
 0x1fd   : > { %2968 = vst [vmem:[#allocation2 + $0xc8] sm:$0xff] %v2890_v33  ;;  %v10429_v45 = vpack.c.b16 %v10422_v28, %v10300_v17  ;;  %v1765_v17 = vunpack.c.l.b16 %v731_v5  ;;  %v10478_v5 = vsel %vm993_vm3, %v1667_v4, %v1669_v43 }
 0x1fe   : > { %v2531_v50 = vpop.f32.mrf.mxu0  ;;  %v2151_v62 = vrot.slane %v10478_v5, 4  ;;  %v734_v5 = vpack.c.bf16 %v7406_v15, %v7406_v15 }
 0x1ff   : > { %v2532_v3 = vadd.f32 %v10140_v51, %v2531_v50  ;;  %v13733_v16 = vshrl.u32 %v10429_v45, 16  ;;  %v13734_v9 = vshll.u32 %v10429_v45, 16  ;;  %v10460_v26 = vpack.c.b16 %v1766_v59, %v1765_v17 }
 0x200   : > { %v2152_v17 = vsel %vm2130_vm7, %v2147_v7, %v2151_v62 }
 0x201   : > { %v2736_v56 = vadd.f32 %v10262_v31, %v2532_v3  ;;  %2570 = vmatmul.bf16.gmra.mxu0 %v2138_v42  ;;  %v10453_v12 = vrot.slane %v13733_v16, 1  ;;  %v10457_v46 = vrot.slane %v13734_v9, 2  ;;  %v1819_v60 = vshll.u32 %v10460_v26, 16 }
 0x202   : > { %v1893_v23 = vrot.slane %v10460_v26, 1 }
 0x203   : > { %v2891_v31 = vmax.f32 %v2736_v56, 0.0  ;;  %v3402_v21 = vor.u32 %v10457_v46, %v10453_v12  ;;  %v1821_v50 = vrot.slane %v1819_v60, 1 }
 0x204   : > { %v10481_v61 = vpop.f32.mrf.mxu1  ;;  %v1894_v42 = vsel %vm893_vm2, %v1891_v6, %v1893_v23 }
 0x205   : > { %2969 = vst [vmem:[#allocation2 + $0xd0] sm:$0xff] %v2891_v31  ;;  %v1822_v3 = vsel %vm793_vm0, %v1817_v1, %v1821_v50  ;;  %1911 = vrot.lane.b32.xlu1 %v1894_v42, %s13859_s25  ;;  %v1936_v31 = vrot.slane %v1815_v49, 1  ;;  %v1549_v1 = vpop.permute.xlu0 %1548 }
 0x206   : > { %v2533_v33 = vpop.f32.mrf.mxu0  ;;  %1872 = vrot.lane.b32.xlu0 %v1822_v3, %s13858_s0 }
 0x207   : > { %v2534_v2 = vadd.f32 %v10140_v51, %v2533_v33  ;;  %v733_v33 = vpack.c.bf16 %v7405_v10, %v7405_v10  ;;  %v1938_v3 = vor.u32 %v1937_v20, %v1936_v31 }
 0x209   : > { %v2738_v13 = vadd.f32 %v10295_v38, %v2534_v2  ;;  %v2141_v38 = vrot.slane %v10473_v19, 4  ;;  %v1767_v42 = vunpack.c.l.b16 %v733_v33 }
 0x20a   : > { %7479 = vmatmul.msk.bf16.gmra.mxu1 %vm1013_vm4, %v2152_v17  ;;  %v1768_v17 = vunpack.c.l.b16 %v734_v5 }
 0x20b   : > { %v2892_v4 = vmax.f32 %v2738_v13, 0.0  ;;  %v2142_v13 = vsel %vm2130_vm7, %v2137_v37, %v2141_v38 }
 0x20c   : > { %v3037_v56 = vld [vmem:[#allocation2 + $0xc0] ss:$3 sm:$0xff]  ;;  %v3089_v59 = vld [vmem:[#allocation2 + $0xc1] ss:$3 sm:$0xff]  ;;  %v3167_v47 = vld [vmem:[#allocation2 + $0xc2] ss:$3 sm:$0xff]  ;;  %v10513_v37 = vpack.c.b16 %v1768_v17, %v1767_v42 }
 0x20d   : > { %2970 = vst [vmem:[#allocation2 + $0xd8] sm:$0xff] %v2892_v4  ;;  %v3132_v44 = vmax.f32 %v3037_v56, %v3089_v59  ;;  %v10504_v4 = vpop.f32.mrf.mxu1  ;;  %v1686_v56 = vsel %vm1013_vm4, %v9756_v41, %v1549_v1  ;;  %v1588_v59 = vpop.permute.xlu1 %1587  ;;  %v3393_v41 = vrot.slane %v10429_v45, 1 }
 0x20e   : > { %v2536_v6 = vpop.f32.mrf.mxu0  ;;  %v1706_v15 = vsel %vm1034_vm5, %v1686_v56, %v1588_v59  ;;  %v1827_v31 = vshll.u32 %v10513_v37, 16  ;;  %v7407_v56 = vld [vmem:[%s9150_s22 + $0x240] sm:$0xff]  ;;  %v7408_v59 = vld [vmem:[%s9150_s22 + $0x248] sm:$0xff] }
 0x20f   : > { %v2537_v7 = vadd.f32 %v10140_v51, %v2536_v6  ;;  %v3210_v2 = vmax.f32 %v3132_v44, %v3167_v47  ;;  %v1939_v44 = vsel %vm933_vm1, %v10439_v11, %v1938_v3  ;;  %v1647_v6 = vpop.permute.xlu2 %1646  ;;  %v1671_v47 = vrot.slane %v9963_v54, 2 }
 0x210   : > { %1968 = vrot.lane.b32.xlu2 %v1939_v44, %s13862_s26  ;;  %v1829_v1 = vrot.slane %v1827_v31, 1 }
 0x211   : > { %v2741_v49 = vadd.f32 %v10329_v34, %v2537_v7  ;;  %2575 = vmatmul.bf16.gmra.mxu0 %v2142_v13  ;;  %v3236_v35 = vpack.c.bf16 %v3210_v2, %v3210_v2  ;;  %v1823_v34 = vshrl.u32 %v10460_v26, 16  ;;  %v1895_v7 = vrot.slane %v10513_v37, 1 }
 0x212   : > { %v10526_v2 = vsel %vm1055_vm6, %v1706_v15, %v1647_v6  ;;  %v10531_v5 = vsel %vm993_vm3, %v1669_v43, %v1671_v47  ;;  %v735_v15 = vpack.c.bf16 %v7407_v56, %v7407_v56  ;;  %v1551_v6 = vpop.permute.xlu0 %1550 }
 0x213   : > { %v2893_v10 = vmax.f32 %v2741_v49, 0.0  ;;  %v10511_v32 = vunpack.c.l.b16 %v3236_v35  ;;  %v1825_v11 = vor.u32 %v1823_v34, %v1821_v50  ;;  %v1896_v49 = vsel %vm893_vm2, %v1893_v23, %v1895_v7 }
 0x214   : > { %v2155_v35 = vrot.slane %v10531_v5, 4  ;;  %1913 = vrot.lane.b32.xlu1 %v1896_v49, %s13859_s25  ;;  %v1940_v23 = vrot.slane %v1823_v34, 1  ;;  %v10566_v49 = vld [vmem:[%s13863_s4] ss:$0 sm:$0xff] }
 0x215   : > { %2971 = vst [vmem:[#allocation2 + $0xe0] sm:$0xff] %v2893_v10  ;;  %v10534_v13 = vpop.f32.mrf.mxu1  ;;  %v1830_v42 = vsel %vm793_vm0, %v1825_v11, %v1829_v1  ;;  %v1941_v10 = vrot.slane %v1819_v60, 2  ;;  %v736_v11 = vpack.c.bf16 %v7408_v59, %v7408_v59  ;;  %v1590_v19 = vpop.permute.xlu1 %1589 }
 0x216   : > { %v2538_v20 = vpop.f32.mrf.mxu0  ;;  %1874 = vrot.lane.b32.xlu0 %v1830_v42, %s13858_s0  ;;  %v2156_v43 = vsel %vm2130_vm7, %v2151_v62, %v2155_v35 }
 0x217   : > { %v2539_v33 = vadd.f32 %v10140_v51, %v2538_v20  ;;  %v1770_v60 = vunpack.c.l.b16 %v736_v11 }
 0x219   : > { %v2743_v50 = vadd.f32 %v10376_v53, %v2539_v33  ;;  %v2145_v53 = vrot.slane %v10526_v2, 4  ;;  %v10558_v33 = vor.u32 %v1941_v10, %v1940_v23  ;;  %v1649_v10 = vpop.permute.xlu2 %1648 }
 0x21a   : > { %7480 = vmatmul.msk.bf16.gmra.mxu1 %vm1013_vm4, %v2156_v43  ;;  %v4025_v43 = vpop.f32.mrf.mxu2  ;;  %v1553_v5 = vpop.permute.xlu0 %1552 }
 0x21b   : > { %v2894_v17 = vmax.f32 %v2743_v50, 0.0  ;;  %v2146_v62 = vsel %vm2130_vm7, %v2141_v38, %v2145_v53  ;;  %v1769_v50 = vunpack.c.l.b16 %v735_v15  ;;  %v1943_v38 = vsel %vm933_vm1, %v1938_v3, %v10558_v33 }
 0x21c   : > { %1970 = vrot.lane.b32.xlu2 %v1943_v38, %s13862_s26  ;;  %v1690_v2 = vsel %vm1013_vm4, %v9907_v22, %v1553_v5 }
 0x21d   : > { %2972 = vst [vmem:[#allocation2 + $0xe8] sm:$0xff] %v2894_v17  ;;  %v10561_v34 = vpop.f32.mrf.mxu1  ;;  %v1688_v17 = vsel %vm1013_vm4, %v9835_v55, %v1551_v6  ;;  %v4026_v6 = vadd.f32 %v10566_v49, %v4025_v43 }
 0x21e   : > { %v2541_v44 = vpop.f32.mrf.mxu0  ;;  %v1708_v23 = vsel %vm1034_vm5, %v1688_v17, %v1590_v19 }
 0x21f   : > { %v2542_v20 = vadd.f32 %v10140_v51, %v2541_v44  ;;  %v10584_v19 = vsel %vm1055_vm6, %v1708_v23, %v1649_v10 }
 0x221   : > { %v2746_v42 = vadd.f32 %v10407_v63, %v2542_v20  ;;  %2580 = vmatmul.bf16.gmra.mxu0 %v2146_v62  ;;  %v10573_v63 = vpack.c.b16 %v1770_v60, %v1769_v50  ;;  %v1831_v20 = vshrl.u32 %v10513_v37, 16  ;;  %v1673_v62 = vrot.slane %v10035_v0, 2 }
 0x223   : > { %v2895_v56 = vmax.f32 %v2746_v42, 0.0  ;;  %v1835_v55 = vshll.u32 %v10573_v63, 16  ;;  %v1833_v38 = vor.u32 %v1831_v20, %v1829_v1  ;;  %v10594_v43 = vsel %vm993_vm3, %v1671_v47, %v1673_v62 }
 0x224   : > { %v3039_v59 = vld [vmem:[#allocation2 + $0xd8] ss:$3 sm:$0xff]  ;;  %v3091_v44 = vld [vmem:[#allocation2 + $0xd9] ss:$3 sm:$0xff]  ;;  %v3169_v11 = vld [vmem:[#allocation2 + $0xda] ss:$3 sm:$0xff] }
 0x225   : > { %2973 = vst [vmem:[#allocation2 + $0xf0] sm:$0xff] %v2895_v56  ;;  %v3133_v15 = vmax.f32 %v3039_v59, %v3091_v44  ;;  %v1837_v17 = vrot.slane %v1835_v55, 1  ;;  %v1897_v59 = vrot.slane %v10573_v63, 1  ;;  %v2159_v10 = vrot.slane %v10594_v43, 4  ;;  %v7411_v43 = vld [vmem:[%s9150_s22 + $0x260] sm:$0xff] }
 0x226   : > { %v2543_v3 = vpop.f32.mrf.mxu0  ;;  %v1839_v22 = vshrl.u32 %v10573_v63, 16 }
 0x227   : > { %v2544_v50 = vadd.f32 %v10140_v51, %v2543_v3  ;;  %v4094_v42 = vpop.f32.mrf.mxu3  ;;  %v3211_v60 = vmax.f32 %v3133_v15, %v3169_v11  ;;  %v10597_v15 = vpop.f32.mrf.mxu1  ;;  %v1838_v23 = vsel %vm793_vm0, %v1833_v38, %v1837_v17  ;;  %v1898_v47 = vsel %vm893_vm2, %v1895_v7, %v1897_v59  ;;  %v7409_v7 = vld [vmem:[%s9150_s22 + $0x250] sm:$0xff] }
 0x228   : > { %v10586_v56 = vadd.f32 %v4094_v42, %v4026_v6  ;;  %1876 = vrot.lane.b32.xlu0 %v1838_v23, %s13858_s0  ;;  %1915 = vrot.lane.b32.xlu1 %v1898_v47, %s13859_s25  ;;  %v2149_v11 = vrot.slane %v10584_v19, 4  ;;  %v7410_v42 = vld [vmem:[%s9150_s22 + $0x258] sm:$0xff]  ;;  %v1944_v38 = vrot.slane %v1831_v20, 1  ;;  %v3592_v23 = vrot.slane %v10429_v45, 2 }
 0x229   : > { %v2748_v1 = vadd.f32 %v10444_v48, %v2544_v50  ;;  %v3237_v44 = vpack.c.bf16 %v3211_v60, %v3211_v60  ;;  %v2160_v48 = vsel %vm2130_vm7, %v2155_v35, %v2159_v10 }
 0x22a   : > { %7481 = vmatmul.msk.bf16.gmra.mxu1 %vm1013_vm4, %v2160_v48  ;;  %v2150_v48 = vsel %vm2130_vm7, %v2145_v53, %v2149_v11  ;;  %v1592_v53 = vpop.permute.xlu1 %1591 }
 0x22b   : > { %v2896_v6 = vmax.f32 %v2748_v1, 0.0  ;;  %v10607_v3 = vunpack.c.l.b16 %v3237_v44  ;;  %v1945_v1 = vrot.slane %v1827_v31, 2  ;;  %v737_v44 = vpack.c.bf16 %v7409_v7, %v7409_v7 }
 0x22d   : > { %2974 = vst [vmem:[#allocation2 + $0xf8] sm:$0xff] %v2896_v6  ;;  %v10619_v50 = vpack.c.b16 %v10607_v3, %v10511_v32  ;;  %v738_v6 = vpack.c.bf16 %v7410_v42, %v7410_v42  ;;  %v10633_v16 = vor.u32 %v1945_v1, %v1944_v38  ;;  %v1771_v20 = vunpack.c.l.b16 %v737_v44 }
 0x22e   : > { %v2546_v60 = vpop.f32.mrf.mxu0 }
 0x22f   : > { %v2547_v35 = vadd.f32 %v10140_v51, %v2546_v60  ;;  %v13735_v47 = vrot.slane %v10619_v50, 2  ;;  %v13738_v31 = vshll.u32 %v10619_v50, 16  ;;  %v10640_v9 = vpop.f32.mrf.mxu1  ;;  %v1772_v42 = vunpack.c.l.b16 %v738_v6  ;;  %v1651_v6 = vpop.permute.xlu2 %1650 }
 0x230   : > { %v1947_v38 = vsel %vm933_vm1, %v10558_v33, %v10633_v16  ;;  %v13736_v1 = vrot.slane %v10619_v50, 1  ;;  %v1710_v33 = vsel %vm1034_vm5, %v1690_v2, %v1592_v53 }
 0x231   : > { %v2751_v7 = vadd.f32 %v10481_v61, %v2547_v35  ;;  %2585 = vmatmul.bf16.gmra.mxu0 %v2150_v48  ;;  %v3594_v60 = vsel %vm993_vm3, %v3592_v23, %v13735_v47  ;;  %v13737_v61 = vshrl.u32 %v10619_v50, 16  ;;  %1972 = vrot.lane.b32.xlu2 %v1947_v38, %s13862_s26  ;;  %v10651_v35 = vpack.c.b16 %v1772_v42, %v1771_v20 }
 0x232   : > { %4039 = vmatmul.bf16.gmra.mxu2 %v3594_v60  ;;  %v3404_v23 = vrot.slane %v13738_v31, 2  ;;  %v10659_v5 = vsel %vm893_vm2, %v3393_v41, %v13736_v1  ;;  %v1841_v60 = vor.u32 %v1839_v22, %v1837_v17  ;;  %v1675_v42 = vrot.slane %v10107_v27, 2 }
 0x233   : > { %v2897_v44 = vmax.f32 %v2751_v7, 0.0  ;;  %v1843_v48 = vshll.u32 %v10651_v35, 16  ;;  %v3403_v20 = vrot.slane %v13737_v61, 1  ;;  %v1899_v41 = vrot.slane %v10651_v35, 1  ;;  %v7412_v61 = vld [vmem:[%s9150_s22 + $0x268] sm:$0xff] }
 0x234   : > { %v10673_v2 = vsel %vm1055_vm6, %v1710_v33, %v1651_v6  ;;  %v10680_v17 = vsel %vm993_vm3, %v1673_v62, %v1675_v42 }
 0x235   : > { %2975 = vst [vmem:[#allocation2 + $0x100] sm:$0xff] %v2897_v44  ;;  %v1845_v47 = vrot.slane %v1843_v48, 1  ;;  %v10670_v1 = vor.u32 %v3404_v23, %v3403_v20  ;;  %v1900_v23 = vsel %vm893_vm2, %v1897_v59, %v1899_v41  ;;  %v2163_v33 = vrot.slane %v10680_v17, 4 }
 0x236   : > { %v2548_v7 = vpop.f32.mrf.mxu0  ;;  %1917 = vrot.lane.b32.xlu1 %v1900_v23, %s13859_s25  ;;  %v2153_v6 = vrot.slane %v10673_v2, 4 }
 0x237   : > { %v2549_v38 = vadd.f32 %v10140_v51, %v2548_v7  ;;  %v10683_v44 = vpop.f32.mrf.mxu1  ;;  %v1846_v7 = vsel %vm793_vm0, %v1841_v60, %v1845_v47  ;;  %v2164_v59 = vsel %vm2130_vm7, %v2159_v10, %v2163_v33  ;;  %v1555_v10 = vpop.permute.xlu0 %1554 }
 0x238   : > { %1878 = vrot.lane.b32.xlu0 %v1846_v7, %s13858_s0  ;;  %v1692_v19 = vsel %vm1013_vm4, %v9963_v54, %v1555_v10  ;;  %v1847_v10 = vshrl.u32 %v10651_v35, 16 }
 0x239   : > { %v2753_v53 = vadd.f32 %v10504_v4, %v2549_v38  ;;  %v10699_v4 = vsel %vm933_vm1, %v3402_v21, %v10670_v1  ;;  %v1948_v38 = vrot.slane %v1839_v22, 1  ;;  %v1949_v21 = vrot.slane %v1835_v55, 2 }
 0x23a   : > { %7482 = vmatmul.msk.bf16.gmra.mxu1 %vm1013_vm4, %v2164_v59  ;;  %v2154_v59 = vsel %vm2130_vm7, %v2149_v11, %v2153_v6  ;;  %v740_v22 = vpack.c.bf16 %v7412_v61, %v7412_v61  ;;  %v1594_v11 = vpop.permute.xlu1 %1593 }
 0x23b   : > { %v2898_v62 = vmax.f32 %v2753_v53, 0.0 }
 0x23c   : > { %v3041_v20 = vld [vmem:[#allocation2 + $0xf0] ss:$3 sm:$0xff]  ;;  %v3093_v60 = vld [vmem:[#allocation2 + $0xf1] ss:$3 sm:$0xff]  ;;  %v3171_v53 = vld [vmem:[#allocation2 + $0xf2] ss:$3 sm:$0xff]  ;;  %v1774_v31 = vunpack.c.l.b16 %v740_v22  ;;  %v1849_v22 = vor.u32 %v1847_v10, %v1845_v47  ;;  %v10757_v47 = vpop.f32.mrf.mxu2 }
 0x23d   : > { %2976 = vst [vmem:[#allocation2 + $0x108] sm:$0xff] %v2898_v62  ;;  %v3134_v12 = vmax.f32 %v3041_v20, %v3093_v60  ;;  %v10718_v62 = vor.u32 %v1949_v21, %v1948_v38  ;;  %v739_v20 = vpack.c.bf16 %v7411_v43, %v7411_v43  ;;  %v1653_v43 = vpop.permute.xlu2 %1652 }
 0x23e   : > { %v2551_v46 = vpop.f32.mrf.mxu0  ;;  %13865 = vst [vmem:[#allocation9_spill] sm:$0xff] %v10757_v47 }
 0x23f   : > { %v2552_v7 = vadd.f32 %v10140_v51, %v2551_v46  ;;  %v3212_v23 = vmax.f32 %v3134_v12, %v3171_v53  ;;  %v10721_v55 = vpop.f32.mrf.mxu1  ;;  %v1951_v12 = vsel %vm933_vm1, %v10633_v16, %v10718_v62  ;;  %v1773_v53 = vunpack.c.l.b16 %v739_v20 }
 0x240   : > { %1974 = vrot.lane.b32.xlu2 %v1951_v12, %s13862_s26  ;;  %v13864_v16 = vpack.c.b16 %v10511_v32, %v10422_v28 }
 0x241   : > { %v2756_v60 = vadd.f32 %v10534_v13, %v2552_v7  ;;  %2590 = vmatmul.bf16.gmra.mxu0 %v2154_v59  ;;  %v3238_v46 = vpack.c.bf16 %v3212_v23, %v3212_v23  ;;  %v10731_v13 = vpack.c.b16 %v1774_v31, %v1773_v53  ;;  %v1712_v23 = vsel %vm1034_vm5, %v1692_v19, %v1594_v11 }
 0x242   : > { %v3418_v7 = vrot.slane %v13864_v16, 6  ;;  %v10747_v28 = vsel %vm1055_vm6, %v1712_v23, %v1653_v43  ;;  %v10788_v43 = vld [vmem:[%s13860_s19] ss:$0 sm:$0xff] }
 0x243   : > { %v2899_v38 = vmax.f32 %v2756_v60, 0.0  ;;  %v10729_v61 = vunpack.c.l.b16 %v3238_v46  ;;  %v13740_v59 = vshll.u32 %v10731_v13, 16  ;;  %v13741_v60 = vrot.slane %v10731_v13, 1 }
 0x245   : > { %2977 = vst [vmem:[#allocation2 + $0x110] sm:$0xff] %v2899_v38  ;;  %v3416_v21 = vpack.c.b16 %v10729_v61, %v10607_v3  ;;  %v1853_v3 = vrot.slane %v13740_v59, 1  ;;  %v10769_v38 = vrot.slane %v1675_v42, 4  ;;  %v10783_v42 = vpop.f32.mrf.mxu3  ;;  %v4030_v59 = vpop.f32.mrf.mxu2 }
 0x246   : > { %v2553_v54 = vpop.f32.mrf.mxu0  ;;  %13866 = vst [vmem:[#allocation10_spill] sm:$0xff] %v10783_v42 }
 0x247   : > { %v2554_v31 = vadd.f32 %v10140_v51, %v2553_v54  ;;  %v10742_v20 = vrot.slane %v3416_v21, 6  ;;  %v1854_v12 = vsel %vm793_vm0, %v1849_v22, %v1853_v3  ;;  %v3604_v51 = vrot.slane %v3418_v7, 2  ;;  %v10759_v11 = vpop.f32.mrf.mxu1  ;;  %v7414_v22 = vld [vmem:[%s9150_s22 + $0x278] sm:$0xff] }
 0x248   : > { %1880 = vrot.lane.b32.xlu0 %v1854_v12, %s13858_s0  ;;  %v13742_v21 = vrot.slane %v10747_v28, 4 }
 0x249   : > { %v2758_v32 = vadd.f32 %v10561_v34, %v2554_v31  ;;  %v10753_v46 = vsel %vm2188_vm8, %v3418_v7, %v10742_v20  ;;  %v1902_v34 = vsel %vm893_vm2, %v1899_v41, %v13741_v60  ;;  %v2168_v7 = vsel %vm2130_vm7, %v2163_v33, %v10769_v38  ;;  %v1557_v41 = vpop.permute.xlu0 %1556  ;;  %v7413_v31 = vld [vmem:[%s9150_s22 + $0x270] sm:$0xff]  ;;  %s7352_s22 = sshll.u32 %s569_s20, 2 }
 0x24a   : > { %v13739_v53 = vrot.slane %v10753_v46, 2  ;;  %1919 = vrot.lane.b32.xlu1 %v1902_v34, %s13859_s25  ;;  %7483 = vmatmul.msk.bf16.gmra.mxu1 %vm1013_vm4, %v2168_v7  ;;  %v2158_v17 = vsel %vm2130_vm7, %v2153_v6, %v13742_v21  ;;  %v1952_v33 = vrot.slane %v1847_v10, 1  ;;  %v741_v12 = vpack.c.bf16 %v7413_v31, %v7413_v31  ;;  %s571_s21 = scalar_lea.vmem [#allocation3], %s7352_s22 }
 0x24b   : > { %v2900_v19 = vmax.f32 %v2758_v32, 0.0  ;;  %v1953_v32 = vrot.slane %v1843_v48, 2  ;;  %v742_v7 = vpack.c.bf16 %v7414_v22, %v7414_v22  ;;  %v1655_v48 = vpop.permute.xlu2 %1654 }
 0x24c   : > { %v10776_v16 = vsel %vm993_vm3, %v3604_v51, %v13739_v53  ;;  %v1694_v51 = vsel %vm1013_vm4, %v10035_v0, %v1557_v41  ;;  %v1775_v53 = vunpack.c.l.b16 %v741_v12 }
 0x24d   : > { %2978 = vst [vmem:[#allocation2 + $0x118] sm:$0xff] %v2900_v19  ;;  %v1596_v19 = vpop.permute.xlu1 %1595  ;;  %v1776_v6 = vunpack.c.l.b16 %v742_v7 }
 0x24e   : > { %v2556_v23 = vpop.f32.mrf.mxu0  ;;  %v1714_v10 = vsel %vm1034_vm5, %v1694_v51, %v1596_v19 }
 0x24f   : > { %v2557_v54 = vadd.f32 %v10788_v43, %v2556_v23  ;;  %v10803_v23 = vor.u32 %v1953_v32, %v1952_v33  ;;  %v10805_v60 = vpop.f32.mrf.mxu1  ;;  %v10812_v41 = vpack.c.b16 %v1776_v6, %v1775_v53  ;;  %v1855_v33 = vshrl.u32 %v10731_v13, 16 }
 0x250   : > { %v10817_v32 = vsel %vm1055_vm6, %v1714_v10, %v1655_v48  ;;  %v1984_v53 = vrot.slane %v10208_v14, 2  ;;  %v13867_v48 = vshll.u32 %v10429_v45, 16 }
 0x251   : > { %v2761_v34 = vadd.f32 %v10597_v15, %v2557_v54  ;;  %2595 = vmatmul.bf16.gmra.mxu0 %v2158_v17  ;;  %v1955_v0 = vsel %vm933_vm1, %v10718_v62, %v10803_v23  ;;  %v4031_v54 = vadd.f32 %v10566_v49, %v4030_v59  ;;  %v13743_v62 = vshll.u32 %v10812_v41, 16 }
 0x252   : > { %1976 = vrot.lane.b32.xlu2 %v1955_v0, %s13862_s26  ;;  %v13745_v59 = vrot.slane %v10216_v8, 2  ;;  %v1903_v10 = vrot.slane %v10812_v41, 1 }
 0x253   : > { %v2901_v2 = vmax.f32 %v2761_v34, 0.0  ;;  %v1857_v34 = vor.u32 %v1855_v33, %v1853_v3  ;;  %v10828_v6 = vrot.slane %v13743_v62, 1  ;;  %v13872_v62 = vrot.slane %v10619_v50, 2 }
 0x254   : > { %v3043_v31 = vld [vmem:[#allocation2 + $0x108] ss:$3 sm:$0xff]  ;;  %v3095_v21 = vld [vmem:[#allocation2 + $0x109] ss:$3 sm:$0xff]  ;;  %v3173_v17 = vld [vmem:[#allocation2 + $0x10a] ss:$3 sm:$0xff]  ;;  %v10836_v3 = vsel %vm993_vm3, %v1984_v53, %v13745_v59 }
 0x255   : > { %2979 = vst [vmem:[#allocation2 + $0x120] sm:$0xff] %v2901_v2  ;;  %v3135_v15 = vmax.f32 %v3043_v31, %v3095_v21  ;;  %v3367_v31 = vrot.slane %v13867_v48, 1  ;;  %v13744_v53 = vrot.slane %v10836_v3, 6 }
 0x256   : > { %v2558_v22 = vpop.f32.mrf.mxu0 }
 0x257   : > { %v2559_v12 = vadd.f32 %v10788_v43, %v2558_v22  ;;  %v4099_v51 = vpop.f32.mrf.mxu3  ;;  %v3213_v19 = vmax.f32 %v3135_v15, %v3173_v17  ;;  %v13747_v22 = vrot.slane %v10817_v32, 4  ;;  %v13868_v17 = vshll.u32 %v10619_v50, 16 }
 0x258   : > { %v10821_v21 = vadd.f32 %v4099_v51, %v4031_v54  ;;  %v10840_v54 = vpop.f32.mrf.mxu1  ;;  %v13869_v51 = vrot.slane %v10731_v13, 1 }
 0x259   : > { %v2763_v7 = vadd.f32 %v10640_v9, %v2559_v12  ;;  %v3239_v2 = vpack.c.bf16 %v3213_v19, %v3213_v19  ;;  %v1862_v9 = vsel %vm793_vm0, %v1857_v34, %v10828_v6  ;;  %v3372_v12 = vrot.slane %v13868_v17, 1 }
 0x25a   : > { %1882 = vrot.lane.b32.xlu0 %v1862_v9, %s13858_s0  ;;  %v1904_v19 = vsel %vm893_vm2, %v13869_v51, %v1903_v10  ;;  %v2258_v9 = vsel %vm2188_vm8, %v10769_v38, %v13744_v53  ;;  %v1956_v38 = vrot.slane %v1855_v33, 1  ;;  %v13873_v53 = vshrl.u32 %v10619_v50, 16 }
 0x25b   : > { %v2902_v0 = vmax.f32 %v2763_v7, 0.0  ;;  %v10838_v15 = vunpack.c.l.b16 %v3239_v2  ;;  %1921 = vrot.lane.b32.xlu1 %v1904_v19, %s13859_s25  ;;  %v13870_v2 = vshrl.u32 %v10429_v45, 16  ;;  %7484 = vmatmul.msk.bf16.gmra.mxu1 %vm1013_vm4, %v2258_v9  ;;  %v13871_v19 = vrot.slane %v10747_v28, 4 }
 0x25c   : > { %v3376_v59 = vor.u32 %v13873_v53, %v3372_v12 }
 0x25d   : > { %2980 = vst [vmem:[#allocation2 + $0x128] sm:$0xff] %v2902_v0  ;;  %v10854_v7 = vpack.c.b16 %v10838_v15, %v10729_v61  ;;  %v3368_v48 = vor.u32 %v3367_v31, %v13870_v2  ;;  %v1559_v61 = vpop.permute.xlu0 %1558  ;;  %v2162_v45 = vsel %vm2130_vm7, %v13871_v19, %v13747_v22  ;;  %v10884_v19 = vpop.f32.mrf.mxu2 }
 0x25e   : > { %v2561_v34 = vpop.f32.mrf.mxu0  ;;  %13874 = vst [vmem:[#allocation11_spill] sm:$0xff] %v10884_v19 }
 0x25f   : > { %v2562_v17 = vadd.f32 %v10788_v43, %v2561_v34  ;;  %v13746_v51 = vrot.slane %v10854_v7, 2  ;;  %v3378_v0 = vshll.u32 %v10854_v7, 16  ;;  %v3373_v31 = vsel %vm793_vm0, %v3368_v48, %v3372_v12 }
 0x260   : > { %v13748_v2 = vshrl.u32 %v10854_v7, 16  ;;  %v13875_v48 = vshll.u32 %v10731_v13, 16  ;;  %v3595_v53 = vrot.slane %v3373_v31, 2  ;;  %v3601_v31 = vrot.slane %v10699_v4, 2 }
 0x261   : > { %v2766_v34 = vadd.f32 %v10683_v44, %v2562_v17  ;;  %2600 = vmatmul.bf16.gmra.mxu0 %v2162_v45  ;;  %v3608_v9 = vsel %vm993_vm3, %v13872_v62, %v13746_v51  ;;  %v10882_v28 = vrot.slane %v3378_v0, 1  ;;  %v13752_v44 = vrot.slane %v10854_v7, 1  ;;  %v1598_v51 = vpop.permute.xlu1 %1597 }
 0x262   : > { %4044 = vmatmul.bf16.gmra.mxu2 %v3608_v9  ;;  %v1957_v33 = vrot.slane %v13875_v48, 2  ;;  %v3407_v17 = vrot.slane %v13748_v2, 1  ;;  %v3408_v45 = vrot.slane %v3378_v0, 2  ;;  %v1696_v62 = vsel %vm1013_vm4, %v10107_v27, %v1559_v61  ;;  %v10897_v9 = vpop.f32.mrf.mxu1 }
 0x263   : > { %v2903_v22 = vmax.f32 %v2766_v34, 0.0  ;;  %v10895_v12 = vsel %vm793_vm0, %v3376_v59, %v10882_v28  ;;  %v13876_v2 = vrot.slane %v10619_v50, 1  ;;  %1923 = vrot.lane.b32.xlu1 %v1903_v10, %s13859_s25  ;;  %v3598_v59 = vrot.slane %v10659_v5, 2  ;;  %v1657_v34 = vpop.permute.xlu2 %1656  ;;  %v10924_v5 = vpop.f32.mrf.mxu3  ;;  %s8955_s25 = scalar_lea.hbm %s13720_s18, 8 }
 0x264   : > { %v13751_v48 = vrot.slane %v10895_v12, 2  ;;  %v1958_v19 = vor.u32 %v1957_v33, %v1956_v38  ;;  %v10907_v27 = vor.u32 %v3408_v45, %v3407_v17  ;;  %v1716_v38 = vsel %vm1034_vm5, %v1696_v62, %v1598_v51  ;;  %13877 = vst [vmem:[#allocation12_spill] sm:$0xff] %v10924_v5 }
 0x265   : > { %v10905_v0 = vsel %vm893_vm2, %v13876_v2, %v13752_v44  ;;  %2981 = vst [vmem:[#allocation2 + $0x130] sm:$0xff] %v2903_v22  ;;  %v1863_v22 = vshrl.u32 %v10812_v41, 16  ;;  %v1987_v17 = vrot.slane %v10298_v40, 2 }
 0x266   : > { %v13749_v61 = vrot.slane %v10905_v0, 2  ;;  %v2563_v33 = vpop.f32.mrf.mxu0  ;;  %v3597_v50 = vsel %vm993_vm3, %v3595_v53, %v13751_v48  ;;  %v1959_v2 = vsel %vm933_vm1, %v10803_v23, %v1958_v19  ;;  %v10922_v10 = vsel %vm933_vm1, %v10670_v1, %v10907_v27 }
 0x267   : > { %v2564_v4 = vadd.f32 %v10788_v43, %v2563_v33  ;;  %4108 = vmatmul.bf16.gmra.mxu3 %v3597_v50  ;;  %1978 = vrot.lane.b32.xlu2 %v1959_v2, %s13862_s26  ;;  %v13750_v23 = vrot.slane %v10922_v10, 2  ;;  %v10937_v1 = vsel %vm1055_vm6, %v1716_v38, %v1657_v34  ;;  %v1865_v62 = vor.u32 %v1863_v22, %v10828_v6  ;;  %v4035_v50 = vpop.f32.mrf.mxu2 }
 0x268   : > { %v10932_v51 = vsel %vm993_vm3, %v3598_v59, %v13749_v61  ;;  %v13878_v33 = vrot.slane %v10216_v8, 2 }
 0x269   : > { %v2768_v45 = vadd.f32 %v10721_v55, %v2564_v4  ;;  %v10944_v53 = vsel %vm993_vm3, %v3601_v31, %v13750_v23  ;;  %1884 = vrot.lane.b32.xlu0 %v1865_v62, %s13858_s0  ;;  %v1867_v31 = vpop.permute.xlu0 %1866  ;;  %v1960_v62 = vrot.slane %v1863_v22, 1  ;;  %v13882_v22 = vshll.u32 %v10812_v41, 16 }
 0x26a   : > { %v10949_v59 = vsel %vm993_vm3, %v13878_v33, %v1987_v17  ;;  %v10951_v61 = vpop.f32.mrf.mxu1  ;;  %v13879_v33 = vrot.slane %v10836_v3, 6  ;;  %v13880_v3 = vrot.slane %v10937_v1, 4 }
 0x26b   : > { %v2904_v2 = vmax.f32 %v2768_v45, 0.0  ;;  %v13753_v55 = vrot.slane %v10949_v59, 6  ;;  %v4036_v45 = vadd.f32 %v10566_v49, %v4035_v50  ;;  %v1961_v50 = vrot.slane %v13882_v22, 2 }
 0x26c   : > { %v3045_v38 = vld [vmem:[#allocation2 + $0x120] ss:$3 sm:$0xff]  ;;  %v3097_v34 = vld [vmem:[#allocation2 + $0x121] ss:$3 sm:$0xff]  ;;  %v3175_v44 = vld [vmem:[#allocation2 + $0x122] ss:$3 sm:$0xff] }
 0x26d   : > { %2982 = vst [vmem:[#allocation2 + $0x138] sm:$0xff] %v2904_v2  ;;  %v3136_v4 = vmax.f32 %v3045_v38, %v3097_v34  ;;  %v2194_v23 = vsel %vm2188_vm8, %v13879_v33, %v13753_v55  ;;  %v2004_v2 = vsel %vm1013_vm4, %v10208_v14, %v1867_v31  ;;  %v1906_v38 = vpop.permute.xlu1 %1905  ;;  %v13881_v33 = vrot.slane %v10817_v32, 4  ;;  %v1965_v14 = vpop.permute.xlu2 %1964 }
 0x26e   : > { %v2566_v48 = vpop.f32.mrf.mxu0  ;;  %7485 = vmatmul.msk.bf16.gmra.mxu1 %vm1013_vm4, %v2194_v23  ;;  %v1962_v23 = vor.u32 %v1961_v50, %v1960_v62  ;;  %v13884_v50 = vrot.slane %v10854_v7, 2 }
 0x26f   : > { %v2567_v5 = vadd.f32 %v10788_v43, %v2566_v48  ;;  %v4104_v42 = vpop.f32.mrf.mxu3  ;;  %v3214_v6 = vmax.f32 %v3136_v4, %v3175_v44  ;;  %v2166_v49 = vsel %vm2130_vm7, %v13881_v33, %v13880_v3  ;;  %v2024_v4 = vsel %vm1034_vm5, %v2004_v2, %v1906_v38 }
 0x270   : > { %v10966_v34 = vadd.f32 %v4104_v42, %v4036_v45  ;;  %v1963_v55 = vsel %vm933_vm1, %v1958_v19, %v1962_v23  ;;  %v13883_v19 = vshrl.u32 %v10854_v7, 16 }
 0x271   : > { %v2771_v48 = vadd.f32 %v10759_v11, %v2567_v5  ;;  %2605 = vmatmul.bf16.gmra.mxu0 %v2166_v49  ;;  %v3240_v44 = vpack.c.bf16 %v3214_v6, %v3214_v6  ;;  %1980 = vrot.lane.b32.xlu2 %v1963_v55, %s13862_s26  ;;  %v10985_v11 = vsel %vm1055_vm6, %v2024_v4, %v1965_v14  ;;  %v1989_v55 = vrot.slane %v10385_v25, 2 }
 0x272   : > { %v10977_v45 = vpop.f32.mrf.mxu1  ;;  %v3384_v33 = vor.u32 %v13883_v19, %v10882_v28 }
 0x273   : > { %v2905_v31 = vmax.f32 %v2771_v48, 0.0  ;;  %v3357_v42 = vunpack.c.l.b16 %v3240_v44  ;;  %v1990_v14 = vsel %vm993_vm3, %v1987_v17, %v1989_v55 }
 0x274   : > { %v2197_v19 = vrot.slane %v1990_v14, 6  ;;  %v13888_v14 = vrot.slane %v10905_v0, 2 }
 0x275   : > { %2983 = vst [vmem:[#allocation2 + $0x140] sm:$0xff] %v2905_v31  ;;  %v10980_v32 = vpack.c.b16 %v3357_v42, %v3357_v42  ;;  %v3417_v3 = vpack.c.b16 %v3357_v42, %v10838_v15  ;;  %v13885_v31 = vrot.slane %v10854_v7, 1  ;;  %v13886_v7 = vrot.slane %v10949_v59, 6 }
 0x276   : > { %v2568_v5 = vpop.f32.mrf.mxu0 }
 0x277   : > { %v2569_v6 = vadd.f32 %v10788_v43, %v2568_v5  ;;  %v3617_v62 = vrot.slane %v10980_v32, 2  ;;  %v3386_v2 = vshll.u32 %v10980_v32, 16  ;;  %v3390_v38 = vshrl.u32 %v10980_v32, 16 }
 0x278   : > { %v3398_v15 = vrot.slane %v10980_v32, 1  ;;  %v3421_v49 = vrot.slane %v3417_v3, 6  ;;  %v2189_v32 = vrot.slane %v10985_v11, 6 }
 0x279   : > { %v2773_v22 = vadd.f32 %v10805_v60, %v2569_v6  ;;  %v3618_v48 = vsel %vm993_vm3, %v13884_v50, %v3617_v62  ;;  %v3388_v44 = vrot.slane %v3386_v2, 1  ;;  %v3411_v4 = vrot.slane %v3390_v38, 1  ;;  %1982 = vrot.lane.b32.xlu2 %v1962_v23, %s13862_s26  ;;  %s7284_s26 = scalar_lea.hbm %s13720_s18, %s9143_s24 }
 0x27a   : > { %4049 = vmatmul.bf16.gmra.mxu2 %v3618_v48  ;;  %v3399_v28 = vsel %vm893_vm2, %v13885_v31, %v3398_v15  ;;  %v3621_v42 = vrot.slane %v3398_v15, 2  ;;  %v3412_v5 = vrot.slane %v3386_v2, 2  ;;  %v11006_v6 = vpop.f32.mrf.mxu1  ;;  %v3422_v17 = vsel %vm2188_vm8, %v10742_v20, %v3421_v49 }
 0x27b   : > { %v2906_v3 = vmax.f32 %v2773_v22, 0.0  ;;  %v3389_v60 = vsel %vm793_vm0, %v3384_v33, %v3388_v44  ;;  %v3611_v50 = vrot.slane %v3399_v28, 2  ;;  %v2198_v15 = vsel %vm2188_vm8, %v13886_v7, %v2197_v19 }
 0x27c   : > { %v3609_v62 = vrot.slane %v3389_v60, 2  ;;  %v3413_v47 = vor.u32 %v3412_v5, %v3411_v4  ;;  %v3615_v11 = vrot.slane %v3422_v17, 2  ;;  %v3625_v2 = vrot.slane %v3421_v49, 2  ;;  %v1869_v49 = vpop.permute.xlu0 %1868 }
 0x27d   : > { %2984 = vst [vmem:[#allocation2 + $0x148] sm:$0xff] %v2906_v3  ;;  %v13887_v33 = vrot.slane %v10895_v12, 2  ;;  %v11020_v4 = vsel %vm993_vm3, %v13888_v14, %v3611_v50  ;;  %v11023_v20 = vsel %vm993_vm3, %v3611_v50, %v3621_v42  ;;  %v13889_v31 = vrot.slane %v10937_v1, 4  ;;  %v1908_v50 = vpop.permute.xlu1 %1907 }
 0x27e   : > { %v2571_v22 = vpop.f32.mrf.mxu0  ;;  %7486 = vmatmul.msk.bf16.gmra.mxu1 %vm1013_vm4, %v2198_v15  ;;  %v3623_v23 = vrot.slane %v3413_v47, 2  ;;  %v3414_v0 = vsel %vm933_vm1, %v10907_v27, %v3413_v47  ;;  %v13890_v28 = vrot.slane %v10753_v46, 2  ;;  %v11038_v42 = vsel %vm993_vm3, %v3615_v11, %v3625_v2  ;;  %v1967_v15 = vpop.permute.xlu2 %1966 }
 0x27f   : > { %v3610_v48 = vsel %vm993_vm3, %v13887_v33, %v3609_v62  ;;  %v2572_v59 = vadd.f32 %v10788_v43, %v2571_v22  ;;  %v2254_v12 = vsel %vm2188_vm8, %v13889_v31, %v2189_v32  ;;  %v3613_v60 = vrot.slane %v3414_v0, 2 }
 0x280   : > { %4113 = vmatmul.bf16.gmra.mxu3 %v3610_v48  ;;  %v11035_v5 = vsel %vm993_vm3, %v13890_v28, %v3615_v11  ;;  %v2006_v1 = vsel %vm1013_vm4, %v10216_v8, %v1869_v49  ;;  %v13891_v47 = vrot.slane %v10922_v10, 2  ;;  %v3392_v2 = vor.u32 %v3390_v38, %v3388_v44 }
 0x281   : > { %v2776_v3 = vadd.f32 %v10840_v54, %v2572_v59  ;;  %2610 = vmatmul.bf16.gmra.mxu0 %v2254_v12  ;;  %v11051_v27 = vsel %vm993_vm3, %v3613_v60, %v3623_v23  ;;  %v2026_v54 = vsel %vm1034_vm5, %v2006_v1, %v1908_v50  ;;  %v1991_v22 = vrot.slane %v10460_v26, 2 }
 0x282   : > { %v11043_v7 = vpop.f32.mrf.mxu1  ;;  %v11048_v46 = vsel %vm993_vm3, %v13891_v47, %v3613_v60  ;;  %v2046_v33 = vsel %vm1055_vm6, %v2026_v54, %v1967_v15  ;;  %v3619_v48 = vrot.slane %v3392_v2, 2 }
 0x283   : > { %v2907_v17 = vmax.f32 %v2776_v3, 0.0  ;;  %v1992_v14 = vsel %vm993_vm3, %v1989_v55, %v1991_v22  ;;  %v2191_v31 = vrot.slane %v2046_v33, 6 }
 0x284   : > { %v2201_v49 = vrot.slane %v1992_v14, 6  ;;  %v3620_v44 = vsel %vm993_vm3, %v3609_v62, %v3619_v48  ;;  %v3047_v50 = vld [vmem:[#allocation2 + $0x138] ss:$3 sm:$0xff]  ;;  %v3099_v62 = vld [vmem:[#allocation2 + $0x139] ss:$3 sm:$0xff] }
 0x285   : > { %2985 = vst [vmem:[#allocation2 + $0x150] sm:$0xff] %v2907_v17  ;;  %v2192_v28 = vsel %vm2188_vm8, %v2189_v32, %v2191_v31  ;;  %v1910_v60 = vpop.permute.xlu1 %1909  ;;  %v3137_v32 = vmax.f32 %v3047_v50, %v3099_v62  ;;  %v3177_v2 = vld [vmem:[#allocation2 + $0x13a] ss:$3 sm:$0xff] }
 0x286   : > { %v2573_v11 = vpop.f32.mrf.mxu0  ;;  %v2202_v12 = vsel %vm2188_vm8, %v2197_v19, %v2201_v49  ;;  %v1969_v47 = vpop.permute.xlu2 %1968 }
 0x287   : > { %v2574_v8 = vadd.f32 %v10788_v43, %v2573_v11 }
 0x289   : > { %v2778_v10 = vadd.f32 %v10897_v9, %v2574_v8  ;;  %v1871_v9 = vpop.permute.xlu0 %1870 }
 0x28a   : > { %v11059_v23 = vpop.f32.mrf.mxu1  ;;  %v2008_v3 = vsel %vm1013_vm4, %v10298_v40, %v1871_v9 }
 0x28b   : > { %v2908_v59 = vmax.f32 %v2778_v10, 0.0  ;;  %v2028_v17 = vsel %vm1034_vm5, %v2008_v3, %v1910_v60  ;;  %v3215_v10 = vmax.f32 %v3137_v32, %v3177_v2 }
 0x28c   : > { %v2048_v11 = vsel %vm1055_vm6, %v2028_v17, %v1969_v47 }
 0x28d   : > { %2986 = vst [vmem:[#allocation2 + $0x158] sm:$0xff] %v2908_v59  ;;  %v2195_v59 = vrot.slane %v2048_v11, 6  ;;  %v3241_v3 = vpack.c.bf16 %v3215_v10, %v3215_v10  ;;  %v1912_v17 = vpop.permute.xlu1 %1911 }
 0x28e   : > { %v2576_v38 = vpop.f32.mrf.mxu0  ;;  %7487 = vmatmul.msk.bf16.gmra.mxu1 %vm1013_vm4, %v2202_v12 }
 0x28f   : > { %v2577_v0 = vadd.f32 %v10788_v43, %v2576_v38  ;;  %v2196_v60 = vsel %vm2188_vm8, %v2191_v31, %v2195_v59  ;;  %v3429_v47 = vunpack.c.l.b16 %v3241_v3 }
 0x290   : > { %4118 = vmatmul.bf16.gmra.mxu3 %v3620_v44 }
 0x291   : > { %v2781_v55 = vadd.f32 %v10951_v61, %v2577_v0  ;;  %2615 = vmatmul.bf16.gmra.mxu0 %v2192_v28  ;;  %v1993_v61 = vrot.slane %v10513_v37, 2 }
 0x292   : > { %v11069_v19 = vpop.f32.mrf.mxu1 }
 0x293   : > { %v2909_v1 = vmax.f32 %v2781_v55, 0.0  ;;  %v1994_v8 = vsel %vm993_vm3, %v1991_v22, %v1993_v61  ;;  %v1873_v22 = vpop.permute.xlu0 %1872 }
 0x294   : > { %v2205_v14 = vrot.slane %v1994_v8, 6  ;;  %v2010_v62 = vsel %vm1013_vm4, %v10385_v25, %v1873_v22  ;;  %v1995_v8 = vrot.slane %v10573_v63, 2 }
 0x295   : > { %2987 = vst [vmem:[#allocation2 + $0x160] sm:$0xff] %v2909_v1  ;;  %v2030_v11 = vsel %vm1034_vm5, %v2010_v62, %v1912_v17  ;;  %v1914_v62 = vpop.permute.xlu1 %1913 }
 0x296   : > { %v2578_v54 = vpop.f32.mrf.mxu0  ;;  %v2206_v0 = vsel %vm2188_vm8, %v2201_v49, %v2205_v14 }
 0x297   : > { %v2579_v15 = vadd.f32 %v10788_v43, %v2578_v54 }
 0x299   : > { %v2783_v40 = vadd.f32 %v10977_v45, %v2579_v15 }
 0x29a   : > { %v11077_v48 = vpop.f32.mrf.mxu1 }
 0x29b   : > { %v2910_v33 = vmax.f32 %v2783_v40, 0.0  ;;  %v1971_v40 = vpop.permute.xlu2 %1970 }
 0x29c   : > { %v3049_v12 = vld [vmem:[#allocation2 + $0x150] ss:$3 sm:$0xff]  ;;  %v3101_v38 = vld [vmem:[#allocation2 + $0x151] ss:$3 sm:$0xff]  ;;  %v3179_v28 = vld [vmem:[#allocation2 + $0x152] ss:$3 sm:$0xff] }
 0x29d   : > { %2988 = vst [vmem:[#allocation2 + $0x168] sm:$0xff] %v2910_v33  ;;  %v3138_v44 = vmax.f32 %v3049_v12, %v3101_v38  ;;  %v2050_v33 = vsel %vm1055_vm6, %v2030_v11, %v1971_v40  ;;  %v1997_v40 = vrot.slane %v10651_v35, 2 }
 0x29e   : > { %v2581_v9 = vpop.f32.mrf.mxu0  ;;  %7488 = vmatmul.msk.bf16.gmra.mxu1 %vm1013_vm4, %v2206_v0 }
 0x29f   : > { %v2582_v55 = vadd.f32 %v10788_v43, %v2581_v9  ;;  %v3216_v45 = vmax.f32 %v3138_v44, %v3179_v28  ;;  %v1996_v44 = vsel %vm993_vm3, %v1993_v61, %v1995_v8 }
 0x2a0   : > { %v2209_v28 = vrot.slane %v1996_v44, 6 }
 0x2a1   : > { %v2786_v1 = vadd.f32 %v11006_v6, %v2582_v55  ;;  %2620 = vmatmul.bf16.gmra.mxu0 %v2196_v60  ;;  %v3242_v50 = vpack.c.bf16 %v3216_v45, %v3216_v45  ;;  %v2199_v45 = vrot.slane %v2050_v33, 6  ;;  %v1875_v60 = vpop.permute.xlu0 %1874 }
 0x2a2   : > { %v11086_v15 = vpop.f32.mrf.mxu1 }
 0x2a3   : > { %v2911_v49 = vmax.f32 %v2786_v1, 0.0  ;;  %v3430_v54 = vunpack.c.l.b16 %v3242_v50  ;;  %v2200_v1 = vsel %vm2188_vm8, %v2195_v59, %v2199_v45  ;;  %v2012_v50 = vsel %vm1013_vm4, %v10460_v26, %v1875_v60  ;;  %v1916_v60 = vpop.permute.xlu1 %1915 }
 0x2a5   : > { %2989 = vst [vmem:[#allocation2 + $0x170] sm:$0xff] %v2911_v49  ;;  %v11088_v32 = vpack.c.b16 %v3430_v54, %v3429_v47  ;;  %v1973_v47 = vpop.permute.xlu2 %1972 }
 0x2a6   : > { %v2583_v31 = vpop.f32.mrf.mxu0 }
 0x2a7   : > { %v2584_v6 = vadd.f32 %v10788_v43, %v2583_v31  ;;  %4054 = vmatmul.bf16.gmra.mxu2 %v11088_v32  ;;  %v3445_v2 = vshrl.u32 %v11088_v32, 16  ;;  %v3447_v25 = vshll.u32 %v11088_v32, 16  ;;  %v1998_v31 = vsel %vm993_vm3, %v1995_v8, %v1997_v40 }
 0x2a8   : > { %v2213_v33 = vrot.slane %v1998_v31, 6 }
 0x2a9   : > { %v2788_v10 = vadd.f32 %v11043_v7, %v2584_v6  ;;  %v11100_v12 = vrot.slane %v3445_v2, 1  ;;  %v11104_v38 = vrot.slane %v3447_v25, 2  ;;  %v2210_v7 = vsel %vm2188_vm8, %v2205_v14, %v2209_v28 }
 0x2aa   : > { %v11107_v9 = vpop.f32.mrf.mxu1  ;;  %v2032_v14 = vsel %vm1034_vm5, %v2012_v50, %v1914_v62  ;;  %v2214_v44 = vsel %vm2188_vm8, %v2209_v28, %v2213_v33 }
 0x2ab   : > { %v2912_v0 = vmax.f32 %v2788_v10, 0.0  ;;  %v3487_v55 = vor.u32 %v11104_v38, %v11100_v12  ;;  %v2052_v59 = vsel %vm1055_vm6, %v2032_v14, %v1973_v47 }
 0x2ac   : > { %v2203_v10 = vrot.slane %v2052_v59, 6 }
 0x2ad   : > { %2990 = vst [vmem:[#allocation2 + $0x178] sm:$0xff] %v2912_v0 }
 0x2ae   : > { %v2586_v3 = vpop.f32.mrf.mxu0  ;;  %7489 = vmatmul.msk.bf16.gmra.mxu1 %vm1013_vm4, %v2210_v7 }
 0x2af   : > { %v2587_v22 = vadd.f32 %v10788_v43, %v2586_v3  ;;  %v1877_v3 = vpop.permute.xlu0 %1876 }
 0x2b0   : > { %v2014_v8 = vsel %vm1013_vm4, %v10513_v37, %v1877_v3 }
 0x2b1   : > { %v2791_v61 = vadd.f32 %v11059_v23, %v2587_v22  ;;  %2625 = vmatmul.bf16.gmra.mxu0 %v2200_v1  ;;  %v2204_v22 = vsel %vm2188_vm8, %v2199_v45, %v2203_v10  ;;  %v2034_v62 = vsel %vm1034_vm5, %v2014_v8, %v1916_v60 }
 0x2b2   : > { %v11118_v49 = vpop.f32.mrf.mxu1 }
 0x2b3   : > { %v2913_v17 = vmax.f32 %v2791_v61, 0.0 }
 0x2b4   : > { %v3051_v50 = vld [vmem:[#allocation2 + $0x168] ss:$3 sm:$0xff]  ;;  %v3103_v28 = vld [vmem:[#allocation2 + $0x169] ss:$3 sm:$0xff] }
 0x2b5   : > { %2991 = vst [vmem:[#allocation2 + $0x180] sm:$0xff] %v2913_v17  ;;  %v1975_v17 = vpop.permute.xlu2 %1974  ;;  %v3139_v45 = vmax.f32 %v3051_v50, %v3103_v28 }
 0x2b6   : > { %v2588_v54 = vpop.f32.mrf.mxu0 }
 0x2b7   : > { %v2589_v11 = vadd.f32 %v10788_v43, %v2588_v54  ;;  %v11141_v54 = vsel %vm1055_vm6, %v2034_v62, %v1975_v17  ;;  %v1879_v60 = vpop.permute.xlu0 %1878 }
 0x2b9   : > { %v2793_v23 = vadd.f32 %v11069_v19, %v2589_v11  ;;  %v3181_v11 = vld [vmem:[#allocation2 + $0x16a] ss:$3 sm:$0xff] }
 0x2ba   : > { %v11126_v6 = vpop.f32.mrf.mxu1  ;;  %v3217_v31 = vmax.f32 %v3139_v45, %v3181_v11 }
 0x2bb   : > { %v2914_v26 = vmax.f32 %v2793_v23, 0.0 }
 0x2bc   : > { %v3243_v50 = vpack.c.bf16 %v3217_v31, %v3217_v31 }
 0x2bd   : > { %2992 = vst [vmem:[#allocation2 + $0x188] sm:$0xff] %v2914_v26  ;;  %v1977_v31 = vpop.permute.xlu2 %1976 }
 0x2be   : > { %v2591_v0 = vpop.f32.mrf.mxu0  ;;  %7490 = vmatmul.msk.bf16.gmra.mxu1 %vm1013_vm4, %v2214_v44  ;;  %v3431_v45 = vunpack.c.l.b16 %v3243_v50 }
 0x2bf   : > { %v2592_v7 = vadd.f32 %v10788_v43, %v2591_v0  ;;  %v2207_v0 = vrot.slane %v11141_v54, 6 }
 0x2c1   : > { %v2796_v19 = vadd.f32 %v11077_v48, %v2592_v7  ;;  %2630 = vmatmul.bf16.gmra.mxu0 %v2204_v22  ;;  %v1999_v48 = vrot.slane %v10731_v13, 2  ;;  %v2208_v28 = vsel %vm2188_vm8, %v2203_v10, %v2207_v0 }
 0x2c2   : > { %v11135_v61 = vpop.f32.mrf.mxu1 }
 0x2c3   : > { %v2915_v1 = vmax.f32 %v2796_v19, 0.0  ;;  %v11145_v59 = vsel %vm993_vm3, %v1997_v40, %v1999_v48 }
 0x2c4   : > { %v2217_v44 = vrot.slane %v11145_v59, 6  ;;  %v3449_v59 = vrot.slane %v3447_v25, 1 }
 0x2c5   : > { %2993 = vst [vmem:[#allocation2 + $0x190] sm:$0xff] %v2915_v1 }
 0x2c6   : > { %v2593_v14 = vpop.f32.mrf.mxu0  ;;  %v2218_v19 = vsel %vm2188_vm8, %v2213_v33, %v2217_v44  ;;  %v2016_v33 = vsel %vm1013_vm4, %v10573_v63, %v1879_v60  ;;  %v3505_v63 = vrot.slane %v11088_v32, 2  ;;  %v2001_v60 = vrot.slane %v10812_v41, 2 }
 0x2c7   : > { %v2594_v47 = vadd.f32 %v10788_v43, %v2593_v14  ;;  %v1918_v14 = vpop.permute.xlu1 %1917 }
 0x2c9   : > { %v2798_v37 = vadd.f32 %v11086_v15, %v2594_v47 }
 0x2ca   : > { %v11147_v26 = vpop.f32.mrf.mxu1 }
 0x2cb   : > { %v2916_v23 = vmax.f32 %v2798_v37, 0.0 }
 0x2cc   : > { %v3053_v7 = vld [vmem:[#allocation2 + $0x180] ss:$3 sm:$0xff]  ;;  %v3105_v3 = vld [vmem:[#allocation2 + $0x181] ss:$3 sm:$0xff]  ;;  %v3183_v15 = vld [vmem:[#allocation2 + $0x182] ss:$3 sm:$0xff] }
 0x2cd   : > { %2994 = vst [vmem:[#allocation2 + $0x198] sm:$0xff] %v2916_v23  ;;  %v3140_v22 = vmax.f32 %v3053_v7, %v3105_v3  ;;  %v2036_v23 = vsel %vm1034_vm5, %v2016_v33, %v1918_v14  ;;  %v3475_v7 = vrot.slane %v11088_v32, 1 }
 0x2ce   : > { %v2596_v8 = vpop.f32.mrf.mxu0  ;;  %7491 = vmatmul.msk.bf16.gmra.mxu1 %vm1013_vm4, %v2218_v19 }
 0x2cf   : > { %v2597_v40 = vadd.f32 %v10788_v43, %v2596_v8  ;;  %v3218_v1 = vmax.f32 %v3140_v22, %v3183_v15  ;;  %v2056_v8 = vsel %vm1055_vm6, %v2036_v23, %v1977_v31  ;;  %v3450_v15 = vor.u32 %v3449_v59, %v3445_v2  ;;  %v11201_v59 = vpop.f32.mrf.mxu2  ;;  %v1920_v38 = vpop.permute.xlu1 %1919 }
 0x2d0   : > { %13893 = vst [vmem:[#allocation14_spill] sm:$0xff] %v11201_v59 }
 0x2d1   : > { %v2801_v62 = vadd.f32 %v11107_v9, %v2597_v40  ;;  %2635 = vmatmul.bf16.gmra.mxu0 %v2208_v28  ;;  %v3244_v17 = vpack.c.bf16 %v3218_v1, %v3218_v1 }
 0x2d2   : > { %v11160_v11 = vpop.f32.mrf.mxu1 }
 0x2d3   : > { %v2917_v47 = vmax.f32 %v2801_v62, 0.0  ;;  %v3432_v37 = vunpack.c.l.b16 %v3244_v17  ;;  %v2002_v17 = vsel %vm993_vm3, %v1999_v48, %v2001_v60 }
 0x2d4   : > { %v2221_v14 = vrot.slane %v2002_v17, 6 }
 0x2d5   : > { %2995 = vst [vmem:[#allocation2 + $0x1a0] sm:$0xff] %v2917_v47  ;;  %v11165_v10 = vpack.c.b16 %v3432_v37, %v3431_v45  ;;  %v2211_v47 = vrot.slane %v2056_v8, 6 }
 0x2d6   : > { %v2598_v9 = vpop.f32.mrf.mxu0  ;;  %v2222_v48 = vsel %vm2188_vm8, %v2217_v44, %v2221_v14  ;;  %v11217_v44 = vpop.f32.mrf.mxu3 }
 0x2d7   : > { %v2599_v3 = vadd.f32 %v10788_v43, %v2598_v9  ;;  %4059 = vmatmul.bf16.gmra.mxu2 %v11165_v10  ;;  %v3452_v22 = vshll.u32 %v11165_v10, 16  ;;  %v3456_v19 = vshrl.u32 %v11165_v10, 16  ;;  %v3476_v25 = vrot.slane %v11165_v10, 1  ;;  %13894 = vst [vmem:[#allocation15_spill] sm:$0xff] %v11217_v44  ;;  %v4040_v8 = vpop.f32.mrf.mxu2 }
 0x2d8   : > { %v3506_v40 = vrot.slane %v11165_v10, 2  ;;  %v11306_v10 = vld [vmem:[%s13860_s19] ss:$0 sm:$0xff] }
 0x2d9   : > { %v2803_v1 = vadd.f32 %v11118_v49, %v2599_v3  ;;  %v11180_v50 = vrot.slane %v3452_v22, 1  ;;  %v11185_v28 = vsel %vm893_vm2, %v3475_v7, %v3476_v25  ;;  %v3488_v62 = vrot.slane %v3456_v19, 1  ;;  %v1881_v7 = vpop.permute.xlu0 %1880 }
 0x2da   : > { %v3489_v32 = vrot.slane %v3452_v22, 2  ;;  %v11193_v2 = vsel %vm993_vm3, %v3505_v63, %v3506_v40  ;;  %v11197_v45 = vpop.f32.mrf.mxu1  ;;  %v2212_v63 = vsel %vm2188_vm8, %v2207_v0, %v2211_v47  ;;  %v2018_v12 = vsel %vm1013_vm4, %v10651_v35, %v1881_v7 }
 0x2db   : > { %13892 = vst [vmem:[#allocation13_spill] sm:$0xff] %v11193_v2  ;;  %v2918_v33 = vmax.f32 %v2803_v1, 0.0  ;;  %v3455_v49 = vsel %vm793_vm0, %v3450_v15, %v11180_v50  ;;  %v2038_v15 = vsel %vm1034_vm5, %v2018_v12, %v1920_v38  ;;  %v1979_v1 = vpop.permute.xlu2 %1978 }
 0x2dc   : > { %4123 = vmatmul.bf16.gmra.mxu3 %v3455_v49  ;;  %v11199_v37 = vor.u32 %v3489_v32, %v3488_v62  ;;  %v2058_v35 = vsel %vm1055_vm6, %v2038_v15, %v1979_v1 }
 0x2dd   : > { %2996 = vst [vmem:[#allocation2 + $0x1a8] sm:$0xff] %v2918_v33 }
 0x2de   : > { %v2601_v23 = vpop.f32.mrf.mxu0  ;;  %v11209_v31 = vsel %vm933_vm1, %v3487_v55, %v11199_v37  ;;  %7492 = vmatmul.msk.bf16.gmra.mxu1 %vm1013_vm4, %v2222_v48  ;;  %v2225_v48 = vrot.slane %v2001_v60, 6 }
 0x2df   : > { %v2602_v9 = vadd.f32 %v10788_v43, %v2601_v23  ;;  %v2215_v23 = vrot.slane %v2058_v35, 6  ;;  %v11244_v15 = vpop.f32.mrf.mxu2 }
 0x2e0   : > { %13895 = vst [vmem:[#allocation16_spill] sm:$0xff] %v11244_v15 }
 0x2e1   : > { %v2806_v3 = vadd.f32 %v11126_v6, %v2602_v9  ;;  %2640 = vmatmul.bf16.gmra.mxu0 %v2212_v63  ;;  %v11228_v6 = vld [vmem:[%s13863_s4] ss:$0 sm:$0xff]  ;;  %v2226_v9 = vsel %vm2188_vm8, %v2221_v14, %v2225_v48  ;;  %v1883_v12 = vpop.permute.xlu0 %1882  ;;  %v2216_v38 = vsel %vm2188_vm8, %v2211_v47, %v2215_v23 }
 0x2e2   : > { %v11221_v22 = vpop.f32.mrf.mxu1  ;;  %v4041_v62 = vadd.f32 %v11228_v6, %v4040_v8  ;;  %v2020_v60 = vsel %vm1013_vm4, %v10731_v13, %v1883_v12 }
 0x2e3   : > { %v2919_v55 = vmax.f32 %v2806_v3, 0.0 }
 0x2e4   : > { %v3055_v14 = vld [vmem:[#allocation2 + $0x198] ss:$3 sm:$0xff]  ;;  %v3107_v1 = vld [vmem:[#allocation2 + $0x199] ss:$3 sm:$0xff] }
 0x2e5   : > { %2997 = vst [vmem:[#allocation2 + $0x1b0] sm:$0xff] %v2919_v55  ;;  %v1922_v55 = vpop.permute.xlu1 %1921  ;;  %v3141_v47 = vmax.f32 %v3055_v14, %v3107_v1 }
 0x2e6   : > { %v2603_v54 = vpop.f32.mrf.mxu0 }
 0x2e7   : > { %v2604_v0 = vadd.f32 %v10788_v43, %v2603_v54  ;;  %v2040_v54 = vsel %vm1034_vm5, %v2020_v60, %v1922_v55  ;;  %v8582_v60 = vld [vmem:[%s13861_s3 + $0xb8] sm:$0xff] }
 0x2e8   : > { %4154 = vmatpush.bf16.msrb.mxu2 %v8582_v60 }
 0x2e9   : > { %v2808_v17 = vadd.f32 %v11135_v61, %v2604_v0  ;;  %v1981_v0 = vpop.permute.xlu2 %1980  ;;  %v1885_v14 = vpop.permute.xlu0 %1884 }
 0x2ea   : > { %v4109_v32 = vpop.f32.mrf.mxu3 }
 0x2eb   : > { %v2920_v33 = vmax.f32 %v2808_v17, 0.0  ;;  %v11233_v49 = vadd.f32 %v4109_v32, %v4041_v62  ;;  %v11236_v63 = vpop.f32.mrf.mxu1 }
 0x2ed   : > { %2998 = vst [vmem:[#allocation2 + $0x1b8] sm:$0xff] %v2920_v33  ;;  %v3185_v33 = vld [vmem:[#allocation2 + $0x19a] ss:$3 sm:$0xff] }
 0x2ee   : > { %v2606_v7 = vpop.f32.mrf.mxu0  ;;  %7493 = vmatmul.msk.bf16.gmra.mxu1 %vm1013_vm4, %v2226_v9  ;;  %v3219_v9 = vmax.f32 %v3141_v47, %v3185_v33 }
 0x2ef   : > { %v2607_v3 = vadd.f32 %v10788_v43, %v2606_v7  ;;  %v4045_v7 = vpop.f32.mrf.mxu2 }
 0x2f1   : > { %v2811_v61 = vadd.f32 %v11147_v26, %v2607_v3  ;;  %2645 = vmatmul.bf16.gmra.mxu0 %v2216_v38  ;;  %v11251_v26 = vsel %vm1055_vm6, %v2040_v54, %v1981_v0  ;;  %v3245_v54 = vpack.c.bf16 %v3219_v9, %v3219_v9  ;;  %v1983_v60 = vpop.permute.xlu2 %1982 }
 0x2f2   : > { %v11254_v32 = vpop.f32.mrf.mxu3  ;;  %v2219_v3 = vrot.slane %v11251_v26, 6 }
 0x2f3   : > { %v2921_v8 = vmax.f32 %v2811_v61, 0.0  ;;  %v11248_v17 = vpop.f32.mrf.mxu1  ;;  %13896 = vst [vmem:[#allocation17_spill] sm:$0xff] %v11254_v32  ;;  %v3433_v9 = vunpack.c.l.b16 %v3245_v54  ;;  %v3458_v54 = vor.u32 %v3456_v19, %v11180_v50 }
 0x2f4   : > { %v2220_v0 = vsel %vm2188_vm8, %v2215_v23, %v2219_v3 }
 0x2f5   : > { %2999 = vst [vmem:[#allocation2 + $0x1c0] sm:$0xff] %v2921_v8 }
 0x2f6   : > { %v2608_v62 = vpop.f32.mrf.mxu0 }
 0x2f7   : > { %v2609_v35 = vadd.f32 %v10788_v43, %v2608_v62  ;;  %v4046_v62 = vadd.f32 %v11228_v6, %v4045_v7 }
 0x2f9   : > { %v2813_v13 = vadd.f32 %v11160_v11, %v2609_v35  ;;  %v1924_v35 = vpop.permute.xlu1 %1923 }
 0x2fb   : > { %v2922_v48 = vmax.f32 %v2813_v13, 0.0  ;;  %v2022_v13 = vsel %vm1013_vm4, %v10812_v41, %v1885_v14 }
 0x2fc   : > { %v3057_v12 = vld [vmem:[#allocation2 + $0x1b0] ss:$3 sm:$0xff]  ;;  %v3109_v38 = vld [vmem:[#allocation2 + $0x1b1] ss:$3 sm:$0xff]  ;;  %v3187_v8 = vld [vmem:[#allocation2 + $0x1b2] ss:$3 sm:$0xff]  ;;  %v2042_v23 = vsel %vm1034_vm5, %v2022_v13, %v1924_v35 }
 0x2fd   : > { %3000 = vst [vmem:[#allocation2 + $0x1c8] sm:$0xff] %v2922_v48  ;;  %v3142_v61 = vmax.f32 %v3057_v12, %v3109_v38  ;;  %v11266_v48 = vpop.f32.mrf.mxu1 }
 0x2fe   : > { %v2611_v55 = vpop.f32.mrf.mxu0 }
 0x2ff   : > { %v2612_v11 = vadd.f32 %v10788_v43, %v2611_v55  ;;  %v3220_v1 = vmax.f32 %v3142_v61, %v3187_v8 }
 0x301   : > { %v2816_v47 = vadd.f32 %v11197_v45, %v2612_v11  ;;  %2650 = vmatmul.bf16.gmra.mxu0 %v2220_v0  ;;  %v3246_v26 = vpack.c.bf16 %v3220_v1, %v3220_v1  ;;  %v11273_v45 = vpop.f32.mrf.mxu2  ;;  %v2062_v1 = vsel %vm1055_vm6, %v2042_v23, %v1983_v60 }
 0x302   : > { %13897 = vst [vmem:[#allocation18_spill] sm:$0xff] %v11273_v45 }
 0x303   : > { %v4114_v33 = vpop.f32.mrf.mxu3  ;;  %v2923_v12 = vmax.f32 %v2816_v47, 0.0  ;;  %v3434_v61 = vunpack.c.l.b16 %v3246_v26 }
 0x304   : > { %v11268_v38 = vadd.f32 %v4114_v33, %v4046_v62 }
 0x305   : > { %3001 = vst [vmem:[#allocation2 + $0x1d0] sm:$0xff] %v2923_v12  ;;  %v11271_v7 = vpack.c.b16 %v3434_v61, %v3433_v9  ;;  %v2223_v12 = vrot.slane %v2062_v1, 6 }
 0x306   : > { %v2613_v55 = vpop.f32.mrf.mxu0 }
 0x307   : > { %v2614_v8 = vadd.f32 %v10788_v43, %v2613_v55  ;;  %4064 = vmatmul.bf16.gmra.mxu2 %v11271_v7  ;;  %v3460_v41 = vshll.u32 %v11271_v7, 16  ;;  %v3464_v14 = vshrl.u32 %v11271_v7, 16  ;;  %v3478_v11 = vrot.slane %v11271_v7, 1 }
 0x308   : > { %v3508_v0 = vrot.slane %v11271_v7, 2  ;;  %v2224_v60 = vsel %vm2188_vm8, %v2219_v3, %v2223_v12 }
 0x309   : > { %v2818_v62 = vadd.f32 %v11221_v22, %v2614_v8  ;;  %v3462_v35 = vrot.slane %v3460_v41, 1  ;;  %v11289_v43 = vsel %vm893_vm2, %v3476_v25, %v3478_v11  ;;  %v3492_v47 = vrot.slane %v3464_v14, 1  ;;  %v2827_v22 = vpop.f32.mrf.mxu1  ;;  %v4050_v61 = vpop.f32.mrf.mxu2 }
 0x30a   : > { %v3493_v13 = vrot.slane %v3460_v41, 2  ;;  %v11296_v33 = vsel %vm993_vm3, %v3506_v40, %v3508_v0  ;;  %v4051_v7 = vadd.f32 %v11228_v6, %v4050_v61 }
 0x30b   : > { %v11291_v26 = vpop.f32.mrf.mxu3  ;;  %13899 = vst [vmem:[#allocation20_spill] sm:$0xff] %v11296_v33  ;;  %v2924_v19 = vmax.f32 %v2818_v62, 0.0  ;;  %v3463_v50 = vsel %vm793_vm0, %v3458_v54, %v3462_v35 }
 0x30c   : > { %13898 = vst [vmem:[#allocation19_spill] sm:$0xff] %v11291_v26  ;;  %4128 = vmatmul.bf16.gmra.mxu3 %v3463_v50  ;;  %v3494_v9 = vor.u32 %v3493_v13, %v3492_v47  ;;  %v8581_v47 = vld [vmem:[%s13861_s3 + $0xb0] sm:$0xff] }
 0x30d   : > { %3002 = vst [vmem:[#allocation2 + $0x1d8] sm:$0xff] %v2924_v19  ;;  %4155 = vmatpush.bf16.msrb.mxu2 %v8581_v47 }
 0x30e   : > { %v2616_v25 = vpop.f32.mrf.mxu0  ;;  %v11301_v23 = vsel %vm933_vm1, %v11199_v37, %v3494_v9 }
 0x30f   : > { %v2617_v40 = vadd.f32 %v11306_v10, %v2616_v25 }
 0x311   : > { %v2821_v55 = vadd.f32 %v11236_v63, %v2617_v40  ;;  %2655 = vmatmul.bf16.gmra.mxu0 %v2224_v60  ;;  %v2830_v3 = vpop.f32.mrf.mxu1 }
 0x313   : > { %v4119_v8 = vpop.f32.mrf.mxu3  ;;  %v2925_v41 = vmax.f32 %v2821_v55, 0.0 }
 0x314   : > { %v11312_v1 = vadd.f32 %v4119_v8, %v4051_v7  ;;  %v3059_v37 = vld [vmem:[#allocation2 + $0x1c8] ss:$3 sm:$0xff]  ;;  %v3111_v54 = vld [vmem:[#allocation2 + $0x1c9] ss:$3 sm:$0xff]  ;;  %v3189_v19 = vld [vmem:[#allocation2 + $0x1ca] ss:$3 sm:$0xff] }
 0x315   : > { %3003 = vst [vmem:[#allocation2 + $0x1e0] sm:$0xff] %v2925_v41  ;;  %v3143_v62 = vmax.f32 %v3059_v37, %v3111_v54  ;;  %v3466_v54 = vor.u32 %v3464_v14, %v3462_v35 }
 0x316   : > { %v2618_v13 = vpop.f32.mrf.mxu0 }
 0x317   : > { %v2619_v50 = vadd.f32 %v11306_v10, %v2618_v13  ;;  %v3221_v12 = vmax.f32 %v3143_v62, %v3189_v19 }
 0x319   : > { %v2823_v63 = vadd.f32 %v11248_v17, %v2619_v50  ;;  %v3247_v61 = vpack.c.bf16 %v3221_v12, %v3221_v12  ;;  %v2832_v26 = vpop.f32.mrf.mxu1 }
 0x31b   : > { %v2926_v25 = vmax.f32 %v2823_v63, 0.0  ;;  %v3442_v40 = vunpack.c.l.b16 %v3247_v61 }
 0x31d   : > { %3004 = vst [vmem:[#allocation2 + $0x1e8] sm:$0xff] %v2926_v25  ;;  %v3443_v60 = vpack.c.b16 %v3442_v40, %v3442_v40 }
 0x31e   : > { %v2621_v7 = vpop.f32.mrf.mxu0 }
 0x31f   : > { %v2622_v55 = vadd.f32 %v11306_v10, %v2621_v7  ;;  %v3468_v8 = vshll.u32 %v3443_v60, 16  ;;  %v3480_v41 = vrot.slane %v3443_v60, 1  ;;  %v3496_v37 = vshrl.u32 %v3443_v60, 16 }
 0x320   : > { %v3510_v45 = vrot.slane %v3443_v60, 2 }
 0x321   : > { %v2826_v13 = vadd.f32 %v11266_v48, %v2622_v55  ;;  %v3470_v62 = vrot.slane %v3468_v8, 1  ;;  %v11322_v47 = vsel %vm893_vm2, %v3478_v11, %v3480_v41  ;;  %v3498_v17 = vrot.slane %v3496_v37, 1  ;;  %v2835_v11 = vpop.f32.mrf.mxu1 }
 0x322   : > { %v3499_v19 = vrot.slane %v3468_v8, 2  ;;  %v11325_v50 = vsel %vm993_vm3, %v3508_v0, %v3510_v45  ;;  %v8580_v45 = vld [vmem:[%s13861_s3 + $0xa8] sm:$0xff] }
 0x323   : > { %13900 = vst [vmem:[#allocation21_spill] sm:$0xff] %v11325_v50  ;;  %v2927_v12 = vmax.f32 %v2826_v13, 0.0  ;;  %v3471_v63 = vsel %vm793_vm0, %v3466_v54, %v3470_v62  ;;  %4156 = vmatpush.bf16.msrb.mxu2 %v8580_v45 }
 0x324   : > { %4133 = vmatmul.bf16.gmra.mxu3 %v3471_v63  ;;  %v3500_v61 = vor.u32 %v3499_v19, %v3498_v17 }
 0x325   : > { %3005 = vst [vmem:[#allocation2 + $0x1f0] sm:$0xff] %v2927_v12 }
 0x326   : > { %v2623_v14 = vpop.f32.mrf.mxu0  ;;  %v11329_v35 = vsel %vm933_vm1, %v3494_v9, %v3500_v61 }
 0x327   : > { %v2624_v48 = vadd.f32 %v11306_v10, %v2623_v14 }
 0x329   : > { %v2828_v25 = vadd.f32 %v2827_v22, %v2624_v48  ;;  %v2837_v17 = vpop.f32.mrf.mxu1 }
 0x32b   : > { %v2928_v60 = vmax.f32 %v2828_v25, 0.0 }
 0x32c   : > { %v3061_v7 = vld [vmem:[#allocation2 + $0x1e0] ss:$3 sm:$0xff]  ;;  %v3113_v55 = vld [vmem:[#allocation2 + $0x1e1] ss:$3 sm:$0xff]  ;;  %v3191_v41 = vld [vmem:[#allocation2 + $0x1e2] ss:$3 sm:$0xff] }
 0x32d   : > { %3006 = vst [vmem:[#allocation2 + $0x1f8] sm:$0xff] %v2928_v60  ;;  %v3144_v0 = vmax.f32 %v3061_v7, %v3113_v55 }
 0x32e   : > { %v2626_v8 = vpop.f32.mrf.mxu0 }
 0x32f   : > { %v2627_v37 = vadd.f32 %v11306_v10, %v2626_v8  ;;  %v3222_v9 = vmax.f32 %v3144_v0, %v3191_v41 }
 0x331   : > { %v2831_v54 = vadd.f32 %v2830_v3, %v2627_v37  ;;  %v3248_v13 = vpack.c.bf16 %v3222_v9, %v3222_v9  ;;  %v2840_v55 = vpop.f32.mrf.mxu1  ;;  %v8579_v37 = vld [vmem:[%s13861_s3 + $0xa0] sm:$0xff] }
 0x332   : > { %4157 = vmatpush.bf16.msrb.mxu2 %v8579_v37 }
 0x333   : > { %v2929_v62 = vmax.f32 %v2831_v54, 0.0  ;;  %v11336_v22 = vunpack.c.l.b16 %v3248_v13 }
 0x335   : > { %3007 = vst [vmem:[#allocation2 + $0x200] sm:$0xff] %v2929_v62  ;;  %v11339_v19 = vpack.c.b16 %v11336_v22, %v3442_v40 }
 0x336   : > { %v2628_v12 = vpop.f32.mrf.mxu0 }
 0x337   : > { %v2629_v63 = vadd.f32 %v11306_v10, %v2628_v12  ;;  %v13754_v61 = vshrl.u32 %v11339_v19, 16  ;;  %v13755_v14 = vshll.u32 %v11339_v19, 16 }
 0x339   : > { %v2833_v48 = vadd.f32 %v2832_v26, %v2629_v63  ;;  %v11346_v3 = vrot.slane %v13754_v61, 1  ;;  %v11350_v25 = vrot.slane %v13755_v14, 2  ;;  %v2842_v63 = vpop.f32.mrf.mxu1  ;;  %v11364_v61 = vpop.f32.mrf.mxu2 }
 0x33a   : > { %13901 = vst [vmem:[#allocation22_spill] sm:$0xff] %v11364_v61 }
 0x33b   : > { %v2930_v60 = vmax.f32 %v2833_v48, 0.0 }
 0x33d   : > { %3008 = vst [vmem:[#allocation2 + $0x208] sm:$0xff] %v2930_v60 }
 0x33e   : > { %v2631_v7 = vpop.f32.mrf.mxu0 }
 0x33f   : > { %v2632_v45 = vadd.f32 %v11306_v10, %v2631_v7 }
 0x341   : > { %v2836_v0 = vadd.f32 %v2835_v11, %v2632_v45 }
 0x343   : > { %v2931_v8 = vmax.f32 %v2836_v0, 0.0 }
 0x344   : > { %v3063_v26 = vld [vmem:[#allocation2 + $0x1f8] ss:$3 sm:$0xff]  ;;  %v3115_v41 = vld [vmem:[#allocation2 + $0x1f9] ss:$3 sm:$0xff]  ;;  %v3193_v13 = vld [vmem:[#allocation2 + $0x1fa] ss:$3 sm:$0xff] }
 0x345   : > { %3009 = vst [vmem:[#allocation2 + $0x210] sm:$0xff] %v2931_v8  ;;  %v3145_v9 = vmax.f32 %v3063_v26, %v3115_v41  ;;  %v2845_v41 = vpop.f32.mrf.mxu1 }
 0x346   : > { %v2633_v54 = vpop.f32.mrf.mxu0 }
 0x347   : > { %v2634_v62 = vadd.f32 %v11306_v10, %v2633_v54  ;;  %v3223_v12 = vmax.f32 %v3145_v9, %v3193_v13  ;;  %v11366_v9 = vpop.f32.mrf.mxu3 }
 0x348   : > { %13902 = vst [vmem:[#allocation23_spill] sm:$0xff] %v11366_v9 }
 0x349   : > { %v2838_v48 = vadd.f32 %v2837_v17, %v2634_v62  ;;  %v3249_v60 = vpack.c.bf16 %v3223_v12, %v3223_v12  ;;  %v4055_v62 = vpop.f32.mrf.mxu2 }
 0x34b   : > { %v2932_v7 = vmax.f32 %v2838_v48, 0.0  ;;  %v11359_v11 = vunpack.c.l.b16 %v3249_v60 }
 0x34d   : > { %3010 = vst [vmem:[#allocation2 + $0x218] sm:$0xff] %v2932_v7  ;;  %v2847_v48 = vpop.f32.mrf.mxu1 }
 0x34e   : > { %v2636_v0 = vpop.f32.mrf.mxu0 }
 0x34f   : > { %v2637_v8 = vadd.f32 %v11306_v10, %v2636_v0  ;;  %v4056_v0 = vadd.f32 %v11228_v6, %v4055_v62  ;;  %v3642_v62 = vrot.slane %v11339_v19, 2 }
 0x351   : > { %v2841_v26 = vadd.f32 %v2840_v55, %v2637_v8  ;;  %v8578_v55 = vld [vmem:[%s13861_s3 + $0x98] sm:$0xff] }
 0x352   : > { %4158 = vmatpush.bf16.msrb.mxu2 %v8578_v55 }
 0x353   : > { %v2933_v54 = vmax.f32 %v2841_v26, 0.0 }
 0x355   : > { %3011 = vst [vmem:[#allocation2 + $0x220] sm:$0xff] %v2933_v54  ;;  %v2850_v9 = vpop.f32.mrf.mxu1 }
 0x356   : > { %v2638_v37 = vpop.f32.mrf.mxu0 }
 0x357   : > { %v2639_v17 = vadd.f32 %v11306_v10, %v2638_v37 }
 0x359   : > { %v2843_v13 = vadd.f32 %v2842_v63, %v2639_v17 }
 0x35b   : > { %v2934_v12 = vmax.f32 %v2843_v13, 0.0 }
 0x35c   : > { %v3065_v60 = vld [vmem:[#allocation2 + $0x210] ss:$3 sm:$0xff]  ;;  %v3117_v7 = vld [vmem:[#allocation2 + $0x211] ss:$3 sm:$0xff]  ;;  %v3195_v26 = vld [vmem:[#allocation2 + $0x212] ss:$3 sm:$0xff] }
 0x35d   : > { %3012 = vst [vmem:[#allocation2 + $0x228] sm:$0xff] %v2934_v12  ;;  %v3146_v14 = vmax.f32 %v3065_v60, %v3117_v7 }
 0x35e   : > { %v2641_v8 = vpop.f32.mrf.mxu0 }
 0x35f   : > { %v2642_v54 = vadd.f32 %v11306_v10, %v2641_v8  ;;  %v4124_v45 = vpop.f32.mrf.mxu3  ;;  %v3224_v37 = vmax.f32 %v3146_v14, %v3195_v26 }
 0x360   : > { %v11374_v63 = vadd.f32 %v4124_v45, %v4056_v0 }
 0x361   : > { %v2846_v17 = vadd.f32 %v2845_v41, %v2642_v54  ;;  %v3250_v13 = vpack.c.bf16 %v3224_v37, %v3224_v37  ;;  %v3562_v41 = vrot.slane %v11339_v19, 1 }
 0x363   : > { %v2935_v40 = vmax.f32 %v2846_v17, 0.0  ;;  %v3523_v12 = vunpack.c.l.b16 %v3250_v13 }
 0x365   : > { %3013 = vst [vmem:[#allocation2 + $0x230] sm:$0xff] %v2935_v40  ;;  %v11377_v60 = vpack.c.b16 %v3523_v12, %v11359_v11 }
 0x366   : > { %v2643_v7 = vpop.f32.mrf.mxu0 }
 0x367   : > { %v2644_v61 = vadd.f32 %v11306_v10, %v2643_v7  ;;  %v13757_v8 = vrot.slane %v11377_v60, 2  ;;  %v13759_v14 = vshll.u32 %v11377_v60, 16  ;;  %v13758_v45 = vshrl.u32 %v11377_v60, 16 }
 0x368   : > { %v13756_v55 = vrot.slane %v11377_v60, 1 }
 0x369   : > { %v2848_v40 = vadd.f32 %v2847_v48, %v2644_v61  ;;  %v3644_v0 = vsel %vm993_vm3, %v3642_v62, %v13757_v8  ;;  %v3572_v26 = vrot.slane %v13758_v45, 1  ;;  %v3573_v37 = vrot.slane %v13759_v14, 2 }
 0x36a   : > { %4069 = vmatmul.bf16.gmra.mxu2 %v3644_v0  ;;  %v11394_v54 = vsel %vm893_vm2, %v3562_v41, %v13756_v55  ;;  %v13903_v48 = vor.u32 %v11350_v25, %v11346_v3  ;;  %v2852_v0 = vpop.f32.mrf.mxu1 }
 0x36b   : > { %v2936_v17 = vmax.f32 %v2848_v40, 0.0  ;;  %v11398_v13 = vor.u32 %v3573_v37, %v3572_v26  ;;  %v8577_v40 = vld [vmem:[%s13861_s3 + $0x90] sm:$0xff] }
 0x36c   : > { %4159 = vmatpush.bf16.msrb.mxu2 %v8577_v40 }
 0x36d   : > { %3014 = vst [vmem:[#allocation2 + $0x238] sm:$0xff] %v2936_v17  ;;  %v11405_v7 = vsel %vm933_vm1, %v13903_v48, %v11398_v13 }
 0x36e   : > { %v2646_v61 = vpop.f32.mrf.mxu0 }
 0x36f   : > { %v2647_v62 = vadd.f32 %v11306_v10, %v2646_v61 }
 0x371   : > { %v2851_v41 = vadd.f32 %v2850_v9, %v2647_v62 }
 0x372   : > { %v2855_v61 = vpop.f32.mrf.mxu1 }
 0x373   : > { %v2937_v55 = vmax.f32 %v2851_v41, 0.0 }
 0x374   : > { %v3067_v8 = vld [vmem:[#allocation2 + $0x228] ss:$3 sm:$0xff]  ;;  %v3119_v45 = vld [vmem:[#allocation2 + $0x229] ss:$3 sm:$0xff]  ;;  %v3197_v17 = vld [vmem:[#allocation2 + $0x22a] ss:$3 sm:$0xff] }
 0x375   : > { %3015 = vst [vmem:[#allocation2 + $0x240] sm:$0xff] %v2937_v55  ;;  %v3147_v26 = vmax.f32 %v3067_v8, %v3119_v45  ;;  %v13904_v55 = vpack.c.b16 %v11359_v11, %v11336_v22 }
 0x376   : > { %v2648_v37 = vpop.f32.mrf.mxu0 }
 0x377   : > { %v2649_v3 = vadd.f32 %v11306_v10, %v2648_v37  ;;  %v3225_v25 = vmax.f32 %v3147_v26, %v3197_v17  ;;  %v3587_v15 = vrot.slane %v13904_v55, 6  ;;  %v11430_v37 = vpop.f32.mrf.mxu3 }
 0x378   : > { %13907 = vst [vmem:[#allocation26_spill] sm:$0xff] %v11430_v37 }
 0x379   : > { %v2853_v48 = vadd.f32 %v2852_v0, %v2649_v3  ;;  %v3251_v14 = vpack.c.bf16 %v3225_v25, %v3225_v25  ;;  %v3654_v0 = vrot.slane %v3587_v15, 2 }
 0x37b   : > { %v2938_v32 = vmax.f32 %v2853_v48, 0.0  ;;  %v3524_v9 = vunpack.c.l.b16 %v3251_v14  ;;  %v11423_v14 = vpop.f32.mrf.mxu2 }
 0x37c   : > { %13905 = vst [vmem:[#allocation24_spill] sm:$0xff] %v11423_v14 }
 0x37d   : > { %3016 = vst [vmem:[#allocation2 + $0x248] sm:$0xff] %v2938_v32  ;;  %v3585_v62 = vpack.c.b16 %v3524_v9, %v3523_v12  ;;  %v2857_v12 = vpop.f32.mrf.mxu1 }
 0x37e   : > { %v2651_v41 = vpop.f32.mrf.mxu0 }
 0x37f   : > { %v2652_v8 = vadd.f32 %v11306_v10, %v2651_v41  ;;  %v11416_v45 = vrot.slane %v3585_v62, 6 }
 0x381   : > { %v2856_v44 = vadd.f32 %v2855_v61, %v2652_v8  ;;  %v11420_v40 = vsel %vm2188_vm8, %v3587_v15, %v11416_v45  ;;  %v8576_v15 = vld [vmem:[%s13861_s3 + $0x88] sm:$0xff] }
 0x382   : > { %v13760_v26 = vrot.slane %v11420_v40, 2  ;;  %4160 = vmatpush.bf16.msrb.mxu2 %v8576_v15 }
 0x383   : > { %v2939_v32 = vmax.f32 %v2856_v44, 0.0  ;;  %v4060_v25 = vpop.f32.mrf.mxu2 }
 0x384   : > { %v11428_v22 = vsel %vm993_vm3, %v3654_v0, %v13760_v26  ;;  %v4061_v41 = vadd.f32 %v11228_v6, %v4060_v25 }
 0x385   : > { %13906 = vst [vmem:[#allocation25_spill] sm:$0xff] %v11428_v22  ;;  %v2860_v55 = vpop.f32.mrf.mxu1 }
 0x386   : > { %3017 = vst [vmem:[#allocation2 + $0x250] sm:$0xff] %v2939_v32  ;;  %v2653_v11 = vpop.f32.mrf.mxu0 }
 0x387   : > { %v2654_v17 = vadd.f32 %v11306_v10, %v2653_v11 }
 0x389   : > { %v2858_v3 = vadd.f32 %v2857_v12, %v2654_v17  ;;  %v13908_v17 = vshll.u32 %v11339_v19, 16 }
 0x38b   : > { %v2940_v44 = vmax.f32 %v2858_v3, 0.0  ;;  %v3536_v15 = vrot.slane %v13908_v17, 1 }
 0x38d   : > { %v3069_v48 = vld [vmem:[#allocation2 + $0x240] ss:$3 sm:$0xff]  ;;  %v3121_v61 = vld [vmem:[#allocation2 + $0x241] ss:$3 sm:$0xff]  ;;  %3018 = vst [vmem:[#allocation2 + $0x258] sm:$0xff] %v2940_v44  ;;  %v13909_v44 = vshll.u32 %v11377_v60, 16 }
 0x38e   : > { %v3148_v62 = vmax.f32 %v3069_v48, %v3121_v61  ;;  %v2656_v8 = vpop.f32.mrf.mxu0  ;;  %v3199_v0 = vld [vmem:[#allocation2 + $0x242] ss:$3 sm:$0xff] }
 0x38f   : > { %v2657_v32 = vadd.f32 %v11306_v10, %v2656_v8  ;;  %v4129_v11 = vpop.f32.mrf.mxu3  ;;  %v3541_v25 = vrot.slane %v13909_v44, 1 }
 0x390   : > { %v3226_v26 = vmax.f32 %v3148_v62, %v3199_v0  ;;  %v11438_v37 = vadd.f32 %v4129_v11, %v4061_v41  ;;  %v13910_v62 = vshrl.u32 %v11339_v19, 16  ;;  %v8590_v0 = vld [vmem:[%s13861_s3 + $0xf8] sm:$0xff]  ;;  %v13911_v11 = vshrl.u32 %v11377_v60, 16 }
 0x391   : > { %v2861_v14 = vadd.f32 %v2860_v55, %v2657_v32  ;;  %v2862_v32 = vpop.f32.mrf.mxu1  ;;  %4223 = vmatpush.bf16.msrb.mxu3 %v8590_v0  ;;  %v3648_v0 = vrot.slane %v11394_v54, 2 }
 0x392   : > { %v3252_v12 = vpack.c.bf16 %v3226_v26, %v3226_v26  ;;  %v3537_v41 = vor.u32 %v3536_v15, %v13910_v62  ;;  %v13912_v15 = vrot.slane %v11377_v60, 2 }
 0x393   : > { %v2941_v3 = vmax.f32 %v2861_v14, 0.0 }
 0x394   : > { %v11442_v59 = vunpack.c.l.b16 %v3252_v12  ;;  %v3542_v19 = vsel %vm793_vm0, %v3537_v41, %v3541_v25 }
 0x395   : > { %3019 = vst [vmem:[#allocation2 + $0x260] sm:$0xff] %v2941_v3  ;;  %v3645_v22 = vrot.slane %v3542_v19, 2  ;;  %v3651_v19 = vrot.slane %v11405_v7, 2 }
 0x396   : > { %v11447_v48 = vpack.c.b16 %v11442_v59, %v3524_v9  ;;  %v2658_v61 = vpop.f32.mrf.mxu0  ;;  %v8575_v9 = vld [vmem:[%s13861_s3 + $0x80] sm:$0xff] }
 0x397   : > { %v2659_v55 = vadd.f32 %v11306_v10, %v2658_v61  ;;  %v3545_v10 = vor.u32 %v13911_v11, %v3541_v25  ;;  %v8589_v61 = vld [vmem:[%s13861_s3 + $0xf0] sm:$0xff]  ;;  %4161 = vmatpush.bf16.msrb.mxu2 %v8575_v9  ;;  %v13913_v25 = vrot.slane %v11377_v60, 1  ;;  %v8588_v60 = vld [vmem:[%s13861_s3 + $0xe8] sm:$0xff] }
 0x398   : > { %v13761_v26 = vrot.slane %v11447_v48, 2  ;;  %v3547_v8 = vshll.u32 %v11447_v48, 16  ;;  %v3551_v14 = vshrl.u32 %v11447_v48, 16  ;;  %v3565_v12 = vrot.slane %v11447_v48, 1  ;;  %4224 = vmatpush.bf16.msrb.mxu3 %v8589_v61 }
 0x399   : > { %v2863_v17 = vadd.f32 %v2862_v32, %v2659_v55  ;;  %v11478_v32 = vpop.f32.mrf.mxu2 }
 0x39a   : > { %v3658_v3 = vsel %vm993_vm3, %v13912_v15, %v13761_v26  ;;  %v3549_v44 = vrot.slane %v3547_v8, 1  ;;  %v3576_v62 = vrot.slane %v3551_v14, 1  ;;  %v11476_v41 = vsel %vm893_vm2, %v13913_v25, %v3565_v12  ;;  %13914 = vst [vmem:[#allocation27_spill] sm:$0xff] %v11478_v32  ;;  %v8587_v25 = vld [vmem:[%s13861_s3 + $0xe0] sm:$0xff] }
 0x39b   : > { %4074 = vmatmul.bf16.gmra.mxu2 %v3658_v3  ;;  %v3577_v55 = vrot.slane %v3547_v8, 2  ;;  %v2942_v11 = vmax.f32 %v2863_v17, 0.0  ;;  %v3649_v26 = vrot.slane %v11476_v41, 2  ;;  %v11497_v17 = vpop.f32.mrf.mxu3 }
 0x39c   : > { %v11481_v15 = vsel %vm793_vm0, %v3545_v10, %v3549_v44  ;;  %13915 = vst [vmem:[#allocation28_spill] sm:$0xff] %v11497_v17  ;;  %4225 = vmatpush.bf16.msrb.mxu3 %v8588_v60  ;;  %v8586_v60 = vld [vmem:[%s13861_s3 + $0xd8] sm:$0xff] }
 0x39d   : > { %v3646_v9 = vrot.slane %v11481_v15, 2  ;;  %v3578_v3 = vor.u32 %v3577_v55, %v3576_v62  ;;  %3020 = vst [vmem:[#allocation2 + $0x268] sm:$0xff] %v2942_v11  ;;  %v11490_v8 = vsel %vm993_vm3, %v3648_v0, %v3649_v26 }
 0x39f   : > { %v3647_v10 = vsel %vm993_vm3, %v3645_v22, %v3646_v9  ;;  %v11495_v54 = vsel %vm933_vm1, %v11398_v13, %v3578_v3 }
 0x3a0   : > { %4138 = vmatmul.bf16.gmra.mxu3 %v3647_v10  ;;  %v3652_v61 = vrot.slane %v11495_v54, 2 }
 0x3a1   : > { %v4065_v22 = vpop.f32.mrf.mxu2  ;;  %4226 = vmatpush.bf16.msrb.mxu3 %v8587_v25  ;;  %v8584_v25 = vld [vmem:[%s13861_s3 + $0xc8] sm:$0xff] }
 0x3a2   : > { %v11502_v62 = vsel %vm993_vm3, %v3651_v19, %v3652_v61  ;;  %v4066_v11 = vadd.f32 %v11228_v6, %v4065_v22  ;;  %v8585_v19 = vld [vmem:[%s13861_s3 + $0xd0] sm:$0xff] }
 0x3a4   : > { %v3071_v41 = vld [vmem:[#allocation2 + $0x258] ss:$3 sm:$0xff]  ;;  %v3123_v55 = vld [vmem:[#allocation2 + $0x259] ss:$3 sm:$0xff]  ;;  %v3201_v15 = vld [vmem:[#allocation2 + $0x25a] ss:$3 sm:$0xff] }
 0x3a5   : > { %v3149_v13 = vmax.f32 %v3071_v41, %v3123_v55  ;;  %4227 = vmatpush.bf16.msrb.mxu3 %v8586_v60  ;;  %v13916_v60 = vrot.slane %v11447_v48, 2 }
 0x3a7   : > { %v4134_v0 = vpop.f32.mrf.mxu3  ;;  %v3227_v7 = vmax.f32 %v3149_v13, %v3201_v15 }
 0x3a8   : > { %v11511_v10 = vadd.f32 %v4134_v0, %v4066_v11  ;;  %v3553_v0 = vor.u32 %v3551_v14, %v3549_v44 }
 0x3a9   : > { %v3253_v54 = vpack.c.bf16 %v3227_v7, %v3227_v7  ;;  %4228 = vmatpush.bf16.msrb.mxu3 %v8585_v19 }
 0x3ab   : > { %v3526_v17 = vunpack.c.l.b16 %v3253_v54 }
 0x3ad   : > { %v3530_v41 = vpack.c.b16 %v3526_v17, %v3526_v17  ;;  %v3586_v22 = vpack.c.b16 %v3526_v17, %v11442_v59  ;;  %4229 = vmatpush.bf16.msrb.mxu3 %v8584_v25  ;;  %v8583_v59 = vld [vmem:[%s13861_s3 + $0xc0] sm:$0xff] }
 0x3af   : > { %v3667_v55 = vrot.slane %v3530_v41, 2  ;;  %v3555_v13 = vshll.u32 %v3530_v41, 16  ;;  %v3559_v15 = vshrl.u32 %v3530_v41, 16  ;;  %v3567_v11 = vrot.slane %v3530_v41, 1 }
 0x3b0   : > { %v3590_v7 = vrot.slane %v3586_v22, 6 }
 0x3b1   : > { %v3668_v32 = vsel %vm993_vm3, %v13916_v60, %v3667_v55  ;;  %v3557_v50 = vrot.slane %v3555_v13, 1  ;;  %v3580_v54 = vrot.slane %v3559_v15, 1  ;;  %v3568_v19 = vsel %vm893_vm2, %v3565_v12, %v3567_v11  ;;  %4230 = vmatpush.bf16.msrb.mxu3 %v8583_v59 }
 0x3b2   : > { %4079 = vmatmul.bf16.gmra.mxu2 %v3668_v32  ;;  %v3661_v17 = vrot.slane %v3568_v19, 2  ;;  %v3671_v33 = vrot.slane %v3567_v11, 2  ;;  %v3581_v2 = vrot.slane %v3555_v13, 2  ;;  %v3591_v14 = vsel %vm2188_vm8, %v11416_v45, %v3590_v7 }
 0x3b3   : > { %v3558_v48 = vsel %vm793_vm0, %v3553_v0, %v3557_v50  ;;  %v3665_v44 = vrot.slane %v3591_v14, 2  ;;  %v3675_v41 = vrot.slane %v3590_v7, 2  ;;  %v13917_v55 = vrot.slane %v11420_v40, 2 }
 0x3b4   : > { %v3659_v22 = vrot.slane %v3558_v48, 2  ;;  %v11531_v25 = vsel %vm993_vm3, %v3649_v26, %v3661_v17  ;;  %v11534_v12 = vsel %vm993_vm3, %v3661_v17, %v3671_v33  ;;  %v3582_v32 = vor.u32 %v3581_v2, %v3580_v54  ;;  %v8598_v33 = vld [vmem:[%s13861_s3 + $0x138] sm:$0xff]  ;;  %v8597_v54 = vld [vmem:[%s13861_s3 + $0x130] sm:$0xff] }
 0x3b5   : > { %v11539_v13 = vsel %vm993_vm3, %v13917_v55, %v3665_v44  ;;  %v11542_v45 = vsel %vm993_vm3, %v3665_v44, %v3675_v41  ;;  %4292 = vmatpush.bf16.msra.mxu2 %v8598_v33  ;;  %v3561_v60 = vor.u32 %v3559_v15, %v3557_v50  ;;  %v8593_v15 = vld [vmem:[%s13861_s3 + $0x110] sm:$0xff]  ;;  %v8592_v55 = vld [vmem:[%s13861_s3 + $0x108] sm:$0xff] }
 0x3b6   : > { %v3660_v11 = vsel %vm993_vm3, %v3646_v9, %v3659_v22  ;;  %v3583_v0 = vsel %vm933_vm1, %v3578_v3, %v3582_v32  ;;  %v3673_v7 = vrot.slane %v3582_v32, 2 }
 0x3b7   : > { %4143 = vmatmul.bf16.gmra.mxu3 %v3660_v11  ;;  %v3663_v2 = vrot.slane %v3583_v0, 2  ;;  %v3669_v9 = vrot.slane %v3561_v60, 2 }
 0x3b9   : > { %v11550_v40 = vsel %vm993_vm3, %v3652_v61, %v3663_v2  ;;  %v11553_v26 = vsel %vm993_vm3, %v3663_v2, %v3673_v7  ;;  %v3670_v3 = vsel %vm993_vm3, %v3659_v22, %v3669_v9  ;;  %4293 = vmatpush.bf16.msra.mxu2 %v8597_v54  ;;  %v8591_v2 = vld [vmem:[%s13861_s3 + $0x100] sm:$0xff] }
 0x3c2   : > { %4162 = vmatmul.bf16.vlgmr.msrb.gmra.mxu2 %v10042_v57  ;;  %v8596_v57 = vld [vmem:[%s13861_s3 + $0x128] sm:$0xff] }
 0x3c3   : > { %4294 = vmatpush.bf16.msra.mxu2 %v8596_v57 }
 0x3c7   : > { %4148 = vmatmul.bf16.gmra.mxu3 %v3670_v3 }
 0x3d2   : > { %4167 = vmatmul.bf16.gmra.mxu2 %v10225_v29  ;;  %v8595_v29 = vld [vmem:[%s13861_s3 + $0x120] sm:$0xff] }
 0x3d3   : > { %4295 = vmatpush.bf16.msra.mxu2 %v8595_v29 }
 0x3d7   : > { %4231 = vmatmul.bf16.vlgmr.msrb.gmra.mxu3 %v10067_v36  ;;  %v11574_v36 = vpop.f32.mrf.mxu2 }
 0x3e2   : > { %4172 = vmatmul.bf16.gmra.mxu2 %v10342_v52  ;;  %v11578_v52 = vpop.f32.mrf.mxu3 }
 0x3e7   : > { %4236 = vmatmul.bf16.gmra.mxu3 %v10273_v58 }
 0x3ed   : > { %v4070_v58 = vpop.f32.mrf.mxu2 }
 0x3f2   : > { %4177 = vmatmul.bf16.gmra.mxu2 %v10932_v51 }
 0x3f5   : > { %v11580_v51 = vpop.f32.mrf.mxu2 }
 0x3f7   : > { %4241 = vmatmul.bf16.gmra.mxu3 %v10373_v30  ;;  %v8594_v30 = vld [vmem:[%s13861_s3 + $0x118] sm:$0xff]  ;;  %s7288_s3 = sshll.u32 %s7284_s26, 4  ;;  %s7289_s3 = int_to_ptr.hbm [resolvable:$true] %s7288_s3 }
 0x3f8   : > { %4296 = vmatpush.bf16.msra.mxu2 %v8594_v30 }
 0x3fc   : > { %4297 = vmatpush.bf16.msra.mxu2 %v8593_v15 }
 0x400   : > { %4298 = vmatpush.bf16.msra.mxu2 %v8592_v55 }
 0x402   : > { %4182 = vmatmul.bf16.gmra.mxu2 %v11020_v4  ;;  %v4071_v4 = vadd.f32 %v11228_v6, %v4070_v58 }
 0x404   : > { %4299 = vmatpush.bf16.msra.mxu2 %v8591_v2 }
 0x407   : > { %4246 = vmatmul.bf16.gmra.mxu3 %v10944_v53 }
 0x412   : > { %4187 = vmatmul.bf16.gmra.mxu2 %v11023_v20 }
 0x417   : > { %4251 = vmatmul.bf16.gmra.mxu3 %v11048_v46 }
 0x41e   : > { %v4075_v53 = vpop.f32.mrf.mxu2 }
 0x422   : > { %4192 = vmatmul.bf16.gmra.mxu2 %v11185_v28  ;;  %v4076_v28 = vadd.f32 %v11228_v6, %v4075_v53 }
 0x423   : > { %v4139_v50 = vpop.f32.mrf.mxu3 }
 0x424   : > { %v11587_v61 = vadd.f32 %v4139_v50, %v4071_v4 }
 0x426   : > { %v4077_v20 = vpop.f32.mrf.mxu2 }
 0x427   : > { %4256 = vmatmul.bf16.gmra.mxu3 %v11051_v27  ;;  %v4078_v27 = vadd.f32 %v11228_v6, %v4077_v20 }
 0x42b   : > { %v11590_v46 = vpop.f32.mrf.mxu3 }
 0x432   : > { %4197 = vmatmul.bf16.gmra.mxu2 %v11289_v43 }
 0x435   : > { %v4080_v19 = vpop.f32.mrf.mxu2 }
 0x437   : > { %4261 = vmatmul.bf16.gmra.mxu3 %v11209_v31  ;;  %v4081_v31 = vadd.f32 %v11228_v6, %v4080_v19 }
 0x43a   : > { %v4144_v59 = vpop.f32.mrf.mxu3 }
 0x43b   : > { %v11598_v17 = vadd.f32 %v4144_v59, %v4076_v28 }
 0x43d   : > { %v4082_v14 = vpop.f32.mrf.mxu2 }
 0x442   : > { %v4146_v48 = vpop.f32.mrf.mxu3  ;;  %4202 = vmatmul.bf16.gmra.mxu2 %v11322_v47  ;;  %v4083_v47 = vadd.f32 %v11228_v6, %v4082_v14 }
 0x443   : > { %v11602_v43 = vadd.f32 %v4146_v48, %v4078_v27 }
 0x445   : > { %v4163_v44 = vpop.f32.mrf.mxu2 }
 0x446   : > { %v11605_v41 = vadd.f32 %v4163_v44, %v10586_v56 }
 0x447   : > { %4266 = vmatmul.bf16.gmra.mxu3 %v11301_v23 }
 0x44a   : > { %v4149_v22 = vpop.f32.mrf.mxu3 }
 0x44b   : > { %v11609_v32 = vadd.f32 %v4149_v22, %v4081_v31  ;;  %v13920_v31 = vld [vmem:[#allocation20_spill] sm:$0xff] }
 0x44d   : > { %v11614_v11 = vpop.f32.mrf.mxu2 }
 0x452   : > { %v4151_v0 = vpop.f32.mrf.mxu3  ;;  %4207 = vmatmul.bf16.gmra.mxu2 %v11490_v8 }
 0x453   : > { %v11618_v56 = vadd.f32 %v4151_v0, %v4083_v47  ;;  %v8688_v47 = vld [vmem:[%s13918_s7 + $0x18c] sm:$0xf] }
 0x454   : > { %v8020_v0 = vld [vmem:[%s13918_s7 + $0x1a8] sm:$0xf0] }
 0x455   : > { %v4168_v23 = vpop.f32.mrf.mxu2  ;;  %v8023_v2 = vor.u32 %v8688_v47, %v8020_v0 }
 0x456   : > { %v11621_v7 = vadd.f32 %v4168_v23, %v10821_v21 }
 0x457   : > { %4271 = vmatmul.bf16.gmra.mxu3 %v11329_v35 }
 0x45a   : > { %v4232_v53 = vpop.f32.mrf.mxu3 }
 0x45d   : > { %v11624_v33 = vpop.f32.mrf.mxu2 }
 0x462   : > { %4212 = vmatmul.bf16.gmra.mxu2 %v11531_v25  ;;  %v4234_v15 = vpop.f32.mrf.mxu3 }
 0x465   : > { %v4173_v6 = vpop.f32.mrf.mxu2 }
 0x466   : > { %v11631_v8 = vadd.f32 %v4173_v6, %v10966_v34 }
 0x467   : > { %4276 = vmatmul.bf16.gmra.mxu3 %v11502_v62 }
 0x46a   : > { %v4237_v14 = vpop.f32.mrf.mxu3 }
 0x46d   : > { %v11634_v60 = vpop.f32.mrf.mxu2 }
 0x472   : > { %4217 = vmatmul.bf16.gmra.mxu2 %v11534_v12  ;;  %v4239_v44 = vpop.f32.mrf.mxu3 }
 0x475   : > { %v4178_v21 = vpop.f32.mrf.mxu2 }
 0x476   : > { %v11638_v35 = vadd.f32 %v4178_v21, %v11233_v49 }
 0x477   : > { %4281 = vmatmul.bf16.gmra.mxu3 %v11550_v40 }
 0x47a   : > { %v4242_v23 = vpop.f32.mrf.mxu3 }
 0x47d   : > { %v11641_v9 = vpop.f32.mrf.mxu2 }
 0x482   : > { %4300 = vmatmul.bf16.vlgmr.msra.gmra.mxu2 %v10056_v39  ;;  %v8695_v39 = vld [vmem:[%s13918_s7 + $0x1c4] sm:$0xf] }
 0x485   : > { %v4183_v25 = vpop.f32.mrf.mxu2 }
 0x486   : > { %v11645_v34 = vadd.f32 %v4183_v25, %v11268_v38  ;;  %v8044_v38 = vld [vmem:[%s13918_s7 + $0x1e0] sm:$0xf0]  ;;  %v13922_v25 = vld [vmem:[#allocation21_spill] sm:$0xff] }
 0x487   : > { %4286 = vmatmul.bf16.gmra.mxu3 %v11553_v26  ;;  %v8047_v40 = vor.u32 %v8695_v39, %v8044_v38  ;;  %v13923_v38 = vld [vmem:[#allocation9_spill] sm:$0xff] }
 0x489   : > { %5496 = vmatpush.bf16.msrb.mxu1 %v8047_v40 }
 0x48d   : > { %v11648_v62 = vpop.f32.mrf.mxu2 }
 0x492   : > { %4305 = vmatmul.bf16.gmra.mxu2 %v10256_v24 }
 0x495   : > { %v4188_v12 = vpop.f32.mrf.mxu2 }
 0x496   : > { %v11652_v49 = vadd.f32 %v4188_v12, %v11312_v1  ;;  %v8696_v1 = vld [vmem:[%s13918_s7 + $0x1cc] sm:$0xf]  ;;  %v4244_v12 = vpop.f32.mrf.mxu3 }
 0x49d   : > { %v11654_v3 = vpop.f32.mrf.mxu2 }
 0x4a2   : > { %4310 = vmatmul.bf16.gmra.mxu2 %v10347_v18  ;;  %v8052_v18 = vld [vmem:[%s13918_s7 + $0x1e8] sm:$0xf0] }
 0x4a3   : > { %v8055_v54 = vor.u32 %v8696_v1, %v8052_v18  ;;  %v13924_v1 = vld [vmem:[#allocation10_spill] sm:$0xff] }
 0x4a5   : > { %v4193_v26 = vpop.f32.mrf.mxu2  ;;  %5524 = vmatpush.bf16.msrb.mxu0 %v8055_v54 }
 0x4a6   : > { %v11664_v24 = vadd.f32 %v4193_v26, %v11374_v63 }
 0x4a9   : > { %5525 = vmatpush.bf16.msrb.mxu0 %v8023_v2  ;;  %v4243_v2 = vadd.f32 %v4242_v23, %v11631_v8 }
 0x4ad   : > { %v11672_v57 = vpop.f32.mrf.mxu2 }
 0x4b2   : > { %4315 = vmatmul.bf16.gmra.mxu2 %v10776_v16 }
 0x4b5   : > { %v4198_v29 = vpop.f32.mrf.mxu2 }
 0x4b6   : > { %v11676_v58 = vadd.f32 %v4198_v29, %v11438_v37  ;;  %v11693_v37 = vld [vmem:[%s13863_s4] ss:$0 sm:$0xff]  ;;  %s7286_s4 = sshll.u32 %s571_s21, 4  ;;  %s7287_s4 = int_to_ptr.vmem [resolvable:$true] %s7286_s4 }
 0x4b7   : > { %v4028_v40 = vadd.f32 %v11693_v37, %v13923_v38 }
 0x4b9   : > { %v4097_v18 = vadd.f32 %v13924_v1, %v4028_v40 }
 0x4bb   : > { %v4166_v29 = vadd.f32 %v11614_v11, %v4097_v18 }
 0x4bd   : > { %v11678_v63 = vpop.f32.mrf.mxu2 }
 0x4c2   : > { %4320 = vmatmul.bf16.gmra.mxu2 %v11035_v5  ;;  %v4073_v5 = vadd.f32 %v11693_v37, %v11580_v51  ;;  %v8606_v51 = vld [vmem:[%s13921_s5 + $0x38] sm:$0xff] }
 0x4c3   : > { %4919 = vmatpush.bf16.msra.mxu3 %v8606_v51 }
 0x4c5   : > { %v4203_v30 = vpop.f32.mrf.mxu2 }
 0x4c6   : > { %v11682_v4 = vadd.f32 %v4203_v30, %v11511_v10  ;;  %v4142_v10 = vadd.f32 %v11590_v46, %v4073_v5  ;;  %v8687_v46 = vld [vmem:[%s13918_s7 + $0x184] sm:$0xf]  ;;  %v4235_v30 = vadd.f32 %v4234_v15, %v4166_v29 }
 0x4cd   : > { %v11684_v50 = vpop.f32.mrf.mxu2 }
 0x4d2   : > { %4325 = vmatmul.bf16.gmra.mxu2 %v11038_v42  ;;  %v13919_v42 = vld [vmem:[#allocation13_spill] sm:$0xff] }
 0x4d5   : > { %v4208_v20 = vpop.f32.mrf.mxu2 }
 0x4d6   : > { %v11688_v16 = vadd.f32 %v4208_v20, %v11587_v61 }
 0x4dd   : > { %v4210_v19 = vpop.f32.mrf.mxu2 }
 0x4de   : > { %v11698_v28 = vadd.f32 %v4210_v19, %v4142_v10  ;;  %v13925_v10 = vld [vmem:[#allocation25_spill] sm:$0xff]  ;;  %v4238_v19 = vadd.f32 %v4237_v14, %v11621_v7  ;;  %v8604_v7 = vld [vmem:[%s13921_s5 + $0x28] sm:$0xff] }
 0x4e2   : > { %4330 = vmatmul.bf16.gmra.mxu2 %v13919_v42 }
 0x4e5   : > { %v4213_v59 = vpop.f32.mrf.mxu2 }
 0x4e6   : > { %v11702_v61 = vadd.f32 %v4213_v59, %v11598_v17  ;;  %v8012_v17 = vld [vmem:[%s13918_s7 + $0x1a0] sm:$0xf0]  ;;  %v13926_v59 = vld [vmem:[#allocation11_spill] sm:$0xff] }
 0x4e7   : > { %v8015_v22 = vor.u32 %v8687_v46, %v8012_v17  ;;  %v4033_v11 = vadd.f32 %v11693_v37, %v13926_v59 }
 0x4e9   : > { %5497 = vmatpush.bf16.msrb.mxu1 %v8015_v22 }
 0x4ed   : > { %v4215_v27 = vpop.f32.mrf.mxu2 }
 0x4ee   : > { %v11705_v48 = vadd.f32 %v4215_v27, %v11602_v43 }
 0x4f2   : > { %4335 = vmatmul.bf16.gmra.mxu2 %v13920_v31  ;;  %v13927_v31 = vld [vmem:[#allocation12_spill] sm:$0xff] }
 0x4f3   : > { %v4102_v51 = vadd.f32 %v13927_v31, %v4033_v11 }
 0x4f5   : > { %v4218_v55 = vpop.f32.mrf.mxu2  ;;  %v4171_v15 = vadd.f32 %v11624_v33, %v4102_v51 }
 0x4f6   : > { %v11718_v43 = vadd.f32 %v4218_v55, %v11609_v32  ;;  %v4233_v32 = vadd.f32 %v4232_v53, %v11605_v41  ;;  %v4247_v53 = vpop.f32.mrf.mxu3 }
 0x4f7   : > { %v4240_v22 = vadd.f32 %v4239_v44, %v4171_v15  ;;  %v13929_v44 = vld [vmem:[#allocation15_spill] sm:$0xff]  ;;  %v4248_v23 = vadd.f32 %v4247_v53, %v11638_v35  ;;  %v8638_v35 = vld [vmem:[%s13921_s5 + $0x138] sm:$0xff] }
 0x4f8   : > { %5015 = vmatpush.bf16.msrb.mxu2 %v8638_v35  ;;  %v8600_v35 = vld [vmem:[%s13921_s5 + $0x8] sm:$0xff] }
 0x4fd   : > { %v4220_v6 = vpop.f32.mrf.mxu2 }
 0x4fe   : > { %v11727_v21 = vadd.f32 %v4220_v6, %v11618_v56  ;;  %v8605_v56 = vld [vmem:[%s13921_s5 + $0x30] sm:$0xff]  ;;  %v4249_v17 = vpop.f32.mrf.mxu3 }
 0x4ff   : > { %4920 = vmatpush.bf16.msra.mxu3 %v8605_v56 }
 0x502   : > { %4340 = vmatmul.bf16.gmra.mxu2 %v13922_v25  ;;  %v13928_v25 = vld [vmem:[#allocation14_spill] sm:$0xff] }
 0x503   : > { %4921 = vmatpush.bf16.msra.mxu3 %v8604_v7  ;;  %v4038_v33 = vadd.f32 %v11693_v37, %v13928_v25  ;;  %v8637_v25 = vld [vmem:[%s13921_s5 + $0x130] sm:$0xff] }
 0x504   : > { %5016 = vmatpush.bf16.msrb.mxu2 %v8637_v25 }
 0x505   : > { %v4301_v39 = vpop.f32.mrf.mxu2 }
 0x506   : > { %v4302_v26 = vadd.f32 %v4301_v39, %v4233_v32  ;;  %v4252_v14 = vpop.f32.mrf.mxu3  ;;  %v4107_v39 = vadd.f32 %v13929_v44, %v4038_v33  ;;  %v7980_v33 = vld [vmem:[%s13918_s7 + $0x160] sm:$0xf0] }
 0x508   : > { %v4361_v54 = vmax.f32 %v4302_v26, 0.0  ;;  %v4176_v40 = vadd.f32 %v11634_v60, %v4107_v39  ;;  %v4253_v39 = vadd.f32 %v4252_v14, %v11645_v34  ;;  %v13933_v14 = vld [vmem:[#allocation19_spill] sm:$0xff] }
 0x50a   : > { %4385 = vst [vmem:[#allocation2] sm:$0xff] %v4361_v54 }
 0x50d   : > { %v4303_v20 = vpop.f32.mrf.mxu2 }
 0x50e   : > { %v4304_v41 = vadd.f32 %v4303_v20, %v4235_v30  ;;  %v11753_v26 = vpop.f32.mrf.mxu3  ;;  %v13930_v20 = vld [vmem:[#allocation16_spill] sm:$0xff] }
 0x510   : > { %v4362_v5 = vmax.f32 %v4304_v41, 0.0  ;;  %v4043_v41 = vadd.f32 %v11693_v37, %v13930_v20 }
 0x512   : > { %4386 = vst [vmem:[#allocation2 + $0x8] sm:$0xff] %v4362_v5  ;;  %4345 = vmatmul.bf16.gmra.mxu2 %v13925_v10  ;;  %v13931_v10 = vld [vmem:[#allocation17_spill] sm:$0xff] }
 0x515   : > { %v4306_v42 = vpop.f32.mrf.mxu2 }
 0x516   : > { %v4307_v27 = vadd.f32 %v4306_v42, %v4238_v19  ;;  %v11759_v5 = vpop.f32.mrf.mxu3  ;;  %v4112_v19 = vadd.f32 %v13931_v10, %v4043_v41  ;;  %v8680_v41 = vld [vmem:[%s13918_s7 + $0x14c] sm:$0xf] }
 0x518   : > { %v4363_v46 = vmax.f32 %v4307_v27, 0.0  ;;  %v4181_v31 = vadd.f32 %v11641_v9, %v4112_v19 }
 0x51a   : > { %4387 = vst [vmem:[#allocation2 + $0x10] sm:$0xff] %v4363_v46  ;;  %v4250_v46 = vadd.f32 %v4249_v17, %v4181_v31  ;;  %v8679_v17 = vld [vmem:[%s13918_s7 + $0x144] sm:$0xf] }
 0x51b   : > { %v7983_v44 = vor.u32 %v8679_v17, %v7980_v33 }
 0x51d   : > { %v4308_v55 = vpop.f32.mrf.mxu2  ;;  %5498 = vmatpush.bf16.msrb.mxu1 %v7983_v44 }
 0x51e   : > { %v4309_v47 = vadd.f32 %v4308_v55, %v4240_v22 }
 0x520   : > { %v4364_v0 = vmax.f32 %v4309_v47, 0.0 }
 0x521   : > { %v4409_v29 = vld [vmem:[#allocation2] ss:$3 sm:$0xff]  ;;  %v4424_v8 = vld [vmem:[#allocation2 + $0x1] ss:$3 sm:$0xff] }
 0x522   : > { %4388 = vst [vmem:[#allocation2 + $0x18] sm:$0xff] %v4364_v0  ;;  %4350 = vmatmul.bf16.gmra.mxu2 %v11539_v13  ;;  %v4245_v13 = vadd.f32 %v4244_v12, %v4176_v40  ;;  %v4432_v56 = vmax.f32 %v4409_v29, %v4424_v8  ;;  %v4440_v12 = vld [vmem:[#allocation2 + $0x2] ss:$3 sm:$0xff] }
 0x524   : > { %v4448_v59 = vmax.f32 %v4432_v56, %v4440_v12  ;;  %v8635_v12 = vld [vmem:[%s13921_s5 + $0x120] sm:$0xff] }
 0x525   : > { %v4311_v6 = vpop.f32.mrf.mxu2 }
 0x526   : > { %v4312_v32 = vadd.f32 %v4311_v6, %v4243_v2  ;;  %v4456_v22 = vpack.c.bf16 %v4448_v59, %v4448_v59  ;;  %v4259_v6 = vpop.f32.mrf.mxu3  ;;  %v8634_v59 = vld [vmem:[%s13921_s5 + $0x118] sm:$0xff] }
 0x528   : > { %v4365_v38 = vmax.f32 %v4312_v32, 0.0  ;;  %v4466_v7 = vunpack.c.l.b16 %v4456_v22  ;;  %v8599_v22 = vld [vmem:[%s13921_s5] sm:$0xff] }
 0x52a   : > { %4389 = vst [vmem:[#allocation2 + $0x20] sm:$0xff] %v4365_v38  ;;  %v8636_v38 = vld [vmem:[%s13921_s5 + $0x128] sm:$0xff] }
 0x52b   : > { %5017 = vmatpush.bf16.msrb.mxu2 %v8636_v38 }
 0x52d   : > { %v4313_v1 = vpop.f32.mrf.mxu2 }
 0x52e   : > { %v4314_v18 = vadd.f32 %v4313_v1, %v4245_v13  ;;  %v4262_v10 = vpop.f32.mrf.mxu3 }
 0x52f   : > { %5018 = vmatpush.bf16.msrb.mxu2 %v8635_v12 }
 0x530   : > { %v4366_v54 = vmax.f32 %v4314_v18, 0.0  ;;  %v13932_v18 = vld [vmem:[#allocation18_spill] sm:$0xff] }
 0x532   : > { %4390 = vst [vmem:[#allocation2 + $0x28] sm:$0xff] %v4366_v54  ;;  %4355 = vmatmul.bf16.gmra.mxu2 %v11542_v45  ;;  %v8603_v45 = vld [vmem:[%s13921_s5 + $0x20] sm:$0xff]  ;;  %v4048_v54 = vadd.f32 %v11693_v37, %v13932_v18  ;;  %v4263_v18 = vadd.f32 %v4262_v10, %v11664_v24 }
 0x533   : > { %4922 = vmatpush.bf16.msra.mxu3 %v8603_v45  ;;  %5019 = vmatpush.bf16.msrb.mxu2 %v8634_v59 }
 0x535   : > { %v4316_v30 = vpop.f32.mrf.mxu2 }
 0x536   : > { %v4317_v60 = vadd.f32 %v4316_v30, %v4248_v23  ;;  %v4117_v23 = vadd.f32 %v13933_v14, %v4048_v54  ;;  %v13936_v14 = vld [vmem:[#allocation24_spill] sm:$0xff] }
 0x538   : > { %v4367_v42 = vmax.f32 %v4317_v60, 0.0  ;;  %v4186_v20 = vadd.f32 %v11648_v62, %v4117_v23  ;;  %v7988_v60 = vld [vmem:[%s13918_s7 + $0x168] sm:$0xf0] }
 0x539   : > { %v4411_v11 = vld [vmem:[#allocation2 + $0x18] ss:$3 sm:$0xff]  ;;  %v4425_v27 = vld [vmem:[#allocation2 + $0x19] ss:$3 sm:$0xff]  ;;  %v4441_v51 = vld [vmem:[#allocation2 + $0x1a] ss:$3 sm:$0xff]  ;;  %v7991_v19 = vor.u32 %v8680_v41, %v7988_v60 }
 0x53a   : > { %4391 = vst [vmem:[#allocation2 + $0x30] sm:$0xff] %v4367_v42  ;;  %v4433_v53 = vmax.f32 %v4411_v11, %v4425_v27  ;;  %v8602_v42 = vld [vmem:[%s13921_s5 + $0x18] sm:$0xff]  ;;  %v4255_v62 = vadd.f32 %v11753_v26, %v4186_v20  ;;  %v8601_v27 = vld [vmem:[%s13921_s5 + $0x10] sm:$0xff]  ;;  %v13937_v20 = vld [vmem:[#allocation26_spill] sm:$0xff] }
 0x53b   : > { %5526 = vmatpush.bf16.msrb.mxu0 %v7991_v19  ;;  %4923 = vmatpush.bf16.msra.mxu3 %v8602_v42  ;;  %v8633_v26 = vld [vmem:[%s13921_s5 + $0x110] sm:$0xff] }
 0x53c   : > { %v4449_v15 = vmax.f32 %v4433_v53, %v4441_v51  ;;  %v4258_v53 = vadd.f32 %v11759_v5, %v11652_v49  ;;  %5020 = vmatpush.bf16.msrb.mxu2 %v8633_v26  ;;  %v8632_v51 = vld [vmem:[%s13921_s5 + $0x108] sm:$0xff]  ;;  %v8631_v5 = vld [vmem:[%s13921_s5 + $0x100] sm:$0xff] }
 0x53d   : > { %v4318_v55 = vpop.f32.mrf.mxu2 }
 0x53e   : > { %v4319_v47 = vadd.f32 %v4318_v55, %v4250_v46  ;;  %v4457_v0 = vpack.c.bf16 %v4449_v15, %v4449_v15  ;;  %v4264_v46 = vpop.f32.mrf.mxu3  ;;  %v13934_v55 = vld [vmem:[#allocation22_spill] sm:$0xff] }
 0x53f   : > { %4924 = vmatpush.bf16.msra.mxu3 %v8601_v27 }
 0x540   : > { %v4368_v9 = vmax.f32 %v4319_v47, 0.0  ;;  %v4467_v2 = vunpack.c.l.b16 %v4457_v0  ;;  %v4053_v47 = vadd.f32 %v11693_v37, %v13934_v55  ;;  %5021 = vmatpush.bf16.msrb.mxu2 %v8632_v51 }
 0x542   : > { %4392 = vst [vmem:[#allocation2 + $0x38] sm:$0xff] %v4368_v9  ;;  %v11778_v32 = vpack.c.b16 %v4467_v2, %v4466_v7  ;;  %v13935_v9 = vld [vmem:[#allocation23_spill] sm:$0xff] }
 0x543   : > { %4925 = vmatpush.bf16.msra.mxu3 %v8600_v35  ;;  %v4122_v7 = vadd.f32 %v13935_v9, %v4053_v47 }
 0x544   : > { %v4470_v40 = vshrl.u32 %v11778_v32, 16  ;;  %v4472_v13 = vshll.u32 %v11778_v32, 16  ;;  %5022 = vmatpush.bf16.msrb.mxu2 %v8631_v5 }
 0x545   : > { %v4321_v1 = vpop.f32.mrf.mxu2  ;;  %v4191_v49 = vadd.f32 %v11654_v3, %v4122_v7  ;;  %v4058_v3 = vadd.f32 %v11693_v37, %v13936_v14  ;;  %v13938_v7 = vld [vmem:[#allocation27_spill] sm:$0xff] }
 0x546   : > { %v4322_v29 = vadd.f32 %v4321_v1, %v4253_v39  ;;  %v11790_v8 = vrot.slane %v4470_v40, 1  ;;  %v11794_v34 = vrot.slane %v4472_v13, 2  ;;  %v4267_v44 = vpop.f32.mrf.mxu3  ;;  %v4474_v5 = vrot.slane %v4472_v13, 1 }
 0x547   : > { %4926 = vmatpush.bf16.msra.mxu3 %v8599_v22  ;;  %v4260_v25 = vadd.f32 %v4259_v6, %v4191_v49  ;;  %v4127_v41 = vadd.f32 %v13937_v20, %v4058_v3  ;;  %v4268_v22 = vadd.f32 %v4267_v44, %v11676_v58  ;;  %v4480_v49 = vrot.slane %v11778_v32, 2 }
 0x548   : > { %v4369_v56 = vmax.f32 %v4322_v29, 0.0  ;;  %v4479_v30 = vor.u32 %v11794_v34, %v11790_v8  ;;  %v4476_v44 = vrot.slane %v11778_v32, 1  ;;  %v4475_v20 = vor.u32 %v4474_v5, %v4470_v40 }
 0x54a   : > { %4393 = vst [vmem:[#allocation2 + $0x40] sm:$0xff] %v4369_v56 }
 0x54d   : > { %v4323_v11 = vpop.f32.mrf.mxu2 }
 0x54e   : > { %v4324_v31 = vadd.f32 %v4323_v11, %v4255_v62  ;;  %v4269_v12 = vpop.f32.mrf.mxu3  ;;  %v4196_v62 = vadd.f32 %v11672_v57, %v4127_v41 }
 0x550   : > { %v4370_v45 = vmax.f32 %v4324_v31, 0.0  ;;  %v4265_v24 = vadd.f32 %v4264_v46, %v4196_v62  ;;  %v4063_v46 = vadd.f32 %v11693_v37, %v13938_v7 }
 0x551   : > { %v4413_v38 = vld [vmem:[#allocation2 + $0x30] ss:$3 sm:$0xff]  ;;  %v4426_v1 = vld [vmem:[#allocation2 + $0x31] ss:$3 sm:$0xff]  ;;  %v4442_v56 = vld [vmem:[#allocation2 + $0x32] ss:$3 sm:$0xff] }
 0x552   : > { %4394 = vst [vmem:[#allocation2 + $0x48] sm:$0xff] %v4370_v45  ;;  %v4434_v54 = vmax.f32 %v4413_v38, %v4426_v1 }
 0x554   : > { %v4450_v60 = vmax.f32 %v4434_v54, %v4442_v56 }
 0x555   : > { %v4326_v15 = vpop.f32.mrf.mxu2 }
 0x556   : > { %v4327_v0 = vadd.f32 %v4326_v15, %v4258_v53  ;;  %v4458_v27 = vpack.c.bf16 %v4450_v60, %v4450_v60  ;;  %v4272_v55 = vpop.f32.mrf.mxu3 }
 0x558   : > { %v4371_v2 = vmax.f32 %v4327_v0, 0.0  ;;  %v4483_v53 = vunpack.c.l.b16 %v4458_v27 }
 0x55a   : > { %4395 = vst [vmem:[#allocation2 + $0x50] sm:$0xff] %v4371_v2 }
 0x55d   : > { %v4328_v17 = vpop.f32.mrf.mxu2 }
 0x55e   : > { %v4329_v33 = vadd.f32 %v4328_v17, %v4260_v25 }
 0x560   : > { %v4372_v39 = vmax.f32 %v4329_v33, 0.0 }
 0x562   : > { %4396 = vst [vmem:[#allocation2 + $0x58] sm:$0xff] %v4372_v39 }
 0x565   : > { %v4331_v29 = vpop.f32.mrf.mxu2 }
 0x566   : > { %v4332_v23 = vadd.f32 %v4331_v29, %v4263_v18  ;;  %v13939_v18 = vld [vmem:[#allocation28_spill] sm:$0xff] }
 0x567   : > { %v4132_v54 = vadd.f32 %v13939_v18, %v4063_v46 }
 0x568   : > { %v4373_v6 = vmax.f32 %v4332_v23, 0.0 }
 0x569   : > { %v4415_v19 = vld [vmem:[#allocation2 + $0x48] ss:$3 sm:$0xff]  ;;  %v4427_v42 = vld [vmem:[#allocation2 + $0x49] ss:$3 sm:$0xff]  ;;  %v4443_v11 = vld [vmem:[#allocation2 + $0x4a] ss:$3 sm:$0xff]  ;;  %v4201_v56 = vadd.f32 %v11678_v63, %v4132_v54 }
 0x56a   : > { %4397 = vst [vmem:[#allocation2 + $0x60] sm:$0xff] %v4373_v6  ;;  %v4435_v59 = vmax.f32 %v4415_v19, %v4427_v42  ;;  %v4274_v42 = vpop.f32.mrf.mxu3 }
 0x56b   : > { %v4270_v60 = vadd.f32 %v4269_v12, %v4201_v56  ;;  %v8614_v56 = vld [vmem:[%s13921_s5 + $0x78] sm:$0xff] }
 0x56c   : > { %v4451_v10 = vmax.f32 %v4435_v59, %v4443_v11  ;;  %v4273_v59 = vadd.f32 %v4272_v55, %v11682_v4  ;;  %v4068_v11 = vadd.f32 %v11693_v37, %v11574_v36  ;;  %v8671_v36 = vld [vmem:[%s13918_s7 + $0x104] sm:$0xf]  ;;  %v7956_v37 = vld [vmem:[%s13918_s7 + $0x128] sm:$0xf0]  ;;  %4943 = vmatpush.bf16.msrb.mxu3 %v8614_v56 }
 0x56d   : > { %v4333_v31 = vpop.f32.mrf.mxu2 }
 0x56e   : > { %v4334_v45 = vadd.f32 %v4333_v31, %v4265_v24  ;;  %v4459_v26 = vpack.c.bf16 %v4451_v10, %v4451_v10  ;;  %v4137_v27 = vadd.f32 %v11578_v52, %v4068_v11  ;;  %v7948_v52 = vld [vmem:[%s13918_s7 + $0x120] sm:$0xf0] }
 0x56f   : > { %v7951_v4 = vor.u32 %v8671_v36, %v7948_v52  ;;  %v8611_v36 = vld [vmem:[%s13921_s5 + $0x60] sm:$0xff] }
 0x570   : > { %v4374_v35 = vmax.f32 %v4334_v45, 0.0  ;;  %v4484_v51 = vunpack.c.l.b16 %v4459_v26  ;;  %v4206_v45 = vadd.f32 %v11684_v50, %v4137_v27  ;;  %v8672_v50 = vld [vmem:[%s13918_s7 + $0x10c] sm:$0xf] }
 0x571   : > { %v7959_v55 = vor.u32 %v8672_v50, %v7956_v37  ;;  %5499 = vmatpush.bf16.msrb.mxu1 %v7951_v4 }
 0x572   : > { %4398 = vst [vmem:[#allocation2 + $0x68] sm:$0xff] %v4374_v35  ;;  %v4485_v15 = vpack.c.b16 %v4484_v51, %v4483_v53  ;;  %v4277_v10 = vpop.f32.mrf.mxu3  ;;  %v4275_v8 = vadd.f32 %v4274_v42, %v4206_v45  ;;  %v8613_v42 = vld [vmem:[%s13921_s5 + $0x70] sm:$0xff] }
 0x573   : > { %5527 = vmatpush.bf16.msrb.mxu0 %v7959_v55  ;;  %4944 = vmatpush.bf16.msrb.mxu3 %v8613_v42 }
 0x574   : > { %v11846_v47 = vrot.slane %v4485_v15, 2  ;;  %v4487_v57 = vshrl.u32 %v4485_v15, 16  ;;  %v4489_v0 = vshll.u32 %v4485_v15, 16  ;;  %v4493_v9 = vrot.slane %v4485_v15, 1 }
 0x575   : > { %v4336_v2 = vpop.f32.mrf.mxu2  ;;  %v4278_v15 = vadd.f32 %v4277_v10, %v11688_v16 }
 0x576   : > { %v4337_v25 = vadd.f32 %v4336_v2, %v4268_v22  ;;  %v4547_v58 = vsel %vm993_vm3, %v11778_v32, %v11846_v47  ;;  %v4535_v17 = vrot.slane %v11846_v47, 2  ;;  %v4491_v33 = vrot.slane %v4489_v0, 1 }
 0x577   : > { %4927 = vmatmul.bf16.vlgmr.msra.gmra.mxu3 %v4547_v58  ;;  %v11858_v39 = vrot.slane %v4493_v9, 2  ;;  %v4494_v38 = vrot.slane %v4487_v57, 1  ;;  %v4495_v1 = vrot.slane %v4489_v0, 2 }
 0x578   : > { %v4375_v29 = vmax.f32 %v4337_v25, 0.0  ;;  %v4563_v13 = vsel %vm993_vm3, %v4480_v49, %v4535_v17  ;;  %v11864_v14 = vor.u32 %v4491_v33, %v4487_v57 }
 0x579   : > { %5023 = vmatmul.bf16.vlgmr.msrb.gmra.mxu2 %v4563_v13  ;;  %v11868_v3 = vsel %vm993_vm3, %v4476_v44, %v11858_v39  ;;  %v4496_v23 = vor.u32 %v4495_v1, %v4494_v38 }
 0x57a   : > { %4399 = vst [vmem:[#allocation2 + $0x70] sm:$0xff] %v4375_v29  ;;  %v4532_v41 = vrot.slane %v11864_v14, 2  ;;  %v4279_v35 = vpop.f32.mrf.mxu3  ;;  %v8610_v14 = vld [vmem:[%s13921_s5 + $0x58] sm:$0xff] }
 0x57b   : > { %v11874_v6 = vrot.slane %v4496_v23, 2  ;;  %v4280_v33 = vadd.f32 %v4279_v35, %v11698_v28 }
 0x57c   : > { %v11879_v19 = vsel %vm993_vm3, %v4475_v20, %v4532_v41 }
 0x57d   : > { %v4338_v62 = vpop.f32.mrf.mxu2  ;;  %v11886_v63 = vsel %vm993_vm3, %v4479_v30, %v11874_v6 }
 0x57e   : > { %v4339_v32 = vadd.f32 %v4338_v62, %v4270_v60 }
 0x580   : > { %v4376_v40 = vmax.f32 %v4339_v32, 0.0 }
 0x581   : > { %v4417_v53 = vld [vmem:[#allocation2 + $0x60] ss:$3 sm:$0xff]  ;;  %v4428_v51 = vld [vmem:[#allocation2 + $0x61] ss:$3 sm:$0xff]  ;;  %v4444_v9 = vld [vmem:[#allocation2 + $0x62] ss:$3 sm:$0xff] }
 0x582   : > { %4400 = vst [vmem:[#allocation2 + $0x78] sm:$0xff] %v4376_v40  ;;  %v4436_v22 = vmax.f32 %v4417_v53, %v4428_v51  ;;  %v4282_v25 = vpop.f32.mrf.mxu3 }
 0x583   : > { %v4283_v20 = vadd.f32 %v4282_v25, %v11702_v61 }
 0x584   : > { %v4452_v46 = vmax.f32 %v4436_v22, %v4444_v9 }
 0x585   : > { %v4341_v12 = vpop.f32.mrf.mxu2 }
 0x586   : > { %v4342_v24 = vadd.f32 %v4341_v12, %v4273_v59  ;;  %v4460_v38 = vpack.c.bf16 %v4452_v46, %v4452_v46 }
 0x588   : > { %v4377_v31 = vmax.f32 %v4342_v24, 0.0  ;;  %v4500_v29 = vunpack.c.l.b16 %v4460_v38 }
 0x58a   : > { %4401 = vst [vmem:[#allocation2 + $0x80] sm:$0xff] %v4377_v31  ;;  %v4284_v40 = vpop.f32.mrf.mxu3 }
 0x58d   : > { %v4343_v34 = vpop.f32.mrf.mxu2 }
 0x58e   : > { %v4344_v30 = vadd.f32 %v4343_v34, %v4275_v8 }
 0x590   : > { %v4378_v26 = vmax.f32 %v4344_v30, 0.0  ;;  %v8612_v30 = vld [vmem:[%s13921_s5 + $0x68] sm:$0xff] }
 0x591   : > { %4945 = vmatpush.bf16.msrb.mxu3 %v8612_v30  ;;  %v8620_v30 = vld [vmem:[%s13921_s5 + $0xa8] sm:$0xff] }
 0x592   : > { %4402 = vst [vmem:[#allocation2 + $0x88] sm:$0xff] %v4378_v26 }
 0x595   : > { %v4346_v57 = vpop.f32.mrf.mxu2  ;;  %4946 = vmatpush.bf16.msrb.mxu3 %v8611_v36  ;;  %v8617_v36 = vld [vmem:[%s13921_s5 + $0x90] sm:$0xff] }
 0x596   : > { %v4347_v0 = vadd.f32 %v4346_v57, %v4278_v15 }
 0x598   : > { %v4379_v7 = vmax.f32 %v4347_v0, 0.0 }
 0x599   : > { %v4419_v2 = vld [vmem:[#allocation2 + $0x78] ss:$3 sm:$0xff]  ;;  %v4429_v49 = vld [vmem:[#allocation2 + $0x79] ss:$3 sm:$0xff]  ;;  %v4445_v58 = vld [vmem:[#allocation2 + $0x7a] ss:$3 sm:$0xff]  ;;  %4947 = vmatpush.bf16.msrb.mxu3 %v8610_v14 }
 0x59a   : > { %4403 = vst [vmem:[#allocation2 + $0x90] sm:$0xff] %v4379_v7  ;;  %v4437_v5 = vmax.f32 %v4419_v2, %v4429_v49  ;;  %v8625_v14 = vld [vmem:[%s13921_s5 + $0xd0] sm:$0xff] }
 0x59c   : > { %v4453_v44 = vmax.f32 %v4437_v5, %v4445_v58  ;;  %v8607_v5 = vld [vmem:[%s13921_s5 + $0x40] sm:$0xff] }
 0x59d   : > { %v4348_v16 = vpop.f32.mrf.mxu2 }
 0x59e   : > { %v4349_v1 = vadd.f32 %v4348_v16, %v4280_v33  ;;  %v4461_v18 = vpack.c.bf16 %v4453_v44, %v4453_v44 }
 0x5a0   : > { %v4380_v54 = vmax.f32 %v4349_v1, 0.0  ;;  %v4501_v13 = vunpack.c.l.b16 %v4461_v18 }
 0x5a2   : > { %4404 = vst [vmem:[#allocation2 + $0x98] sm:$0xff] %v4380_v54  ;;  %v11907_v23 = vpack.c.b16 %v4501_v13, %v4500_v29 }
 0x5a4   : > { %v4536_v60 = vrot.slane %v11907_v23, 4  ;;  %v4514_v28 = vrot.slane %v11907_v23, 2  ;;  %v4504_v62 = vshrl.u32 %v11907_v23, 16  ;;  %v4506_v32 = vshll.u32 %v11907_v23, 16 }
 0x5a5   : > { %v4351_v59 = vpop.f32.mrf.mxu2  ;;  %v4510_v12 = vrot.slane %v11907_v23, 1  ;;  %v7916_v23 = vld [vmem:[%s13918_s7 + $0xe0] sm:$0xf0] }
 0x5a6   : > { %v4352_v11 = vadd.f32 %v4351_v59, %v4283_v20  ;;  %v4566_v61 = vsel %vm2130_vm7, %v11846_v47, %v4536_v60  ;;  %v11925_v24 = vrot.slane %v4514_v28, 4  ;;  %v4508_v10 = vrot.slane %v4506_v32, 1 }
 0x5a7   : > { %4932 = vmatmul.bf16.gmra.mxu3 %v4566_v61  ;;  %v11927_v27 = vrot.slane %v4510_v12, 4  ;;  %v4511_v31 = vrot.slane %v4504_v62, 1  ;;  %v4512_v45 = vrot.slane %v4506_v32, 2 }
 0x5a8   : > { %v4381_v8 = vmax.f32 %v4352_v11, 0.0  ;;  %v4578_v34 = vsel %vm2130_vm7, %v4535_v17, %v11925_v24  ;;  %v11936_v26 = vor.u32 %v4508_v10, %v4504_v62  ;;  %v4285_v17 = vadd.f32 %v4284_v40, %v11705_v48  ;;  %v4287_v48 = vpop.f32.mrf.mxu3  ;;  %v8622_v11 = vld [vmem:[%s13921_s5 + $0xb8] sm:$0xff] }
 0x5a9   : > { %5028 = vmatmul.bf16.gmra.mxu2 %v4578_v34  ;;  %v11941_v35 = vsel %vm2130_vm7, %v11858_v39, %v11927_v27  ;;  %v4513_v53 = vor.u32 %v4512_v45, %v4511_v31  ;;  %v4288_v15 = vadd.f32 %v4287_v48, %v11718_v43  ;;  %v8608_v43 = vld [vmem:[%s13921_s5 + $0x48] sm:$0xff]  ;;  %v8663_v31 = vld [vmem:[%s13918_s7 + $0xc4] sm:$0xf] }
 0x5aa   : > { %4405 = vst [vmem:[#allocation2 + $0xa0] sm:$0xff] %v4381_v8  ;;  %v4537_v51 = vrot.slane %v11936_v26, 4  ;;  %v7919_v45 = vor.u32 %v8663_v31, %v7916_v23  ;;  %v7924_v8 = vld [vmem:[%s13918_s7 + $0xe8] sm:$0xf0]  ;;  %v8627_v26 = vld [vmem:[%s13921_s5 + $0xe0] sm:$0xff] }
 0x5ab   : > { %v11944_v47 = vrot.slane %v4513_v53, 4 }
 0x5ac   : > { %v11955_v39 = vsel %vm2130_vm7, %v4532_v41, %v4537_v51  ;;  %5500 = vmatpush.bf16.msrb.mxu1 %v7919_v45  ;;  %v8010_v45 = vld [vmem:[%s13918_s7 + $0x180] sm:$0xf] }
 0x5ad   : > { %v4353_v52 = vpop.f32.mrf.mxu2  ;;  %v11960_v4 = vsel %vm2130_vm7, %v11874_v6, %v11944_v47  ;;  %v8609_v6 = vld [vmem:[%s13921_s5 + $0x50] sm:$0xff] }
 0x5ae   : > { %v4354_v50 = vadd.f32 %v4353_v52, %v4285_v17  ;;  %4948 = vmatpush.bf16.msrb.mxu3 %v8609_v6  ;;  %v8619_v17 = vld [vmem:[%s13921_s5 + $0xa0] sm:$0xff]  ;;  %v8616_v52 = vld [vmem:[%s13921_s5 + $0x88] sm:$0xff] }
 0x5af   : > { %v7884_v6 = vld [vmem:[%s13918_s7 + $0xa0] sm:$0xf0] }
 0x5b0   : > { %v4382_v37 = vmax.f32 %v4354_v50, 0.0  ;;  %v4289_v57 = vpop.f32.mrf.mxu3  ;;  %v8615_v50 = vld [vmem:[%s13921_s5 + $0x80] sm:$0xff] }
 0x5b1   : > { %v4290_v0 = vadd.f32 %v4289_v57, %v11727_v21  ;;  %v4421_v2 = vld [vmem:[#allocation2 + $0x90] ss:$3 sm:$0xff]  ;;  %v4430_v49 = vld [vmem:[#allocation2 + $0x91] ss:$3 sm:$0xff]  ;;  %v4446_v58 = vld [vmem:[#allocation2 + $0x92] ss:$3 sm:$0xff] }
 0x5b2   : > { %4406 = vst [vmem:[#allocation2 + $0xa8] sm:$0xff] %v4382_v37  ;;  %4949 = vmatpush.bf16.msrb.mxu3 %v8608_v43  ;;  %v4438_v25 = vmax.f32 %v4421_v2, %v4430_v49  ;;  %v8623_v57 = vld [vmem:[%s13921_s5 + $0xc0] sm:$0xff]  ;;  %v7892_v43 = vld [vmem:[%s13918_s7 + $0xa8] sm:$0xf0] }
 0x5b4   : > { %v4454_v21 = vmax.f32 %v4438_v25, %v4446_v58  ;;  %v12075_v58 = vld [vmem:[%s13940_s6] ss:$0 sm:$0xff]  ;;  %s8949_s6 = sshra.s32 %s7289_s3, 4  ;;  %s8950_s6 = int_to_ptr.hbm [resolvable:$true] %s8949_s6 }
 0x5b5   : > { %v4356_v22 = vpop.f32.mrf.mxu2  ;;  %p8956_p0 = scmp.lt.s32.totalorder %s8950_s6, %s13720_s18 }
 0x5b6   : > { %v4357_v55 = vadd.f32 %v4356_v22, %v4288_v15  ;;  %4950 = vmatpush.bf16.msrb.mxu3 %v8607_v5  ;;  %v4462_v18 = vpack.c.bf16 %v4454_v21, %v4454_v21  ;;  %v8630_v22 = vld [vmem:[%s13921_s5 + $0xf8] sm:$0xff] }
 0x5b8   : > { %v4383_v41 = vmax.f32 %v4357_v55, 0.0  ;;  %v4517_v29 = vunpack.c.l.b16 %v4462_v18  ;;  %v8629_v55 = vld [vmem:[%s13921_s5 + $0xf0] sm:$0xff] }
 0x5ba   : > { %4407 = vst [vmem:[#allocation2 + $0xb0] sm:$0xff] %v4383_v41  ;;  %4967 = vmatpush.bf16.msra.mxu3 %v8622_v11  ;;  %v8624_v41 = vld [vmem:[%s13921_s5 + $0xc8] sm:$0xff] }
 0x5bd   : > { %v4358_v9 = vpop.f32.mrf.mxu2 }
 0x5be   : > { %v4359_v7 = vadd.f32 %v4358_v9, %v4290_v0  ;;  %v8656_v0 = vld [vmem:[%s13918_s7 + $0x8c] sm:$0xf] }
 0x5c0   : > { %v4384_v46 = vmax.f32 %v4359_v7, 0.0  ;;  %v7895_v7 = vor.u32 %v8656_v0, %v7892_v43  ;;  %v7820_v43 = vld [vmem:[%s13918_s7 + $0x20] sm:$0xf0] }
 0x5c2   : > { %4408 = vst [vmem:[#allocation2 + $0xb8] sm:$0xff] %v4384_v46 }
 0x5c9   : > { %v4423_v33 = vld [vmem:[#allocation2 + $0xa8] ss:$3 sm:$0xff]  ;;  %v4431_v44 = vld [vmem:[#allocation2 + $0xa9] ss:$3 sm:$0xff]  ;;  %v4447_v16 = vld [vmem:[#allocation2 + $0xaa] ss:$3 sm:$0xff] }
 0x5ca   : > { %v4439_v38 = vmax.f32 %v4423_v33, %v4431_v44 }
 0x5cc   : > { %v4455_v1 = vmax.f32 %v4439_v38, %v4447_v16 }
 0x5ce   : > { %v4463_v54 = vpack.c.bf16 %v4455_v1, %v4455_v1 }
 0x5d0   : > { %v4518_v13 = vunpack.c.l.b16 %v4463_v54 }
 0x5d2   : > { %v4519_v56 = vpack.c.b16 %v4518_v13, %v4517_v29  ;;  %v8648_v29 = vld [vmem:[%s13918_s7 + $0x4c] sm:$0xf] }
 0x5d3   : > { %v7860_v13 = vld [vmem:[%s13918_s7 + $0x68] sm:$0xf0] }
 0x5d4   : > { %v4593_v20 = vsel %vm2188_vm8, %v11925_v24, %v4519_v56  ;;  %v4541_v28 = vrot.slane %v4519_v56, 6  ;;  %v4521_v42 = vshrl.u32 %v4519_v56, 16  ;;  %v4523_v62 = vshll.u32 %v4519_v56, 16 }
 0x5d5   : > { %5033 = vmatmul.bf16.gmra.mxu2 %v4593_v20  ;;  %v7654_v32 = vrot.slane %v4519_v56, 7  ;;  %v7863_v56 = vor.u32 %v8648_v29, %v7860_v13 }
 0x5d6   : > { %v4581_v40 = vsel %vm2188_vm8, %v4536_v60, %v4541_v28  ;;  %v4528_v59 = vrot.slane %v4521_v42, 1  ;;  %v4529_v12 = vrot.slane %v4523_v62, 2  ;;  %v8621_v60 = vld [vmem:[%s13921_s5 + $0xb0] sm:$0xff] }
 0x5d7   : > { %4937 = vmatmul.bf16.gmra.mxu3 %v4581_v40  ;;  %v4587_v61 = vsel %vm2188_vm8, %v11927_v27, %v7654_v32  ;;  %v8664_v27 = vld [vmem:[%s13918_s7 + $0xcc] sm:$0xf] }
 0x5d8   : > { %v4530_v24 = vor.u32 %v4529_v12, %v4528_v59  ;;  %4968 = vmatpush.bf16.msra.mxu3 %v8621_v60  ;;  %v7927_v53 = vor.u32 %v8664_v27, %v7924_v8  ;;  %v8701_v60 = vld [vmem:[%s13918_s7 + $0x1ec] sm:$0xf0]  ;;  %v8691_v27 = vld [vmem:[%s13918_s7 + $0x19c] sm:$0xf0] }
 0x5da   : > { %v4544_v10 = vrot.slane %v4530_v24, 6  ;;  %5528 = vmatpush.bf16.msrb.mxu0 %v7927_v53  ;;  %v8699_v24 = vld [vmem:[%s13918_s7 + $0x1dc] sm:$0xf0]  ;;  %v8693_v53 = vld [vmem:[%s13918_s7 + $0x1ac] sm:$0xf0] }
 0x5dc   : > { %v4590_v34 = vsel %vm2188_vm8, %v11944_v47, %v4544_v10  ;;  %4969 = vmatpush.bf16.msra.mxu3 %v8620_v30  ;;  %v8618_v47 = vld [vmem:[%s13921_s5 + $0x98] sm:$0xff]  ;;  %v8058_v10 = vld [vmem:[%s13918_s7 + $0x1d0] sm:$0xf] }
 0x5dd   : > { %v8059_v8 = vor.u32 %v8701_v60, %v8058_v10  ;;  %v8026_v30 = vld [vmem:[%s13918_s7 + $0x190] sm:$0xf] }
 0x5de   : > { %5529 = vmatpush.bf16.msrb.mxu0 %v7895_v7  ;;  %v7930_v7 = vld [vmem:[%s13918_s7 + $0xd0] sm:$0xf] }
 0x5df   : > { %5538 = vmatpush.bf16.msra.mxu2 %v8059_v8  ;;  %v7866_v10 = vld [vmem:[%s13918_s7 + $0x50] sm:$0xf]  ;;  %v8643_v8 = vld [vmem:[%s13918_s7 + $0x1c] sm:$0xf0] }
 0x5e0   : > { %4970 = vmatpush.bf16.msra.mxu3 %v8619_v17  ;;  %v8027_v17 = vor.u32 %v8693_v53, %v8026_v30 }
 0x5e2   : > { %5530 = vmatpush.bf16.msrb.mxu0 %v7863_v56 }
 0x5e3   : > { %5539 = vmatpush.bf16.msra.mxu2 %v8027_v17  ;;  %v8050_v17 = vld [vmem:[%s13918_s7 + $0x1c8] sm:$0xf] }
 0x5e4   : > { %4971 = vmatpush.bf16.msra.mxu3 %v8618_v47  ;;  %v7978_v47 = vld [vmem:[%s13918_s7 + $0x140] sm:$0xf] }
 0x5e7   : > { %4951 = vmatmul.bf16.vlgmr.msrb.gmra.mxu3 %v11879_v19  ;;  %v4525_v19 = vrot.slane %v4523_v62, 1 }
 0x5e8   : > { %4972 = vmatpush.bf16.msra.mxu3 %v8617_v36  ;;  %v8683_v36 = vld [vmem:[%s13918_s7 + $0x15c] sm:$0xf0] }
 0x5e9   : > { %v4526_v48 = vor.u32 %v4525_v19, %v4521_v42  ;;  %v7979_v19 = vor.u32 %v8683_v36, %v7978_v47  ;;  %v8700_v47 = vld [vmem:[%s13918_s7 + $0x1e4] sm:$0xf0]  ;;  %v7834_v36 = vld [vmem:[%s13918_s7 + $0x10] sm:$0xf] }
 0x5eb   : > { %v4542_v37 = vrot.slane %v4526_v48, 6  ;;  %v8685_v48 = vld [vmem:[%s13918_s7 + $0x16c] sm:$0xf0] }
 0x5ec   : > { %4973 = vmatpush.bf16.msra.mxu3 %v8616_v52  ;;  %v7994_v52 = vld [vmem:[%s13918_s7 + $0x150] sm:$0xf] }
 0x5ed   : > { %v4584_v15 = vsel %vm2188_vm8, %v4537_v51, %v4542_v37  ;;  %v8626_v51 = vld [vmem:[%s13921_s5 + $0xd8] sm:$0xff]  ;;  %v7946_v37 = vld [vmem:[%s13918_s7 + $0x100] sm:$0xf] }
 0x5f0   : > { %4974 = vmatpush.bf16.msra.mxu3 %v8615_v50 }
 0x5f4   : > { %4991 = vmatpush.bf16.msrb.mxu3 %v8630_v22  ;;  %v7995_v22 = vor.u32 %v8685_v48, %v7994_v52  ;;  %v8645_v48 = vld [vmem:[%s13918_s7 + $0x2c] sm:$0xf0] }
 0x5f6   : > { %5540 = vmatpush.bf16.msra.mxu2 %v7995_v22  ;;  %v7835_v22 = vor.u32 %v8645_v48, %v7834_v36  ;;  %v7922_v48 = vld [vmem:[%s13918_s7 + $0xc8] sm:$0xf] }
 0x5f7   : > { %4956 = vmatmul.bf16.gmra.mxu3 %v11955_v39  ;;  %v8628_v39 = vld [vmem:[%s13921_s5 + $0xe8] sm:$0xff]  ;;  %s7274_s5 = scalar_lea.sflag [#allocation4], %s569_s20 }
 0x5f8   : > { %4992 = vmatpush.bf16.msrb.mxu3 %v8629_v55 }
 0x5fc   : > { %4993 = vmatpush.bf16.msrb.mxu3 %v8628_v39  ;;  %v5024_v39 = vpop.f32.mrf.mxu2 }
 0x600   : > { %4994 = vmatpush.bf16.msrb.mxu3 %v8627_v26  ;;  %v7962_v26 = vld [vmem:[%s13918_s7 + $0x110] sm:$0xf] }
 0x604   : > { %4995 = vmatpush.bf16.msrb.mxu3 %v8626_v51  ;;  %v8677_v51 = vld [vmem:[%s13918_s7 + $0x12c] sm:$0xf0] }
 0x607   : > { %4961 = vmatmul.bf16.gmra.mxu3 %v4584_v15  ;;  %v8675_v15 = vld [vmem:[%s13918_s7 + $0x11c] sm:$0xf0] }
 0x608   : > { %4996 = vmatpush.bf16.msrb.mxu3 %v8625_v14  ;;  %v7947_v55 = vor.u32 %v8675_v15, %v7946_v37  ;;  %v7963_v14 = vor.u32 %v8677_v51, %v7962_v26  ;;  %v8697_v37 = vld [vmem:[%s13918_s7 + $0x1d4] sm:$0xf]  ;;  %v8068_v26 = vld [vmem:[%s13918_s7 + $0x1f8] sm:$0xf0] }
 0x60a   : > { %5541 = vmatpush.bf16.msra.mxu2 %v7963_v14 }
 0x60c   : > { %4997 = vmatpush.bf16.msrb.mxu3 %v8624_v41 }
 0x610   : > { %4998 = vmatpush.bf16.msrb.mxu3 %v8623_v57  ;;  %v7914_v57 = vld [vmem:[%s13918_s7 + $0xc0] sm:$0xf] }
 0x617   : > { %4975 = vmatmul.bf16.vlgmr.msra.gmra.mxu3 %v11868_v3  ;;  %v8655_v3 = vld [vmem:[%s13918_s7 + $0x84] sm:$0xf] }
 0x618   : > { %v7887_v9 = vor.u32 %v8655_v3, %v7884_v6  ;;  %v8667_v3 = vld [vmem:[%s13918_s7 + $0xdc] sm:$0xf0]  ;;  %v8639_v6 = vld [vmem:[%s13918_s7 + $0x4] sm:$0xf] }
 0x61a   : > { %5501 = vmatpush.bf16.msrb.mxu1 %v7887_v9  ;;  %v7915_v9 = vor.u32 %v8667_v3, %v7914_v57  ;;  %v8298_v57 = vld [vmem:[%s13710_s8 + $0x1c0] sm:$0xf] }
 0x61b   : > { %v8763_v3 = vld [vmem:[%s13710_s8 + $0x1dc] sm:$0xf0] }
 0x627   : > { %4980 = vmatmul.bf16.gmra.mxu3 %v11941_v35  ;;  %v4928_v35 = vpop.f32.mrf.mxu3 }
 0x628   : > { %v4929_v21 = vadd.f32 %v12075_v58, %v4928_v35  ;;  %v8669_v35 = vld [vmem:[%s13918_s7 + $0xec] sm:$0xf0] }
 0x62f   : > { %v12064_v46 = vpop.f32.mrf.mxu3 }
 0x637   : > { %4985 = vmatmul.bf16.gmra.mxu3 %v4587_v61  ;;  %v4933_v2 = vpop.f32.mrf.mxu3  ;;  %v8042_v61 = vld [vmem:[%s13918_s7 + $0x1c0] sm:$0xf] }
 0x638   : > { %v4934_v1 = vadd.f32 %v12075_v58, %v4933_v2  ;;  %v8043_v23 = vor.u32 %v8699_v24, %v8042_v61 }
 0x63a   : > { %5482 = vmatpush.bf16.msra.mxu3 %v8043_v23 }
 0x63f   : > { %v12067_v49 = vpop.f32.mrf.mxu3 }
 0x647   : > { %4999 = vmatmul.bf16.vlgmr.msrb.gmra.mxu3 %v11886_v63  ;;  %v8647_v63 = vld [vmem:[%s13918_s7 + $0x44] sm:$0xf] }
 0x657   : > { %5004 = vmatmul.bf16.gmra.mxu3 %v11960_v4  ;;  %v7852_v4 = vld [vmem:[%s13918_s7 + $0x60] sm:$0xf0] }
 0x658   : > { %v7855_v16 = vor.u32 %v8647_v63, %v7852_v4  ;;  %v4931_v4 = vadd.f32 %v12075_v58, %v12064_v46  ;;  %v8640_v46 = vld [vmem:[%s13918_s7 + $0xc] sm:$0xf] }
 0x65a   : > { %v4938_v5 = vpop.f32.mrf.mxu3  ;;  %5502 = vmatpush.bf16.msrb.mxu1 %v7855_v16 }
 0x65b   : > { %v4939_v28 = vadd.f32 %v12075_v58, %v4938_v5  ;;  %v7823_v5 = vor.u32 %v8639_v6, %v7820_v43 }
 0x65e   : > { %5503 = vmatpush.bf16.msrb.mxu1 %v7823_v5  ;;  %v8036_v5 = vld [vmem:[%s13918_s7 + $0x1b8] sm:$0xf0] }
 0x662   : > { %v12070_v25 = vpop.f32.mrf.mxu3 }
 0x667   : > { %5009 = vmatmul.bf16.gmra.mxu3 %v4590_v34  ;;  %v8011_v34 = vor.u32 %v8691_v27, %v8010_v45  ;;  %v8653_v45 = vld [vmem:[%s13918_s7 + $0x6c] sm:$0xf0]  ;;  %v7818_v27 = vld [vmem:[%s13918_s7] sm:$0xf] }
 0x668   : > { %v7819_v53 = vor.u32 %v8643_v8, %v7818_v27  ;;  %v8674_v8 = vld [vmem:[%s13918_s7 + $0x11c] sm:$0xf] }
 0x669   : > { %5483 = vmatpush.bf16.msra.mxu3 %v8011_v34  ;;  %v7867_v34 = vor.u32 %v8653_v45, %v7866_v10  ;;  %v7954_v10 = vld [vmem:[%s13918_s7 + $0x108] sm:$0xf]  ;;  %v7964_v45 = vld [vmem:[%s13918_s7 + $0x130] sm:$0xf0] }
 0x66a   : > { %v4952_v33 = vpop.f32.mrf.mxu3 }
 0x66b   : > { %v4953_v44 = vadd.f32 %v4952_v33, %v4929_v21  ;;  %v7931_v21 = vor.u32 %v8669_v35, %v7930_v7  ;;  %v7882_v33 = vld [vmem:[%s13918_s7 + $0x80] sm:$0xf]  ;;  %v8028_v35 = vld [vmem:[%s13918_s7 + $0x1b0] sm:$0xf0] }
 0x66d   : > { %5484 = vmatpush.bf16.msra.mxu3 %v7979_v19  ;;  %5542 = vmatpush.bf16.msra.mxu2 %v7931_v21  ;;  %v8051_v19 = vor.u32 %v8700_v47, %v8050_v17  ;;  %v8202_v47 = vld [vmem:[%s13710_s8 + $0x100] sm:$0xf] }
 0x671   : > { %5485 = vmatpush.bf16.msra.mxu3 %v7947_v55  ;;  %v8060_v55 = vld [vmem:[%s13918_s7 + $0x1f0] sm:$0xf0] }
 0x672   : > { %v12078_v38 = vpop.f32.mrf.mxu3  ;;  %v8063_v14 = vor.u32 %v8697_v37, %v8060_v55  ;;  %v8668_v37 = vld [vmem:[%s13918_s7 + $0xe4] sm:$0xf0]  ;;  %v7932_v55 = vld [vmem:[%s13918_s7 + $0xf0] sm:$0xf0] }
 0x673   : > { %v4955_v29 = vadd.f32 %v12078_v38, %v4931_v4  ;;  %v7850_v38 = vld [vmem:[%s13918_s7 + $0x40] sm:$0xf]  ;;  %v7986_v4 = vld [vmem:[%s13918_s7 + $0x148] sm:$0xf] }
 0x674   : > { %5552 = vmatpush.bf16.msra.mxu1 %v8063_v14  ;;  %v8170_v14 = vld [vmem:[%s13710_s8 + $0xc0] sm:$0xf] }
 0x675   : > { %5486 = vmatpush.bf16.msra.mxu3 %v7915_v9  ;;  %v8689_v9 = vld [vmem:[%s13918_s7 + $0x194] sm:$0xf] }
 0x676   : > { %v8031_v21 = vor.u32 %v8689_v9, %v8028_v35  ;;  %v8660_v9 = vld [vmem:[%s13918_s7 + $0xa4] sm:$0xf0]  ;;  %v7900_v35 = vld [vmem:[%s13918_s7 + $0xb0] sm:$0xf0] }
 0x678   : > { %5553 = vmatpush.bf16.msra.mxu1 %v8031_v21 }
 0x67a   : > { %v4957_v18 = vpop.f32.mrf.mxu3 }
 0x67b   : > { %v12087_v54 = vadd.f32 %v4957_v18, %v4934_v1  ;;  %v7898_v1 = vld [vmem:[%s13918_s7 + $0x90] sm:$0xf] }
 0x67c   : > { %v8661_v18 = vld [vmem:[%s13918_s7 + $0xac] sm:$0xf0] }
 0x67d   : > { %v7899_v56 = vor.u32 %v8661_v18, %v7898_v1 }
 0x67f   : > { %5543 = vmatpush.bf16.msra.mxu2 %v7899_v56  ;;  %v7996_v56 = vld [vmem:[%s13918_s7 + $0x170] sm:$0xf0] }
 0x682   : > { %v12095_v20 = vpop.f32.mrf.mxu3 }
 0x683   : > { %5544 = vmatpush.bf16.msra.mxu2 %v7867_v34  ;;  %v7972_v34 = vld [vmem:[%s13918_s7 + $0x138] sm:$0xf0] }
 0x687   : > { %5545 = vmatpush.bf16.msra.mxu2 %v7835_v22 }
 0x68a   : > { %v4962_v42 = vpop.f32.mrf.mxu3 }
 0x68b   : > { %v12098_v62 = vadd.f32 %v4962_v42, %v4939_v28  ;;  %v5026_v28 = vpop.f32.mrf.mxu2 }
 0x692   : > { %v12100_v32 = vpop.f32.mrf.mxu3 }
 0x693   : > { %v5029_v15 = vpop.f32.mrf.mxu2 }
 0x69a   : > { %v4976_v40 = vpop.f32.mrf.mxu3 }
 0x69b   : > { %v4977_v41 = vadd.f32 %v4976_v40, %v4953_v44  ;;  %v8659_v44 = vld [vmem:[%s13918_s7 + $0x9c] sm:$0xf0]  ;;  %v7828_v40 = vld [vmem:[%s13918_s7 + $0x28] sm:$0xf0] }
 0x69c   : > { %v7883_v63 = vor.u32 %v8659_v44, %v7882_v33  ;;  %v7831_v24 = vor.u32 %v8640_v46, %v7828_v40  ;;  %v8266_v44 = vld [vmem:[%s13710_s8 + $0x180] sm:$0xf] }
 0x69d   : > { %v8234_v46 = vld [vmem:[%s13710_s8 + $0x140] sm:$0xf] }
 0x69e   : > { %5487 = vmatpush.bf16.msra.mxu3 %v7883_v63  ;;  %5531 = vmatpush.bf16.msrb.mxu0 %v7831_v24  ;;  %v8755_v63 = vld [vmem:[%s13710_s8 + $0x19c] sm:$0xf0] }
 0x69f   : > { %v12282_v18 = vor.u32 %v8755_v63, %v8266_v44  ;;  %v8723_v44 = vld [vmem:[%s13710_s8 + $0x9c] sm:$0xf0] }
 0x6a2   : > { %v12102_v59 = vpop.f32.mrf.mxu3 }
 0x6a3   : > { %v4979_v42 = vadd.f32 %v12102_v59, %v4955_v29  ;;  %v8651_v59 = vld [vmem:[%s13918_s7 + $0x5c] sm:$0xf0]  ;;  %v8684_v29 = vld [vmem:[%s13918_s7 + $0x164] sm:$0xf0] }
 0x6a4   : > { %v7851_v60 = vor.u32 %v8651_v59, %v7850_v38  ;;  %v8747_v59 = vld [vmem:[%s13710_s8 + $0x15c] sm:$0xf0] }
 0x6a6   : > { %5488 = vmatpush.bf16.msra.mxu3 %v7851_v60  ;;  %v8673_v60 = vld [vmem:[%s13918_s7 + $0x114] sm:$0xf] }
 0x6aa   : > { %v12104_v12 = vpop.f32.mrf.mxu3  ;;  %5489 = vmatpush.bf16.msra.mxu3 %v7819_v53 }
 0x6ab   : > { %v4982_v51 = vadd.f32 %v12104_v12, %v12087_v54  ;;  %v8018_v54 = vld [vmem:[%s13918_s7 + $0x188] sm:$0xf] }
 0x6ac   : > { %v8692_v12 = vld [vmem:[%s13918_s7 + $0x1a4] sm:$0xf0] }
 0x6ad   : > { %v8019_v7 = vor.u32 %v8692_v12, %v8018_v54 }
 0x6ae   : > { %5510 = vmatpush.bf16.msrb.mxu3 %v8051_v19  ;;  %v7975_v19 = vor.u32 %v8674_v8, %v7972_v34  ;;  %v8642_v34 = vld [vmem:[%s13918_s7 + $0x1c] sm:$0xf] }
 0x6b2   : > { %v12106_v11 = vpop.f32.mrf.mxu3  ;;  %5511 = vmatpush.bf16.msrb.mxu3 %v8019_v7 }
 0x6ba   : > { %v12117_v31 = vpop.f32.mrf.mxu3 }
 0x6bb   : > { %v4987_v21 = vadd.f32 %v12117_v31, %v12098_v62  ;;  %v7858_v62 = vld [vmem:[%s13918_s7 + $0x48] sm:$0xf] }
 0x6bc   : > { %v8652_v31 = vld [vmem:[%s13918_s7 + $0x64] sm:$0xf0] }
 0x6c2   : > { %v12143_v50 = vpop.f32.mrf.mxu3 }
 0x6ca   : > { %v5000_v0 = vpop.f32.mrf.mxu3 }
 0x6cb   : > { %v5001_v2 = vadd.f32 %v5000_v0, %v4977_v41  ;;  %v12250_v0 = vor.u32 %v8763_v3, %v8298_v57  ;;  %v7923_v57 = vor.u32 %v8668_v37, %v7922_v48  ;;  %v7890_v3 = vld [vmem:[%s13918_s7 + $0x88] sm:$0xf] }
 0x6cd   : > { %v5025_v16 = vadd.f32 %v5024_v39, %v5001_v2  ;;  %v8698_v39 = vld [vmem:[%s13918_s7 + $0x1dc] sm:$0xf]  ;;  %6014 = vmatpush.bf16.msrb.mxu2 %v12250_v0 }
 0x6ce   : > { %v8071_v41 = vor.u32 %v8698_v39, %v8068_v26  ;;  %v8690_v2 = vld [vmem:[%s13918_s7 + $0x19c] sm:$0xf] }
 0x6cf   : > { %v5039_v13 = vmax.f32 %v5025_v16, 0.0  ;;  %v8039_v33 = vor.u32 %v8690_v2, %v8036_v5  ;;  %v4936_v16 = vadd.f32 %v12075_v58, %v12067_v49  ;;  %v8682_v49 = vld [vmem:[%s13918_s7 + $0x15c] sm:$0xf] }
 0x6d0   : > { %5580 = vmatpush.bf16.msra.mxu0 %v8071_v41  ;;  %v8666_v39 = vld [vmem:[%s13918_s7 + $0xdc] sm:$0xf]  ;;  %v8731_v41 = vld [vmem:[%s13710_s8 + $0xdc] sm:$0xf0] }
 0x6d1   : > { %5045 = vst [vmem:[#allocation2] sm:$0xff] %v5039_v13  ;;  %v8681_v13 = vld [vmem:[%s13918_s7 + $0x154] sm:$0xf]  ;;  %v4960_v40 = vadd.f32 %v12095_v20, %v4936_v16  ;;  %6015 = vmatpush.bf16.msrb.mxu2 %v12282_v18  ;;  %v8676_v20 = vld [vmem:[%s13918_s7 + $0x124] sm:$0xf0]  ;;  %v12371_v7 = vor.u32 %v8731_v41, %v8170_v14  ;;  %v7891_v16 = vor.u32 %v8660_v9, %v7890_v3 }
 0x6d2   : > { %v5002_v61 = vpop.f32.mrf.mxu3  ;;  %v7999_v24 = vor.u32 %v8681_v13, %v7996_v56  ;;  %v7955_v17 = vor.u32 %v8676_v20, %v7954_v10  ;;  %v7940_v26 = vld [vmem:[%s13918_s7 + $0xf8] sm:$0xf0]  ;;  %v8649_v56 = vld [vmem:[%s13918_s7 + $0x54] sm:$0xf]  ;;  %v7826_v10 = vld [vmem:[%s13918_s7 + $0x8] sm:$0xf] }
 0x6d3   : > { %v5003_v23 = vadd.f32 %v5002_v61, %v4979_v42  ;;  %v8004_v42 = vld [vmem:[%s13918_s7 + $0x178] sm:$0xf0]  ;;  %v4984_v27 = vadd.f32 %v12106_v11, %v4960_v40  ;;  %v8739_v11 = vld [vmem:[%s13710_s8 + $0x11c] sm:$0xf0]  ;;  %v7943_v12 = vor.u32 %v8666_v39, %v7940_v26  ;;  %13942 = vst [vmem:[#allocation20_spill] sm:$0xff] %v12371_v7  ;;  %v4941_v40 = vadd.f32 %v12075_v58, %v12070_v25 }
 0x6d4   : > { %5581 = vmatpush.bf16.msra.mxu0 %v8039_v33  ;;  %v8007_v38 = vor.u32 %v8682_v49, %v8004_v42  ;;  %5554 = vmatpush.bf16.msra.mxu1 %v7999_v24  ;;  %v12344_v22 = vor.u32 %v8739_v11, %v8202_v47  ;;  %v8658_v2 = vld [vmem:[%s13918_s7 + $0x9c] sm:$0xf]  ;;  %v8138_v33 = vld [vmem:[%s13710_s8 + $0x80] sm:$0xf]  ;;  %v7868_v49 = vld [vmem:[%s13918_s7 + $0x70] sm:$0xf0] }
 0x6d5   : > { %v5027_v30 = vadd.f32 %v5026_v28, %v5003_v23  ;;  %v7987_v28 = vor.u32 %v8684_v29, %v7986_v4  ;;  %v12310_v23 = vor.u32 %v8747_v59, %v8234_v46  ;;  %v7908_v5 = vld [vmem:[%s13918_s7 + $0xb8] sm:$0xf0]  ;;  %v8106_v24 = vld [vmem:[%s13710_s8 + $0x40] sm:$0xf]  ;;  %v7859_v59 = vor.u32 %v8652_v31, %v7858_v62 }
 0x6d6   : > { %13941 = vst [vmem:[#allocation13_spill] sm:$0xff] %v12344_v22  ;;  %v7911_v13 = vor.u32 %v8658_v2, %v7908_v5  ;;  %v8650_v42 = vld [vmem:[%s13918_s7 + $0x5c] sm:$0xf]  ;;  %v4965_v20 = vadd.f32 %v12100_v32, %v4941_v40  ;;  %v7871_v25 = vor.u32 %v8649_v56, %v7868_v49  ;;  %v7836_v32 = vld [vmem:[%s13918_s7 + $0x30] sm:$0xf0] }
 0x6d7   : > { %v5040_v52 = vmax.f32 %v5027_v30, 0.0  ;;  %v5031_v30 = vpop.f32.mrf.mxu2  ;;  %5512 = vmatpush.bf16.msrb.mxu3 %v7987_v28  ;;  %6016 = vmatpush.bf16.msrb.mxu2 %v12310_v23  ;;  %v12400_v28 = vor.u32 %v8723_v44, %v8138_v33  ;;  %v7876_v46 = vld [vmem:[%s13918_s7 + $0x78] sm:$0xf0]  ;;  %v8707_v47 = vld [vmem:[%s13710_s8 + $0x1c] sm:$0xf0] }
 0x6d8   : > { %5582 = vmatpush.bf16.msra.mxu0 %v8007_v38  ;;  %v8715_v38 = vld [vmem:[%s13710_s8 + $0x5c] sm:$0xf0]  ;;  %v7879_v58 = vor.u32 %v8650_v42, %v7876_v46  ;;  %v8066_v42 = vld [vmem:[%s13918_s7 + $0x1d8] sm:$0xf] }
 0x6d9   : > { %5046 = vst [vmem:[#allocation2 + $0x8] sm:$0xff] %v5040_v52  ;;  %v7967_v52 = vor.u32 %v8673_v60, %v7964_v45  ;;  %v8644_v45 = vld [vmem:[%s13918_s7 + $0x24] sm:$0xf0]  ;;  %v12430_v8 = vor.u32 %v8715_v38, %v8106_v24  ;;  %v8702_v46 = vld [vmem:[%s13918_s7 + $0x1f4] sm:$0xf0] }
 0x6da   : > { %v5005_v6 = vpop.f32.mrf.mxu3  ;;  %v8759_v24 = vld [vmem:[%s13710_s8 + $0x1c4] sm:$0xf] }
 0x6db   : > { %v5006_v43 = vadd.f32 %v5005_v6, %v4982_v51  ;;  %5513 = vmatpush.bf16.msrb.mxu3 %v7955_v17  ;;  %5555 = vmatpush.bf16.msra.mxu1 %v7967_v52  ;;  %v8074_v17 = vld [vmem:[%s13710_s8] sm:$0xf]  ;;  %v8300_v38 = vld [vmem:[%s13710_s8 + $0x1e0] sm:$0xf0] }
 0x6dc   : > { %5583 = vmatpush.bf16.msra.mxu0 %v7975_v19  ;;  %6017 = vmatpush.bf16.msrb.mxu2 %v12344_v22 }
 0x6dd   : > { %v5030_v1 = vadd.f32 %v5029_v15, %v5006_v43  ;;  %v8665_v15 = vld [vmem:[%s13918_s7 + $0xd4] sm:$0xf] }
 0x6de   : > { %v7935_v54 = vor.u32 %v8665_v15, %v7932_v55  ;;  %v8657_v43 = vld [vmem:[%s13918_s7 + $0x94] sm:$0xf] }
 0x6df   : > { %v5041_v61 = vmax.f32 %v5030_v1, 0.0  ;;  %v5034_v63 = vpop.f32.mrf.mxu2  ;;  %5514 = vmatpush.bf16.msrb.mxu3 %v7923_v57  ;;  %v7903_v29 = vor.u32 %v8657_v43, %v7900_v35  ;;  %v13762_v35 = vmov 0  }
 0x6e0   : > { %5556 = vmatpush.bf16.msra.mxu1 %v7935_v54  ;;  %5584 = vmatpush.bf16.msra.mxu0 %v7943_v12 }
 0x6e1   : > { %5047 = vst [vmem:[#allocation2 + $0x10] sm:$0xff] %v5041_v61  ;;  %6018 = vmatpush.bf16.msrb.mxu2 %v12371_v7  ;;  %8865 = vset.pattern.permute.xlu2 %v13762_v35 }
 0x6e2   : > { %v5007_v53 = vpop.f32.mrf.mxu3  ;;  %8866 = vset.pattern.permute.xlu0 %v13762_v35 }
 0x6e3   : > { %v5008_v36 = vadd.f32 %v5007_v53, %v4984_v27  ;;  %5515 = vmatpush.bf16.msrb.mxu3 %v7891_v16  ;;  %v8641_v27 = vld [vmem:[%s13918_s7 + $0x14] sm:$0xf]  ;;  %v4989_v53 = vadd.f32 %v12143_v50, %v4965_v20  ;;  %v12449_v50 = vor.u32 %v8707_v47, %v8074_v17 }
 0x6e4   : > { %5557 = vmatpush.bf16.msra.mxu1 %v7903_v29  ;;  %5585 = vmatpush.bf16.msra.mxu0 %v7911_v13  ;;  %v7839_v19 = vor.u32 %v8641_v27, %v7836_v32  ;;  %v8067_v32 = vor.u32 %v8702_v46, %v8066_v42  ;;  %v8727_v46 = vld [vmem:[%s13710_s8 + $0xc4] sm:$0xf] }
 0x6e5   : > { %v5032_v51 = vadd.f32 %v5031_v30, %v5008_v36  ;;  %6019 = vmatpush.bf16.msrb.mxu2 %v12400_v28  ;;  %v7844_v30 = vld [vmem:[%s13918_s7 + $0x38] sm:$0xf0]  ;;  %v7827_v36 = vor.u32 %v8644_v45, %v7826_v10 }
 0x6e6   : > { %v7847_v48 = vor.u32 %v8642_v34, %v7844_v30  ;;  %v12488_v34 = vor.u32 %v8759_v24, %v8300_v38  ;;  %v8034_v30 = vld [vmem:[%s13918_s7 + $0x198] sm:$0xf]  ;;  %v8180_v24 = vld [vmem:[%s13710_s8 + $0xe8] sm:$0xf0]  ;;  %v8186_v38 = vld [vmem:[%s13710_s8 + $0xd0] sm:$0xf] }
 0x6e7   : > { %v5042_v6 = vmax.f32 %v5032_v51, 0.0  ;;  %5516 = vmatpush.bf16.msrb.mxu3 %v7859_v59  ;;  %v5036_v37 = vpop.f32.mrf.mxu2  ;;  %v8760_v59 = vld [vmem:[%s13710_s8 + $0x1cc] sm:$0xf] }
 0x6e8   : > { %5558 = vmatpush.bf16.msra.mxu1 %v7871_v25  ;;  %5586 = vmatpush.bf16.msra.mxu0 %v7879_v58  ;;  %v5051_v55 = vld [vmem:[#allocation2] ss:$3 sm:$0xff]  ;;  %v5053_v39 = vld [vmem:[#allocation2 + $0x1] ss:$3 sm:$0xff]  ;;  %v5057_v14 = vld [vmem:[#allocation2 + $0x2] ss:$3 sm:$0xff] }
 0x6e9   : > { %5048 = vst [vmem:[#allocation2 + $0x18] sm:$0xff] %v5042_v6  ;;  %6020 = vmatpush.bf16.msrb.mxu2 %v12430_v8  ;;  %v5055_v51 = vmax.f32 %v5051_v55, %v5053_v39  ;;  %v8314_v25 = vld [vmem:[%s13710_s8 + $0x1d0] sm:$0xf]  ;;  %v8002_v39 = vld [vmem:[%s13918_s7 + $0x158] sm:$0xf] }
 0x6ea   : > { %v5010_v4 = vpop.f32.mrf.mxu3  ;;  %v8765_v58 = vld [vmem:[%s13710_s8 + $0x1ec] sm:$0xf0] }
 0x6eb   : > { %v5011_v1 = vadd.f32 %v5010_v4, %v4987_v21  ;;  %5517 = vmatpush.bf16.msrb.mxu3 %v7827_v36  ;;  %v5059_v41 = vmax.f32 %v5055_v51, %v5057_v14  ;;  %v12498_v47 = vor.u32 %v8765_v58, %v8314_v25  ;;  %v8268_v36 = vld [vmem:[%s13710_s8 + $0x1a0] sm:$0xf0]  ;;  %v8662_v25 = vld [vmem:[%s13918_s7 + $0xb4] sm:$0xf0] }
 0x6ec   : > { %5559 = vmatpush.bf16.msra.mxu1 %v7839_v19  ;;  %5587 = vmatpush.bf16.msra.mxu0 %v7847_v48  ;;  %v8276_v19 = vld [vmem:[%s13710_s8 + $0x1a8] sm:$0xf0]  ;;  %v8282_v48 = vld [vmem:[%s13710_s8 + $0x190] sm:$0xf] }
 0x6ed   : > { %v5035_v61 = vadd.f32 %v5034_v63, %v5011_v1  ;;  %6021 = vmatpush.bf16.msrb.mxu2 %v12449_v50  ;;  %v5069_v54 = vrot.slane %v5059_v41, 5  ;;  %v5073_v12 = vrot.slane %v5059_v41, 2  ;;  %v5062_v43 = vrot.slane %v5059_v41, 3  ;;  %13943 = vst [vmem:[#allocation21_spill] sm:$0xff] %v12498_v47 }
 0x6ee   : > { %v5075_v63 = vrot.slane %v5059_v41, 7 }
 0x6ef   : > { %v5043_v60 = vmax.f32 %v5035_v61, 0.0  ;;  %v5090_v44 = vsel %vm5079_vm9, %v5073_v12, %v5069_v54  ;;  %v5080_v4 = vsel %vm5079_vm9, %v5059_v41, %v5062_v43 }
 0x6f1   : > { %5049 = vst [vmem:[#allocation2 + $0x20] sm:$0xff] %v5043_v60  ;;  %v8308_v60 = vld [vmem:[%s13710_s8 + $0x1e8] sm:$0xf0] }
 0x6f2   : > { %v5012_v11 = vpop.f32.mrf.mxu3  ;;  %v12496_v17 = vor.u32 %v8760_v59, %v8308_v60  ;;  %v8733_v59 = vld [vmem:[%s13710_s8 + $0xec] sm:$0xf0]  ;;  %v7906_v60 = vld [vmem:[%s13918_s7 + $0x98] sm:$0xf] }
 0x6f3   : > { %v5013_v52 = vadd.f32 %v5012_v11, %v4989_v53  ;;  %v8694_v53 = vld [vmem:[%s13918_s7 + $0x1b4] sm:$0xf0]  ;;  %v8751_v11 = vld [vmem:[%s13710_s8 + $0x184] sm:$0xf] }
 0x6f4   : > { %v12523_v55 = vor.u32 %v8751_v11, %v8268_v36  ;;  %v8148_v11 = vld [vmem:[%s13710_s8 + $0xa8] sm:$0xf0]  ;;  %v8154_v36 = vld [vmem:[%s13710_s8 + $0x90] sm:$0xf] }
 0x6f5   : > { %v5037_v15 = vadd.f32 %v5036_v37, %v5013_v52  ;;  %v8752_v52 = vld [vmem:[%s13710_s8 + $0x18c] sm:$0xf]  ;;  %v8757_v37 = vld [vmem:[%s13710_s8 + $0x1ac] sm:$0xf0] }
 0x6f6   : > { %v12533_v51 = vor.u32 %v8752_v52, %v8276_v19  ;;  %v12535_v14 = vor.u32 %v8757_v37, %v8282_v48  ;;  %v8725_v52 = vld [vmem:[%s13710_s8 + $0xac] sm:$0xf0]  ;;  %v7907_v19 = vor.u32 %v8662_v25, %v7906_v60  ;;  %v7874_v37 = vld [vmem:[%s13918_s7 + $0x58] sm:$0xf]  ;;  %v8324_v60 = vld [vmem:[%s13710_s8 + $0x1f8] sm:$0xf0] }
 0x6f7   : > { %v5044_v26 = vmax.f32 %v5037_v15, 0.0  ;;  %v8035_v15 = vor.u32 %v8694_v53, %v8034_v30  ;;  %v8140_v30 = vld [vmem:[%s13710_s8 + $0xa0] sm:$0xf0]  ;;  %v8720_v53 = vld [vmem:[%s13710_s8 + $0x8c] sm:$0xf] }
 0x6f8   : > { %13944 = vst [vmem:[#allocation9_spill] sm:$0xff] %v12535_v14 }
 0x6f9   : > { %5050 = vst [vmem:[#allocation2 + $0x28] sm:$0xff] %v5044_v26  ;;  %v8686_v26 = vld [vmem:[%s13918_s7 + $0x174] sm:$0xf0] }
 0x700   : > { %v5052_v57 = vld [vmem:[#allocation2 + $0x18] ss:$3 sm:$0xff]  ;;  %v5054_v3 = vld [vmem:[#allocation2 + $0x19] ss:$3 sm:$0xff]  ;;  %v5058_v9 = vld [vmem:[#allocation2 + $0x1a] ss:$3 sm:$0xff] }
 0x701   : > { %v5056_v6 = vmax.f32 %v5052_v57, %v5054_v3  ;;  %v8236_v57 = vld [vmem:[%s13710_s8 + $0x160] sm:$0xf0]  ;;  %v8744_v3 = vld [vmem:[%s13710_s8 + $0x14c] sm:$0xf] }
 0x703   : > { %v5060_v2 = vmax.f32 %v5056_v6, %v5058_v9  ;;  %v8244_v6 = vld [vmem:[%s13710_s8 + $0x168] sm:$0xf0]  ;;  %v8003_v9 = vor.u32 %v8686_v26, %v8002_v39  ;;  %v12669_v39 = vor.u32 %v8720_v53, %v8148_v11  ;;  %v12671_v26 = vor.u32 %v8725_v52, %v8154_v36  ;;  %v8274_v11 = vld [vmem:[%s13710_s8 + $0x188] sm:$0xf] }
 0x704   : > { %v8756_v36 = vld [vmem:[%s13710_s8 + $0x1a4] sm:$0xf0] }
 0x705   : > { %v5065_v5 = vrot.slane %v5060_v2, 6  ;;  %v5067_v21 = vrot.slane %v5060_v2, 1  ;;  %v5071_v33 = vrot.slane %v5060_v2, 3  ;;  %v5091_v16 = vsel %vm2188_vm8, %v5090_v44, %v5060_v2  ;;  %v8735_v44 = vld [vmem:[%s13710_s8 + $0x104] sm:$0xf]  ;;  %13948 = vst [vmem:[#allocation12_spill] sm:$0xff] %v12671_v26 }
 0x706   : > { %v5077_v13 = vrot.slane %v5060_v2, 5 }
 0x707   : > { %v5081_v1 = vsel %vm2188_vm8, %v5080_v4, %v5065_v5  ;;  %v5092_v29 = vsel %vm5082_vm10, %v5091_v16, %v5071_v33  ;;  %v8736_v4 = vld [vmem:[%s13710_s8 + $0x10c] sm:$0xf] }
 0x708   : > { %v5083_v62 = vsel %vm5082_vm10, %v5081_v1, %v5067_v21  ;;  %v5093_v31 = vsel %vm2130_vm7, %v5092_v29, %v5075_v63  ;;  %v12566_v21 = vor.u32 %v8744_v3, %v8244_v6  ;;  %v8204_v63 = vld [vmem:[%s13710_s8 + $0x120] sm:$0xf0]  ;;  %v8212_v16 = vld [vmem:[%s13710_s8 + $0x128] sm:$0xf0]  ;;  %v8218_v1 = vld [vmem:[%s13710_s8 + $0x110] sm:$0xf] }
 0x709   : > { %v5084_v56 = vsel %vm2130_vm7, %v5083_v62, %v5069_v54  ;;  %v5094_v49 = vsel %vm5085_vm11, %v5093_v31, %v5073_v12  ;;  %v8250_v54 = vld [vmem:[%s13710_s8 + $0x150] sm:$0xf]  ;;  %v12589_v62 = vor.u32 %v8735_v44, %v8204_v63  ;;  %v7938_v31 = vld [vmem:[%s13918_s7 + $0xd8] sm:$0xf]  ;;  %v8712_v3 = vld [vmem:[%s13710_s8 + $0x4c] sm:$0xf] }
 0x70a   : > { %v5086_v40 = vsel %vm5085_vm11, %v5084_v56, %v5059_v41  ;;  %v5095_v61 = vsel %vm993_vm3, %v5094_v49, %v5077_v13  ;;  %v8743_v41 = vld [vmem:[%s13710_s8 + $0x144] sm:$0xf]  ;;  %v8749_v12 = vld [vmem:[%s13710_s8 + $0x16c] sm:$0xf0]  ;;  %v8670_v56 = vld [vmem:[%s13918_s7 + $0xf4] sm:$0xf0]  ;;  %v12599_v49 = vor.u32 %v8736_v4, %v8212_v16 }
 0x70b   : > { %v5087_v10 = vsel %vm993_vm3, %v5086_v40, %v5071_v33  ;;  %v5096_v20 = vsel %vm893_vm2, %v5095_v61, %v5060_v2  ;;  %v12556_v43 = vor.u32 %v8743_v41, %v8236_v57  ;;  %v7970_v2 = vld [vmem:[%s13918_s7 + $0x118] sm:$0xf]  ;;  %v12568_v33 = vor.u32 %v8749_v12, %v8250_v54  ;;  %v8741_v29 = vld [vmem:[%s13710_s8 + $0x12c] sm:$0xf0]  ;;  %v8172_v40 = vld [vmem:[%s13710_s8 + $0xe0] sm:$0xf0] }
 0x70c   : > { %v5089_v45 = vsel %vm893_vm2, %v5087_v10, %v5065_v5  ;;  %v8678_v5 = vld [vmem:[%s13918_s7 + $0x134] sm:$0xf0]  ;;  %v12601_v42 = vor.u32 %v8741_v29, %v8218_v1  ;;  %v8728_v61 = vld [vmem:[%s13710_s8 + $0xcc] sm:$0xf]  ;;  %v7939_v10 = vor.u32 %v8670_v56, %v7938_v31  ;;  %v8711_v41 = vld [vmem:[%s13710_s8 + $0x44] sm:$0xf] }
 0x70d   : > { %v12486_v27 = vpack.c.bf16 %v5096_v20, %v5089_v45  ;;  %13945 = vst [vmem:[#allocation10_spill] sm:$0xff] %v12568_v33  ;;  %v7971_v13 = vor.u32 %v8678_v5, %v7970_v2  ;;  %v12622_v20 = vor.u32 %v8727_v46, %v8172_v40  ;;  %v12632_v58 = vor.u32 %v8728_v61, %v8180_v24  ;;  %v8108_v57 = vld [vmem:[%s13710_s8 + $0x60] sm:$0xf0]  ;;  %v8116_v6 = vld [vmem:[%s13710_s8 + $0x68] sm:$0xf0] }
 0x70e   : > { %13946 = vst [vmem:[#allocation25_spill] sm:$0xff] %v12601_v42  ;;  %v12634_v45 = vor.u32 %v8733_v59, %v8186_v38  ;;  %v8122_v54 = vld [vmem:[%s13710_s8 + $0x50] sm:$0xf]  ;;  %v12692_v2 = vor.u32 %v8711_v41, %v8108_v57  ;;  %v7842_v5 = vld [vmem:[%s13918_s7 + $0x18] sm:$0xf]  ;;  %v12705_v4 = vor.u32 %v8712_v3, %v8116_v6  ;;  %v12778_v57 = vor.u32 %v8756_v36, %v8274_v11 }
 0x70f   : > { %5490 = vmatmul.bf16.vlgmr.msra.gmra.mxu3 %v12486_v27  ;;  %5504 = vmatmul.bf16.vlgmr.msrb.gmra.mxu1 %v12486_v27  ;;  %v8717_v12 = vld [vmem:[%s13710_s8 + $0x6c] sm:$0xf0]  ;;  %v8646_v44 = vld [vmem:[%s13918_s7 + $0x34] sm:$0xf0]  ;;  %v8703_v63 = vld [vmem:[%s13710_s8 + $0x4] sm:$0xf] }
 0x710   : > { %5532 = vmatmul.bf16.vlgmr.msrb.gmra.mxu0 %v12486_v27  ;;  %5546 = vmatmul.bf16.vlgmr.msra.gmra.mxu2 %v12486_v27  ;;  %13947 = vst [vmem:[#allocation11_spill] sm:$0xff] %v12634_v45  ;;  %v12707_v16 = vor.u32 %v8717_v12, %v8122_v54  ;;  %v8076_v1 = vld [vmem:[%s13710_s8 + $0x20] sm:$0xf0]  ;;  %v8704_v29 = vld [vmem:[%s13710_s8 + $0xc] sm:$0xf]  ;;  %v7843_v38 = vor.u32 %v8646_v44, %v7842_v5 }
 0x711   : > { %5566 = vmatpush.bf16.msra.mxu3 %v8067_v32  ;;  %6027 = vmatpush.bf16.msrb.mxu1 %v12488_v34  ;;  %v8719_v32 = vld [vmem:[%s13710_s8 + $0x84] sm:$0xf]  ;;  %v8306_v31 = vld [vmem:[%s13710_s8 + $0x1c8] sm:$0xf]  ;;  %v8090_v46 = vld [vmem:[%s13710_s8 + $0x10] sm:$0xf]  ;;  %v12737_v59 = vor.u32 %v8703_v63, %v8076_v1 }
 0x712   : > { %6053 = vmatpush.bf16.msrb.mxu0 %v12496_v17  ;;  %6066 = vmatpush.bf16.msra.mxu2 %v12498_v47  ;;  %v12659_v48 = vor.u32 %v8719_v32, %v8140_v30  ;;  %13949 = vst [vmem:[#allocation14_spill] sm:$0xff] %v12707_v16  ;;  %v8764_v56 = vld [vmem:[%s13710_s8 + $0x1e4] sm:$0xf0]  ;;  %v8709_v40 = vld [vmem:[%s13710_s8 + $0x2c] sm:$0xf0] }
 0x713   : > { %v8761_v61 = vld [vmem:[%s13710_s8 + $0x1d4] sm:$0xf]  ;;  %v12749_v32 = vor.u32 %v8764_v56, %v8306_v31  ;;  %v12751_v30 = vor.u32 %v8709_v40, %v8090_v46  ;;  %v8292_v41 = vld [vmem:[%s13710_s8 + $0x1b8] sm:$0xf0]  ;;  %v8242_v6 = vld [vmem:[%s13710_s8 + $0x148] sm:$0xf] }
 0x714   : > { %v8316_v24 = vld [vmem:[%s13710_s8 + $0x1f0] sm:$0xf0]  ;;  %v8748_v54 = vld [vmem:[%s13710_s8 + $0x164] sm:$0xf0]  ;;  %v8746_v44 = vld [vmem:[%s13710_s8 + $0x15c] sm:$0xf] }
 0x715   : > { %5567 = vmatpush.bf16.msra.mxu3 %v8035_v15  ;;  %6028 = vmatpush.bf16.msrb.mxu1 %v12523_v55  ;;  %v8654_v15 = vld [vmem:[%s13918_s7 + $0x74] sm:$0xf0]  ;;  %13950 = vst [vmem:[#allocation15_spill] sm:$0xff] %v12751_v30  ;;  %v12753_v53 = vor.u32 %v8761_v61, %v8316_v24  ;;  %v8252_v5 = vld [vmem:[%s13710_s8 + $0x170] sm:$0xf0]  ;;  %v12810_v63 = vor.u32 %v8748_v54, %v8242_v6  ;;  %s8951_s7 = scalar_lea.hbm %s8950_s6, 4 }
 0x716   : > { %6054 = vmatpush.bf16.msrb.mxu0 %v12533_v51  ;;  %6067 = vmatpush.bf16.msra.mxu2 %v12535_v14  ;;  %v8737_v56 = vld [vmem:[%s13710_s8 + $0x114] sm:$0xf]  ;;  %v8738_v40 = vld [vmem:[%s13710_s8 + $0x11c] sm:$0xf]  ;;  %v8146_v54 = vld [vmem:[%s13710_s8 + $0x88] sm:$0xf]  ;;  %p8952_p11 = scmp.ne.s32.totalorder %s8950_s6, %s8951_s7  ;;  %p8957_p1 = scmp.lt.s32.totalorder %s8955_s25, %s8951_s7 }
 0x717   : > { %13951 = vst [vmem:[#allocation16_spill] sm:$0xff] %v12753_v53  ;;  %v8220_v46 = vld [vmem:[%s13710_s8 + $0x130] sm:$0xf0]  ;;  %v8228_v61 = vld [vmem:[%s13710_s8 + $0x138] sm:$0xf0] }
 0x718   : > { %v12851_v11 = vor.u32 %v8738_v40, %v8228_v61  ;;  %v8729_v36 = vld [vmem:[%s13710_s8 + $0xd4] sm:$0xf]  ;;  %v8114_v40 = vld [vmem:[%s13710_s8 + $0x48] sm:$0xf]  ;;  %p8953_p12 = pnand %p8952_p11, %p9133_p5  ;;  %p8958_p2 = por %p8957_p1, %p8956_p0 }
 0x719   : > { %5568 = vmatpush.bf16.msra.mxu3 %v8003_v9  ;;  %6029 = vmatpush.bf16.msrb.mxu1 %v12556_v43  ;;  %v7875_v9 = vor.u32 %v8654_v15, %v7874_v37  ;;  %v8284_v37 = vld [vmem:[%s13710_s8 + $0x1b0] sm:$0xf0]  ;;  %v8754_v15 = vld [vmem:[%s13710_s8 + $0x19c] sm:$0xf]  ;;  %v8716_v61 = vld [vmem:[%s13710_s8 + $0x64] sm:$0xf0] }
 0x71a   : > { %6055 = vmatpush.bf16.msrb.mxu0 %v12566_v21  ;;  %6068 = vmatpush.bf16.msra.mxu2 %v12568_v33  ;;  %v12792_v12 = vor.u32 %v8754_v15, %v8292_v41  ;;  %13958 = vst [vmem:[#allocation26_spill] sm:$0xff] %v12851_v11  ;;  %v8196_v15 = vld [vmem:[%s13710_s8 + $0xf8] sm:$0xf0]  ;;  %p8954_p13 = pneg %p8953_p12 }
 0x71c   : > { %13954 = vst [vmem:[#allocation19_spill] sm:$0xff] %v12792_v12  ;;  %p8959_p3 = pnand %p8958_p2, %p8954_p13 }
 0x71d   : > { %5569 = vmatpush.bf16.msra.mxu3 %v7971_v13  ;;  %6030 = vmatpush.bf16.msrb.mxu1 %v12589_v62  ;;  %v8084_v13 = vld [vmem:[%s13710_s8 + $0x28] sm:$0xf0] }
 0x71e   : > { %6056 = vmatpush.bf16.msrb.mxu0 %v12599_v49  ;;  %6069 = vmatpush.bf16.msra.mxu2 %v12601_v42  ;;  %v12747_v25 = vor.u32 %v8704_v29, %v8084_v13  ;;  %v8210_v29 = vld [vmem:[%s13710_s8 + $0x108] sm:$0xf] }
 0x71f   : > { %5518 = vmatmul.bf16.vlgmr.msrb.gmra.mxu3 %v12486_v27  ;;  %5560 = vmatmul.bf16.vlgmr.msra.gmra.mxu1 %v12486_v27  ;;  %v8740_v13 = vld [vmem:[%s13710_s8 + $0x124] sm:$0xf0] }
 0x720   : > { %5588 = vmatmul.bf16.vlgmr.msra.gmra.mxu0 %v12486_v27  ;;  %6022 = vmatmul.bf16.vlgmr.msrb.gmra.mxu2 %v13762_v35  ;;  %v12838_v24 = vor.u32 %v8740_v13, %v8210_v29  ;;  %v8722_v29 = vld [vmem:[%s13710_s8 + $0x9c] sm:$0xf] }
 0x721   : > { %5570 = vmatpush.bf16.msra.mxu3 %v7939_v10  ;;  %6031 = vmatpush.bf16.msrb.mxu1 %v12622_v20  ;;  %v8762_v10 = vld [vmem:[%s13710_s8 + $0x1dc] sm:$0xf] }
 0x722   : > { %6057 = vmatpush.bf16.msrb.mxu0 %v12632_v58  ;;  %6070 = vmatpush.bf16.msra.mxu2 %v12634_v45  ;;  %v12761_v52 = vor.u32 %v8762_v10, %v8324_v60  ;;  %v8178_v10 = vld [vmem:[%s13710_s8 + $0xc8] sm:$0xf]  ;;  %v8164_v13 = vld [vmem:[%s13710_s8 + $0xb8] sm:$0xf0] }
 0x723   : > { %v8732_v60 = vld [vmem:[%s13710_s8 + $0xe4] sm:$0xf0] }
 0x724   : > { %13952 = vst [vmem:[#allocation17_spill] sm:$0xff] %v12761_v52  ;;  %v12866_v41 = vor.u32 %v8732_v60, %v8178_v10  ;;  %v12907_v10 = vor.u32 %v8722_v29, %v8164_v13  ;;  %v8713_v60 = vld [vmem:[%s13710_s8 + $0x54] sm:$0xf] }
 0x725   : > { %5571 = vmatpush.bf16.msra.mxu3 %v7907_v19  ;;  %6032 = vmatpush.bf16.msrb.mxu1 %v12659_v48  ;;  %v8753_v19 = vld [vmem:[%s13710_s8 + $0x194] sm:$0xf] }
 0x726   : > { %6058 = vmatpush.bf16.msrb.mxu0 %v12669_v39  ;;  %6071 = vmatpush.bf16.msra.mxu2 %v12671_v26  ;;  %v12782_v3 = vor.u32 %v8753_v19, %v8284_v37  ;;  %v8188_v19 = vld [vmem:[%s13710_s8 + $0xf0] sm:$0xf0]  ;;  %v8730_v37 = vld [vmem:[%s13710_s8 + $0xdc] sm:$0xf]  ;;  %13962 = vst [vmem:[#allocation30_spill] sm:$0xff] %v12907_v10 }
 0x727   : > { %v12869_v6 = vor.u32 %v8729_v36, %v8188_v19  ;;  %v8124_v36 = vld [vmem:[%s13710_s8 + $0x70] sm:$0xf0]  ;;  %v8714_v19 = vld [vmem:[%s13710_s8 + $0x5c] sm:$0xf] }
 0x728   : > { %13953 = vst [vmem:[#allocation18_spill] sm:$0xff] %v12782_v3  ;;  %v8092_v13 = vld [vmem:[%s13710_s8 + $0x30] sm:$0xf0] }
 0x729   : > { %5572 = vmatpush.bf16.msra.mxu3 %v7875_v9  ;;  %6033 = vmatpush.bf16.msrb.mxu1 %v12692_v2  ;;  %v8745_v9 = vld [vmem:[%s13710_s8 + $0x154] sm:$0xf]  ;;  %13959 = vst [vmem:[#allocation27_spill] sm:$0xff] %v12869_v6 }
 0x72a   : > { %6059 = vmatpush.bf16.msrb.mxu0 %v12705_v4  ;;  %6072 = vmatpush.bf16.msra.mxu2 %v12707_v16  ;;  %v12813_v1 = vor.u32 %v8745_v9, %v8252_v5  ;;  %v8724_v9 = vld [vmem:[%s13710_s8 + $0xa4] sm:$0xf0]  ;;  %v12879_v5 = vor.u32 %v8730_v37, %v8196_v15  ;;  %v8132_v37 = vld [vmem:[%s13710_s8 + $0x78] sm:$0xf0]  ;;  %v12922_v15 = vor.u32 %v8716_v61, %v8114_v40  ;;  %v8322_v40 = vld [vmem:[%s13710_s8 + $0x1d8] sm:$0xf] }
 0x72b   : > { %v12938_v29 = vor.u32 %v8714_v19, %v8132_v37  ;;  %v8766_v61 = vld [vmem:[%s13710_s8 + $0x1f4] sm:$0xf0] }
 0x72c   : > { %13955 = vst [vmem:[#allocation22_spill] sm:$0xff] %v12813_v1 }
 0x72d   : > { %5573 = vmatpush.bf16.msra.mxu3 %v7843_v38  ;;  %6034 = vmatpush.bf16.msrb.mxu1 %v12737_v59  ;;  %v12841_v38 = vor.u32 %v8737_v56, %v8220_v46  ;;  %13960 = vst [vmem:[#allocation28_spill] sm:$0xff] %v12879_v5  ;;  %v12894_v56 = vor.u32 %v8724_v9, %v8146_v54  ;;  %v8082_v9 = vld [vmem:[%s13710_s8 + $0x8] sm:$0xf] }
 0x72e   : > { %6060 = vmatpush.bf16.msrb.mxu0 %v12747_v25  ;;  %6073 = vmatpush.bf16.msra.mxu2 %v12751_v30  ;;  %v12925_v54 = vor.u32 %v8713_v60, %v8124_v36  ;;  %13964 = vst [vmem:[#allocation32_spill] sm:$0xff] %v12938_v29  ;;  %v8706_v60 = vld [vmem:[%s13710_s8 + $0x1c] sm:$0xf] }
 0x72f   : > { %13957 = vst [vmem:[#allocation24_spill] sm:$0xff] %v12841_v38  ;;  %v8100_v36 = vld [vmem:[%s13710_s8 + $0x38] sm:$0xf0] }
 0x730   : > { %5574 = vmatmul.bf16.vlgmr.msra.gmra.mxu3 %v12486_v27  ;;  %6035 = vmatmul.bf16.vlgmr.msrb.gmra.mxu1 %v13762_v35  ;;  %v8260_v27 = vld [vmem:[%s13710_s8 + $0x178] sm:$0xf0]  ;;  %13963 = vst [vmem:[#allocation31_spill] sm:$0xff] %v12925_v54 }
 0x731   : > { %6040 = vmatpush.bf16.msrb.mxu3 %v12749_v32  ;;  %6079 = vmatpush.bf16.msra.mxu1 %v12753_v53  ;;  %v12823_v31 = vor.u32 %v8746_v44, %v8260_v27  ;;  %v8721_v44 = vld [vmem:[%s13710_s8 + $0x94] sm:$0xf] }
 0x732   : > { %6105 = vmatpush.bf16.msra.mxu0 %v12761_v52  ;;  %6074 = vmatmul.bf16.vlgmr.msra.gmra.mxu2 %v13762_v35  ;;  %v8156_v27 = vld [vmem:[%s13710_s8 + $0xb0] sm:$0xf0] }
 0x733   : > { %6061 = vmatmul.bf16.vlgmr.msrb.gmra.mxu0 %v13762_v35  ;;  %6149 = vmatpush.bf16.msrb.mxu2 %v12250_v0  ;;  %13956 = vst [vmem:[#allocation23_spill] sm:$0xff] %v12823_v31  ;;  %v12897_v46 = vor.u32 %v8721_v44, %v8156_v27  ;;  %v8708_v44 = vld [vmem:[%s13710_s8 + $0x24] sm:$0xf0]  ;;  %v8705_v27 = vld [vmem:[%s13710_s8 + $0x14] sm:$0xf]  ;;  %v12961_v35 = vor.u32 %v8766_v61, %v8322_v40  ;;  %v13969_v40 = vmov 0  }
 0x734   : > { %v12956_v19 = vor.u32 %v8708_v44, %v8082_v9  ;;  %v12959_v37 = vor.u32 %v8705_v27, %v8092_v13  ;;  %v8758_v9 = vld [vmem:[%s13710_s8 + $0x1b4] sm:$0xf0] }
 0x735   : > { %6041 = vmatpush.bf16.msrb.mxu3 %v12778_v57  ;;  %6080 = vmatpush.bf16.msra.mxu1 %v12782_v3  ;;  %13961 = vst [vmem:[#allocation29_spill] sm:$0xff] %v12897_v46  ;;  %v8258_v27 = vld [vmem:[%s13710_s8 + $0x158] sm:$0xf] }
 0x736   : > { %6106 = vmatpush.bf16.msra.mxu0 %v12792_v12  ;;  %13965 = vst [vmem:[#allocation33_spill] sm:$0xff] %v12959_v37  ;;  %v8750_v13 = vld [vmem:[%s13710_s8 + $0x174] sm:$0xf0] }
 0x737   : > { %6150 = vmatpush.bf16.msrb.mxu2 %v12282_v18  ;;  %13966 = vst [vmem:[#allocation34_spill] sm:$0xff] %v12961_v35  ;;  %v8226_v61 = vld [vmem:[%s13710_s8 + $0x118] sm:$0xf] }
 0x739   : > { %6042 = vmatpush.bf16.msrb.mxu3 %v12810_v63  ;;  %6081 = vmatpush.bf16.msra.mxu1 %v12813_v1 }
 0x73a   : > { %6107 = vmatpush.bf16.msra.mxu0 %v12823_v31 }
 0x73b   : > { %6151 = vmatpush.bf16.msrb.mxu2 %v12310_v23 }
 0x73d   : > { %6043 = vmatpush.bf16.msrb.mxu3 %v12838_v24  ;;  %6082 = vmatpush.bf16.msra.mxu1 %v12841_v38 }
 0x73e   : > { %6108 = vmatpush.bf16.msra.mxu0 %v12851_v11 }
 0x73f   : > { %6152 = vmatpush.bf16.msrb.mxu2 %v12344_v22  ;;  %v8290_v22 = vld [vmem:[%s13710_s8 + $0x198] sm:$0xf] }
 0x740   : > { %v12976_v44 = vor.u32 %v8758_v9, %v8290_v22  ;;  %v12992_v22 = vor.u32 %v8750_v13, %v8258_v27  ;;  %v8194_v9 = vld [vmem:[%s13710_s8 + $0xd8] sm:$0xf] }
 0x741   : > { %6044 = vmatpush.bf16.msrb.mxu3 %v12866_v41  ;;  %6083 = vmatpush.bf16.msra.mxu1 %v12869_v6  ;;  %v8734_v27 = vld [vmem:[%s13710_s8 + $0xf4] sm:$0xf0] }
 0x742   : > { %6109 = vmatpush.bf16.msra.mxu0 %v12879_v5  ;;  %13968 = vst [vmem:[#allocation36_spill] sm:$0xff] %v12976_v44  ;;  %v13016_v13 = vor.u32 %v8734_v27, %v8194_v9  ;;  %v8130_v9 = vld [vmem:[%s13710_s8 + $0x58] sm:$0xf] }
 0x743   : > { %6153 = vmatpush.bf16.msrb.mxu2 %v12371_v7  ;;  %v12965_v7 = vor.u32 %v8706_v60, %v8100_v36  ;;  %13970 = vst [vmem:[#allocation37_spill] sm:$0xff] %v12992_v22  ;;  %v8742_v60 = vld [vmem:[%s13710_s8 + $0x134] sm:$0xf0] }
 0x744   : > { %v13004_v36 = vor.u32 %v8742_v60, %v8226_v61  ;;  %13972 = vst [vmem:[#allocation39_spill] sm:$0xff] %v13016_v13  ;;  %v8162_v61 = vld [vmem:[%s13710_s8 + $0x98] sm:$0xf] }
 0x745   : > { %6045 = vmatpush.bf16.msrb.mxu3 %v12894_v56  ;;  %6084 = vmatpush.bf16.msra.mxu1 %v12897_v46  ;;  %13967 = vst [vmem:[#allocation35_spill] sm:$0xff] %v12965_v7  ;;  %v8726_v60 = vld [vmem:[%s13710_s8 + $0xb4] sm:$0xf0] }
 0x746   : > { %6110 = vmatpush.bf16.msra.mxu0 %v12907_v10  ;;  %13971 = vst [vmem:[#allocation38_spill] sm:$0xff] %v13004_v36  ;;  %v8718_v27 = vld [vmem:[%s13710_s8 + $0x74] sm:$0xf0] }
 0x747   : > { %6154 = vmatpush.bf16.msrb.mxu2 %v12400_v28 }
 0x749   : > { %6046 = vmatpush.bf16.msrb.mxu3 %v12922_v15  ;;  %6085 = vmatpush.bf16.msra.mxu1 %v12925_v54 }
 0x74a   : > { %6111 = vmatpush.bf16.msra.mxu0 %v12938_v29 }
 0x74b   : > { %6155 = vmatpush.bf16.msrb.mxu2 %v12430_v8 }
 0x74d   : > { %6047 = vmatpush.bf16.msrb.mxu3 %v12956_v19  ;;  %6086 = vmatpush.bf16.msra.mxu1 %v12959_v37 }
 0x74e   : > { %6112 = vmatpush.bf16.msra.mxu0 %v12965_v7 }
 0x74f   : > { %6156 = vmatpush.bf16.msrb.mxu2 %v12449_v50 }
 0x750   : > { %6048 = vmatmul.bf16.vlgmr.msrb.gmra.mxu3 %v13969_v40  ;;  %6087 = vmatmul.bf16.vlgmr.msra.gmra.mxu1 %v13969_v40 }
 0x751   : > { %6092 = vmatpush.bf16.msra.mxu3 %v12961_v35  ;;  %6162 = vmatpush.bf16.msrb.mxu1 %v12488_v34 }
 0x752   : > { %6188 = vmatpush.bf16.msrb.mxu0 %v12496_v17 }
 0x753   : > { %6113 = vmatmul.bf16.vlgmr.msra.gmra.mxu0 %v13969_v40  ;;  %6201 = vmatpush.bf16.msra.mxu2 %v12498_v47  ;;  %v13028_v47 = vor.u32 %v8726_v60, %v8162_v61  ;;  %v8098_v61 = vld [vmem:[%s13710_s8 + $0x18] sm:$0xf] }
 0x754   : > { %v8710_v60 = vld [vmem:[%s13710_s8 + $0x34] sm:$0xf0] }
 0x755   : > { %6093 = vmatpush.bf16.msra.mxu3 %v12976_v44  ;;  %6163 = vmatpush.bf16.msrb.mxu1 %v12523_v55  ;;  %13973 = vst [vmem:[#allocation40_spill] sm:$0xff] %v13028_v47 }
 0x756   : > { %6189 = vmatpush.bf16.msrb.mxu0 %v12533_v51 }
 0x757   : > { %6202 = vmatpush.bf16.msra.mxu2 %v12535_v14  ;;  %v13040_v14 = vor.u32 %v8718_v27, %v8130_v9  ;;  %v13095_v27 = vld [vmem:[%s13712_s10] sm:$0xf] }
 0x759   : > { %6094 = vmatpush.bf16.msra.mxu3 %v12992_v22  ;;  %6164 = vmatpush.bf16.msrb.mxu1 %v12556_v43  ;;  %13974 = vst [vmem:[#allocation41_spill] sm:$0xff] %v13040_v14 }
 0x75a   : > { %6190 = vmatpush.bf16.msrb.mxu0 %v12566_v21 }
 0x75b   : > { %6203 = vmatpush.bf16.msra.mxu2 %v12568_v33  ;;  %v13052_v33 = vor.u32 %v8710_v60, %v8098_v61  ;;  %v13101_v61 = vld [vmem:[%s13711_s9] sm:$0xf]  ;;  %v5614_v60 = vperm.slane %v13095_v27, 0 }
 0x75c   : > { %13976 = vst [vmem:[#allocation43_spill] sm:$0xff] %v13101_v61 }
 0x75d   : > { %6095 = vmatpush.bf16.msra.mxu3 %v13004_v36  ;;  %6165 = vmatpush.bf16.msrb.mxu1 %v12589_v62  ;;  %13975 = vst [vmem:[#allocation42_spill] sm:$0xff] %v13052_v33 }
 0x75e   : > { %6191 = vmatpush.bf16.msrb.mxu0 %v12599_v49 }
 0x75f   : > { %6204 = vmatpush.bf16.msra.mxu2 %v12601_v42 }
 0x761   : > { %6096 = vmatpush.bf16.msra.mxu3 %v13016_v13  ;;  %6166 = vmatpush.bf16.msrb.mxu1 %v12622_v20 }
 0x762   : > { %6192 = vmatpush.bf16.msrb.mxu0 %v12632_v58 }
 0x763   : > { %6205 = vmatpush.bf16.msra.mxu2 %v12634_v45  ;;  %v5617_v45 = vperm.slane %v13095_v27, 3 }
 0x765   : > { %6097 = vmatpush.bf16.msra.mxu3 %v13028_v47  ;;  %6167 = vmatpush.bf16.msrb.mxu1 %v12659_v48 }
 0x766   : > { %6193 = vmatpush.bf16.msrb.mxu0 %v12669_v39 }
 0x767   : > { %6206 = vmatpush.bf16.msra.mxu2 %v12671_v26 }
 0x769   : > { %6098 = vmatpush.bf16.msra.mxu3 %v13040_v14  ;;  %6168 = vmatpush.bf16.msrb.mxu1 %v12692_v2 }
 0x76a   : > { %6194 = vmatpush.bf16.msrb.mxu0 %v12705_v4 }
 0x76b   : > { %6207 = vmatpush.bf16.msra.mxu2 %v12707_v16 }
 0x76d   : > { %6099 = vmatpush.bf16.msra.mxu3 %v13052_v33  ;;  %6169 = vmatpush.bf16.msrb.mxu1 %v12737_v59 }
 0x76e   : > { %6195 = vmatpush.bf16.msrb.mxu0 %v12747_v25 }
 0x76f   : > { %6208 = vmatpush.bf16.msra.mxu2 %v12751_v30 }
 0x770   : > { %6100 = vmatmul.bf16.vlgmr.msra.gmra.mxu3 %v13969_v40 }
 0x771   : > { %6175 = vmatpush.bf16.msrb.mxu3 %v12749_v32  ;;  %6214 = vmatpush.bf16.msra.mxu1 %v12753_v53 }
 0x772   : > { %6240 = vmatpush.bf16.msra.mxu0 %v12761_v52 }
 0x775   : > { %6176 = vmatpush.bf16.msrb.mxu3 %v12778_v57  ;;  %6215 = vmatpush.bf16.msra.mxu1 %v12782_v3 }
 0x776   : > { %6241 = vmatpush.bf16.msra.mxu0 %v12792_v12 }
 0x779   : > { %6177 = vmatpush.bf16.msrb.mxu3 %v12810_v63  ;;  %6216 = vmatpush.bf16.msra.mxu1 %v12813_v1 }
 0x77a   : > { %6242 = vmatpush.bf16.msra.mxu0 %v12823_v31 }
 0x77d   : > { %6178 = vmatpush.bf16.msrb.mxu3 %v12838_v24  ;;  %6217 = vmatpush.bf16.msra.mxu1 %v12841_v38 }
 0x77e   : > { %6243 = vmatpush.bf16.msra.mxu0 %v12851_v11 }
 0x781   : > { %6179 = vmatpush.bf16.msrb.mxu3 %v12866_v41  ;;  %6218 = vmatpush.bf16.msra.mxu1 %v12869_v6 }
 0x782   : > { %6244 = vmatpush.bf16.msra.mxu0 %v12879_v5  ;;  %v5615_v5 = vperm.slane %v13095_v27, 1 }
 0x785   : > { %6180 = vmatpush.bf16.msrb.mxu3 %v12894_v56  ;;  %6219 = vmatpush.bf16.msra.mxu1 %v12897_v46 }
 0x786   : > { %6245 = vmatpush.bf16.msra.mxu0 %v12907_v10 }
 0x789   : > { %6181 = vmatpush.bf16.msrb.mxu3 %v12922_v15  ;;  %6220 = vmatpush.bf16.msra.mxu1 %v12925_v54 }
 0x78a   : > { %6246 = vmatpush.bf16.msra.mxu0 %v12938_v29  ;;  %v5599_v29 = vperm.slane %v13101_v61, 3 }
 0x78c   : > { %v5505_v40 = vpop.f32.mrf.mxu1 }
 0x78d   : > { %6182 = vmatpush.bf16.msrb.mxu3 %v12956_v19  ;;  %6221 = vmatpush.bf16.msra.mxu1 %v12959_v37  ;;  %v13090_v9 = vpop.f32.mrf.mxu0  ;;  %v5597_v37 = vperm.slane %v13101_v61, 1 }
 0x78e   : > { %6247 = vmatpush.bf16.msra.mxu0 %v12965_v7 }
 0x791   : > { %6227 = vmatpush.bf16.msra.mxu3 %v12961_v35 }
 0x792   : > { %v5491_v7 = vpop.f32.mrf.mxu3 }
 0x793   : > { %v5547_v30 = vpop.f32.mrf.mxu2 }
 0x794   : > { %v13107_v54 = vadd.f32 %v5614_v60, %v5547_v30  ;;  %v5507_v16 = vpop.f32.mrf.mxu1 }
 0x795   : > { %6228 = vmatpush.bf16.msra.mxu3 %v12976_v44  ;;  %v13109_v10 = vadd.f32 %v5597_v37, %v5507_v16  ;;  %v5535_v46 = vpop.f32.mrf.mxu0 }
 0x796   : > { %13977 = vst [vmem:[#allocation44_spill] sm:$0xff] %v13107_v54  ;;  %v13112_v26 = vadd.f32 %v5599_v29, %v5535_v46 }
 0x797   : > { %13978 = vst [vmem:[#allocation45_spill] sm:$0xff] %v13109_v10 }
 0x798   : > { %13979 = vst [vmem:[#allocation46_spill] sm:$0xff] %v13112_v26 }
 0x799   : > { %6229 = vmatpush.bf16.msra.mxu3 %v12992_v22 }
 0x79a   : > { %v13116_v6 = vpop.f32.mrf.mxu3 }
 0x79b   : > { %13980 = vst [vmem:[#allocation47_spill] sm:$0xff] %v13116_v6  ;;  %v5549_v11 = vpop.f32.mrf.mxu2 }
 0x79d   : > { %6230 = vmatpush.bf16.msra.mxu3 %v13004_v36  ;;  %v5561_v36 = vpop.f32.mrf.mxu1  ;;  %v5589_v54 = vpop.f32.mrf.mxu0 }
 0x79e   : > { %v13119_v30 = vadd.f32 %v5615_v5, %v5561_v36  ;;  %v13122_v16 = vadd.f32 %v5617_v45, %v5589_v54 }
 0x7a0   : > { %13981 = vst [vmem:[#allocation48_spill] sm:$0xff] %v13119_v30  ;;  %v5616_v30 = vperm.slane %v13095_v27, 2 }
 0x7a1   : > { %6231 = vmatpush.bf16.msra.mxu3 %v13016_v13  ;;  %13982 = vst [vmem:[#allocation49_spill] sm:$0xff] %v13122_v16 }
 0x7a2   : > { %v5519_v46 = vpop.f32.mrf.mxu3 }
 0x7a3   : > { %v6023_v26 = vpop.f32.mrf.mxu2 }
 0x7a5   : > { %6232 = vmatpush.bf16.msra.mxu3 %v13028_v47  ;;  %v5563_v10 = vpop.f32.mrf.mxu1  ;;  %v5591_v13 = vpop.f32.mrf.mxu0  ;;  %v5598_v47 = vperm.slane %v13101_v61, 2 }
 0x7a6   : > { %v13131_v35 = vadd.f32 %v5615_v5, %v5563_v10 }
 0x7a9   : > { %6233 = vmatpush.bf16.msra.mxu3 %v13040_v14 }
 0x7aa   : > { %v5521_v6 = vpop.f32.mrf.mxu3 }
 0x7ab   : > { %v13126_v38 = vadd.f32 %v5598_v47, %v5521_v6  ;;  %v6025_v42 = vpop.f32.mrf.mxu2  ;;  %v13133_v6 = vadd.f32 %v5597_v37, %v5505_v40 }
 0x7ac   : > { %v13838_v42 = vperm.slane %v13101_v61, 0  ;;  %v14010_v61 = vld [vmem:[#allocation40_spill] sm:$0xff] }
 0x7ad   : > { %6234 = vmatpush.bf16.msra.mxu3 %v13052_v33  ;;  %13983 = vst [vmem:[#allocation50_spill] sm:$0xff] %v13126_v38  ;;  %v6036_v31 = vpop.f32.mrf.mxu1 }
 0x7b0   : > { %v6062_v36 = vpop.f32.mrf.mxu0 }
 0x7b3   : > { %v5575_v22 = vpop.f32.mrf.mxu3 }
 0x7b4   : > { %v13129_v14 = vadd.f32 %v5616_v30, %v5575_v22  ;;  %v13137_v22 = vadd.f32 %v5614_v60, %v5549_v11 }
 0x7b5   : > { %v6075_v54 = vpop.f32.mrf.mxu2  ;;  %v6038_v16 = vpop.f32.mrf.mxu1 }
 0x7b6   : > { %13984 = vst [vmem:[#allocation51_spill] sm:$0xff] %v13129_v14  ;;  %v6119_v16 = vadd.f32 %v6036_v31, %v13133_v6  ;;  %v13151_v31 = vadd.f32 %v5599_v29, %v13090_v9  ;;  %v14009_v14 = vld [vmem:[#allocation29_spill] sm:$0xff] }
 0x7b8   : > { %v6064_v33 = vpop.f32.mrf.mxu0  ;;  %v6121_v11 = vadd.f32 %v6062_v36, %v13151_v31 }
 0x7b9   : > { %v13142_v33 = vadd.f32 %v13838_v42, %v5491_v7  ;;  %v14007_v42 = vld [vmem:[#allocation28_spill] sm:$0xff] }
 0x7bb   : > { %v5577_v12 = vpop.f32.mrf.mxu3  ;;  %v6118_v37 = vadd.f32 %v6023_v26, %v13142_v33 }
 0x7bd   : > { %v6077_v1 = vpop.f32.mrf.mxu2 }
 0x7be   : > { %v6122_v1 = vadd.f32 %v6075_v54, %v13137_v22 }
 0x7cd   : > { %v6088_v44 = vpop.f32.mrf.mxu1 }
 0x7ce   : > { %v6123_v38 = vadd.f32 %v6088_v44, %v13131_v35  ;;  %v6126_v44 = vsel %vm2130_vm7, %v6118_v37, %v6122_v1 }
 0x7d0   : > { %v6114_v3 = vpop.f32.mrf.mxu0  ;;  %v6127_v5 = vsel %vm2130_vm7, %v6119_v16, %v6123_v38 }
 0x7d1   : > { %v6131_v40 = vmul.f32 0.5, %v6127_v5  ;;  %v13156_v5 = vadd.f32 %v5598_v47, %v5519_v46 }
 0x7d3   : > { %v6049_v52 = vpop.f32.mrf.mxu3  ;;  %8872 = vtanh.f32 %v6131_v40 }
 0x7d4   : > { %v6120_v9 = vadd.f32 %v6049_v52, %v13156_v5 }
 0x7d5   : > { %v6090_v27 = vpop.f32.mrf.mxu1 }
 0x7d6   : > { %v6130_v27 = vmul.f32 0.5, %v6126_v44 }
 0x7d8   : > { %v6116_v53 = vpop.f32.mrf.mxu0  ;;  %8874 = vtanh.f32 %v6130_v27 }
 0x7d9   : > { %v13148_v53 = vadd.f32 %v5617_v45, %v5591_v13  ;;  %v8873_v60 = vpop.eup %8872  ;;  %v13158_v45 = vadd.f32 %v5616_v30, %v5577_v12 }
 0x7da   : > { %v6137_v54 = vadd.f32 1.0, %v8873_v60  ;;  %v13986_v60 = vld [vmem:[#allocation13_spill] sm:$0xff] }
 0x7db   : > { %v6051_v10 = vpop.f32.mrf.mxu3  ;;  %v6125_v7 = vadd.f32 %v6114_v3, %v13148_v53 }
 0x7dc   : > { %v6140_v1 = vmul.f32 0.5, %v6137_v54  ;;  %v13988_v54 = vld [vmem:[#allocation21_spill] sm:$0xff] }
 0x7dd   : > { %v6129_v38 = vsel %vm2130_vm7, %v6121_v11, %v6125_v7 }
 0x7de   : > { %v8875_v26 = vpop.eup %8874  ;;  %8876 = vtanh.f32 %v6129_v38  ;;  %v6143_v36 = vmul.f32 0.0, %v6140_v1  ;;  %v13987_v38 = vld [vmem:[#allocation20_spill] sm:$0xff]  ;;  %v13991_v1 = vld [vmem:[#allocation17_spill] sm:$0xff] }
 0x7df   : > { %v6136_v16 = vadd.f32 1.0, %v8875_v26  ;;  %v13989_v26 = vld [vmem:[#allocation16_spill] sm:$0xff] }
 0x7e1   : > { %v6139_v10 = vmul.f32 0.5, %v6136_v16  ;;  %v13990_v16 = vld [vmem:[#allocation34_spill] sm:$0xff] }
 0x7e4   : > { %v8877_v29 = vpop.eup %8876 }
 0x7e5   : > { %v6144_v40 = vmul.f32 %v8877_v29, %v6139_v10  ;;  %v13993_v29 = vld [vmem:[#allocation18_spill] sm:$0xff] }
 0x7e6   : > { %v13996_v10 = vld [vmem:[#allocation10_spill] sm:$0xff] }
 0x7e7   : > { %v13163_v27 = vadd.f32 %v6144_v40, %v6143_v36  ;;  %v13997_v36 = vld [vmem:[#allocation22_spill] sm:$0xff]  ;;  %v13999_v40 = vld [vmem:[#allocation23_spill] sm:$0xff] }
 0x7f3   : > { %v6101_v13 = vpop.f32.mrf.mxu3 }
 0x7f4   : > { %v6124_v3 = vadd.f32 %v6101_v13, %v13158_v45  ;;  %v13992_v13 = vld [vmem:[#allocation9_spill] sm:$0xff] }
 0x7f6   : > { %v6128_v37 = vsel %vm2130_vm7, %v6120_v9, %v6124_v3  ;;  %v13994_v9 = vld [vmem:[#allocation36_spill] sm:$0xff]  ;;  %v13995_v3 = vld [vmem:[#allocation19_spill] sm:$0xff] }
 0x7f7   : > { %v6132_v44 = vmul.f32 0.5, %v6128_v37  ;;  %v13998_v37 = vld [vmem:[#allocation37_spill] sm:$0xff] }
 0x7f9   : > { %8878 = vtanh.f32 %v6132_v44  ;;  %v14000_v44 = vld [vmem:[#allocation25_spill] sm:$0xff] }
 0x7fa   : > { %8880 = vtanh.f32 %v13163_v27 }
 0x7fb   : > { %v6103_v7 = vpop.f32.mrf.mxu3 }
 0x7fc   : > { %v14001_v7 = vld [vmem:[#allocation24_spill] sm:$0xff] }
 0x7ff   : > { %v8879_v47 = vpop.eup %8878 }
 0x800   : > { %v6138_v12 = vadd.f32 1.0, %v8879_v47  ;;  %v8881_v46 = vpop.eup %8880  ;;  %v14002_v47 = vld [vmem:[#allocation38_spill] sm:$0xff] }
 0x802   : > { %v6141_v30 = vmul.f32 0.5, %v6138_v12  ;;  %v14003_v12 = vld [vmem:[#allocation26_spill] sm:$0xff] }
 0x804   : > { %v13166_v11 = vmul.f32 %v8881_v46, %v6141_v30  ;;  %v14004_v30 = vld [vmem:[#allocation11_spill] sm:$0xff] }
 0x805   : > { %v14005_v46 = vld [vmem:[#allocation27_spill] sm:$0xff] }
 0x806   : > { %13985 = vst [vmem:[#allocation52_spill] sm:$0xff] %v13166_v11  ;;  %v6148_v52 = vpack.c.bf16 %v13166_v11, %v13166_v11  ;;  %v14008_v11 = vld [vmem:[#allocation12_spill] sm:$0xff] }
 0x808   : > { %6157 = vmatmul.bf16.vlgmr.msrb.gmra.mxu2 %v6148_v52  ;;  %6170 = vmatmul.bf16.vlgmr.msrb.gmra.mxu1 %v6148_v52 }
 0x809   : > { %6183 = vmatmul.bf16.vlgmr.msrb.gmra.mxu3 %v6148_v52  ;;  %6196 = vmatmul.bf16.vlgmr.msrb.gmra.mxu0 %v6148_v52 }
 0x80a   : > { %6332 = vmatpush.bf16.msrb.mxu2 %v12250_v0  ;;  %6345 = vmatpush.bf16.msrb.mxu1 %v12488_v34 }
 0x80b   : > { %6358 = vmatpush.bf16.msrb.mxu3 %v12749_v32  ;;  %6371 = vmatpush.bf16.msrb.mxu0 %v12496_v17 }
 0x80e   : > { %6333 = vmatpush.bf16.msrb.mxu2 %v12282_v18  ;;  %6346 = vmatpush.bf16.msrb.mxu1 %v12523_v55 }
 0x80f   : > { %6359 = vmatpush.bf16.msrb.mxu3 %v12778_v57  ;;  %6372 = vmatpush.bf16.msrb.mxu0 %v12533_v51 }
 0x812   : > { %6334 = vmatpush.bf16.msrb.mxu2 %v12310_v23  ;;  %6347 = vmatpush.bf16.msrb.mxu1 %v12556_v43 }
 0x813   : > { %6360 = vmatpush.bf16.msrb.mxu3 %v12810_v63  ;;  %6373 = vmatpush.bf16.msrb.mxu0 %v12566_v21 }
 0x816   : > { %6335 = vmatpush.bf16.msrb.mxu2 %v13986_v60  ;;  %6348 = vmatpush.bf16.msrb.mxu1 %v12589_v62 }
 0x817   : > { %6361 = vmatpush.bf16.msrb.mxu3 %v12838_v24  ;;  %6374 = vmatpush.bf16.msrb.mxu0 %v12599_v49 }
 0x818   : > { %6209 = vmatmul.bf16.vlgmr.msra.gmra.mxu2 %v6148_v52  ;;  %6222 = vmatmul.bf16.vlgmr.msra.gmra.mxu1 %v6148_v52 }
 0x819   : > { %6235 = vmatmul.bf16.vlgmr.msra.gmra.mxu3 %v6148_v52  ;;  %6248 = vmatmul.bf16.vlgmr.msra.gmra.mxu0 %v6148_v52  ;;  %v14006_v52 = vld [vmem:[#allocation39_spill] sm:$0xff] }
 0x81a   : > { %6336 = vmatpush.bf16.msrb.mxu2 %v13987_v38  ;;  %6349 = vmatpush.bf16.msrb.mxu1 %v12622_v20 }
 0x81b   : > { %6362 = vmatpush.bf16.msrb.mxu3 %v12866_v41  ;;  %6375 = vmatpush.bf16.msrb.mxu0 %v12632_v58 }
 0x81e   : > { %6337 = vmatpush.bf16.msrb.mxu2 %v12400_v28  ;;  %6350 = vmatpush.bf16.msrb.mxu1 %v12659_v48 }
 0x81f   : > { %6363 = vmatpush.bf16.msrb.mxu3 %v12894_v56  ;;  %6376 = vmatpush.bf16.msrb.mxu0 %v12669_v39 }
 0x822   : > { %6338 = vmatpush.bf16.msrb.mxu2 %v12430_v8  ;;  %6351 = vmatpush.bf16.msrb.mxu1 %v12692_v2 }
 0x823   : > { %6364 = vmatpush.bf16.msrb.mxu3 %v12922_v15  ;;  %6377 = vmatpush.bf16.msrb.mxu0 %v12705_v4 }
 0x826   : > { %6339 = vmatpush.bf16.msrb.mxu2 %v12449_v50  ;;  %6352 = vmatpush.bf16.msrb.mxu1 %v12737_v59 }
 0x827   : > { %6365 = vmatpush.bf16.msrb.mxu3 %v12956_v19  ;;  %6378 = vmatpush.bf16.msrb.mxu0 %v12747_v25 }
 0x82a   : > { %6384 = vmatpush.bf16.msra.mxu2 %v13988_v54  ;;  %6397 = vmatpush.bf16.msra.mxu1 %v13989_v26 }
 0x82b   : > { %6410 = vmatpush.bf16.msra.mxu3 %v13990_v16  ;;  %6423 = vmatpush.bf16.msra.mxu0 %v13991_v1 }
 0x82e   : > { %6385 = vmatpush.bf16.msra.mxu2 %v13992_v13  ;;  %6398 = vmatpush.bf16.msra.mxu1 %v13993_v29 }
 0x82f   : > { %6411 = vmatpush.bf16.msra.mxu3 %v13994_v9  ;;  %6424 = vmatpush.bf16.msra.mxu0 %v13995_v3 }
 0x832   : > { %6386 = vmatpush.bf16.msra.mxu2 %v13996_v10  ;;  %6399 = vmatpush.bf16.msra.mxu1 %v13997_v36 }
 0x833   : > { %6412 = vmatpush.bf16.msra.mxu3 %v13998_v37  ;;  %6425 = vmatpush.bf16.msra.mxu0 %v13999_v40 }
 0x836   : > { %6387 = vmatpush.bf16.msra.mxu2 %v14000_v44  ;;  %6400 = vmatpush.bf16.msra.mxu1 %v14001_v7  ;;  %v14011_v44 = vld [vmem:[#allocation30_spill] sm:$0xff] }
 0x837   : > { %6413 = vmatpush.bf16.msra.mxu3 %v14002_v47  ;;  %6426 = vmatpush.bf16.msra.mxu0 %v14003_v12  ;;  %v14012_v7 = vld [vmem:[#allocation14_spill] sm:$0xff]  ;;  %v14013_v47 = vld [vmem:[#allocation31_spill] sm:$0xff]  ;;  %v14014_v12 = vld [vmem:[#allocation41_spill] sm:$0xff] }
 0x83a   : > { %6388 = vmatpush.bf16.msra.mxu2 %v14004_v30  ;;  %6401 = vmatpush.bf16.msra.mxu1 %v14005_v46  ;;  %v14015_v30 = vld [vmem:[#allocation32_spill] sm:$0xff]  ;;  %v14016_v46 = vld [vmem:[#allocation15_spill] sm:$0xff] }
 0x83b   : > { %6414 = vmatpush.bf16.msra.mxu3 %v14006_v52  ;;  %6427 = vmatpush.bf16.msra.mxu0 %v14007_v42  ;;  %v14017_v52 = vld [vmem:[#allocation33_spill] sm:$0xff]  ;;  %v14018_v42 = vld [vmem:[#allocation42_spill] sm:$0xff] }
 0x83e   : > { %6389 = vmatpush.bf16.msra.mxu2 %v14008_v11  ;;  %6402 = vmatpush.bf16.msra.mxu1 %v14009_v14  ;;  %v14019_v11 = vld [vmem:[#allocation35_spill] sm:$0xff] }
 0x83f   : > { %6415 = vmatpush.bf16.msra.mxu3 %v14010_v61  ;;  %6428 = vmatpush.bf16.msra.mxu0 %v14011_v44 }
 0x842   : > { %6390 = vmatpush.bf16.msra.mxu2 %v14012_v7  ;;  %6403 = vmatpush.bf16.msra.mxu1 %v14013_v47 }
 0x843   : > { %6416 = vmatpush.bf16.msra.mxu3 %v14014_v12  ;;  %6429 = vmatpush.bf16.msra.mxu0 %v14015_v30 }
 0x846   : > { %6391 = vmatpush.bf16.msra.mxu2 %v14016_v46  ;;  %6404 = vmatpush.bf16.msra.mxu1 %v14017_v52 }
 0x847   : > { %6417 = vmatpush.bf16.msra.mxu3 %v14018_v42  ;;  %6430 = vmatpush.bf16.msra.mxu0 %v14019_v11 }
 0x885   : > { %v6171_v14 = vpop.f32.mrf.mxu1 }
 0x886   : > { %v6197_v61 = vpop.f32.mrf.mxu0  ;;  %v6258_v36 = vrot.slane %v6171_v14, 4 }
 0x887   : > { %v6260_v16 = vrot.slane %v6197_v61, 4 }
 0x888   : > { %v6266_v30 = vadd.f32 %v6258_v36, %v13133_v6 }
 0x889   : > { %v6268_v61 = vadd.f32 %v6260_v16, %v13151_v31 }
 0x88a   : > { %v6290_v42 = vrot.slane %v6266_v30, 4 }
 0x88b   : > { %v6158_v40 = vpop.f32.mrf.mxu2 }
 0x88c   : > { %v6184_v44 = vpop.f32.mrf.mxu3  ;;  %v6257_v9 = vrot.slane %v6158_v40, 4 }
 0x88d   : > { %v6173_v37 = vpop.f32.mrf.mxu1  ;;  %v6259_v13 = vrot.slane %v6184_v44, 4 }
 0x88e   : > { %v6199_v7 = vpop.f32.mrf.mxu0  ;;  %v6265_v37 = vadd.f32 %v6257_v9, %v13142_v33 }
 0x890   : > { %v6289_v33 = vrot.slane %v6265_v37, 4 }
 0x893   : > { %v6160_v47 = vpop.f32.mrf.mxu2 }
 0x894   : > { %v6186_v10 = vpop.f32.mrf.mxu3 }
 0x895   : > { %v6223_v12 = vpop.f32.mrf.mxu1 }
 0x896   : > { %v6274_v3 = vrot.slane %v6223_v12, 4  ;;  %v6249_v46 = vpop.f32.mrf.mxu0 }
 0x897   : > { %v6276_v11 = vrot.slane %v6249_v46, 4 }
 0x898   : > { %v6282_v52 = vadd.f32 %v6274_v3, %v13131_v35  ;;  %v6267_v3 = vadd.f32 %v6259_v13, %v13156_v5 }
 0x899   : > { %v6284_v36 = vadd.f32 %v6276_v11, %v13148_v53  ;;  %v6292_v53 = vrot.slane %v6268_v61, 4 }
 0x89a   : > { %v6302_v29 = vrot.slane %v6282_v52, 4  ;;  %v6291_v12 = vrot.slane %v6267_v3, 4 }
 0x89b   : > { %v6210_v1 = vpop.f32.mrf.mxu2 }
 0x89c   : > { %v6310_v14 = vsel %vm2130_vm7, %v6290_v42, %v6302_v29  ;;  %v6273_v7 = vrot.slane %v6210_v1, 4  ;;  %v6236_v10 = vpop.f32.mrf.mxu3  ;;  %v6304_v1 = vrot.slane %v6284_v36, 4 }
 0x89d   : > { %v6314_v47 = vmul.f32 0.5, %v6310_v14  ;;  %v6275_v26 = vrot.slane %v6236_v10, 4  ;;  %v6225_v6 = vpop.f32.mrf.mxu1 }
 0x89e   : > { %v6281_v40 = vadd.f32 %v6273_v7, %v13137_v22  ;;  %v6251_v35 = vpop.f32.mrf.mxu0  ;;  %v6312_v13 = vsel %vm2130_vm7, %v6292_v53, %v6304_v1 }
 0x89f   : > { %8882 = vtanh.f32 %v6314_v47  ;;  %v6283_v44 = vadd.f32 %v6275_v26, %v13158_v45 }
 0x8a0   : > { %v6301_v9 = vrot.slane %v6281_v40, 4 }
 0x8a1   : > { %v6303_v42 = vrot.slane %v6283_v44, 4 }
 0x8a2   : > { %v6309_v29 = vsel %vm2130_vm7, %v6289_v33, %v6301_v9 }
 0x8a3   : > { %v6313_v30 = vmul.f32 0.5, %v6309_v29  ;;  %v6212_v46 = vpop.f32.mrf.mxu2  ;;  %v6311_v5 = vsel %vm2130_vm7, %v6291_v12, %v6303_v42  ;;  %v14051_v12 = vld [vmem:[#allocation45_spill] sm:$0xff] }
 0x8a4   : > { %v6238_v11 = vpop.f32.mrf.mxu3  ;;  %v6315_v26 = vmul.f32 0.5, %v6311_v5  ;;  %v14052_v46 = vld [vmem:[#allocation48_spill] sm:$0xff] }
 0x8a5   : > { %v8883_v22 = vpop.eup %8882  ;;  %8884 = vtanh.f32 %v6313_v30 }
 0x8a6   : > { %v6320_v45 = vadd.f32 1.0, %v8883_v22  ;;  %8886 = vtanh.f32 %v6312_v13  ;;  %v14053_v13 = vld [vmem:[#allocation47_spill] sm:$0xff] }
 0x8a7   : > { %8888 = vtanh.f32 %v6315_v26 }
 0x8a8   : > { %v6323_v16 = vmul.f32 0.5, %v6320_v45  ;;  %v14054_v45 = vld [vmem:[#allocation43_spill] sm:$0xff] }
 0x8a9   : > { %v14055_v26 = vperm.slane %v14054_v45, 0 }
 0x8aa   : > { %v6326_v7 = vmul.f32 %v6323_v16, %v13163_v27  ;;  %v14050_v27 = vld [vmem:[#allocation35_spill] sm:$0xff] }
 0x8ab   : > { %v8885_v31 = vpop.eup %8884 }
 0x8ac   : > { %v6319_v52 = vadd.f32 1.0, %v8885_v31  ;;  %v8887_v14 = vpop.eup %8886  ;;  %v13324_v31 = vadd.f32 %v14055_v26, %v14053_v13  ;;  %v8779_v13 = vld [vmem:[%s13713_s11 + $0x64] sm:$0xf] }
 0x8ad   : > { %v8889_v47 = vpop.eup %8888 }
 0x8ae   : > { %v6322_v37 = vmul.f32 0.5, %v6319_v52  ;;  %v6321_v36 = vadd.f32 1.0, %v8889_v47 }
 0x8b0   : > { %v6327_v10 = vmul.f32 %v8887_v14, %v6322_v37  ;;  %v6324_v40 = vmul.f32 0.5, %v6321_v36  ;;  %v14056_v37 = vld [vmem:[#allocation44_spill] sm:$0xff] }
 0x8b2   : > { %v13247_v6 = vadd.f32 %v6327_v10, %v6326_v7  ;;  %v14057_v10 = vld [vmem:[#allocation51_spill] sm:$0xff] }
 0x8b4   : > { %8890 = vtanh.f32 %v13247_v6 }
 0x8ba   : > { %v8891_v35 = vpop.eup %8890 }
 0x8bb   : > { %v13250_v3 = vmul.f32 %v8891_v35, %v6324_v40  ;;  %v14058_v40 = vld [vmem:[#allocation49_spill] sm:$0xff] }
 0x8bd   : > { %v6331_v44 = vpack.c.bf16 %v13250_v3, %v13250_v3 }
 0x8bf   : > { %6340 = vmatmul.bf16.vlgmr.msrb.gmra.mxu2 %v6331_v44  ;;  %6353 = vmatmul.bf16.vlgmr.msrb.gmra.mxu1 %v6331_v44 }
 0x8c0   : > { %6366 = vmatmul.bf16.vlgmr.msrb.gmra.mxu3 %v6331_v44  ;;  %6379 = vmatmul.bf16.vlgmr.msrb.gmra.mxu0 %v6331_v44 }
 0x8c1   : > { %6467 = vmatpush.bf16.msrb.mxu2 %v12250_v0  ;;  %6480 = vmatpush.bf16.msrb.mxu1 %v12488_v34  ;;  %v14020_v0 = vld [vmem:[#allocation16_spill] sm:$0xff] }
 0x8c2   : > { %6493 = vmatpush.bf16.msrb.mxu3 %v12749_v32  ;;  %6506 = vmatpush.bf16.msrb.mxu0 %v12496_v17  ;;  %v14025_v34 = vld [vmem:[#allocation36_spill] sm:$0xff]  ;;  %v14027_v17 = vld [vmem:[#allocation10_spill] sm:$0xff] }
 0x8c3   : > { %v14042_v32 = vld [vmem:[#allocation30_spill] sm:$0xff] }
 0x8c5   : > { %6468 = vmatpush.bf16.msrb.mxu2 %v12282_v18  ;;  %6481 = vmatpush.bf16.msrb.mxu1 %v12523_v55  ;;  %v14021_v18 = vld [vmem:[#allocation34_spill] sm:$0xff] }
 0x8c6   : > { %6494 = vmatpush.bf16.msrb.mxu3 %v12778_v57  ;;  %6507 = vmatpush.bf16.msrb.mxu0 %v12533_v51  ;;  %v14028_v55 = vld [vmem:[#allocation22_spill] sm:$0xff]  ;;  %v14029_v51 = vld [vmem:[#allocation37_spill] sm:$0xff] }
 0x8c7   : > { %v14043_v57 = vld [vmem:[#allocation14_spill] sm:$0xff] }
 0x8c9   : > { %6469 = vmatpush.bf16.msrb.mxu2 %v12310_v23  ;;  %6482 = vmatpush.bf16.msrb.mxu1 %v12556_v43  ;;  %v14022_v23 = vld [vmem:[#allocation17_spill] sm:$0xff]  ;;  %v14030_v43 = vld [vmem:[#allocation23_spill] sm:$0xff] }
 0x8ca   : > { %6495 = vmatpush.bf16.msrb.mxu3 %v12810_v63  ;;  %6508 = vmatpush.bf16.msrb.mxu0 %v12566_v21  ;;  %v14031_v21 = vld [vmem:[#allocation25_spill] sm:$0xff]  ;;  %v14044_v63 = vld [vmem:[#allocation31_spill] sm:$0xff] }
 0x8cd   : > { %6470 = vmatpush.bf16.msrb.mxu2 %v13986_v60  ;;  %6483 = vmatpush.bf16.msrb.mxu1 %v12589_v62  ;;  %v14032_v62 = vld [vmem:[#allocation24_spill] sm:$0xff] }
 0x8ce   : > { %6496 = vmatpush.bf16.msrb.mxu3 %v12838_v24  ;;  %6509 = vmatpush.bf16.msrb.mxu0 %v12599_v49  ;;  %v14033_v49 = vld [vmem:[#allocation38_spill] sm:$0xff]  ;;  %v14045_v24 = vld [vmem:[#allocation41_spill] sm:$0xff] }
 0x8cf   : > { %6392 = vmatmul.bf16.vlgmr.msra.gmra.mxu2 %v6331_v44  ;;  %6405 = vmatmul.bf16.vlgmr.msra.gmra.mxu1 %v6331_v44 }
 0x8d0   : > { %6418 = vmatmul.bf16.vlgmr.msra.gmra.mxu3 %v6331_v44  ;;  %6431 = vmatmul.bf16.vlgmr.msra.gmra.mxu0 %v6331_v44 }
 0x8d1   : > { %6471 = vmatpush.bf16.msrb.mxu2 %v13987_v38  ;;  %6484 = vmatpush.bf16.msrb.mxu1 %v12622_v20  ;;  %v14034_v20 = vld [vmem:[#allocation26_spill] sm:$0xff] }
 0x8d2   : > { %6497 = vmatpush.bf16.msrb.mxu3 %v12866_v41  ;;  %6510 = vmatpush.bf16.msrb.mxu0 %v12632_v58  ;;  %v14035_v58 = vld [vmem:[#allocation11_spill] sm:$0xff]  ;;  %v14046_v41 = vld [vmem:[#allocation32_spill] sm:$0xff] }
 0x8d5   : > { %6472 = vmatpush.bf16.msrb.mxu2 %v12400_v28  ;;  %6485 = vmatpush.bf16.msrb.mxu1 %v12659_v48  ;;  %v14023_v28 = vld [vmem:[#allocation9_spill] sm:$0xff]  ;;  %v14036_v48 = vld [vmem:[#allocation27_spill] sm:$0xff] }
 0x8d6   : > { %6498 = vmatpush.bf16.msrb.mxu3 %v12894_v56  ;;  %6511 = vmatpush.bf16.msrb.mxu0 %v12669_v39  ;;  %v14037_v39 = vld [vmem:[#allocation39_spill] sm:$0xff] }
 0x8d7   : > { %v14047_v56 = vld [vmem:[#allocation15_spill] sm:$0xff] }
 0x8d9   : > { %6473 = vmatpush.bf16.msrb.mxu2 %v12430_v8  ;;  %6486 = vmatpush.bf16.msrb.mxu1 %v12692_v2  ;;  %v14024_v8 = vld [vmem:[#allocation18_spill] sm:$0xff]  ;;  %v14038_v2 = vld [vmem:[#allocation28_spill] sm:$0xff] }
 0x8da   : > { %6499 = vmatpush.bf16.msrb.mxu3 %v12922_v15  ;;  %6512 = vmatpush.bf16.msrb.mxu0 %v12705_v4  ;;  %v14039_v4 = vld [vmem:[#allocation12_spill] sm:$0xff]  ;;  %v14048_v15 = vld [vmem:[#allocation33_spill] sm:$0xff] }
 0x8dd   : > { %6474 = vmatpush.bf16.msrb.mxu2 %v12449_v50  ;;  %6487 = vmatpush.bf16.msrb.mxu1 %v12737_v59  ;;  %v14026_v50 = vld [vmem:[#allocation19_spill] sm:$0xff]  ;;  %v14040_v59 = vld [vmem:[#allocation29_spill] sm:$0xff] }
 0x8de   : > { %6500 = vmatpush.bf16.msrb.mxu3 %v12956_v19  ;;  %6513 = vmatpush.bf16.msrb.mxu0 %v12747_v25  ;;  %v14041_v25 = vld [vmem:[#allocation40_spill] sm:$0xff]  ;;  %v14049_v19 = vld [vmem:[#allocation42_spill] sm:$0xff] }
 0x8e1   : > { %6519 = vmatpush.bf16.msra.mxu2 %v13988_v54  ;;  %6532 = vmatpush.bf16.msra.mxu1 %v14020_v0 }
 0x8e2   : > { %6545 = vmatpush.bf16.msra.mxu3 %v14021_v18  ;;  %6558 = vmatpush.bf16.msra.mxu0 %v14022_v23  ;;  %v14059_v18 = vld [vmem:[#allocation50_spill] sm:$0xff] }
 0x8e5   : > { %6520 = vmatpush.bf16.msra.mxu2 %v14023_v28  ;;  %6533 = vmatpush.bf16.msra.mxu1 %v14024_v8  ;;  %v14060_v8 = vld [vmem:[#allocation46_spill] sm:$0xff] }
 0x8e6   : > { %6546 = vmatpush.bf16.msra.mxu3 %v14025_v34  ;;  %6559 = vmatpush.bf16.msra.mxu0 %v14026_v50 }
 0x8e9   : > { %6521 = vmatpush.bf16.msra.mxu2 %v14027_v17  ;;  %6534 = vmatpush.bf16.msra.mxu1 %v14028_v55 }
 0x8ea   : > { %6547 = vmatpush.bf16.msra.mxu3 %v14029_v51  ;;  %6560 = vmatpush.bf16.msra.mxu0 %v14030_v43 }
 0x8ed   : > { %6522 = vmatpush.bf16.msra.mxu2 %v14031_v21  ;;  %6535 = vmatpush.bf16.msra.mxu1 %v14032_v62 }
 0x8ee   : > { %6548 = vmatpush.bf16.msra.mxu3 %v14033_v49  ;;  %6561 = vmatpush.bf16.msra.mxu0 %v14034_v20 }
 0x8f1   : > { %6523 = vmatpush.bf16.msra.mxu2 %v14035_v58  ;;  %6536 = vmatpush.bf16.msra.mxu1 %v14036_v48 }
 0x8f2   : > { %6549 = vmatpush.bf16.msra.mxu3 %v14037_v39  ;;  %6562 = vmatpush.bf16.msra.mxu0 %v14038_v2 }
 0x8f5   : > { %6524 = vmatpush.bf16.msra.mxu2 %v14039_v4  ;;  %6537 = vmatpush.bf16.msra.mxu1 %v14040_v59 }
 0x8f6   : > { %6550 = vmatpush.bf16.msra.mxu3 %v14041_v25  ;;  %6563 = vmatpush.bf16.msra.mxu0 %v14042_v32 }
 0x8f9   : > { %6525 = vmatpush.bf16.msra.mxu2 %v14043_v57  ;;  %6538 = vmatpush.bf16.msra.mxu1 %v14044_v63 }
 0x8fa   : > { %6551 = vmatpush.bf16.msra.mxu3 %v14045_v24  ;;  %6564 = vmatpush.bf16.msra.mxu0 %v14046_v41 }
 0x8fd   : > { %6526 = vmatpush.bf16.msra.mxu2 %v14047_v56  ;;  %6539 = vmatpush.bf16.msra.mxu1 %v14048_v15  ;;  %v8386_v56 = vld [vmem:[%s13713_s11 + $0x70] sm:$0xf]  ;;  %v8782_v15 = vld [vmem:[%s13713_s11 + $0x74] sm:$0xf0] }
 0x8fe   : > { %6552 = vmatpush.bf16.msra.mxu3 %v14049_v19  ;;  %6565 = vmatpush.bf16.msra.mxu0 %v14050_v27  ;;  %v8450_v19 = vld [vmem:[%s13713_s11 + $0xf0] sm:$0xf] }
 0x93c   : > { %v6354_v60 = vpop.f32.mrf.mxu1 }
 0x93d   : > { %v6380_v38 = vpop.f32.mrf.mxu0  ;;  %v6437_v30 = vadd.f32 %v6354_v60, %v14051_v12  ;;  %v8387_v60 = vor.u32 %v8782_v15, %v8386_v56 }
 0x93e   : > { %v6439_v34 = vadd.f32 %v6380_v38, %v14060_v8  ;;  %v8798_v38 = vld [vmem:[%s13713_s11 + $0xf4] sm:$0xf0] }
 0x942   : > { %v6341_v54 = vpop.f32.mrf.mxu2 }
 0x943   : > { %v6367_v61 = vpop.f32.mrf.mxu3  ;;  %v6436_v52 = vadd.f32 %v6341_v54, %v13324_v31  ;;  %v8781_v54 = vld [vmem:[%s13713_s11 + $0x74] sm:$0xf] }
 0x944   : > { %v6356_v33 = vpop.f32.mrf.mxu1  ;;  %v6438_v23 = vadd.f32 %v6367_v61, %v14059_v18  ;;  %v8451_v61 = vor.u32 %v8798_v38, %v8450_v19  ;;  %v8354_v38 = vld [vmem:[%s13713_s11 + $0x30] sm:$0xf] }
 0x945   : > { %v6382_v9 = vpop.f32.mrf.mxu0  ;;  %v8388_v33 = vld [vmem:[%s13713_s11 + $0x78] sm:$0xf0] }
 0x946   : > { %v8797_v9 = vld [vmem:[%s13713_s11 + $0xf4] sm:$0xf] }
 0x94a   : > { %v6343_v42 = vpop.f32.mrf.mxu2 }
 0x94b   : > { %v6369_v1 = vpop.f32.mrf.mxu3  ;;  %v8391_v42 = vor.u32 %v8781_v54, %v8388_v33  ;;  %v8774_v54 = vld [vmem:[%s13713_s11 + $0x34] sm:$0xf0] }
 0x94c   : > { %v6406_v29 = vpop.f32.mrf.mxu1  ;;  %v8452_v1 = vld [vmem:[%s13713_s11 + $0xf8] sm:$0xf0] }
 0x94d   : > { %v6441_v53 = vadd.f32 %v6406_v29, %v14052_v46  ;;  %v6432_v11 = vpop.f32.mrf.mxu0  ;;  %v8455_v29 = vor.u32 %v8797_v9, %v8452_v1  ;;  %v8355_v1 = vor.u32 %v8774_v54, %v8354_v38 }
 0x94e   : > { %v6443_v35 = vadd.f32 %v6432_v11, %v14058_v40  ;;  %v8442_v11 = vld [vmem:[%s13713_s11 + $0xe0] sm:$0xf] }
 0x94f   : > { %v6445_v22 = vsel %vm2130_vm7, %v6437_v30, %v6441_v53  ;;  %v8378_v30 = vld [vmem:[%s13713_s11 + $0x60] sm:$0xf]  ;;  %v8780_v53 = vld [vmem:[%s13713_s11 + $0x64] sm:$0xf0] }
 0x950   : > { %v6449_v5 = vmul.f32 0.5, %v6445_v22  ;;  %v6447_v55 = vsel %vm2130_vm7, %v6439_v34, %v6443_v35  ;;  %v8379_v22 = vor.u32 %v8780_v53, %v8378_v30  ;;  %v8434_v34 = vld [vmem:[%s13713_s11 + $0xd0] sm:$0xf]  ;;  %v8773_v30 = vld [vmem:[%s13713_s11 + $0x34] sm:$0xf] }
 0x952   : > { %8892 = vtanh.f32 %v6449_v5  ;;  %v6393_v16 = vpop.f32.mrf.mxu2  ;;  %v8796_v5 = vld [vmem:[%s13713_s11 + $0xe4] sm:$0xf0] }
 0x953   : > { %v6440_v14 = vadd.f32 %v6393_v16, %v14056_v37  ;;  %v6419_v7 = vpop.f32.mrf.mxu3  ;;  %v8443_v26 = vor.u32 %v8796_v5, %v8442_v11  ;;  %v8380_v16 = vld [vmem:[%s13713_s11 + $0x68] sm:$0xf0] }
 0x954   : > { %v6442_v47 = vadd.f32 %v6419_v7, %v14057_v10  ;;  %v6408_v36 = vpop.f32.mrf.mxu1  ;;  %v8383_v7 = vor.u32 %v8779_v13, %v8380_v16 }
 0x955   : > { %v6444_v44 = vsel %vm2130_vm7, %v6436_v52, %v6440_v14  ;;  %v6434_v0 = vpop.f32.mrf.mxu0  ;;  %v8795_v52 = vld [vmem:[%s13713_s11 + $0xe4] sm:$0xf] }
 0x956   : > { %v6448_v28 = vmul.f32 0.5, %v6444_v44  ;;  %v6446_v17 = vsel %vm2130_vm7, %v6438_v23, %v6442_v47  ;;  %v8444_v47 = vld [vmem:[%s13713_s11 + $0xe8] sm:$0xf0]  ;;  %v8370_v44 = vld [vmem:[%s13713_s11 + $0x50] sm:$0xf] }
 0x957   : > { %v6450_v21 = vmul.f32 0.5, %v6446_v17  ;;  %v8447_v35 = vor.u32 %v8795_v52, %v8444_v47  ;;  %v8778_v0 = vld [vmem:[%s13713_s11 + $0x54] sm:$0xf0]  ;;  %v8777_v17 = vld [vmem:[%s13713_s11 + $0x54] sm:$0xf] }
 0x958   : > { %v8893_v50 = vpop.eup %8892  ;;  %8894 = vtanh.f32 %v6448_v28  ;;  %v8371_v28 = vor.u32 %v8778_v0, %v8370_v44  ;;  %v8772_v47 = vld [vmem:[%s13713_s11 + $0x24] sm:$0xf0]  ;;  %v8771_v0 = vld [vmem:[%s13713_s11 + $0x24] sm:$0xf] }
 0x959   : > { %v6455_v43 = vadd.f32 1.0, %v8893_v50  ;;  %8896 = vtanh.f32 %v6447_v55  ;;  %v8794_v50 = vld [vmem:[%s13713_s11 + $0xd4] sm:$0xf0]  ;;  %v8788_v44 = vld [vmem:[%s13713_s11 + $0xa4] sm:$0xf0] }
 0x95a   : > { %v6395_v51 = vpop.f32.mrf.mxu2  ;;  %8898 = vtanh.f32 %v6450_v21  ;;  %v8435_v55 = vor.u32 %v8794_v50, %v8434_v34  ;;  %v8436_v21 = vld [vmem:[%s13713_s11 + $0xd8] sm:$0xf0]  ;;  %v8348_v50 = vld [vmem:[%s13713_s11 + $0x28] sm:$0xf0] }
 0x95b   : > { %v6421_v62 = vpop.f32.mrf.mxu3  ;;  %v6458_v20 = vmul.f32 0.5, %v6455_v43  ;;  %v8372_v51 = vld [vmem:[%s13713_s11 + $0x58] sm:$0xf0]  ;;  %v8793_v43 = vld [vmem:[%s13713_s11 + $0xd4] sm:$0xf] }
 0x95c   : > { %v8375_v62 = vor.u32 %v8777_v17, %v8372_v51  ;;  %v8787_v17 = vld [vmem:[%s13713_s11 + $0xa4] sm:$0xf] }
 0x95d   : > { %v6461_v2 = vmul.f32 %v6458_v20, %v13247_v6 }
 0x95e   : > { %v8895_v49 = vpop.eup %8894 }
 0x95f   : > { %v6454_v58 = vadd.f32 1.0, %v8895_v49  ;;  %v8897_v39 = vpop.eup %8896  ;;  %v8439_v49 = vor.u32 %v8793_v43, %v8436_v21 }
 0x960   : > { %v8899_v59 = vpop.eup %8898 }
 0x961   : > { %v6457_v48 = vmul.f32 0.5, %v6454_v58  ;;  %v6456_v32 = vadd.f32 1.0, %v8899_v59  ;;  %v8362_v58 = vld [vmem:[%s13713_s11 + $0x40] sm:$0xf]  ;;  %v8775_v59 = vld [vmem:[%s13713_s11 + $0x44] sm:$0xf] }
 0x963   : > { %v6462_v4 = vmul.f32 %v8897_v39, %v6457_v48  ;;  %v6459_v57 = vmul.f32 0.5, %v6456_v32  ;;  %v8776_v48 = vld [vmem:[%s13713_s11 + $0x44] sm:$0xf0] }
 0x964   : > { %v8363_v39 = vor.u32 %v8776_v48, %v8362_v58 }
 0x965   : > { %v13336_v25 = vadd.f32 %v6462_v4, %v6461_v2  ;;  %v8426_v2 = vld [vmem:[%s13713_s11 + $0xc0] sm:$0xf]  ;;  %v8792_v4 = vld [vmem:[%s13713_s11 + $0xc4] sm:$0xf0] }
 0x967   : > { %8900 = vtanh.f32 %v13336_v25 }
 0x96d   : > { %v8901_v63 = vpop.eup %8900 }
 0x96e   : > { %v13339_v24 = vmul.f32 %v8901_v63, %v6459_v57  ;;  %v8427_v57 = vor.u32 %v8792_v4, %v8426_v2  ;;  %v8364_v63 = vld [vmem:[%s13713_s11 + $0x48] sm:$0xf0]  ;;  %v8770_v2 = vld [vmem:[%s13713_s11 + $0x14] sm:$0xf0] }
 0x96f   : > { %v8367_v15 = vor.u32 %v8775_v59, %v8364_v63  ;;  %v8786_v63 = vld [vmem:[%s13713_s11 + $0x94] sm:$0xf0] }
 0x970   : > { %v6466_v41 = vpack.c.bf16 %v13339_v24, %v13339_v24 }
 0x972   : > { %6475 = vmatmul.bf16.vlgmr.msrb.gmra.mxu2 %v6466_v41  ;;  %6488 = vmatmul.bf16.vlgmr.msrb.gmra.mxu1 %v6466_v41 }
 0x973   : > { %6501 = vmatmul.bf16.vlgmr.msrb.gmra.mxu3 %v6466_v41  ;;  %6514 = vmatmul.bf16.vlgmr.msrb.gmra.mxu0 %v6466_v41 }
 0x974   : > { %6867 = vmatpush.bf16.msrb.mxu2 %v8387_v60  ;;  %6881 = vmatpush.bf16.msrb.mxu1 %v8451_v61  ;;  %v8418_v61 = vld [vmem:[%s13713_s11 + $0xb0] sm:$0xf] }
 0x975   : > { %6895 = vmatpush.bf16.msrb.mxu3 %v8391_v42  ;;  %6909 = vmatpush.bf16.msrb.mxu0 %v8455_v29  ;;  %v8790_v29 = vld [vmem:[%s13713_s11 + $0xb4] sm:$0xf0] }
 0x976   : > { %v8419_v11 = vor.u32 %v8790_v29, %v8418_v61  ;;  %v8768_v61 = vld [vmem:[%s13713_s11 + $0x4] sm:$0xf0] }
 0x977   : > { %v8784_v29 = vld [vmem:[%s13713_s11 + $0x84] sm:$0xf0] }
 0x978   : > { %6868 = vmatpush.bf16.msrb.mxu2 %v8379_v22  ;;  %6882 = vmatpush.bf16.msrb.mxu1 %v8443_v26  ;;  %v8789_v22 = vld [vmem:[%s13713_s11 + $0xb4] sm:$0xf] }
 0x979   : > { %6896 = vmatpush.bf16.msrb.mxu3 %v8383_v7  ;;  %6910 = vmatpush.bf16.msrb.mxu0 %v8447_v35  ;;  %v8346_v7 = vld [vmem:[%s13713_s11 + $0x20] sm:$0xf] }
 0x97a   : > { %v8347_v35 = vor.u32 %v8772_v47, %v8346_v7 }
 0x97c   : > { %6869 = vmatpush.bf16.msrb.mxu2 %v8371_v28  ;;  %6883 = vmatpush.bf16.msrb.mxu1 %v8435_v55 }
 0x97d   : > { %6897 = vmatpush.bf16.msrb.mxu3 %v8375_v62  ;;  %6911 = vmatpush.bf16.msrb.mxu0 %v8439_v49  ;;  %v8351_v62 = vor.u32 %v8771_v0, %v8348_v50 }
 0x980   : > { %6870 = vmatpush.bf16.msrb.mxu2 %v8363_v39  ;;  %6884 = vmatpush.bf16.msrb.mxu1 %v8427_v57 }
 0x981   : > { %6898 = vmatpush.bf16.msrb.mxu3 %v8367_v15  ;;  %v8785_v15 = vld [vmem:[%s13713_s11 + $0x94] sm:$0xf] }
 0x982   : > { %6527 = vmatmul.bf16.vlgmr.msra.gmra.mxu2 %v6466_v41  ;;  %6540 = vmatmul.bf16.vlgmr.msra.gmra.mxu1 %v6466_v41 }
 0x983   : > { %6553 = vmatmul.bf16.vlgmr.msra.gmra.mxu3 %v6466_v41  ;;  %6566 = vmatmul.bf16.vlgmr.msra.gmra.mxu0 %v6466_v41  ;;  %v8791_v41 = vld [vmem:[%s13713_s11 + $0xc4] sm:$0xf] }
 0x984   : > { %6871 = vmatpush.bf16.msrb.mxu2 %v8355_v1  ;;  %6885 = vmatpush.bf16.msrb.mxu1 %v8419_v11  ;;  %v8394_v1 = vld [vmem:[%s13713_s11 + $0x80] sm:$0xf]  ;;  %v8767_v11 = vld [vmem:[%s13713_s11 + $0x4] sm:$0xf] }
 0x988   : > { %6872 = vmatpush.bf16.msrb.mxu2 %v8347_v35 }
 0x9ef   : > { %v13343_v6 = vpop.f32.mrf.mxu1 }
 0x9f0   : > { %v13354_v27 = vpop.f32.mrf.mxu0  ;;  %v6576_v20 = vrot.slane %v13343_v6, 4  ;;  %v8428_v6 = vld [vmem:[%s13713_s11 + $0xc8] sm:$0xf0] }
 0x9f1   : > { %v8431_v19 = vor.u32 %v8791_v41, %v8428_v6  ;;  %v6578_v53 = vrot.slane %v13354_v27, 4  ;;  %v8420_v27 = vld [vmem:[%s13713_s11 + $0xb8] sm:$0xf0]  ;;  %v8769_v41 = vld [vmem:[%s13713_s11 + $0x14] sm:$0xf] }
 0x9f2   : > { %v6584_v33 = vadd.f32 %v6576_v20, %v14051_v12  ;;  %v8356_v12 = vld [vmem:[%s13713_s11 + $0x38] sm:$0xf0]  ;;  %v8423_v52 = vor.u32 %v8789_v22, %v8420_v27  ;;  %v8783_v22 = vld [vmem:[%s13713_s11 + $0x84] sm:$0xf]  ;;  %v8396_v27 = vld [vmem:[%s13713_s11 + $0x88] sm:$0xf0] }
 0x9f3   : > { %6912 = vmatpush.bf16.msrb.mxu0 %v8431_v19  ;;  %v8359_v16 = vor.u32 %v8773_v30, %v8356_v12  ;;  %v6586_v4 = vadd.f32 %v6578_v53, %v14060_v8  ;;  %v8404_v19 = vld [vmem:[%s13713_s11 + $0x98] sm:$0xf0]  ;;  %v8395_v53 = vor.u32 %v8784_v29, %v8394_v1  ;;  %v8332_v12 = vld [vmem:[%s13713_s11 + $0x8] sm:$0xf0]  ;;  %v8399_v47 = vor.u32 %v8783_v22, %v8396_v27 }
 0x9f4   : > { %v8407_v54 = vor.u32 %v8785_v15, %v8404_v19 }
 0x9f5   : > { %v13386_v45 = vpop.f32.mrf.mxu2  ;;  %6899 = vmatpush.bf16.msrb.mxu3 %v8359_v16  ;;  %v8335_v16 = vor.u32 %v8767_v11, %v8332_v12 }
 0x9f6   : > { %v13394_v14 = vpop.f32.mrf.mxu3  ;;  %v6575_v5 = vrot.slane %v13386_v45, 4  ;;  %v6608_v45 = vrot.slane %v6584_v33, 4 }
 0x9f7   : > { %v6491_v36 = vpop.f32.mrf.mxu1  ;;  %6913 = vmatpush.bf16.msrb.mxu0 %v8423_v52  ;;  %v6610_v52 = vrot.slane %v6586_v4, 4 }
 0x9f8   : > { %v6517_v23 = vpop.f32.mrf.mxu0  ;;  %v6583_v55 = vadd.f32 %v6575_v5, %v13324_v31  ;;  %v8338_v31 = vld [vmem:[%s13713_s11 + $0x10] sm:$0xf] }
 0x9f9   : > { %v6577_v23 = vrot.slane %v13394_v14, 4  ;;  %v8412_v14 = vld [vmem:[%s13713_s11 + $0xa8] sm:$0xf0]  ;;  %6900 = vmatpush.bf16.msrb.mxu3 %v8351_v62  ;;  %v8339_v57 = vor.u32 %v8770_v2, %v8338_v31 }
 0x9fa   : > { %v8415_v39 = vor.u32 %v8787_v17, %v8412_v14  ;;  %v6653_v14 = vrot.slane %v13339_v24, 4 }
 0x9fb   : > { %v6585_v6 = vadd.f32 %v6577_v23, %v14059_v18  ;;  %6873 = vmatpush.bf16.msrb.mxu2 %v8339_v57 }
 0x9fc   : > { %6914 = vmatpush.bf16.msrb.mxu0 %v8415_v39  ;;  %v13567_v2 = vrot.slane %v6653_v14, 4 }
 0x9fd   : > { %v6478_v32 = vpop.f32.mrf.mxu2  ;;  %v6609_v5 = vrot.slane %v6585_v6, 4 }
 0x9fe   : > { %v6504_v56 = vpop.f32.mrf.mxu3 }
 0x9ff   : > { %v6541_v60 = vpop.f32.mrf.mxu1  ;;  %v8340_v56 = vld [vmem:[%s13713_s11 + $0x18] sm:$0xf0] }
 0xa00   : > { %v6592_v9 = vrot.slane %v6541_v60, 4  ;;  %v6567_v42 = vpop.f32.mrf.mxu0  ;;  %v6607_v60 = vrot.slane %v6583_v55, 4  ;;  %v8343_v18 = vor.u32 %v8769_v41, %v8340_v56  ;;  %6915 = vmatpush.bf16.msrb.mxu0 %v8407_v54  ;;  %v6927_v54 = vld [vmem:[%s13715_s13] sm:$0x3] }
 0xa01   : > { %v6594_v26 = vrot.slane %v6567_v42, 4 }
 0xa02   : > { %v6600_v13 = vadd.f32 %v6592_v9, %v14052_v46  ;;  %v8410_v46 = vld [vmem:[%s13713_s11 + $0xa0] sm:$0xf]  ;;  %6901 = vmatpush.bf16.msrb.mxu3 %v8343_v18 }
 0xa03   : > { %v8411_v34 = vor.u32 %v8788_v44, %v8410_v46  ;;  %v6602_v20 = vadd.f32 %v6594_v26, %v14058_v40  ;;  %v8402_v40 = vld [vmem:[%s13713_s11 + $0x90] sm:$0xf] }
 0xa04   : > { %v6620_v36 = vrot.slane %v6600_v13, 4  ;;  %v8403_v8 = vor.u32 %v8786_v63, %v8402_v40  ;;  %6916 = vmatpush.bf16.msrb.mxu0 %v8399_v47  ;;  %v6701_v63 = vld [vmem:[%s13714_s12] sm:$0x3] }
 0xa05   : > { %v6528_v28 = vpop.f32.mrf.mxu2  ;;  %6886 = vmatpush.bf16.msrb.mxu1 %v8411_v34  ;;  %v6622_v33 = vrot.slane %v6602_v20, 4  ;;  %v6703_v41 = vperm.slane %v6701_v63, 0  ;;  %v6704_v6 = vperm.slane %v6701_v63, 1 }
 0xa06   : > { %v6628_v51 = vsel %vm2130_vm7, %v6608_v45, %v6620_v36  ;;  %v6591_v43 = vrot.slane %v6528_v28, 4  ;;  %v6554_v21 = vpop.f32.mrf.mxu3  ;;  %6902 = vmatpush.bf16.msrb.mxu3 %v8335_v16 }
 0xa07   : > { %v6632_v49 = vmul.f32 0.5, %v6628_v51  ;;  %v6593_v58 = vrot.slane %v6554_v21, 4  ;;  %v6543_v48 = vpop.f32.mrf.mxu1  ;;  %v6630_v36 = vsel %vm2130_vm7, %v6610_v52, %v6622_v33 }
 0xa08   : > { %v6599_v59 = vadd.f32 %v6591_v43, %v14056_v37  ;;  %v6569_v32 = vpop.f32.mrf.mxu0  ;;  %v13563_v48 = vrot.slane %v13250_v3, 4 }
 0xa09   : > { %8902 = vtanh.f32 %v6632_v49  ;;  %v6601_v37 = vadd.f32 %v6593_v58, %v14057_v10  ;;  %v8330_v10 = vld [vmem:[%s13713_s11] sm:$0xf]  ;;  %6887 = vmatpush.bf16.msrb.mxu1 %v8403_v8  ;;  %v14061_v49 = vld [vmem:[#allocation52_spill] sm:$0xff] }
 0xa0a   : > { %v6619_v38 = vrot.slane %v6599_v59, 4  ;;  %v8331_v42 = vor.u32 %v8768_v61, %v8330_v10  ;;  %v6658_v20 = vrot.slane %v14061_v49, 4  ;;  %v6663_v4 = vsel %vm2130_vm7, %v14061_v49, %v13563_v48 }
 0xa0b   : > { %v6621_v9 = vrot.slane %v6601_v37, 4  ;;  %v6929_v61 = vperm.slane %v6927_v54, 0 }
 0xa0c   : > { %v6627_v30 = vsel %vm2130_vm7, %v6607_v60, %v6619_v38  ;;  %6874 = vmatpush.bf16.msrb.mxu2 %v8331_v42  ;;  %v6930_v42 = vperm.slane %v6927_v54, 1  ;;  %v8805_v54 = vld [vmem:[%s13716_s14 + $0x30] sm:$0xff] }
 0xa0d   : > { %v6631_v13 = vmul.f32 0.5, %v6627_v30  ;;  %v6530_v26 = vpop.f32.mrf.mxu2  ;;  %v6629_v45 = vsel %vm2130_vm7, %v6609_v5, %v6621_v9  ;;  %6888 = vmatpush.bf16.msrb.mxu1 %v8395_v53 }
 0xa0e   : > { %v6556_v7 = vpop.f32.mrf.mxu3  ;;  %v6633_v44 = vmul.f32 0.5, %v6629_v45 }
 0xa0f   : > { %v8903_v46 = vpop.eup %8902  ;;  %8904 = vtanh.f32 %v6631_v13 }
 0xa10   : > { %v6638_v35 = vadd.f32 1.0, %v8903_v46  ;;  %8906 = vtanh.f32 %v6630_v36 }
 0xa11   : > { %8908 = vtanh.f32 %v6633_v44 }
 0xa12   : > { %v6641_v23 = vmul.f32 0.5, %v6638_v35 }
 0xa14   : > { %v6644_v17 = vmul.f32 %v6641_v23, %v13336_v25  ;;  %v13569_v25 = vrot.slane %v6658_v20, 4 }
 0xa15   : > { %v8905_v0 = vpop.eup %8904 }
 0xa16   : > { %v6637_v28 = vadd.f32 1.0, %v8905_v0  ;;  %v8907_v50 = vpop.eup %8906  ;;  %v6666_v32 = vsel %vm2130_vm7, %v13563_v48, %v13569_v25 }
 0xa17   : > { %v8909_v51 = vpop.eup %8908 }
 0xa18   : > { %v6640_v34 = vmul.f32 0.5, %v6637_v28  ;;  %v6639_v21 = vadd.f32 1.0, %v8909_v51 }
 0xa1a   : > { %v6645_v55 = vmul.f32 %v8907_v50, %v6640_v34  ;;  %v6642_v62 = vmul.f32 0.5, %v6639_v21 }
 0xa1c   : > { %v6646_v43 = vadd.f32 %v6645_v55, %v6644_v17 }
 0xa1e   : > { %8910 = vtanh.f32 %v6646_v43 }
 0xa24   : > { %v8911_v58 = vpop.eup %8910 }
 0xa25   : > { %v6648_v39 = vmul.f32 %v8911_v58, %v6642_v62 }
 0xa27   : > { %v13565_v31 = vrot.slane %v6648_v39, 4 }
 0xa29   : > { %v6665_v59 = vsel %vm2130_vm7, %v13339_v24, %v13565_v31  ;;  %v6664_v3 = vsel %vm2130_vm7, %v13565_v31, %v13567_v2 }
 0xa2a   : > { %v6667_v57 = vpack.c.bf16 %v6665_v59, %v6663_v4  ;;  %v6668_v40 = vpack.c.bf16 %v6666_v32, %v6664_v3 }
 0xa2c   : > { %6875 = vmatmul.bf16.vlgmr.msrb.gmra.mxu2 %v6667_v57  ;;  %6889 = vmatmul.bf16.vlgmr.msrb.gmra.mxu1 %v6668_v40 }
 0xa2d   : > { %6903 = vmatmul.bf16.vlgmr.msrb.gmra.mxu3 %v6667_v57  ;;  %6917 = vmatmul.bf16.vlgmr.msrb.gmra.mxu0 %v6668_v40 }
 0xaa9   : > { %v6890_v37 = vpop.f32.mrf.mxu1 }
 0xaaa   : > { %v6918_v56 = vpop.f32.mrf.mxu0 }
 0xaaf   : > { %v6876_v8 = vpop.f32.mrf.mxu2 }
 0xab0   : > { %v6877_v15 = vadd.f32 %v6876_v8, %v6703_v41  ;;  %v6904_v19 = vpop.f32.mrf.mxu3 }
 0xab1   : > { %v6905_v60 = vadd.f32 %v6904_v19, %v6704_v6  ;;  %v6892_v1 = vpop.f32.mrf.mxu1 }
 0xab2   : > { %v6891_v38 = vadd.f32 %v6890_v37, %v6877_v15  ;;  %v6920_v53 = vpop.f32.mrf.mxu0 }
 0xab3   : > { %v6919_v18 = vadd.f32 %v6918_v56, %v6905_v60 }
 0xab4   : > { %8912 = vtanh.f32 %v6891_v38  ;;  %v8806_v38 = vld [vmem:[%s13716_s14 + $0x38] sm:$0xff] }
 0xab5   : > { %8914 = vtanh.f32 %v6919_v18  ;;  %v8814_v18 = vld [vmem:[%s13716_s14 + $0x78] sm:$0xff]  ;;  %7176 = vmatpush.bf16.msra.mxu2 %v8806_v38 }
 0xab6   : > { %7189 = vmatpush.bf16.msra.mxu1 %v8814_v18 }
 0xab7   : > { %v6878_v10 = vpop.f32.mrf.mxu2 }
 0xab8   : > { %v6879_v33 = vadd.f32 %v6878_v10, %v6703_v41  ;;  %v6906_v9 = vpop.f32.mrf.mxu3  ;;  %v8813_v10 = vld [vmem:[%s13716_s14 + $0x70] sm:$0xff] }
 0xab9   : > { %v6907_v29 = vadd.f32 %v6906_v9, %v6704_v6  ;;  %7177 = vmatpush.bf16.msra.mxu2 %v8805_v54  ;;  %v8803_v9 = vld [vmem:[%s13716_s14 + $0x20] sm:$0xff] }
 0xaba   : > { %v8913_v30 = vpop.eup %8912  ;;  %v6893_v11 = vadd.f32 %v6892_v1, %v6879_v33  ;;  %7190 = vmatpush.bf16.msra.mxu1 %v8813_v10  ;;  %v8812_v33 = vld [vmem:[%s13716_s14 + $0x68] sm:$0xff]  ;;  %v8802_v1 = vld [vmem:[%s13716_s14 + $0x18] sm:$0xff] }
 0xabb   : > { %v8915_v12 = vpop.eup %8914  ;;  %v6921_v22 = vadd.f32 %v6920_v53, %v6907_v29  ;;  %v6933_v5 = vmul.f32 %v8913_v30, %v6929_v61  ;;  %v8810_v29 = vld [vmem:[%s13716_s14 + $0x58] sm:$0xff]  ;;  %v8801_v30 = vld [vmem:[%s13716_s14 + $0x10] sm:$0xff] }
 0xabc   : > { %8916 = vtanh.f32 %v6893_v11  ;;  %v6934_v13 = vmul.f32 %v8915_v12, %v6930_v42  ;;  %v8809_v53 = vld [vmem:[%s13716_s14 + $0x50] sm:$0xff]  ;;  %v8800_v11 = vld [vmem:[%s13716_s14 + $0x8] sm:$0xff] }
 0xabd   : > { %8918 = vtanh.f32 %v6921_v22  ;;  %v8808_v12 = vld [vmem:[%s13716_s14 + $0x48] sm:$0xff] }
 0xabe   : > { %v6937_v26 = vadd.f32 %v6934_v13, %v6933_v5  ;;  %7191 = vmatpush.bf16.msra.mxu1 %v8812_v33  ;;  %v8799_v5 = vld [vmem:[%s13716_s14] sm:$0xff] }
 0xabf   : > { %v8807_v13 = vld [vmem:[%s13716_s14 + $0x40] sm:$0xff] }
 0xac0   : > { %6938 = vadd.xlane.f32.xlu0 %v6937_v26  ;;  %v8820_v26 = vld [vmem:[%s13718_s16 + $0x28] sm:$0xff] }
 0xac1   : > { %7261 = vmatpush.bf16.msra.mxu3 %v8820_v26 }
 0xac2   : > { %v8917_v16 = vpop.eup %8916 }
 0xac3   : > { %v8919_v27 = vpop.eup %8918  ;;  %v6935_v52 = vmul.f32 %v8917_v16, %v6929_v61  ;;  %v8804_v61 = vld [vmem:[%s13716_s14 + $0x28] sm:$0xff]  ;;  %v8819_v16 = vld [vmem:[%s13718_s16 + $0x20] sm:$0xff] }
 0xac4   : > { %v6936_v7 = vmul.f32 %v8919_v27, %v6930_v42  ;;  %7178 = vmatpush.bf16.msra.mxu2 %v8804_v61  ;;  %v8811_v42 = vld [vmem:[%s13716_s14 + $0x60] sm:$0xff] }
 0xac5   : > { %7192 = vmatpush.bf16.msra.mxu1 %v8811_v42  ;;  %7262 = vmatpush.bf16.msra.mxu3 %v8819_v16 }
 0xac6   : > { %v6940_v47 = vadd.f32 %v6936_v7, %v6935_v52 }
 0xac8   : > { %6941 = vadd.xlane.f32.xlu1 %v6940_v47  ;;  %7179 = vmatpush.bf16.msra.mxu2 %v8803_v9 }
 0xac9   : > { %7193 = vmatpush.bf16.msra.mxu1 %v8810_v29 }
 0xacc   : > { %7180 = vmatpush.bf16.msra.mxu2 %v8802_v1 }
 0xacd   : > { %7194 = vmatpush.bf16.msra.mxu1 %v8809_v53 }
 0xad0   : > { %7181 = vmatpush.bf16.msra.mxu2 %v8801_v30 }
 0xad1   : > { %7195 = vmatpush.bf16.msra.mxu1 %v8808_v12 }
 0xad4   : > { %7182 = vmatpush.bf16.msra.mxu2 %v8800_v11 }
 0xad5   : > { %7196 = vmatpush.bf16.msra.mxu1 %v8807_v13 }
 0xad8   : > { %7183 = vmatpush.bf16.msra.mxu2 %v8799_v5 }
 0xb33   : > { %v6939_v46 = vpop.xlane.xlu0 %6938 }
 0xb34   : > { %v6944_v45 = vrot.slane %v6939_v46, 4 }
 0xb36   : > { %v6946_v36 = vmax.f32 %v6939_v46, %v6944_v45 }
 0xb3b   : > { %v6942_v35 = vpop.xlane.xlu1 %6941 }
 0xb3c   : > { %v6947_v44 = vmax.f32 %v6946_v36, %v6942_v35  ;;  %v6949_v0 = vrot.slane %v6942_v35, 4 }
 0xb3e   : > { %v6951_v23 = vmax.f32 %v6947_v44, %v6949_v0 }
 0xb40   : > { %v6952_v28 = vsub.f32 %v6939_v46, %v6951_v23  ;;  %v6956_v34 = vrot.slane %v6951_v23, 4  ;;  %v6961_v55 = vsub.f32 %v6942_v35, %v6951_v23 }
 0xb42   : > { %v6953_v50 = vmul.f32 1.442695, %v6952_v28  ;;  %v6958_v17 = vsub.f32 %v6939_v46, %v6956_v34  ;;  %v6964_v51 = vsub.f32 %v6942_v35, %v6956_v34  ;;  %v6962_v62 = vmul.f32 1.442695, %v6961_v55 }
 0xb44   : > { %8920 = vpow2.f32 %v6953_v50  ;;  %v6959_v43 = vmul.f32 1.442695, %v6958_v17  ;;  %v6965_v21 = vmul.f32 1.442695, %v6964_v51 }
 0xb46   : > { %8922 = vpow2.f32 %v6959_v43 }
 0xb47   : > { %8924 = vpow2.f32 %v6965_v21 }
 0xb48   : > { %8926 = vpow2.f32 %v6962_v62 }
 0xb4a   : > { %v8921_v14 = vpop.eup %8920 }
 0xb4b   : > { %6978 = vperm.xlu2 %8865, %v8921_v14  }
 0xb4c   : > { %v8923_v20 = vpop.eup %8922 }
 0xb4d   : > { %v6968_v58 = vrot.slane %v8923_v20, 4  ;;  %v8925_v39 = vpop.eup %8924 }
 0xb4e   : > { %v8927_v59 = vpop.eup %8926  ;;  %v6973_v32 = vrot.slane %v8925_v39, 4 }
 0xb4f   : > { %v6970_v4 = vadd.f32 %v8921_v14, %v6968_v58 }
 0xb51   : > { %v6971_v3 = vadd.f32 %v8927_v59, %v6970_v4 }
 0xb53   : > { %v6975_v57 = vadd.f32 %v6973_v32, %v6971_v3  ;;  %6999 = vperm.xlu2 %8865, %v8927_v59   ;;  %v8870_v59 = vld [vmem:[%s13717_s15] ss:$0 sm:$0xff] }
 0xb55   : > { %8928 = vrcp.f32 %v6975_v57  ;;  %v7031_v8 = vand.u32 2147483648, %v6975_v57  ;;  %vm7025_vm13 = vweird.f32 %v6975_v57  ;;  %v7029_v56 = vand.u32 2147483647, %v6975_v57 }
 0xb57   : > { %v7032_v19 = vor.u32 1.1754944e-38, %v7031_v8  ;;  %vm7030_vm15 = vcmp.eq.f32.partialorder %v7029_v56, 8.507059e+37 }
 0xb5b   : > { %v8929_v40 = vpop.eup %8928  ;;  %6984 = vperm.xlu2 %8865, %v8923_v20  }
 0xb5c   : > { %v7021_v63 = vmul.f32 %v8929_v40, %v6975_v57  ;;  %vm7026_vm12 = vweird.f32 %v8929_v40 }
 0xb5d   : > { %vm7027_vm14 = vmor %vm7025_vm13, %vm7026_vm12 }
 0xb5e   : > { %v7022_v41 = vsub.f32 1.0, %v7021_v63 }
 0xb60   : > { %v7023_v6 = vmul.f32 %v8929_v40, %v7022_v41 }
 0xb62   : > { %v7024_v37 = vadd.f32 %v8929_v40, %v7023_v6 }
 0xb63   : > { %7007 = vperm.xlu2 %8865, %v8925_v39  }
 0xb64   : > { %v7028_v15 = vsel %vm7027_vm14, %v8929_v40, %v7024_v37  ;;  %v8871_v37 = vld [vmem:[%s13719_s17] ss:$0 sm:$0xff] }
 0xb65   : > { %v7033_v60 = vsel %vm7030_vm15, %v7032_v19, %v7028_v15 }
 0xb6b   : > { %7037 = vperm.xlu2 %8865, %v7033_v60  }
 0xba5   : > { %v6979_v22 = vpop.permute.xlu2 %6978 }
 0xba6   : > { %v6981_v36 = vmul.f32 %v6979_v22, %v14061_v49  ;;  %v6982_v35 = vmul.f32 %v6979_v22, %v13565_v31 }
 0xbad   : > { %v7000_v27 = vpop.permute.xlu2 %6999 }
 0xbae   : > { %v7002_v50 = vmul.f32 %v7000_v27, %v13339_v24  ;;  %v7003_v17 = vmul.f32 %v7000_v27, %v13563_v48  ;;  %v8817_v24 = vld [vmem:[%s13718_s16 + $0x10] sm:$0xff] }
 0xbb5   : > { %v6985_v52 = vpop.permute.xlu2 %6984 }
 0xbb6   : > { %v6987_v7 = vmul.f32 %v6985_v52, %v13563_v48  ;;  %v6988_v47 = vmul.f32 %v6985_v52, %v13567_v2  ;;  %v8816_v48 = vld [vmem:[%s13718_s16 + $0x8] sm:$0xff] }
 0xbb8   : > { %v6991_v46 = vrot.slane %v6987_v7, 4  ;;  %v6992_v45 = vrot.slane %v6988_v47, 4 }
 0xbba   : > { %v6995_v0 = vadd.f32 %v6991_v46, %v6981_v36  ;;  %v6996_v23 = vadd.f32 %v6992_v45, %v6982_v35 }
 0xbbc   : > { %v7004_v2 = vadd.f32 %v7002_v50, %v6995_v0  ;;  %v7005_v43 = vadd.f32 %v7003_v17, %v6996_v23 }
 0xbbd   : > { %v7008_v44 = vpop.permute.xlu2 %7007 }
 0xbbe   : > { %v7010_v28 = vmul.f32 %v7008_v44, %v13565_v31  ;;  %v7011_v34 = vmul.f32 %v7008_v44, %v13569_v25  ;;  %v8818_v31 = vld [vmem:[%s13718_s16 + $0x18] sm:$0xff]  ;;  %v8815_v25 = vld [vmem:[%s13718_s16] sm:$0xff] }
 0xbbf   : > { %7263 = vmatpush.bf16.msra.mxu3 %v8818_v31 }
 0xbc0   : > { %v7014_v55 = vrot.slane %v7010_v28, 4  ;;  %v7015_v51 = vrot.slane %v7011_v34, 4 }
 0xbc2   : > { %v7018_v21 = vadd.f32 %v7014_v55, %v7004_v2  ;;  %v7019_v62 = vadd.f32 %v7015_v51, %v7005_v43 }
 0xbc3   : > { %7264 = vmatpush.bf16.msra.mxu3 %v8817_v24 }
 0xbc5   : > { %v7038_v49 = vpop.permute.xlu2 %7037 }
 0xbc6   : > { %v7040_v14 = vmul.f32 %v7038_v49, %v7018_v21  ;;  %v7041_v20 = vmul.f32 %v7038_v49, %v7019_v62 }
 0xbc7   : > { %7265 = vmatpush.bf16.msra.mxu3 %v8816_v48 }
 0xbc8   : > { %v7042_v58 = vpack.c.bf16 %v7040_v14, %v7040_v14  ;;  %v7043_v39 = vpack.c.bf16 %v7041_v20, %v7041_v20 }
 0xbca   : > { %7184 = vmatmul.bf16.vlgmr.msra.gmra.mxu2 %v7042_v58  ;;  %7197 = vmatmul.bf16.vlgmr.msra.gmra.mxu1 %v7043_v39 }
 0xbcb   : > { %7266 = vmatpush.bf16.msra.mxu3 %v8815_v25 }
 0xc47   : > { %v7198_v4 = vpop.f32.mrf.mxu1 }
 0xc4d   : > { %v7185_v3 = vpop.f32.mrf.mxu2 }
 0xc4e   : > { %v7186_v32 = vadd.f32 %v8870_v59, %v7185_v3 }
 0xc4f   : > { %v7200_v57 = vpop.f32.mrf.mxu1 }
 0xc50   : > { %v7199_v40 = vadd.f32 %v7198_v4, %v7186_v32 }
 0xc52   : > { %v7202_v63 = vmax.f32 %v7199_v40, 0.0 }
 0xc54   : > { %v7203_v41 = vpack.c.bf16 %v7202_v63, %v7202_v63 }
 0xc55   : > { %v7187_v6 = vpop.f32.mrf.mxu2 }
 0xc56   : > { %8544 = vmatmul.msk.bf16.vlgmr.msra.gmra.mxu3 %vm1055_vm6, %v7203_v41 }
 0xcd9   : > { %v7268_v8 = vpop.f32.mrf.mxu3 }
 0xcda   : > { %v7269_v56 = vadd.f32 %v8871_v37, %v7268_v8 }
 0xcdc   : > { %7272 = vst [vmem:[%s571_s21] sm:$0xf] %v7269_v56 }
 0xcdd   : > { %8962 = shalt.err (!%p8959_p3)
}
 0xcde   : > { %8822 = dma.vmem_to_hbm [thread:$0]  (%p9133_p5), %s7287_s4, 64, %s7289_s3, %s7274_s5  }
 0xce1   : > { %v7270_v15 = vpop.f32.mrf.mxu3 }
 0xce2 PF: > { %p8828_p4 = scmp.ge.s32.totalorder %s8997_s30, 2  ;;  %s7300_s20 = sand.u32 1, %s8985_s27  }
 0xce3   : > { %s7301_s26 = scalar_lea.sflag [#allocation4], %s7300_s20 }
 0xce4   : > { %p8825_p7 = pnand %p8828_p4, %p9137_p6 }
 0xce6   : > { %p8826_p8 = pneg %p8825_p7 }
 0xce8   : > { %8980 = dma.done.wait (%p8826_p8), %s7301_s26, 64  }
 0xce9   : > { %8982 = vsyncadd (%p8826_p8), %s7301_s26, 4294967232  ;;  %s14062_s30 = sld [smem:[#allocation7_spill]]  ;;  %s14065_s27 = smov %s8989_s28 }
 0xcea   : > { %s14063_s7 = sld [smem:[#allocation6_spill]] }
 0xceb   : > { %s14064_s29 = sld [smem:[#allocation8_spill]] }
 0xcef   : > { %p28_p9 = scmp.ge.s32.totalorder %s14062_s30, 4  }
 0xcf0   : > { %s14066_s28 = smov %s14063_s7 }
 0xcf1   :  { %30 = sbr.rel (!%p28_p9) target bundleno = 12 (0xc), region = 214 }
 0xcf6   :  { %7307 = vsyncpa [#allocation4], 1 }
 0xcf7   :  { %7309 = vsyncpa [#allocation4 + $0x1], 1 }

</bundles_post_ra>
